<compile_context>
chip_gen: v7x
topology: tpu7x:2x2x1
jax: 0.10.0
libtpu: 0.0.40
codegen_flags: <defaults>
</compile_context>

<pallas_src>
import jax
import jax.numpy as jnp
from jax.experimental import pallas as pl
from jax.experimental.pallas import tpu as pltpu

BN_EPS = 1e-5
_LANES = 128
_TARGET_ROWS = 1024                 # rows (= G*Ho*Wo) per grid step (sweepable)
_VMEM_LIMIT = 32 * 1024 * 1024      # explicit cap, safe on v5e/v6e/v7x


def _round_up(x, m):
    return ((x + m - 1) // m) * m


def _pick_group(n, rows_per_image, target_rows=_TARGET_ROWS):
    """Largest divisor of n such that g * rows_per_image <= target (>= 1)."""
    g = 1
    for cand in range(1, n + 1):
        if n % cand == 0 and cand * rows_per_image <= target_rows:
            g = cand
    return g


# ----------------------------------------------------------------------------
# Kernel 1: conv (3x3 via shifted-tap MXU accumulation, or 1x1) + partial
#           per-channel (sum, sum_sq) columns for BatchNorm.
# ----------------------------------------------------------------------------
def _make_conv_stats_kernel(taps, g, ho, wo, cp):
    """taps: list of (phase_idx, row_offset, col_offset, weight_tap_idx)."""
    def kernel(x_ref, w_ref, y_ref, ps_ref):
        acc = jnp.zeros((g * ho * wo, cp), jnp.float32)
        for (ph, qy, qx, t) in taps:
            xs = x_ref[ph, :, qy:qy + ho, qx:qx + wo, :]   # [g, ho, wo, cin] bf16
            xs = xs.reshape(g * ho * wo, -1)
            acc = acc + jnp.dot(xs, w_ref[t],
                                preferred_element_type=jnp.float32)
        y_ref[...] = acc.reshape(g, ho, wo, cp)
        ps_ref[0, 0:1, :] = jnp.sum(acc, axis=0, keepdims=True)
        ps_ref[0, 1:2, :] = jnp.sum(acc * acc, axis=0, keepdims=True)
    return kernel


def _conv_stats_pallas(xph, w_taps, taps, ho, wo, g, cp):
    s2, n, hq, wq, cin = xph.shape
    kernel = _make_conv_stats_kernel(taps, g, ho, wo, cp)
    return pl.pallas_call(
        kernel,
        out_shape=(jax.ShapeDtypeStruct((n, ho, wo, cp), jnp.float32),
                   jax.ShapeDtypeStruct((n // g, 2, cp), jnp.float32)),
        grid=(n // g,),
        in_specs=[
            pl.BlockSpec((s2, g, hq, wq, cin), lambda i: (0, i, 0, 0, 0)),
            pl.BlockSpec(w_taps.shape, lambda i: (0, 0, 0)),
        ],
        out_specs=(
            pl.BlockSpec((g, ho, wo, cp), lambda i: (i, 0, 0, 0)),
            pl.BlockSpec((1, 2, cp), lambda i: (i, 0, 0)),
        ),
        compiler_params=pltpu.CompilerParams(
            dimension_semantics=("parallel",),
            vmem_limit_bytes=_VMEM_LIMIT),
    )(xph, w_taps)


# ----------------------------------------------------------------------------
# Kernel 2: fused bn1(scale/shift) + ReLU + conv2 (3x3, stride 1) + partial
#           stats.  The padded conv2 input tile lives only in a VMEM scratch.
# ----------------------------------------------------------------------------
def _make_bn_conv_stats_kernel(g, ho, wo, cp):
    def kernel(y1_ref, sc_ref, sh_ref, w_ref, y2_ref, ps_ref, xpad_ref):
        a = jnp.maximum(y1_ref[...] * sc_ref[...] + sh_ref[...], 0.0)
        xpad_ref[...] = jnp.zeros_like(xpad_ref)
        xpad_ref[:, 1:ho + 1, 1:wo + 1, :] = a
        acc = jnp.zeros((g * ho * wo, cp), jnp.float32)
        for dy in range(3):
            for dx in range(3):
                xs = xpad_ref[:, dy:dy + ho, dx:dx + wo, :]
                xs = xs.astype(jnp.bfloat16).reshape(g * ho * wo, cp)
                acc = acc + jnp.dot(xs, w_ref[dy * 3 + dx],
                                    preferred_element_type=jnp.float32)
        y2_ref[...] = acc.reshape(g, ho, wo, cp)
        ps_ref[0, 0:1, :] = jnp.sum(acc, axis=0, keepdims=True)
        ps_ref[0, 1:2, :] = jnp.sum(acc * acc, axis=0, keepdims=True)
    return kernel


def _bn_conv_stats_pallas(y1, scale, shift, w2, g, cp):
    n, ho, wo, _ = y1.shape
    kernel = _make_bn_conv_stats_kernel(g, ho, wo, cp)
    return pl.pallas_call(
        kernel,
        out_shape=(jax.ShapeDtypeStruct((n, ho, wo, cp), jnp.float32),
                   jax.ShapeDtypeStruct((n // g, 2, cp), jnp.float32)),
        grid=(n // g,),
        in_specs=[
            pl.BlockSpec((g, ho, wo, cp), lambda i: (i, 0, 0, 0)),
            pl.BlockSpec((1, cp), lambda i: (0, 0)),
            pl.BlockSpec((1, cp), lambda i: (0, 0)),
            pl.BlockSpec(w2.shape, lambda i: (0, 0, 0)),
        ],
        out_specs=(
            pl.BlockSpec((g, ho, wo, cp), lambda i: (i, 0, 0, 0)),
            pl.BlockSpec((1, 2, cp), lambda i: (i, 0, 0)),
        ),
        scratch_shapes=[pltpu.VMEM((g, ho + 2, wo + 2, cp), jnp.float32)],
        compiler_params=pltpu.CompilerParams(
            dimension_semantics=("parallel",),
            vmem_limit_bytes=_VMEM_LIMIT),
    )(y1, scale, shift, w2)


# ----------------------------------------------------------------------------
# Kernel 3: bn2(scale/shift) + (affine-)residual add + ReLU.
# ----------------------------------------------------------------------------
def _bn_add_relu_kernel(y_ref, sc_ref, sh_ref, r_ref, rsc_ref, rsh_ref, o_ref):
    y = y_ref[...] * sc_ref[...] + sh_ref[...]
    r = r_ref[...].astype(jnp.float32) * rsc_ref[...] + rsh_ref[...]
    o_ref[...] = jnp.maximum(y + r, 0.0)


def _bn_add_relu_pallas(y, scale, shift, r, rscale, rshift, g, cp):
    n, ho, wo, _ = y.shape
    blk = pl.BlockSpec((g, ho, wo, cp), lambda i: (i, 0, 0, 0))
    vec = pl.BlockSpec((1, cp), lambda i: (0, 0))
    return pl.pallas_call(
        _bn_add_relu_kernel,
        out_shape=jax.ShapeDtypeStruct((n, ho, wo, cp), jnp.float32),
        grid=(n // g,),
        in_specs=[blk, vec, vec, blk, vec, vec],
        out_specs=pl.BlockSpec((g, ho, wo, cp), lambda i: (i, 0, 0, 0)),
        compiler_params=pltpu.CompilerParams(
            dimension_semantics=("parallel",),
            vmem_limit_bytes=_VMEM_LIMIT),
    )(y, scale, shift, r, rscale, rshift)


# ----------------------------------------------------------------------------
# Plain-JAX glue (cheap): padding/phase decomposition, BN scale/shift folding,
# weight preparation (hoisted to __init__).
# ----------------------------------------------------------------------------
def _phases_3x3(x_nhwc, stride):
    """Zero-pad spatially and split into stride-phases: [s*s, N, Hq, Wq, C]."""
    n, h, w, c = x_nhwc.shape
    s = stride
    xp = jnp.pad(x_nhwc, ((0, 0), (1, 1), (1, 1), (0, 0)))
    hp, wp = h + 2, w + 2
    ho = (h + 2 - 3) // s + 1
    wo = (w + 2 - 3) // s + 1
    hq = -(-hp // s)
    wq = -(-wp // s)
    phases = []
    for ry in range(s):
        for rx in range(s):
            p = xp[:, ry::s, rx::s, :]
            p = jnp.pad(p, ((0, 0), (0, hq - p.shape[1]),
                            (0, wq - p.shape[2]), (0, 0)))
            phases.append(p)
    xph = jnp.stack(phases, axis=0).astype(jnp.bfloat16)
    taps = [((dy % s) * s + (dx % s), dy // s, dx // s, dy * 3 + dx)
            for dy in range(3) for dx in range(3)]
    return xph, taps, ho, wo


def _bn_scale_shift(partial_stats, count, gamma_p, beta_p):
    """Fold batch statistics (sum, sum_sq) into per-channel scale/shift."""
    tot = jnp.sum(partial_stats, axis=0)            # [2, cp]
    mean = tot[0] / count
    var = jnp.maximum(tot[1] / count - mean * mean, 0.0)
    inv = jax.lax.rsqrt(var + BN_EPS)
    scale = gamma_p * inv
    shift = beta_p - mean * scale
    return scale.reshape(1, -1), shift.reshape(1, -1)


def _prep_conv_weight(w, cin_pad, cout_pad):
    """PyTorch [Cout, Cin, kh, kw] -> tap-major [kh*kw, cin_pad, cout_pad] bf16."""
    cout, cin, kh, kw = w.shape
    wt = jnp.transpose(w, (2, 3, 1, 0)).reshape(kh * kw, cin, cout)
    wt = jnp.pad(wt, ((0, 0), (0, cin_pad - cin), (0, cout_pad - cout)))
    return wt.astype(jnp.bfloat16)


def _pad_channels(v, cp):
    return jnp.pad(v.astype(jnp.float32), (0, cp - v.shape[0]))


# ----------------------------------------------------------------------------
# CifarBasicBlock
# ----------------------------------------------------------------------------
class CifarBasicBlockPallas:
    def __init__(self, inplanes, planes, stride=1, reduction=16, key=None):
        if key is None:
            key = jax.random.PRNGKey(0)
        k1, k2, k3 = jax.random.split(key, 3)
        self.inplanes, self.planes, self.stride = inplanes, planes, stride
        self.reduction = reduction  # unused in forward (matches PyTorch)
        self.cp = _round_up(planes, _LANES)

        def init_conv(k, shape):
            fan_in = shape[1] * shape[2] * shape[3]
            return jax.random.normal(k, shape, jnp.float32) * (2.0 / fan_in) ** 0.5

        # raw f32 parameters (also used by the pure-JAX reference)
        self.w1 = init_conv(k1, (planes, inplanes, 3, 3))
        self.w2 = init_conv(k2, (planes, planes, 3, 3))
        self.g1 = jnp.ones((planes,), jnp.float32)
        self.b1 = jnp.zeros((planes,), jnp.float32)
        self.g2 = jnp.ones((planes,), jnp.float32)
        self.b2 = jnp.zeros((planes,), jnp.float32)

        # kernel-ready parameters (pre-transposed, channel-padded, bf16)
        self.w1_k = _prep_conv_weight(self.w1, inplanes, self.cp)   # [9, cin, cp]
        self.w2_k = _prep_conv_weight(self.w2, self.cp, self.cp)    # [9, cp, cp]
        self.g1_p = _pad_channels(self.g1, self.cp)
        self.b1_p = _pad_channels(self.b1, self.cp)
        self.g2_p = _pad_channels(self.g2, self.cp)
        self.b2_p = _pad_channels(self.b2, self.cp)

        if inplanes != planes:
            self.wd = init_conv(k3, (planes, inplanes, 1, 1))
            self.gd = jnp.ones((planes,), jnp.float32)
            self.bd = jnp.zeros((planes,), jnp.float32)
            self.wd_k = _prep_conv_weight(self.wd, inplanes, self.cp)  # [1, cin, cp]
            self.gd_p = _pad_channels(self.gd, self.cp)
            self.bd_p = _pad_channels(self.bd, self.cp)
        else:
            self.wd = None

    def __call__(self, x_nchw):
        x = jnp.transpose(x_nchw, (0, 2, 3, 1)).astype(jnp.float32)   # NHWC
        n, h, w, cin = x.shape
        cp, s = self.cp, self.stride

        xph, taps, ho, wo = _phases_3x3(x.astype(jnp.bfloat16), s)
        g = _pick_group(n, ho * wo)
        m = n * ho * wo

        # conv1 (+ BN partial stats)
        y1, ps1 = _conv_stats_pallas(xph, self.w1_k, taps, ho, wo, g, cp)
        sc1, sh1 = _bn_scale_shift(ps1, m, self.g1_p, self.b1_p)

        # fused bn1 + relu + conv2 (+ BN partial stats)
        y2, ps2 = _bn_conv_stats_pallas(y1, sc1, sh1, self.w2_k, g, cp)
        sc2, sh2 = _bn_scale_shift(ps2, m, self.g2_p, self.b2_p)

        # residual path
        if self.wd is not None:
            xs = x[:, ::s, ::s, :].astype(jnp.bfloat16)[None]  # [1, n, ho, wo, cin]
            r, psd = _conv_stats_pallas(xs, self.wd_k, [(0, 0, 0, 0)],
                                        ho, wo, g, cp)
            rsc, rsh = _bn_scale_shift(psd, m, self.gd_p, self.bd_p)
        else:
            if s != 1:
                raise ValueError("identity residual requires stride == 1")
            r = jnp.pad(x, ((0, 0), (0, 0), (0, 0),
                            (0, cp - cin))).astype(jnp.bfloat16)
            rsc = jnp.ones((1, cp), jnp.float32)
            rsh = jnp.zeros((1, cp), jnp.float32)

        # bn2 + residual + relu, drop the lane padding, back to NCHW
        out = _bn_add_relu_pallas(y2, sc2, sh2, r, rsc, rsh, g, cp)
        out = out[:, :, :, :self.planes]
        return jnp.transpose(out, (0, 3, 1, 2))


# ----------------------------------------------------------------------------
# Pure-JAX f32 reference (training-mode BN, batch statistics).
# ----------------------------------------------------------------------------
def _reference_block(x_nchw, block):
    prec = jax.lax.Precision.HIGHEST

    def conv(x, w, stride, pad):
        return jax.lax.conv_general_dilated(
            x, w, window_strides=(stride, stride),
            padding=((pad, pad), (pad, pad)),
            dimension_numbers=("NCHW", "OIHW", "NCHW"), precision=prec)

    def bn(y, gamma, beta):
        mean = jnp.mean(y, axis=(0, 2, 3), keepdims=True)
        var = jnp.mean(jnp.square(y - mean), axis=(0, 2, 3), keepdims=True)
        yhat = (y - mean) * jax.lax.rsqrt(var + BN_EPS)
        return yhat * gamma.reshape(1, -1, 1, 1) + beta.reshape(1, -1, 1, 1)

    if block.wd is not None:
        residual = bn(conv(x_nchw, block.wd, block.stride, 0), block.gd, block.bd)
    else:
        residual = x_nchw
    out = jax.nn.relu(bn(conv(x_nchw, block.w1, block.stride, 1),
                         block.g1, block.b1))
    out = bn(conv(out, block.w2, 1, 1), block.g2, block.b2)
    return jax.nn.relu(out + residual)


# ----------------------------------------------------------------------------
if __name__ == "__main__":
    key = jax.random.PRNGKey(0)
    kx, kp1, kp2 = jax.random.split(key, 3)
    x = jax.random.normal(kx, (2, 4, 16, 16), jnp.float32)

    # identity-residual block (stride 1)
    blk1 = CifarBasicBlockPallas(inplanes=4, planes=4, stride=1, key=kp1)
    out1 = jax.block_until_ready(jax.jit(blk1.__call__)(x))
    assert out1.shape == (2, 4, 16, 16), out1.shape
    assert bool(jnp.all(out1 >= 0.0))
    err1 = float(jnp.max(jnp.abs(out1 - _reference_block(x, blk1))))
    assert err1 < 2e-1, f"identity block max abs err {err1}"

    # downsample block (stride 2, channel expansion)
    blk2 = CifarBasicBlockPallas(inplanes=4, planes=8, stride=2, key=kp2)
    out2 = jax.block_until_ready(jax.jit(blk2.__call__)(x))
    assert out2.shape == (2, 8, 8, 8), out2.shape
    assert bool(jnp.all(out2 >= 0.0))
    err2 = float(jnp.max(jnp.abs(out2 - _reference_block(x, blk2))))
    assert err2 < 2e-1, f"downsample block max abs err {err2}"

    print("KERNEL_OK")
</pallas_src>

<mosaic_0001>
module attributes {stable_mosaic.version = 11 : i64} {
  func.func @kernel(%arg0: i32, %arg1: memref<1x2x18x18x4xbf16, #tpu.memory_space<vmem>>, %arg2: memref<9x4x128xbf16, #tpu.memory_space<vmem>>, %arg3: memref<2x16x16x128xf32, #tpu.memory_space<vmem>>, %arg4: memref<1x2x128xf32, #tpu.memory_space<vmem>>) attributes {dimension_semantics = [#tpu.dimension_semantics<parallel>], iteration_bounds = array<i64: 1>, scalar_prefetch = 0 : i64, scratch_operands = 0 : i64, tpu.core_type = #tpu.core_type<tc>, window_params = [{transform_indices = @transform_0, window_bounds = array<i64: 1, 2, 18, 18, 4>}, {pipeline_mode = #tpu.pipeline_mode<synchronous>, transform_indices = @transform_1, window_bounds = array<i64: 9, 4, 128>}, {transform_indices = @transform_2, window_bounds = array<i64: 2, 16, 16, 128>}, {transform_indices = @transform_3, window_bounds = array<i64: 1, 2, 128>}]} {
    %cst = arith.constant 0.000000e+00 : f32
    %0 = vector.broadcast %cst : f32 to vector<512x128xf32>
    %c0 = arith.constant 0 : index
    %c0_0 = arith.constant 0 : index
    %c0_1 = arith.constant 0 : index
    %c0_2 = arith.constant 0 : index
    %c0_3 = arith.constant 0 : index
    %1 = vector.load %arg1[%c0, %c0_0, %c0_1, %c0_2, %c0_3] : memref<1x2x18x18x4xbf16, #tpu.memory_space<vmem>>, vector<1x2x16x16x4xbf16>
    %2 = vector.shape_cast %1 : vector<1x2x16x16x4xbf16> to vector<2x16x16x4xbf16>
    %3 = vector.shape_cast %2 : vector<2x16x16x4xbf16> to vector<512x4xbf16>
    %c0_4 = arith.constant 0 : index
    %c0_5 = arith.constant 0 : index
    %c0_6 = arith.constant 0 : index
    %4 = vector.load %arg2[%c0_4, %c0_5, %c0_6] : memref<9x4x128xbf16, #tpu.memory_space<vmem>>, vector<1x4x128xbf16>
    %5 = vector.shape_cast %4 : vector<1x4x128xbf16> to vector<4x128xbf16>
    %cst_7 = arith.constant dense<0.000000e+00> : vector<512x128xf32>
    %6 = tpu.matmul %3, %5, %cst_7 {dimension_numbers = #tpu.dot_dimension_numbers<[1], [0], [0], [1], [0, 0, 1, 1], [], []>} : vector<512x4xbf16>, vector<4x128xbf16>, vector<512x128xf32> -> vector<512x128xf32>
    %7 = arith.addf %0, %6 : vector<512x128xf32>
    %c0_8 = arith.constant 0 : index
    %c0_9 = arith.constant 0 : index
    %c0_10 = arith.constant 0 : index
    %c1 = arith.constant 1 : index
    %c0_11 = arith.constant 0 : index
    %8 = vector.load %arg1[%c0_8, %c0_9, %c0_10, %c1, %c0_11] : memref<1x2x18x18x4xbf16, #tpu.memory_space<vmem>>, vector<1x2x16x16x4xbf16>
    %9 = vector.shape_cast %8 : vector<1x2x16x16x4xbf16> to vector<2x16x16x4xbf16>
    %10 = vector.shape_cast %9 : vector<2x16x16x4xbf16> to vector<512x4xbf16>
    %c1_12 = arith.constant 1 : index
    %c0_13 = arith.constant 0 : index
    %c0_14 = arith.constant 0 : index
    %11 = vector.load %arg2[%c1_12, %c0_13, %c0_14] : memref<9x4x128xbf16, #tpu.memory_space<vmem>>, vector<1x4x128xbf16>
    %12 = vector.shape_cast %11 : vector<1x4x128xbf16> to vector<4x128xbf16>
    %cst_15 = arith.constant dense<0.000000e+00> : vector<512x128xf32>
    %13 = tpu.matmul %10, %12, %cst_15 {dimension_numbers = #tpu.dot_dimension_numbers<[1], [0], [0], [1], [0, 0, 1, 1], [], []>} : vector<512x4xbf16>, vector<4x128xbf16>, vector<512x128xf32> -> vector<512x128xf32>
    %14 = arith.addf %7, %13 : vector<512x128xf32>
    %c0_16 = arith.constant 0 : index
    %c0_17 = arith.constant 0 : index
    %c0_18 = arith.constant 0 : index
    %c2 = arith.constant 2 : index
    %c0_19 = arith.constant 0 : index
    %15 = vector.load %arg1[%c0_16, %c0_17, %c0_18, %c2, %c0_19] : memref<1x2x18x18x4xbf16, #tpu.memory_space<vmem>>, vector<1x2x16x16x4xbf16>
    %16 = vector.shape_cast %15 : vector<1x2x16x16x4xbf16> to vector<2x16x16x4xbf16>
    %17 = vector.shape_cast %16 : vector<2x16x16x4xbf16> to vector<512x4xbf16>
    %c2_20 = arith.constant 2 : index
    %c0_21 = arith.constant 0 : index
    %c0_22 = arith.constant 0 : index
    %18 = vector.load %arg2[%c2_20, %c0_21, %c0_22] : memref<9x4x128xbf16, #tpu.memory_space<vmem>>, vector<1x4x128xbf16>
    %19 = vector.shape_cast %18 : vector<1x4x128xbf16> to vector<4x128xbf16>
    %cst_23 = arith.constant dense<0.000000e+00> : vector<512x128xf32>
    %20 = tpu.matmul %17, %19, %cst_23 {dimension_numbers = #tpu.dot_dimension_numbers<[1], [0], [0], [1], [0, 0, 1, 1], [], []>} : vector<512x4xbf16>, vector<4x128xbf16>, vector<512x128xf32> -> vector<512x128xf32>
    %21 = arith.addf %14, %20 : vector<512x128xf32>
    %c0_24 = arith.constant 0 : index
    %c0_25 = arith.constant 0 : index
    %c1_26 = arith.constant 1 : index
    %c0_27 = arith.constant 0 : index
    %c0_28 = arith.constant 0 : index
    %22 = vector.load %arg1[%c0_24, %c0_25, %c1_26, %c0_27, %c0_28] : memref<1x2x18x18x4xbf16, #tpu.memory_space<vmem>>, vector<1x2x16x16x4xbf16>
    %23 = vector.shape_cast %22 : vector<1x2x16x16x4xbf16> to vector<2x16x16x4xbf16>
    %24 = vector.shape_cast %23 : vector<2x16x16x4xbf16> to vector<512x4xbf16>
    %c3 = arith.constant 3 : index
    %c0_29 = arith.constant 0 : index
    %c0_30 = arith.constant 0 : index
    %25 = vector.load %arg2[%c3, %c0_29, %c0_30] : memref<9x4x128xbf16, #tpu.memory_space<vmem>>, vector<1x4x128xbf16>
    %26 = vector.shape_cast %25 : vector<1x4x128xbf16> to vector<4x128xbf16>
    %cst_31 = arith.constant dense<0.000000e+00> : vector<512x128xf32>
    %27 = tpu.matmul %24, %26, %cst_31 {dimension_numbers = #tpu.dot_dimension_numbers<[1], [0], [0], [1], [0, 0, 1, 1], [], []>} : vector<512x4xbf16>, vector<4x128xbf16>, vector<512x128xf32> -> vector<512x128xf32>
    %28 = arith.addf %21, %27 : vector<512x128xf32>
    %c0_32 = arith.constant 0 : index
    %c0_33 = arith.constant 0 : index
    %c1_34 = arith.constant 1 : index
    %c1_35 = arith.constant 1 : index
    %c0_36 = arith.constant 0 : index
    %29 = vector.load %arg1[%c0_32, %c0_33, %c1_34, %c1_35, %c0_36] : memref<1x2x18x18x4xbf16, #tpu.memory_space<vmem>>, vector<1x2x16x16x4xbf16>
    %30 = vector.shape_cast %29 : vector<1x2x16x16x4xbf16> to vector<2x16x16x4xbf16>
    %31 = vector.shape_cast %30 : vector<2x16x16x4xbf16> to vector<512x4xbf16>
    %c4 = arith.constant 4 : index
    %c0_37 = arith.constant 0 : index
    %c0_38 = arith.constant 0 : index
    %32 = vector.load %arg2[%c4, %c0_37, %c0_38] : memref<9x4x128xbf16, #tpu.memory_space<vmem>>, vector<1x4x128xbf16>
    %33 = vector.shape_cast %32 : vector<1x4x128xbf16> to vector<4x128xbf16>
    %cst_39 = arith.constant dense<0.000000e+00> : vector<512x128xf32>
    %34 = tpu.matmul %31, %33, %cst_39 {dimension_numbers = #tpu.dot_dimension_numbers<[1], [0], [0], [1], [0, 0, 1, 1], [], []>} : vector<512x4xbf16>, vector<4x128xbf16>, vector<512x128xf32> -> vector<512x128xf32>
    %35 = arith.addf %28, %34 : vector<512x128xf32>
    %c0_40 = arith.constant 0 : index
    %c0_41 = arith.constant 0 : index
    %c1_42 = arith.constant 1 : index
    %c2_43 = arith.constant 2 : index
    %c0_44 = arith.constant 0 : index
    %36 = vector.load %arg1[%c0_40, %c0_41, %c1_42, %c2_43, %c0_44] : memref<1x2x18x18x4xbf16, #tpu.memory_space<vmem>>, vector<1x2x16x16x4xbf16>
    %37 = vector.shape_cast %36 : vector<1x2x16x16x4xbf16> to vector<2x16x16x4xbf16>
    %38 = vector.shape_cast %37 : vector<2x16x16x4xbf16> to vector<512x4xbf16>
    %c5 = arith.constant 5 : index
    %c0_45 = arith.constant 0 : index
    %c0_46 = arith.constant 0 : index
    %39 = vector.load %arg2[%c5, %c0_45, %c0_46] : memref<9x4x128xbf16, #tpu.memory_space<vmem>>, vector<1x4x128xbf16>
    %40 = vector.shape_cast %39 : vector<1x4x128xbf16> to vector<4x128xbf16>
    %cst_47 = arith.constant dense<0.000000e+00> : vector<512x128xf32>
    %41 = tpu.matmul %38, %40, %cst_47 {dimension_numbers = #tpu.dot_dimension_numbers<[1], [0], [0], [1], [0, 0, 1, 1], [], []>} : vector<512x4xbf16>, vector<4x128xbf16>, vector<512x128xf32> -> vector<512x128xf32>
    %42 = arith.addf %35, %41 : vector<512x128xf32>
    %c0_48 = arith.constant 0 : index
    %c0_49 = arith.constant 0 : index
    %c2_50 = arith.constant 2 : index
    %c0_51 = arith.constant 0 : index
    %c0_52 = arith.constant 0 : index
    %43 = vector.load %arg1[%c0_48, %c0_49, %c2_50, %c0_51, %c0_52] : memref<1x2x18x18x4xbf16, #tpu.memory_space<vmem>>, vector<1x2x16x16x4xbf16>
    %44 = vector.shape_cast %43 : vector<1x2x16x16x4xbf16> to vector<2x16x16x4xbf16>
    %45 = vector.shape_cast %44 : vector<2x16x16x4xbf16> to vector<512x4xbf16>
    %c6 = arith.constant 6 : index
    %c0_53 = arith.constant 0 : index
    %c0_54 = arith.constant 0 : index
    %46 = vector.load %arg2[%c6, %c0_53, %c0_54] : memref<9x4x128xbf16, #tpu.memory_space<vmem>>, vector<1x4x128xbf16>
    %47 = vector.shape_cast %46 : vector<1x4x128xbf16> to vector<4x128xbf16>
    %cst_55 = arith.constant dense<0.000000e+00> : vector<512x128xf32>
    %48 = tpu.matmul %45, %47, %cst_55 {dimension_numbers = #tpu.dot_dimension_numbers<[1], [0], [0], [1], [0, 0, 1, 1], [], []>} : vector<512x4xbf16>, vector<4x128xbf16>, vector<512x128xf32> -> vector<512x128xf32>
    %49 = arith.addf %42, %48 : vector<512x128xf32>
    %c0_56 = arith.constant 0 : index
    %c0_57 = arith.constant 0 : index
    %c2_58 = arith.constant 2 : index
    %c1_59 = arith.constant 1 : index
    %c0_60 = arith.constant 0 : index
    %50 = vector.load %arg1[%c0_56, %c0_57, %c2_58, %c1_59, %c0_60] : memref<1x2x18x18x4xbf16, #tpu.memory_space<vmem>>, vector<1x2x16x16x4xbf16>
    %51 = vector.shape_cast %50 : vector<1x2x16x16x4xbf16> to vector<2x16x16x4xbf16>
    %52 = vector.shape_cast %51 : vector<2x16x16x4xbf16> to vector<512x4xbf16>
    %c7 = arith.constant 7 : index
    %c0_61 = arith.constant 0 : index
    %c0_62 = arith.constant 0 : index
    %53 = vector.load %arg2[%c7, %c0_61, %c0_62] : memref<9x4x128xbf16, #tpu.memory_space<vmem>>, vector<1x4x128xbf16>
    %54 = vector.shape_cast %53 : vector<1x4x128xbf16> to vector<4x128xbf16>
    %cst_63 = arith.constant dense<0.000000e+00> : vector<512x128xf32>
    %55 = tpu.matmul %52, %54, %cst_63 {dimension_numbers = #tpu.dot_dimension_numbers<[1], [0], [0], [1], [0, 0, 1, 1], [], []>} : vector<512x4xbf16>, vector<4x128xbf16>, vector<512x128xf32> -> vector<512x128xf32>
    %56 = arith.addf %49, %55 : vector<512x128xf32>
    %c0_64 = arith.constant 0 : index
    %c0_65 = arith.constant 0 : index
    %c2_66 = arith.constant 2 : index
    %c2_67 = arith.constant 2 : index
    %c0_68 = arith.constant 0 : index
    %57 = vector.load %arg1[%c0_64, %c0_65, %c2_66, %c2_67, %c0_68] : memref<1x2x18x18x4xbf16, #tpu.memory_space<vmem>>, vector<1x2x16x16x4xbf16>
    %58 = vector.shape_cast %57 : vector<1x2x16x16x4xbf16> to vector<2x16x16x4xbf16>
    %59 = vector.shape_cast %58 : vector<2x16x16x4xbf16> to vector<512x4xbf16>
    %c8 = arith.constant 8 : index
    %c0_69 = arith.constant 0 : index
    %c0_70 = arith.constant 0 : index
    %60 = vector.load %arg2[%c8, %c0_69, %c0_70] : memref<9x4x128xbf16, #tpu.memory_space<vmem>>, vector<1x4x128xbf16>
    %61 = vector.shape_cast %60 : vector<1x4x128xbf16> to vector<4x128xbf16>
    %cst_71 = arith.constant dense<0.000000e+00> : vector<512x128xf32>
    %62 = tpu.matmul %59, %61, %cst_71 {dimension_numbers = #tpu.dot_dimension_numbers<[1], [0], [0], [1], [0, 0, 1, 1], [], []>} : vector<512x4xbf16>, vector<4x128xbf16>, vector<512x128xf32> -> vector<512x128xf32>
    %63 = arith.addf %56, %62 : vector<512x128xf32>
    %64 = vector.shape_cast %63 : vector<512x128xf32> to vector<2x16x16x128xf32>
    %c0_72 = arith.constant 0 : index
    %c0_73 = arith.constant 0 : index
    %c0_74 = arith.constant 0 : index
    %c0_75 = arith.constant 0 : index
    %65 = vector.load %arg3[%c0_72, %c0_73, %c0_74, %c0_75] : memref<2x16x16x128xf32, #tpu.memory_space<vmem>>, vector<2x16x16x128xf32>
    tpu.vector_store %arg3[%c0_72, %c0_73, %c0_74, %c0_75], %64 {strides = array<i32>} : memref<2x16x16x128xf32, #tpu.memory_space<vmem>>, vector<2x16x16x128xf32>,
    %cst_76 = arith.constant dense<0.000000e+00> : vector<128xf32>
    %66 = vector.multi_reduction <add>, %63, %cst_76 [0] : vector<512x128xf32> to vector<128xf32>
    %67 = vector.shape_cast %66 : vector<128xf32> to vector<1x128xf32>
    %c0_77 = arith.constant 0 : index
    %c0_78 = arith.constant 0 : index
    %c0_79 = arith.constant 0 : index
    %68 = vector.load %arg4[%c0_77, %c0_78, %c0_79] : memref<1x2x128xf32, #tpu.memory_space<vmem>>, vector<1x1x128xf32>
    %69 = vector.shape_cast %68 : vector<1x1x128xf32> to vector<1x128xf32>
    %70 = vector.shape_cast %67 : vector<1x128xf32> to vector<1x1x128xf32>
    tpu.vector_store %arg4[%c0_77, %c0_78, %c0_79], %70 {strides = array<i32>} : memref<1x2x128xf32, #tpu.memory_space<vmem>>, vector<1x1x128xf32>,
    %71 = arith.mulf %63, %63 : vector<512x128xf32>
    %cst_80 = arith.constant dense<0.000000e+00> : vector<128xf32>
    %72 = vector.multi_reduction <add>, %71, %cst_80 [0] : vector<512x128xf32> to vector<128xf32>
    %73 = vector.shape_cast %72 : vector<128xf32> to vector<1x128xf32>
    %c0_81 = arith.constant 0 : index
    %c1_82 = arith.constant 1 : index
    %c0_83 = arith.constant 0 : index
    %74 = vector.load %arg4[%c0_81, %c1_82, %c0_83] : memref<1x2x128xf32, #tpu.memory_space<vmem>>, vector<1x1x128xf32>
    %75 = vector.shape_cast %74 : vector<1x1x128xf32> to vector<1x128xf32>
    %76 = vector.shape_cast %73 : vector<1x128xf32> to vector<1x1x128xf32>
    tpu.vector_store %arg4[%c0_81, %c1_82, %c0_83], %76 {strides = array<i32>} : memref<1x2x128xf32, #tpu.memory_space<vmem>>, vector<1x1x128xf32>,
    return
  }
  func.func @transform_0(%arg0: i32) -> (i32, i32, i32, i32, i32) {
    %c0_i32 = arith.constant 0 : i32
    %c0_i32_0 = arith.constant 0 : i32
    %c0_i32_1 = arith.constant 0 : i32
    %c0_i32_2 = arith.constant 0 : i32
    %c0_i32_3 = arith.constant 0 : i32
    return %c0_i32, %arg0, %c0_i32_0, %c0_i32_1, %c0_i32_2 : i32, i32, i32, i32, i32
  }
  func.func @transform_1(%arg0: i32) -> (i32, i32, i32) {
    %c0_i32 = arith.constant 0 : i32
    %c0_i32_0 = arith.constant 0 : i32
    %c0_i32_1 = arith.constant 0 : i32
    %c0_i32_2 = arith.constant 0 : i32
    return %c0_i32, %c0_i32_0, %c0_i32_1 : i32, i32, i32
  }
  func.func @transform_2(%arg0: i32) -> (i32, i32, i32, i32) {
    %c0_i32 = arith.constant 0 : i32
    %c0_i32_0 = arith.constant 0 : i32
    %c0_i32_1 = arith.constant 0 : i32
    %c0_i32_2 = arith.constant 0 : i32
    return %arg0, %c0_i32, %c0_i32_0, %c0_i32_1 : i32, i32, i32, i32
  }
  func.func @transform_3(%arg0: i32) -> (i32, i32, i32) {
    %c0_i32 = arith.constant 0 : i32
    %c0_i32_0 = arith.constant 0 : i32
    %c0_i32_1 = arith.constant 0 : i32
    return %arg0, %c0_i32, %c0_i32_0 : i32, i32, i32
  }
}

module attributes {stable_mosaic.version = 11 : i64} {
  func.func @kernel(%arg0: i32, %arg1: memref<2x16x16x128xf32, #tpu.memory_space<vmem>>, %arg2: memref<1x128xf32, #tpu.memory_space<vmem>>, %arg3: memref<1x128xf32, #tpu.memory_space<vmem>>, %arg4: memref<9x128x128xbf16, #tpu.memory_space<vmem>>, %arg5: memref<2x16x16x128xf32, #tpu.memory_space<vmem>>, %arg6: memref<1x2x128xf32, #tpu.memory_space<vmem>>, %arg7: memref<2x18x18x128xf32, #tpu.memory_space<vmem>>) attributes {dimension_semantics = [#tpu.dimension_semantics<parallel>], iteration_bounds = array<i64: 1>, scalar_prefetch = 0 : i64, scratch_operands = 1 : i64, tpu.core_type = #tpu.core_type<tc>, window_params = [{transform_indices = @transform_0, window_bounds = array<i64: 2, 16, 16, 128>}, {pipeline_mode = #tpu.pipeline_mode<synchronous>, transform_indices = @transform_1, window_bounds = array<i64: 1, 128>}, {pipeline_mode = #tpu.pipeline_mode<synchronous>, transform_indices = @transform_2, window_bounds = array<i64: 1, 128>}, {pipeline_mode = #tpu.pipeline_mode<synchronous>, transform_indices = @transform_3, window_bounds = array<i64: 9, 128, 128>}, {transform_indices = @transform_4, window_bounds = array<i64: 2, 16, 16, 128>}, {transform_indices = @transform_5, window_bounds = array<i64: 1, 2, 128>}]} {
    %c0 = arith.constant 0 : index
    %c0_0 = arith.constant 0 : index
    %c0_1 = arith.constant 0 : index
    %c0_2 = arith.constant 0 : index
    %0 = vector.load %arg1[%c0, %c0_0, %c0_1, %c0_2] : memref<2x16x16x128xf32, #tpu.memory_space<vmem>>, vector<2x16x16x128xf32>
    %c0_3 = arith.constant 0 : index
    %c0_4 = arith.constant 0 : index
    %1 = vector.load %arg2[%c0_3, %c0_4] : memref<1x128xf32, #tpu.memory_space<vmem>>, vector<1x128xf32>
    %2 = vector.shape_cast %1 : vector<1x128xf32> to vector<1x1x1x128xf32>
    %3 = vector.broadcast %2 : vector<1x1x1x128xf32> to vector<2x16x16x128xf32>
    %4 = arith.mulf %0, %3 : vector<2x16x16x128xf32>
    %c0_5 = arith.constant 0 : index
    %c0_6 = arith.constant 0 : index
    %5 = vector.load %arg3[%c0_5, %c0_6] : memref<1x128xf32, #tpu.memory_space<vmem>>, vector<1x128xf32>
    %6 = vector.shape_cast %5 : vector<1x128xf32> to vector<1x1x1x128xf32>
    %7 = vector.broadcast %6 : vector<1x1x1x128xf32> to vector<2x16x16x128xf32>
    %8 = arith.addf %4, %7 : vector<2x16x16x128xf32>
    %cst = arith.constant 0.000000e+00 : f32
    %9 = vector.broadcast %cst : f32 to vector<2x16x16x128xf32>
    %10 = arith.maximumf %8, %9 : vector<2x16x16x128xf32>
    %cst_7 = arith.constant 0.000000e+00 : f32
    %11 = vector.broadcast %cst_7 : f32 to vector<2x18x18x128xf32>
    %c0_8 = arith.constant 0 : index
    %c0_9 = arith.constant 0 : index
    %c0_10 = arith.constant 0 : index
    %c0_11 = arith.constant 0 : index
    %12 = vector.load %arg7[%c0_8, %c0_9, %c0_10, %c0_11] : memref<2x18x18x128xf32, #tpu.memory_space<vmem>>, vector<2x18x18x128xf32>
    tpu.vector_store %arg7[%c0_8, %c0_9, %c0_10, %c0_11], %11 {strides = array<i32>} : memref<2x18x18x128xf32, #tpu.memory_space<vmem>>, vector<2x18x18x128xf32>,
    %c0_12 = arith.constant 0 : index
    %c1 = arith.constant 1 : index
    %c1_13 = arith.constant 1 : index
    %c0_14 = arith.constant 0 : index
    %13 = vector.load %arg7[%c0_12, %c1, %c1_13, %c0_14] : memref<2x18x18x128xf32, #tpu.memory_space<vmem>>, vector<2x16x16x128xf32>
    tpu.vector_store %arg7[%c0_12, %c1, %c1_13, %c0_14], %10 {strides = array<i32>} : memref<2x18x18x128xf32, #tpu.memory_space<vmem>>, vector<2x16x16x128xf32>,
    %cst_15 = arith.constant 0.000000e+00 : f32
    %14 = vector.broadcast %cst_15 : f32 to vector<512x128xf32>
    %c0_16 = arith.constant 0 : index
    %c0_17 = arith.constant 0 : index
    %c0_18 = arith.constant 0 : index
    %c0_19 = arith.constant 0 : index
    %15 = vector.load %arg7[%c0_16, %c0_17, %c0_18, %c0_19] : memref<2x18x18x128xf32, #tpu.memory_space<vmem>>, vector<2x16x16x128xf32>
    %16 = arith.truncf %15 : vector<2x16x16x128xf32> to vector<2x16x16x128xbf16>
    %17 = vector.shape_cast %16 : vector<2x16x16x128xbf16> to vector<512x128xbf16>
    %c0_20 = arith.constant 0 : index
    %c0_21 = arith.constant 0 : index
    %c0_22 = arith.constant 0 : index
    %18 = vector.load %arg4[%c0_20, %c0_21, %c0_22] : memref<9x128x128xbf16, #tpu.memory_space<vmem>>, vector<1x128x128xbf16>
    %19 = vector.shape_cast %18 : vector<1x128x128xbf16> to vector<128x128xbf16>
    %cst_23 = arith.constant dense<0.000000e+00> : vector<512x128xf32>
    %20 = tpu.matmul %17, %19, %cst_23 {dimension_numbers = #tpu.dot_dimension_numbers<[1], [0], [0], [1], [0, 0, 1, 1], [], []>} : vector<512x128xbf16>, vector<128x128xbf16>, vector<512x128xf32> -> vector<512x128xf32>
    %21 = arith.addf %14, %20 : vector<512x128xf32>
    %c0_24 = arith.constant 0 : index
    %c0_25 = arith.constant 0 : index
    %c1_26 = arith.constant 1 : index
    %c0_27 = arith.constant 0 : index
    %22 = vector.load %arg7[%c0_24, %c0_25, %c1_26, %c0_27] : memref<2x18x18x128xf32, #tpu.memory_space<vmem>>, vector<2x16x16x128xf32>
    %23 = arith.truncf %22 : vector<2x16x16x128xf32> to vector<2x16x16x128xbf16>
    %24 = vector.shape_cast %23 : vector<2x16x16x128xbf16> to vector<512x128xbf16>
    %c1_28 = arith.constant 1 : index
    %c0_29 = arith.constant 0 : index
    %c0_30 = arith.constant 0 : index
    %25 = vector.load %arg4[%c1_28, %c0_29, %c0_30] : memref<9x128x128xbf16, #tpu.memory_space<vmem>>, vector<1x128x128xbf16>
    %26 = vector.shape_cast %25 : vector<1x128x128xbf16> to vector<128x128xbf16>
    %cst_31 = arith.constant dense<0.000000e+00> : vector<512x128xf32>
    %27 = tpu.matmul %24, %26, %cst_31 {dimension_numbers = #tpu.dot_dimension_numbers<[1], [0], [0], [1], [0, 0, 1, 1], [], []>} : vector<512x128xbf16>, vector<128x128xbf16>, vector<512x128xf32> -> vector<512x128xf32>
    %28 = arith.addf %21, %27 : vector<512x128xf32>
    %c0_32 = arith.constant 0 : index
    %c0_33 = arith.constant 0 : index
    %c2 = arith.constant 2 : index
    %c0_34 = arith.constant 0 : index
    %29 = vector.load %arg7[%c0_32, %c0_33, %c2, %c0_34] : memref<2x18x18x128xf32, #tpu.memory_space<vmem>>, vector<2x16x16x128xf32>
    %30 = arith.truncf %29 : vector<2x16x16x128xf32> to vector<2x16x16x128xbf16>
    %31 = vector.shape_cast %30 : vector<2x16x16x128xbf16> to vector<512x128xbf16>
    %c2_35 = arith.constant 2 : index
    %c0_36 = arith.constant 0 : index
    %c0_37 = arith.constant 0 : index
    %32 = vector.load %arg4[%c2_35, %c0_36, %c0_37] : memref<9x128x128xbf16, #tpu.memory_space<vmem>>, vector<1x128x128xbf16>
    %33 = vector.shape_cast %32 : vector<1x128x128xbf16> to vector<128x128xbf16>
    %cst_38 = arith.constant dense<0.000000e+00> : vector<512x128xf32>
    %34 = tpu.matmul %31, %33, %cst_38 {dimension_numbers = #tpu.dot_dimension_numbers<[1], [0], [0], [1], [0, 0, 1, 1], [], []>} : vector<512x128xbf16>, vector<128x128xbf16>, vector<512x128xf32> -> vector<512x128xf32>
    %35 = arith.addf %28, %34 : vector<512x128xf32>
    %c0_39 = arith.constant 0 : index
    %c1_40 = arith.constant 1 : index
    %c0_41 = arith.constant 0 : index
    %c0_42 = arith.constant 0 : index
    %36 = vector.load %arg7[%c0_39, %c1_40, %c0_41, %c0_42] : memref<2x18x18x128xf32, #tpu.memory_space<vmem>>, vector<2x16x16x128xf32>
    %37 = arith.truncf %36 : vector<2x16x16x128xf32> to vector<2x16x16x128xbf16>
    %38 = vector.shape_cast %37 : vector<2x16x16x128xbf16> to vector<512x128xbf16>
    %c3 = arith.constant 3 : index
    %c0_43 = arith.constant 0 : index
    %c0_44 = arith.constant 0 : index
    %39 = vector.load %arg4[%c3, %c0_43, %c0_44] : memref<9x128x128xbf16, #tpu.memory_space<vmem>>, vector<1x128x128xbf16>
    %40 = vector.shape_cast %39 : vector<1x128x128xbf16> to vector<128x128xbf16>
    %cst_45 = arith.constant dense<0.000000e+00> : vector<512x128xf32>
    %41 = tpu.matmul %38, %40, %cst_45 {dimension_numbers = #tpu.dot_dimension_numbers<[1], [0], [0], [1], [0, 0, 1, 1], [], []>} : vector<512x128xbf16>, vector<128x128xbf16>, vector<512x128xf32> -> vector<512x128xf32>
    %42 = arith.addf %35, %41 : vector<512x128xf32>
    %c0_46 = arith.constant 0 : index
    %c1_47 = arith.constant 1 : index
    %c1_48 = arith.constant 1 : index
    %c0_49 = arith.constant 0 : index
    %43 = vector.load %arg7[%c0_46, %c1_47, %c1_48, %c0_49] : memref<2x18x18x128xf32, #tpu.memory_space<vmem>>, vector<2x16x16x128xf32>
    %44 = arith.truncf %43 : vector<2x16x16x128xf32> to vector<2x16x16x128xbf16>
    %45 = vector.shape_cast %44 : vector<2x16x16x128xbf16> to vector<512x128xbf16>
    %c4 = arith.constant 4 : index
    %c0_50 = arith.constant 0 : index
    %c0_51 = arith.constant 0 : index
    %46 = vector.load %arg4[%c4, %c0_50, %c0_51] : memref<9x128x128xbf16, #tpu.memory_space<vmem>>, vector<1x128x128xbf16>
    %47 = vector.shape_cast %46 : vector<1x128x128xbf16> to vector<128x128xbf16>
    %cst_52 = arith.constant dense<0.000000e+00> : vector<512x128xf32>
    %48 = tpu.matmul %45, %47, %cst_52 {dimension_numbers = #tpu.dot_dimension_numbers<[1], [0], [0], [1], [0, 0, 1, 1], [], []>} : vector<512x128xbf16>, vector<128x128xbf16>, vector<512x128xf32> -> vector<512x128xf32>
    %49 = arith.addf %42, %48 : vector<512x128xf32>
    %c0_53 = arith.constant 0 : index
    %c1_54 = arith.constant 1 : index
    %c2_55 = arith.constant 2 : index
    %c0_56 = arith.constant 0 : index
    %50 = vector.load %arg7[%c0_53, %c1_54, %c2_55, %c0_56] : memref<2x18x18x128xf32, #tpu.memory_space<vmem>>, vector<2x16x16x128xf32>
    %51 = arith.truncf %50 : vector<2x16x16x128xf32> to vector<2x16x16x128xbf16>
    %52 = vector.shape_cast %51 : vector<2x16x16x128xbf16> to vector<512x128xbf16>
    %c5 = arith.constant 5 : index
    %c0_57 = arith.constant 0 : index
    %c0_58 = arith.constant 0 : index
    %53 = vector.load %arg4[%c5, %c0_57, %c0_58] : memref<9x128x128xbf16, #tpu.memory_space<vmem>>, vector<1x128x128xbf16>
    %54 = vector.shape_cast %53 : vector<1x128x128xbf16> to vector<128x128xbf16>
    %cst_59 = arith.constant dense<0.000000e+00> : vector<512x128xf32>
    %55 = tpu.matmul %52, %54, %cst_59 {dimension_numbers = #tpu.dot_dimension_numbers<[1], [0], [0], [1], [0, 0, 1, 1], [], []>} : vector<512x128xbf16>, vector<128x128xbf16>, vector<512x128xf32> -> vector<512x128xf32>
    %56 = arith.addf %49, %55 : vector<512x128xf32>
    %c0_60 = arith.constant 0 : index
    %c2_61 = arith.constant 2 : index
    %c0_62 = arith.constant 0 : index
    %c0_63 = arith.constant 0 : index
    %57 = vector.load %arg7[%c0_60, %c2_61, %c0_62, %c0_63] : memref<2x18x18x128xf32, #tpu.memory_space<vmem>>, vector<2x16x16x128xf32>
    %58 = arith.truncf %57 : vector<2x16x16x128xf32> to vector<2x16x16x128xbf16>
    %59 = vector.shape_cast %58 : vector<2x16x16x128xbf16> to vector<512x128xbf16>
    %c6 = arith.constant 6 : index
    %c0_64 = arith.constant 0 : index
    %c0_65 = arith.constant 0 : index
    %60 = vector.load %arg4[%c6, %c0_64, %c0_65] : memref<9x128x128xbf16, #tpu.memory_space<vmem>>, vector<1x128x128xbf16>
    %61 = vector.shape_cast %60 : vector<1x128x128xbf16> to vector<128x128xbf16>
    %cst_66 = arith.constant dense<0.000000e+00> : vector<512x128xf32>
    %62 = tpu.matmul %59, %61, %cst_66 {dimension_numbers = #tpu.dot_dimension_numbers<[1], [0], [0], [1], [0, 0, 1, 1], [], []>} : vector<512x128xbf16>, vector<128x128xbf16>, vector<512x128xf32> -> vector<512x128xf32>
    %63 = arith.addf %56, %62 : vector<512x128xf32>
    %c0_67 = arith.constant 0 : index
    %c2_68 = arith.constant 2 : index
    %c1_69 = arith.constant 1 : index
    %c0_70 = arith.constant 0 : index
    %64 = vector.load %arg7[%c0_67, %c2_68, %c1_69, %c0_70] : memref<2x18x18x128xf32, #tpu.memory_space<vmem>>, vector<2x16x16x128xf32>
    %65 = arith.truncf %64 : vector<2x16x16x128xf32> to vector<2x16x16x128xbf16>
    %66 = vector.shape_cast %65 : vector<2x16x16x128xbf16> to vector<512x128xbf16>
    %c7 = arith.constant 7 : index
    %c0_71 = arith.constant 0 : index
    %c0_72 = arith.constant 0 : index
    %67 = vector.load %arg4[%c7, %c0_71, %c0_72] : memref<9x128x128xbf16, #tpu.memory_space<vmem>>, vector<1x128x128xbf16>
    %68 = vector.shape_cast %67 : vector<1x128x128xbf16> to vector<128x128xbf16>
    %cst_73 = arith.constant dense<0.000000e+00> : vector<512x128xf32>
    %69 = tpu.matmul %66, %68, %cst_73 {dimension_numbers = #tpu.dot_dimension_numbers<[1], [0], [0], [1], [0, 0, 1, 1], [], []>} : vector<512x128xbf16>, vector<128x128xbf16>, vector<512x128xf32> -> vector<512x128xf32>
    %70 = arith.addf %63, %69 : vector<512x128xf32>
    %c0_74 = arith.constant 0 : index
    %c2_75 = arith.constant 2 : index
    %c2_76 = arith.constant 2 : index
    %c0_77 = arith.constant 0 : index
    %71 = vector.load %arg7[%c0_74, %c2_75, %c2_76, %c0_77] : memref<2x18x18x128xf32, #tpu.memory_space<vmem>>, vector<2x16x16x128xf32>
    %72 = arith.truncf %71 : vector<2x16x16x128xf32> to vector<2x16x16x128xbf16>
    %73 = vector.shape_cast %72 : vector<2x16x16x128xbf16> to vector<512x128xbf16>
    %c8 = arith.constant 8 : index
    %c0_78 = arith.constant 0 : index
    %c0_79 = arith.constant 0 : index
    %74 = vector.load %arg4[%c8, %c0_78, %c0_79] : memref<9x128x128xbf16, #tpu.memory_space<vmem>>, vector<1x128x128xbf16>
    %75 = vector.shape_cast %74 : vector<1x128x128xbf16> to vector<128x128xbf16>
    %cst_80 = arith.constant dense<0.000000e+00> : vector<512x128xf32>
    %76 = tpu.matmul %73, %75, %cst_80 {dimension_numbers = #tpu.dot_dimension_numbers<[1], [0], [0], [1], [0, 0, 1, 1], [], []>} : vector<512x128xbf16>, vector<128x128xbf16>, vector<512x128xf32> -> vector<512x128xf32>
    %77 = arith.addf %70, %76 : vector<512x128xf32>
    %78 = vector.shape_cast %77 : vector<512x128xf32> to vector<2x16x16x128xf32>
    %c0_81 = arith.constant 0 : index
    %c0_82 = arith.constant 0 : index
    %c0_83 = arith.constant 0 : index
    %c0_84 = arith.constant 0 : index
    %79 = vector.load %arg5[%c0_81, %c0_82, %c0_83, %c0_84] : memref<2x16x16x128xf32, #tpu.memory_space<vmem>>, vector<2x16x16x128xf32>
    tpu.vector_store %arg5[%c0_81, %c0_82, %c0_83, %c0_84], %78 {strides = array<i32>} : memref<2x16x16x128xf32, #tpu.memory_space<vmem>>, vector<2x16x16x128xf32>,
    %cst_85 = arith.constant dense<0.000000e+00> : vector<128xf32>
    %80 = vector.multi_reduction <add>, %77, %cst_85 [0] : vector<512x128xf32> to vector<128xf32>
    %81 = vector.shape_cast %80 : vector<128xf32> to vector<1x128xf32>
    %c0_86 = arith.constant 0 : index
    %c0_87 = arith.constant 0 : index
    %c0_88 = arith.constant 0 : index
    %82 = vector.load %arg6[%c0_86, %c0_87, %c0_88] : memref<1x2x128xf32, #tpu.memory_space<vmem>>, vector<1x1x128xf32>
    %83 = vector.shape_cast %82 : vector<1x1x128xf32> to vector<1x128xf32>
    %84 = vector.shape_cast %81 : vector<1x128xf32> to vector<1x1x128xf32>
    tpu.vector_store %arg6[%c0_86, %c0_87, %c0_88], %84 {strides = array<i32>} : memref<1x2x128xf32, #tpu.memory_space<vmem>>, vector<1x1x128xf32>,
    %85 = arith.mulf %77, %77 : vector<512x128xf32>
    %cst_89 = arith.constant dense<0.000000e+00> : vector<128xf32>
    %86 = vector.multi_reduction <add>, %85, %cst_89 [0] : vector<512x128xf32> to vector<128xf32>
    %87 = vector.shape_cast %86 : vector<128xf32> to vector<1x128xf32>
    %c0_90 = arith.constant 0 : index
    %c1_91 = arith.constant 1 : index
    %c0_92 = arith.constant 0 : index
    %88 = vector.load %arg6[%c0_90, %c1_91, %c0_92] : memref<1x2x128xf32, #tpu.memory_space<vmem>>, vector<1x1x128xf32>
    %89 = vector.shape_cast %88 : vector<1x1x128xf32> to vector<1x128xf32>
    %90 = vector.shape_cast %87 : vector<1x128xf32> to vector<1x1x128xf32>
    tpu.vector_store %arg6[%c0_90, %c1_91, %c0_92], %90 {strides = array<i32>} : memref<1x2x128xf32, #tpu.memory_space<vmem>>, vector<1x1x128xf32>,
    return
  }
  func.func @transform_0(%arg0: i32) -> (i32, i32, i32, i32) {
    %c0_i32 = arith.constant 0 : i32
    %c0_i32_0 = arith.constant 0 : i32
    %c0_i32_1 = arith.constant 0 : i32
    %c0_i32_2 = arith.constant 0 : i32
    return %arg0, %c0_i32, %c0_i32_0, %c0_i32_1 : i32, i32, i32, i32
  }
  func.func @transform_1(%arg0: i32) -> (i32, i32) {
    %c0_i32 = arith.constant 0 : i32
    %c0_i32_0 = arith.constant 0 : i32
    %c0_i32_1 = arith.constant 0 : i32
    return %c0_i32, %c0_i32_0 : i32, i32
  }
  func.func @transform_2(%arg0: i32) -> (i32, i32) {
    %c0_i32 = arith.constant 0 : i32
    %c0_i32_0 = arith.constant 0 : i32
    %c0_i32_1 = arith.constant 0 : i32
    return %c0_i32, %c0_i32_0 : i32, i32
  }
  func.func @transform_3(%arg0: i32) -> (i32, i32, i32) {
    %c0_i32 = arith.constant 0 : i32
    %c0_i32_0 = arith.constant 0 : i32
    %c0_i32_1 = arith.constant 0 : i32
    %c0_i32_2 = arith.constant 0 : i32
    return %c0_i32, %c0_i32_0, %c0_i32_1 : i32, i32, i32
  }
  func.func @transform_4(%arg0: i32) -> (i32, i32, i32, i32) {
    %c0_i32 = arith.constant 0 : i32
    %c0_i32_0 = arith.constant 0 : i32
    %c0_i32_1 = arith.constant 0 : i32
    %c0_i32_2 = arith.constant 0 : i32
    return %arg0, %c0_i32, %c0_i32_0, %c0_i32_1 : i32, i32, i32, i32
  }
  func.func @transform_5(%arg0: i32) -> (i32, i32, i32) {
    %c0_i32 = arith.constant 0 : i32
    %c0_i32_0 = arith.constant 0 : i32
    %c0_i32_1 = arith.constant 0 : i32
    return %arg0, %c0_i32, %c0_i32_0 : i32, i32, i32
  }
}

module attributes {stable_mosaic.version = 11 : i64} {
  func.func @_bn_add_relu_kernel(%arg0: i32, %arg1: memref<2x16x16x128xf32, #tpu.memory_space<vmem>>, %arg2: memref<1x128xf32, #tpu.memory_space<vmem>>, %arg3: memref<1x128xf32, #tpu.memory_space<vmem>>, %arg4: memref<2x16x16x128xbf16, #tpu.memory_space<vmem>>, %arg5: memref<1x128xf32, #tpu.memory_space<vmem>>, %arg6: memref<1x128xf32, #tpu.memory_space<vmem>>, %arg7: memref<2x16x16x128xf32, #tpu.memory_space<vmem>>) attributes {dimension_semantics = [#tpu.dimension_semantics<parallel>], iteration_bounds = array<i64: 1>, scalar_prefetch = 0 : i64, scratch_operands = 0 : i64, tpu.core_type = #tpu.core_type<tc>, window_params = [{transform_indices = @transform_0, window_bounds = array<i64: 2, 16, 16, 128>}, {pipeline_mode = #tpu.pipeline_mode<synchronous>, transform_indices = @transform_1, window_bounds = array<i64: 1, 128>}, {pipeline_mode = #tpu.pipeline_mode<synchronous>, transform_indices = @transform_2, window_bounds = array<i64: 1, 128>}, {transform_indices = @transform_3, window_bounds = array<i64: 2, 16, 16, 128>}, {pipeline_mode = #tpu.pipeline_mode<synchronous>, transform_indices = @transform_4, window_bounds = array<i64: 1, 128>}, {pipeline_mode = #tpu.pipeline_mode<synchronous>, transform_indices = @transform_5, window_bounds = array<i64: 1, 128>}, {transform_indices = @transform_6, window_bounds = array<i64: 2, 16, 16, 128>}]} {
    %c0 = arith.constant 0 : index
    %c0_0 = arith.constant 0 : index
    %c0_1 = arith.constant 0 : index
    %c0_2 = arith.constant 0 : index
    %0 = vector.load %arg1[%c0, %c0_0, %c0_1, %c0_2] : memref<2x16x16x128xf32, #tpu.memory_space<vmem>>, vector<2x16x16x128xf32>
    %c0_3 = arith.constant 0 : index
    %c0_4 = arith.constant 0 : index
    %1 = vector.load %arg2[%c0_3, %c0_4] : memref<1x128xf32, #tpu.memory_space<vmem>>, vector<1x128xf32>
    %2 = vector.shape_cast %1 : vector<1x128xf32> to vector<1x1x1x128xf32>
    %3 = vector.broadcast %2 : vector<1x1x1x128xf32> to vector<2x16x16x128xf32>
    %4 = arith.mulf %0, %3 : vector<2x16x16x128xf32>
    %c0_5 = arith.constant 0 : index
    %c0_6 = arith.constant 0 : index
    %5 = vector.load %arg3[%c0_5, %c0_6] : memref<1x128xf32, #tpu.memory_space<vmem>>, vector<1x128xf32>
    %6 = vector.shape_cast %5 : vector<1x128xf32> to vector<1x1x1x128xf32>
    %7 = vector.broadcast %6 : vector<1x1x1x128xf32> to vector<2x16x16x128xf32>
    %8 = arith.addf %4, %7 : vector<2x16x16x128xf32>
    %c0_7 = arith.constant 0 : index
    %c0_8 = arith.constant 0 : index
    %c0_9 = arith.constant 0 : index
    %c0_10 = arith.constant 0 : index
    %9 = vector.load %arg4[%c0_7, %c0_8, %c0_9, %c0_10] : memref<2x16x16x128xbf16, #tpu.memory_space<vmem>>, vector<2x16x16x128xbf16>
    %10 = arith.extf %9 : vector<2x16x16x128xbf16> to vector<2x16x16x128xf32>
    %c0_11 = arith.constant 0 : index
    %c0_12 = arith.constant 0 : index
    %11 = vector.load %arg5[%c0_11, %c0_12] : memref<1x128xf32, #tpu.memory_space<vmem>>, vector<1x128xf32>
    %12 = vector.shape_cast %11 : vector<1x128xf32> to vector<1x1x1x128xf32>
    %13 = vector.broadcast %12 : vector<1x1x1x128xf32> to vector<2x16x16x128xf32>
    %14 = arith.mulf %10, %13 : vector<2x16x16x128xf32>
    %c0_13 = arith.constant 0 : index
    %c0_14 = arith.constant 0 : index
    %15 = vector.load %arg6[%c0_13, %c0_14] : memref<1x128xf32, #tpu.memory_space<vmem>>, vector<1x128xf32>
    %16 = vector.shape_cast %15 : vector<1x128xf32> to vector<1x1x1x128xf32>
    %17 = vector.broadcast %16 : vector<1x1x1x128xf32> to vector<2x16x16x128xf32>
    %18 = arith.addf %14, %17 : vector<2x16x16x128xf32>
    %19 = arith.addf %8, %18 : vector<2x16x16x128xf32>
    %cst = arith.constant 0.000000e+00 : f32
    %20 = vector.broadcast %cst : f32 to vector<2x16x16x128xf32>
    %21 = arith.maximumf %19, %20 : vector<2x16x16x128xf32>
    %c0_15 = arith.constant 0 : index
    %c0_16 = arith.constant 0 : index
    %c0_17 = arith.constant 0 : index
    %c0_18 = arith.constant 0 : index
    %22 = vector.load %arg7[%c0_15, %c0_16, %c0_17, %c0_18] : memref<2x16x16x128xf32, #tpu.memory_space<vmem>>, vector<2x16x16x128xf32>
    tpu.vector_store %arg7[%c0_15, %c0_16, %c0_17, %c0_18], %21 {strides = array<i32>} : memref<2x16x16x128xf32, #tpu.memory_space<vmem>>, vector<2x16x16x128xf32>,
    return
  }
  func.func @transform_0(%arg0: i32) -> (i32, i32, i32, i32) {
    %c0_i32 = arith.constant 0 : i32
    %c0_i32_0 = arith.constant 0 : i32
    %c0_i32_1 = arith.constant 0 : i32
    %c0_i32_2 = arith.constant 0 : i32
    return %arg0, %c0_i32, %c0_i32_0, %c0_i32_1 : i32, i32, i32, i32
  }
  func.func @transform_1(%arg0: i32) -> (i32, i32) {
    %c0_i32 = arith.constant 0 : i32
    %c0_i32_0 = arith.constant 0 : i32
    %c0_i32_1 = arith.constant 0 : i32
    return %c0_i32, %c0_i32_0 : i32, i32
  }
  func.func @transform_2(%arg0: i32) -> (i32, i32) {
    %c0_i32 = arith.constant 0 : i32
    %c0_i32_0 = arith.constant 0 : i32
    %c0_i32_1 = arith.constant 0 : i32
    return %c0_i32, %c0_i32_0 : i32, i32
  }
  func.func @transform_3(%arg0: i32) -> (i32, i32, i32, i32) {
    %c0_i32 = arith.constant 0 : i32
    %c0_i32_0 = arith.constant 0 : i32
    %c0_i32_1 = arith.constant 0 : i32
    %c0_i32_2 = arith.constant 0 : i32
    return %arg0, %c0_i32, %c0_i32_0, %c0_i32_1 : i32, i32, i32, i32
  }
  func.func @transform_4(%arg0: i32) -> (i32, i32) {
    %c0_i32 = arith.constant 0 : i32
    %c0_i32_0 = arith.constant 0 : i32
    %c0_i32_1 = arith.constant 0 : i32
    return %c0_i32, %c0_i32_0 : i32, i32
  }
  func.func @transform_5(%arg0: i32) -> (i32, i32) {
    %c0_i32 = arith.constant 0 : i32
    %c0_i32_0 = arith.constant 0 : i32
    %c0_i32_1 = arith.constant 0 : i32
    return %c0_i32, %c0_i32_0 : i32, i32
  }
  func.func @transform_6(%arg0: i32) -> (i32, i32, i32, i32) {
    %c0_i32 = arith.constant 0 : i32
    %c0_i32_0 = arith.constant 0 : i32
    %c0_i32_1 = arith.constant 0 : i32
    %c0_i32_2 = arith.constant 0 : i32
    return %arg0, %c0_i32, %c0_i32_0, %c0_i32_1 : i32, i32, i32, i32
  }
}

</mosaic_0001>

<bundles_post_ra>
// kernel: a_call__.5
= control target key start
LH: loop header
LB: loop body
LE: loop exit
PB: predicated region body
PF: predicated region fallthrough
CT: control target
= control target key end

     0   :  { %s1673_s0 = inlined_call_operand.vmem [shape: f32[2,16,16,128], index: 0, kind: input, shape index: {}]   ;;  %s1674_s1 = inlined_call_operand.vmem [shape: f32[1,128], index: 1, kind: input, shape index: {}]   ;;  %s1675_s2 = inlined_call_operand.vmem [shape: f32[1,128], index: 2, kind: input, shape index: {}]   ;;  %s1676_s3 = inlined_call_operand.vmem [shape: bf16[2,16,16,128], index: 3, kind: input, shape index: {}]   ;;  %s1677_s4 = inlined_call_operand.vmem [shape: f32[1,128], index: 4, kind: input, shape index: {}]   ;;  %s1678_s5 = inlined_call_operand.vmem [shape: f32[1,128], index: 5, kind: input, shape index: {}]   ;;  %s1679_s6 = inlined_call_operand.vmem [shape: f32[2,16,16,128], index: 6, kind: output, shape index: {}]  }
   0x1   :  { %v23_v0 = vld [vmem:[%s1673_s0] sm:$0xff]  ;;  %v24_v7 = vld [vmem:[%s1673_s0 + $0x8] sm:$0xff]  ;;  %v25_v9 = vld [vmem:[%s1673_s0 + $0x10] sm:$0xff] }
   0x2   :  { %v903_v1 = vld [vmem:[%s1674_s1] ss:$0 sm:$0xff]  ;;  %v827_v10 = vld [vmem:[%s1676_s3 + $0x8] sm:$0xff]   ;;  %v26_v16 = vld [vmem:[%s1673_s0 + $0x18] sm:$0xff] }
   0x3   :  { %v908_v2 = vld [vmem:[%s1675_s2] ss:$0 sm:$0xff]  ;;  %v94_v3 = vmul.f32 %v903_v1, %v23_v0  ;;  %v95_v13 = vmul.f32 %v903_v1, %v24_v7  ;;  %v96_v14 = vmul.f32 %v903_v1, %v25_v9  ;;  %v705_v15 = vunpack.c.l.bf16 %v827_v10  ;;  %v828_v22 = vld [vmem:[%s1676_s3 + $0x10] sm:$0xff]   ;;  %v28_v23 = vld [vmem:[%s1673_s0 + $0x28] sm:$0xff] }
   0x4   :  { %v700_v4 = vld [vmem:[%s1676_s3] sm:$0xff]   ;;  %v97_v20 = vmul.f32 %v903_v1, %v26_v16  ;;  %v706_v21 = vunpack.c.h.bf16 %v827_v10  ;;  %v29_v32 = vld [vmem:[%s1673_s0 + $0x30] sm:$0xff]  ;;  %v709_v35 = vunpack.c.l.bf16 %v828_v22  ;;  %v99_v36 = vmul.f32 %v903_v1, %v28_v23  ;;  %v829_v41 = vld [vmem:[%s1676_s3 + $0x18] sm:$0xff]  }
   0x5   :  { %v917_v5 = vld [vmem:[%s1677_s4] ss:$0 sm:$0xff]  ;;  %v701_v6 = vunpack.c.l.bf16 %v700_v4  ;;  %v702_v8 = vunpack.c.h.bf16 %v700_v4  ;;  %v165_v11 = vadd.f32 %v908_v2, %v94_v3  ;;  %v166_v24 = vadd.f32 %v908_v2, %v95_v13  ;;  %v30_v46 = vld [vmem:[%s1673_s0 + $0x38] sm:$0xff]  ;;  %v32_v57 = vld [vmem:[%s1673_s0 + $0x48] sm:$0xff] }
   0x6   :  { %v932_v12 = vld [vmem:[%s1678_s5] ss:$0 sm:$0xff]  ;;  %v167_v25 = vadd.f32 %v908_v2, %v96_v14  ;;  %v366_v26 = vmul.f32 %v705_v15, %v917_v5  ;;  %v168_v30 = vadd.f32 %v908_v2, %v97_v20  ;;  %v367_v31 = vmul.f32 %v706_v21, %v917_v5  ;;  %v33_v9 = vld [vmem:[%s1673_s0 + $0x50] sm:$0xff]  ;;  %v831_v10 = vld [vmem:[%s1676_s3 + $0x28] sm:$0xff]  }
   0x7   :  { %v27_v17 = vld [vmem:[%s1673_s0 + $0x20] sm:$0xff]  ;;  %v364_v18 = vmul.f32 %v701_v6, %v917_v5  ;;  %v365_v19 = vmul.f32 %v702_v8, %v917_v5  ;;  %v710_v40 = vunpack.c.h.bf16 %v828_v22  ;;  %v368_v43 = vmul.f32 %v709_v35, %v917_v5  ;;  %v34_v16 = vld [vmem:[%s1673_s0 + $0x58] sm:$0xff]  ;;  %v36_v35 = vld [vmem:[%s1673_s0 + $0x68] sm:$0xff] }
   0x8   :  { %v98_v27 = vmul.f32 %v903_v1, %v27_v17  ;;  %v437_v33 = vadd.f32 %v932_v12, %v366_v26  ;;  %v438_v39 = vadd.f32 %v932_v12, %v367_v31  ;;  %v170_v44 = vadd.f32 %v908_v2, %v99_v36  ;;  %v31_v51 = vld [vmem:[%s1673_s0 + $0x40] sm:$0xff] }
   0x9   :  { %v435_v28 = vadd.f32 %v932_v12, %v364_v18  ;;  %v436_v29 = vadd.f32 %v932_v12, %v365_v19  ;;  %v100_v45 = vmul.f32 %v903_v1, %v29_v32  ;;  %v369_v50 = vmul.f32 %v710_v40, %v917_v5  ;;  %v830_v52 = vld [vmem:[%s1676_s3 + $0x20] sm:$0xff]   ;;  %v37_v40 = vld [vmem:[%s1673_s0 + $0x70] sm:$0xff] }
   0xa   :  { %v169_v34 = vadd.f32 %v908_v2, %v98_v27  ;;  %v501_v42 = vadd.f32 %v437_v33, %v167_v25  ;;  %v502_v49 = vadd.f32 %v438_v39, %v168_v30  ;;  %v439_v54 = vadd.f32 %v932_v12, %v368_v43  ;;  %v832_v30 = vld [vmem:[%s1676_s3 + $0x30] sm:$0xff]  }
   0xb   :  { %v499_v37 = vadd.f32 %v435_v28, %v165_v11  ;;  %v500_v38 = vadd.f32 %v436_v29, %v166_v24  ;;  %v171_v55 = vadd.f32 %v908_v2, %v100_v45  ;;  %v713_v56 = vunpack.c.l.bf16 %v829_v41  ;;  %v35_v29 = vld [vmem:[%s1673_s0 + $0x60] sm:$0xff] }
   0xc   :  { %v565_v53 = vmax.f32 %v501_v42, 0.0  ;;  %v566_v58 = vmax.f32 %v502_v49, 0.0  ;;  %v440_v59 = vadd.f32 %v932_v12, %v369_v50  ;;  %v101_v60 = vmul.f32 %v903_v1, %v30_v46  ;;  %v833_v49 = vld [vmem:[%s1676_s3 + $0x38] sm:$0xff]  }
   0xd   :  { %v563_v47 = vmax.f32 %v499_v37, 0.0  ;;  %v564_v48 = vmax.f32 %v500_v38, 0.0  ;;  %v714_v61 = vunpack.c.h.bf16 %v829_v41  ;;  %v503_v62 = vadd.f32 %v439_v54, %v169_v34  ;;  %v38_v54 = vld [vmem:[%s1673_s0 + $0x78] sm:$0xff] }
   0xe   :  { %629 = vst [vmem:[%s1679_s6 + $0x10] sm:$0xff] %v565_v53  ;;  %v370_v63 = vmul.f32 %v713_v56, %v917_v5  ;;  %v102_v0 = vmul.f32 %v903_v1, %v31_v51  ;;  %v717_v3 = vunpack.c.l.bf16 %v830_v52  ;;  %630 = vst [vmem:[%s1679_s6 + $0x18] sm:$0xff] %v566_v58  ;;  %v504_v4 = vadd.f32 %v440_v59, %v170_v44  ;;  %v39_v59 = vld [vmem:[%s1673_s0 + $0x80] sm:$0xff] }
   0xf   :  { %627 = vst [vmem:[%s1679_s6] sm:$0xff] %v563_v47  ;;  %628 = vst [vmem:[%s1679_s6 + $0x8] sm:$0xff] %v564_v48  ;;  %v172_v6 = vadd.f32 %v908_v2, %v101_v60  ;;  %v371_v7 = vmul.f32 %v714_v61, %v917_v5  ;;  %v103_v8 = vmul.f32 %v903_v1, %v32_v57  ;;  %v567_v11 = vmax.f32 %v503_v62, 0.0  ;;  %v834_v60 = vld [vmem:[%s1676_s3 + $0x40] sm:$0xff]  }
  0x10   :  { %v441_v13 = vadd.f32 %v932_v12, %v370_v63  ;;  %v173_v14 = vadd.f32 %v908_v2, %v102_v0  ;;  %v372_v15 = vmul.f32 %v717_v3, %v917_v5  ;;  %v568_v17 = vmax.f32 %v504_v4, 0.0  ;;  %v40_v3 = vld [vmem:[%s1673_s0 + $0x88] sm:$0xff] }
  0x11   :  { %v442_v18 = vadd.f32 %v932_v12, %v371_v7  ;;  %v174_v19 = vadd.f32 %v908_v2, %v103_v8  ;;  %v718_v20 = vunpack.c.h.bf16 %v830_v52  ;;  %631 = vst [vmem:[%s1679_s6 + $0x20] sm:$0xff] %v567_v11  ;;  %v104_v23 = vmul.f32 %v903_v1, %v33_v9 }
  0x12   :  { %v505_v21 = vadd.f32 %v441_v13, %v171_v55  ;;  %v443_v22 = vadd.f32 %v932_v12, %v372_v15  ;;  %v721_v24 = vunpack.c.l.bf16 %v831_v10  ;;  %632 = vst [vmem:[%s1679_s6 + $0x28] sm:$0xff] %v568_v17  ;;  %v105_v27 = vmul.f32 %v903_v1, %v34_v16 }
  0x13   :  { %v506_v25 = vadd.f32 %v442_v18, %v172_v6  ;;  %v373_v26 = vmul.f32 %v718_v20, %v917_v5  ;;  %v722_v28 = vunpack.c.h.bf16 %v831_v10  ;;  %v175_v33 = vadd.f32 %v908_v2, %v104_v23  ;;  %v41_v18 = vld [vmem:[%s1673_s0 + $0x90] sm:$0xff] }
  0x14   :  { %v569_v31 = vmax.f32 %v505_v21, 0.0  ;;  %v507_v32 = vadd.f32 %v443_v22, %v173_v14  ;;  %v374_v34 = vmul.f32 %v721_v24, %v917_v5  ;;  %v176_v38 = vadd.f32 %v908_v2, %v105_v27  ;;  %v42_v24 = vld [vmem:[%s1673_s0 + $0x98] sm:$0xff] }
  0x15   :  { %v570_v36 = vmax.f32 %v506_v25, 0.0  ;;  %v444_v37 = vadd.f32 %v932_v12, %v373_v26  ;;  %v375_v39 = vmul.f32 %v722_v28, %v917_v5  ;;  %v106_v43 = vmul.f32 %v903_v1, %v35_v29 }
  0x16   :  { %633 = vst [vmem:[%s1679_s6 + $0x30] sm:$0xff] %v569_v31  ;;  %v571_v41 = vmax.f32 %v507_v32, 0.0  ;;  %v445_v42 = vadd.f32 %v932_v12, %v374_v34  ;;  %v725_v44 = vunpack.c.l.bf16 %v832_v30  ;;  %v107_v47 = vmul.f32 %v903_v1, %v36_v35 }
  0x17   :  { %634 = vst [vmem:[%s1679_s6 + $0x38] sm:$0xff] %v570_v36  ;;  %v508_v45 = vadd.f32 %v444_v37, %v174_v19  ;;  %v446_v46 = vadd.f32 %v932_v12, %v375_v39  ;;  %v726_v48 = vunpack.c.h.bf16 %v832_v30  ;;  %v177_v51 = vadd.f32 %v908_v2, %v106_v43  ;;  %v835_v19 = vld [vmem:[%s1676_s3 + $0x48] sm:$0xff]   ;;  %v43_v37 = vld [vmem:[%s1673_s0 + $0xa0] sm:$0xff] }
  0x18   :  { %635 = vst [vmem:[%s1679_s6 + $0x40] sm:$0xff] %v571_v41  ;;  %v509_v50 = vadd.f32 %v445_v42, %v175_v33  ;;  %v376_v52 = vmul.f32 %v725_v44, %v917_v5  ;;  %v108_v53 = vmul.f32 %v903_v1, %v37_v40  ;;  %v178_v57 = vadd.f32 %v908_v2, %v107_v47  ;;  %v44_v43 = vld [vmem:[%s1673_s0 + $0xa8] sm:$0xff] }
  0x19   :  { %v572_v55 = vmax.f32 %v508_v45, 0.0  ;;  %v510_v56 = vadd.f32 %v446_v46, %v176_v38  ;;  %v377_v58 = vmul.f32 %v726_v48, %v917_v5  ;;  %v729_v0 = vunpack.c.l.bf16 %v833_v49  ;;  %v836_v38 = vld [vmem:[%s1676_s3 + $0x50] sm:$0xff]  }
  0x1a   :  { %v573_v61 = vmax.f32 %v509_v50, 0.0  ;;  %v447_v62 = vadd.f32 %v932_v12, %v376_v52  ;;  %v179_v63 = vadd.f32 %v908_v2, %v108_v53  ;;  %v109_v7 = vmul.f32 %v903_v1, %v38_v54  ;;  %v45_v48 = vld [vmem:[%s1673_s0 + $0xb0] sm:$0xff] }
  0x1b   :  { %636 = vst [vmem:[%s1679_s6 + $0x48] sm:$0xff] %v572_v55  ;;  %v574_v4 = vmax.f32 %v510_v56, 0.0  ;;  %v448_v6 = vadd.f32 %v932_v12, %v377_v58  ;;  %v730_v8 = vunpack.c.h.bf16 %v833_v49  ;;  %v378_v10 = vmul.f32 %v729_v0, %v917_v5 }
  0x1c   :  { %637 = vst [vmem:[%s1679_s6 + $0x50] sm:$0xff] %v573_v61  ;;  %v511_v9 = vadd.f32 %v447_v62, %v177_v51  ;;  %v110_v11 = vmul.f32 %v903_v1, %v39_v59  ;;  %v733_v13 = vunpack.c.l.bf16 %v834_v60  ;;  %v180_v15 = vadd.f32 %v908_v2, %v109_v7  ;;  %v46_v62 = vld [vmem:[%s1673_s0 + $0xb8] sm:$0xff]  ;;  %v838_v7 = vld [vmem:[%s1676_s3 + $0x60] sm:$0xff]  }
  0x1d   :  { %638 = vst [vmem:[%s1679_s6 + $0x58] sm:$0xff] %v574_v4  ;;  %v512_v14 = vadd.f32 %v448_v6, %v178_v57  ;;  %v379_v16 = vmul.f32 %v730_v8, %v917_v5  ;;  %v111_v17 = vmul.f32 %v903_v1, %v40_v3  ;;  %v449_v21 = vadd.f32 %v932_v12, %v378_v10  ;;  %v837_v57 = vld [vmem:[%s1676_s3 + $0x58] sm:$0xff]   ;;  %v47_v6 = vld [vmem:[%s1673_s0 + $0xc0] sm:$0xff] }
  0x1e   :  { %v575_v20 = vmax.f32 %v511_v9, 0.0  ;;  %v181_v22 = vadd.f32 %v908_v2, %v110_v11  ;;  %v380_v23 = vmul.f32 %v733_v13, %v917_v5  ;;  %v734_v28 = vunpack.c.h.bf16 %v834_v60  ;;  %v48_v13 = vld [vmem:[%s1673_s0 + $0xc8] sm:$0xff] }
  0x1f   :  { %v576_v25 = vmax.f32 %v512_v14, 0.0  ;;  %v450_v26 = vadd.f32 %v932_v12, %v379_v16  ;;  %v182_v27 = vadd.f32 %v908_v2, %v111_v17  ;;  %v513_v29 = vadd.f32 %v449_v21, %v179_v63 }
  0x20   :  { %639 = vst [vmem:[%s1679_s6 + $0x60] sm:$0xff] %v575_v20  ;;  %v451_v30 = vadd.f32 %v932_v12, %v380_v23  ;;  %v112_v31 = vmul.f32 %v903_v1, %v41_v18  ;;  %v737_v32 = vunpack.c.l.bf16 %v835_v19  ;;  %v381_v34 = vmul.f32 %v734_v28, %v917_v5 }
  0x21   :  { %640 = vst [vmem:[%s1679_s6 + $0x68] sm:$0xff] %v576_v25  ;;  %v514_v33 = vadd.f32 %v450_v26, %v180_v15  ;;  %v113_v35 = vmul.f32 %v903_v1, %v42_v24  ;;  %v738_v36 = vunpack.c.h.bf16 %v835_v19  ;;  %v577_v39 = vmax.f32 %v513_v29, 0.0  ;;  %v49_v26 = vld [vmem:[%s1673_s0 + $0xd0] sm:$0xff] }
  0x22   :  { %v515_v40 = vadd.f32 %v451_v30, %v181_v22  ;;  %v183_v41 = vadd.f32 %v908_v2, %v112_v31  ;;  %v382_v42 = vmul.f32 %v737_v32, %v917_v5  ;;  %v452_v45 = vadd.f32 %v932_v12, %v381_v34  ;;  %v50_v32 = vld [vmem:[%s1673_s0 + $0xd8] sm:$0xff] }
  0x23   :  { %v578_v44 = vmax.f32 %v514_v33, 0.0  ;;  %v184_v46 = vadd.f32 %v908_v2, %v113_v35  ;;  %v383_v47 = vmul.f32 %v738_v36, %v917_v5  ;;  %641 = vst [vmem:[%s1679_s6 + $0x70] sm:$0xff] %v577_v39  ;;  %v114_v51 = vmul.f32 %v903_v1, %v43_v37 }
  0x24   :  { %v579_v49 = vmax.f32 %v515_v40, 0.0  ;;  %v453_v50 = vadd.f32 %v932_v12, %v382_v42  ;;  %v741_v52 = vunpack.c.l.bf16 %v836_v38  ;;  %v516_v53 = vadd.f32 %v452_v45, %v182_v27  ;;  %v839_v27 = vld [vmem:[%s1676_s3 + $0x68] sm:$0xff]   ;;  %v51_v45 = vld [vmem:[%s1673_s0 + $0xe0] sm:$0xff] }
  0x25   :  { %642 = vst [vmem:[%s1679_s6 + $0x78] sm:$0xff] %v578_v44  ;;  %v454_v54 = vadd.f32 %v932_v12, %v383_v47  ;;  %v115_v55 = vmul.f32 %v903_v1, %v44_v43  ;;  %v742_v56 = vunpack.c.h.bf16 %v836_v38  ;;  %v185_v59 = vadd.f32 %v908_v2, %v114_v51  ;;  %v52_v51 = vld [vmem:[%s1673_s0 + $0xe8] sm:$0xff] }
  0x26   :  { %643 = vst [vmem:[%s1679_s6 + $0x80] sm:$0xff] %v579_v49  ;;  %v517_v58 = vadd.f32 %v453_v50, %v183_v41  ;;  %v384_v60 = vmul.f32 %v741_v52, %v917_v5  ;;  %v116_v61 = vmul.f32 %v903_v1, %v45_v48  ;;  %v580_v63 = vmax.f32 %v516_v53, 0.0 }
  0x27   :  { %v518_v0 = vadd.f32 %v454_v54, %v184_v46  ;;  %v186_v3 = vadd.f32 %v908_v2, %v115_v55  ;;  %v385_v4 = vmul.f32 %v742_v56, %v917_v5  ;;  %v745_v11 = vunpack.c.l.bf16 %v837_v57  ;;  %v840_v46 = vld [vmem:[%s1676_s3 + $0x70] sm:$0xff]  }
  0x28   :  { %v581_v8 = vmax.f32 %v517_v58, 0.0  ;;  %v455_v9 = vadd.f32 %v932_v12, %v384_v60  ;;  %v187_v10 = vadd.f32 %v908_v2, %v116_v61  ;;  %644 = vst [vmem:[%s1679_s6 + $0x88] sm:$0xff] %v580_v63  ;;  %v117_v16 = vmul.f32 %v903_v1, %v46_v62  ;;  %v53_v56 = vld [vmem:[%s1673_s0 + $0xf0] sm:$0xff] }
  0x29   :  { %v582_v14 = vmax.f32 %v518_v0, 0.0  ;;  %v456_v15 = vadd.f32 %v932_v12, %v385_v4  ;;  %v746_v17 = vunpack.c.h.bf16 %v837_v57  ;;  %v386_v19 = vmul.f32 %v745_v11, %v917_v5 }
  0x2a   :  { %645 = vst [vmem:[%s1679_s6 + $0x90] sm:$0xff] %v581_v8  ;;  %v519_v18 = vadd.f32 %v455_v9, %v185_v59  ;;  %v118_v20 = vmul.f32 %v903_v1, %v47_v6  ;;  %v749_v21 = vunpack.c.l.bf16 %v838_v7  ;;  %v188_v23 = vadd.f32 %v908_v2, %v117_v16  ;;  %v54_v9 = vld [vmem:[%s1673_s0 + $0xf8] sm:$0xff]  ;;  %v842_v16 = vld [vmem:[%s1676_s3 + $0x80] sm:$0xff]  }
  0x2b   :  { %646 = vst [vmem:[%s1679_s6 + $0x98] sm:$0xff] %v582_v14  ;;  %v520_v22 = vadd.f32 %v456_v15, %v186_v3  ;;  %v387_v24 = vmul.f32 %v746_v17, %v917_v5  ;;  %v119_v25 = vmul.f32 %v903_v1, %v48_v13  ;;  %v457_v29 = vadd.f32 %v932_v12, %v386_v19  ;;  %v841_v3 = vld [vmem:[%s1676_s3 + $0x78] sm:$0xff]   ;;  %v55_v15 = vld [vmem:[%s1673_s0 + $0x100] sm:$0xff] }
  0x2c   :  { %v583_v28 = vmax.f32 %v519_v18, 0.0  ;;  %v189_v30 = vadd.f32 %v908_v2, %v118_v20  ;;  %v388_v31 = vmul.f32 %v749_v21, %v917_v5  ;;  %v750_v36 = vunpack.c.h.bf16 %v838_v7  ;;  %v56_v21 = vld [vmem:[%s1673_s0 + $0x108] sm:$0xff] }
  0x2d   :  { %v584_v33 = vmax.f32 %v520_v22, 0.0  ;;  %v458_v34 = vadd.f32 %v932_v12, %v387_v24  ;;  %v190_v35 = vadd.f32 %v908_v2, %v119_v25  ;;  %v521_v37 = vadd.f32 %v457_v29, %v187_v10 }
  0x2e   :  { %647 = vst [vmem:[%s1679_s6 + $0xa0] sm:$0xff] %v583_v28  ;;  %v459_v38 = vadd.f32 %v932_v12, %v388_v31  ;;  %v120_v39 = vmul.f32 %v903_v1, %v49_v26  ;;  %v753_v40 = vunpack.c.l.bf16 %v839_v27  ;;  %v389_v42 = vmul.f32 %v750_v36, %v917_v5 }
  0x2f   :  { %648 = vst [vmem:[%s1679_s6 + $0xa8] sm:$0xff] %v584_v33  ;;  %v522_v41 = vadd.f32 %v458_v34, %v188_v23  ;;  %v121_v43 = vmul.f32 %v903_v1, %v50_v32  ;;  %v754_v44 = vunpack.c.h.bf16 %v839_v27  ;;  %v585_v47 = vmax.f32 %v521_v37, 0.0  ;;  %v57_v34 = vld [vmem:[%s1673_s0 + $0x110] sm:$0xff] }
  0x30   :  { %v523_v48 = vadd.f32 %v459_v38, %v189_v30  ;;  %v191_v49 = vadd.f32 %v908_v2, %v120_v39  ;;  %v390_v50 = vmul.f32 %v753_v40, %v917_v5  ;;  %v460_v53 = vadd.f32 %v932_v12, %v389_v42  ;;  %v58_v40 = vld [vmem:[%s1673_s0 + $0x118] sm:$0xff] }
  0x31   :  { %v586_v52 = vmax.f32 %v522_v41, 0.0  ;;  %v192_v54 = vadd.f32 %v908_v2, %v121_v43  ;;  %v391_v55 = vmul.f32 %v754_v44, %v917_v5  ;;  %649 = vst [vmem:[%s1679_s6 + $0xb0] sm:$0xff] %v585_v47  ;;  %v122_v59 = vmul.f32 %v903_v1, %v51_v45 }
  0x32   :  { %v587_v57 = vmax.f32 %v523_v48, 0.0  ;;  %v461_v58 = vadd.f32 %v932_v12, %v390_v50  ;;  %v757_v60 = vunpack.c.l.bf16 %v840_v46  ;;  %v524_v61 = vadd.f32 %v460_v53, %v190_v35  ;;  %v843_v35 = vld [vmem:[%s1676_s3 + $0x88] sm:$0xff]   ;;  %v59_v53 = vld [vmem:[%s1673_s0 + $0x120] sm:$0xff] }
  0x33   :  { %650 = vst [vmem:[%s1679_s6 + $0xb8] sm:$0xff] %v586_v52  ;;  %v462_v62 = vadd.f32 %v932_v12, %v391_v55  ;;  %v123_v63 = vmul.f32 %v903_v1, %v52_v51  ;;  %v758_v0 = vunpack.c.h.bf16 %v840_v46  ;;  %v193_v6 = vadd.f32 %v908_v2, %v122_v59  ;;  %v60_v59 = vld [vmem:[%s1673_s0 + $0x128] sm:$0xff] }
  0x34   :  { %651 = vst [vmem:[%s1679_s6 + $0xc0] sm:$0xff] %v587_v57  ;;  %v525_v4 = vadd.f32 %v461_v58, %v191_v49  ;;  %v392_v7 = vmul.f32 %v757_v60, %v917_v5  ;;  %v124_v8 = vmul.f32 %v903_v1, %v53_v56  ;;  %v588_v10 = vmax.f32 %v524_v61, 0.0 }
  0x35   :  { %v526_v11 = vadd.f32 %v462_v62, %v192_v54  ;;  %v194_v13 = vadd.f32 %v908_v2, %v123_v63  ;;  %v393_v14 = vmul.f32 %v758_v0, %v917_v5  ;;  %v761_v20 = vunpack.c.l.bf16 %v841_v3  ;;  %v844_v54 = vld [vmem:[%s1676_s3 + $0x90] sm:$0xff]  }
  0x36   :  { %v589_v17 = vmax.f32 %v525_v4, 0.0  ;;  %v463_v18 = vadd.f32 %v932_v12, %v392_v7  ;;  %v195_v19 = vadd.f32 %v908_v2, %v124_v8  ;;  %652 = vst [vmem:[%s1679_s6 + $0xc8] sm:$0xff] %v588_v10  ;;  %v125_v24 = vmul.f32 %v903_v1, %v54_v9  ;;  %v61_v0 = vld [vmem:[%s1673_s0 + $0x130] sm:$0xff] }
  0x37   :  { %v590_v22 = vmax.f32 %v526_v11, 0.0  ;;  %v464_v23 = vadd.f32 %v932_v12, %v393_v14  ;;  %v762_v25 = vunpack.c.h.bf16 %v841_v3  ;;  %v394_v27 = vmul.f32 %v761_v20, %v917_v5 }
  0x38   :  { %653 = vst [vmem:[%s1679_s6 + $0xd0] sm:$0xff] %v589_v17  ;;  %v527_v26 = vadd.f32 %v463_v18, %v193_v6  ;;  %v126_v28 = vmul.f32 %v903_v1, %v55_v15  ;;  %v765_v29 = vunpack.c.l.bf16 %v842_v16  ;;  %v196_v31 = vadd.f32 %v908_v2, %v125_v24  ;;  %v62_v18 = vld [vmem:[%s1673_s0 + $0x138] sm:$0xff]  ;;  %v846_v24 = vld [vmem:[%s1676_s3 + $0xa0] sm:$0xff]  }
  0x39   :  { %654 = vst [vmem:[%s1679_s6 + $0xd8] sm:$0xff] %v590_v22  ;;  %v528_v30 = vadd.f32 %v464_v23, %v194_v13  ;;  %v395_v32 = vmul.f32 %v762_v25, %v917_v5  ;;  %v127_v33 = vmul.f32 %v903_v1, %v56_v21  ;;  %v465_v37 = vadd.f32 %v932_v12, %v394_v27  ;;  %v845_v13 = vld [vmem:[%s1676_s3 + $0x98] sm:$0xff]   ;;  %v63_v23 = vld [vmem:[%s1673_s0 + $0x140] sm:$0xff] }
  0x3a   :  { %v591_v36 = vmax.f32 %v527_v26, 0.0  ;;  %v197_v38 = vadd.f32 %v908_v2, %v126_v28  ;;  %v396_v39 = vmul.f32 %v765_v29, %v917_v5  ;;  %v766_v44 = vunpack.c.h.bf16 %v842_v16  ;;  %v64_v29 = vld [vmem:[%s1673_s0 + $0x148] sm:$0xff] }
  0x3b   :  { %v592_v41 = vmax.f32 %v528_v30, 0.0  ;;  %v466_v42 = vadd.f32 %v932_v12, %v395_v32  ;;  %v198_v43 = vadd.f32 %v908_v2, %v127_v33  ;;  %v529_v45 = vadd.f32 %v465_v37, %v195_v19 }
  0x3c   :  { %655 = vst [vmem:[%s1679_s6 + $0xe0] sm:$0xff] %v591_v36  ;;  %v467_v46 = vadd.f32 %v932_v12, %v396_v39  ;;  %v128_v47 = vmul.f32 %v903_v1, %v57_v34  ;;  %v769_v48 = vunpack.c.l.bf16 %v843_v35  ;;  %v397_v50 = vmul.f32 %v766_v44, %v917_v5 }
  0x3d   :  { %656 = vst [vmem:[%s1679_s6 + $0xe8] sm:$0xff] %v592_v41  ;;  %v530_v49 = vadd.f32 %v466_v42, %v196_v31  ;;  %v129_v51 = vmul.f32 %v903_v1, %v58_v40  ;;  %v770_v52 = vunpack.c.h.bf16 %v843_v35  ;;  %v593_v55 = vmax.f32 %v529_v45, 0.0  ;;  %v65_v42 = vld [vmem:[%s1673_s0 + $0x150] sm:$0xff] }
  0x3e   :  { %v531_v56 = vadd.f32 %v467_v46, %v197_v38  ;;  %v199_v57 = vadd.f32 %v908_v2, %v128_v47  ;;  %v398_v58 = vmul.f32 %v769_v48, %v917_v5  ;;  %v468_v61 = vadd.f32 %v932_v12, %v397_v50  ;;  %v66_v48 = vld [vmem:[%s1673_s0 + $0x158] sm:$0xff] }
  0x3f   :  { %v594_v60 = vmax.f32 %v530_v49, 0.0  ;;  %v200_v62 = vadd.f32 %v908_v2, %v129_v51  ;;  %v399_v63 = vmul.f32 %v770_v52, %v917_v5  ;;  %657 = vst [vmem:[%s1679_s6 + $0xf0] sm:$0xff] %v593_v55  ;;  %v130_v6 = vmul.f32 %v903_v1, %v59_v53 }
  0x40   :  { %v595_v3 = vmax.f32 %v531_v56, 0.0  ;;  %v469_v4 = vadd.f32 %v932_v12, %v398_v58  ;;  %v773_v7 = vunpack.c.l.bf16 %v844_v54  ;;  %v532_v8 = vadd.f32 %v468_v61, %v198_v43  ;;  %v847_v43 = vld [vmem:[%s1676_s3 + $0xa8] sm:$0xff]   ;;  %v67_v61 = vld [vmem:[%s1673_s0 + $0x160] sm:$0xff] }
  0x41   :  { %658 = vst [vmem:[%s1679_s6 + $0xf8] sm:$0xff] %v594_v60  ;;  %v470_v9 = vadd.f32 %v932_v12, %v399_v63  ;;  %v131_v10 = vmul.f32 %v903_v1, %v60_v59  ;;  %v774_v11 = vunpack.c.h.bf16 %v844_v54  ;;  %v201_v15 = vadd.f32 %v908_v2, %v130_v6  ;;  %v68_v6 = vld [vmem:[%s1673_s0 + $0x168] sm:$0xff] }
  0x42   :  { %659 = vst [vmem:[%s1679_s6 + $0x100] sm:$0xff] %v595_v3  ;;  %v533_v14 = vadd.f32 %v469_v4, %v199_v57  ;;  %v400_v16 = vmul.f32 %v773_v7, %v917_v5  ;;  %v132_v17 = vmul.f32 %v903_v1, %v61_v0  ;;  %v596_v19 = vmax.f32 %v532_v8, 0.0 }
  0x43   :  { %v534_v20 = vadd.f32 %v470_v9, %v200_v62  ;;  %v202_v21 = vadd.f32 %v908_v2, %v131_v10  ;;  %v401_v22 = vmul.f32 %v774_v11, %v917_v5  ;;  %v777_v28 = vunpack.c.l.bf16 %v845_v13  ;;  %v848_v62 = vld [vmem:[%s1676_s3 + $0xb0] sm:$0xff]  }
  0x44   :  { %v597_v25 = vmax.f32 %v533_v14, 0.0  ;;  %v471_v26 = vadd.f32 %v932_v12, %v400_v16  ;;  %v203_v27 = vadd.f32 %v908_v2, %v132_v17  ;;  %660 = vst [vmem:[%s1679_s6 + $0x108] sm:$0xff] %v596_v19  ;;  %v133_v32 = vmul.f32 %v903_v1, %v62_v18  ;;  %v69_v11 = vld [vmem:[%s1673_s0 + $0x170] sm:$0xff] }
  0x45   :  { %v598_v30 = vmax.f32 %v534_v20, 0.0  ;;  %v472_v31 = vadd.f32 %v932_v12, %v401_v22  ;;  %v778_v33 = vunpack.c.h.bf16 %v845_v13  ;;  %v402_v35 = vmul.f32 %v777_v28, %v917_v5 }
  0x46   :  { %661 = vst [vmem:[%s1679_s6 + $0x110] sm:$0xff] %v597_v25  ;;  %v535_v34 = vadd.f32 %v471_v26, %v201_v15  ;;  %v134_v36 = vmul.f32 %v903_v1, %v63_v23  ;;  %v781_v37 = vunpack.c.l.bf16 %v846_v24  ;;  %v204_v39 = vadd.f32 %v908_v2, %v133_v32  ;;  %v70_v26 = vld [vmem:[%s1673_s0 + $0x178] sm:$0xff]  ;;  %v850_v32 = vld [vmem:[%s1676_s3 + $0xc0] sm:$0xff]  }
  0x47   :  { %662 = vst [vmem:[%s1679_s6 + $0x118] sm:$0xff] %v598_v30  ;;  %v536_v38 = vadd.f32 %v472_v31, %v202_v21  ;;  %v403_v40 = vmul.f32 %v778_v33, %v917_v5  ;;  %v135_v41 = vmul.f32 %v903_v1, %v64_v29  ;;  %v473_v45 = vadd.f32 %v932_v12, %v402_v35  ;;  %v849_v21 = vld [vmem:[%s1676_s3 + $0xb8] sm:$0xff]   ;;  %v71_v31 = vld [vmem:[%s1673_s0 + $0x180] sm:$0xff] }
  0x48   :  { %v599_v44 = vmax.f32 %v535_v34, 0.0  ;;  %v205_v46 = vadd.f32 %v908_v2, %v134_v36  ;;  %v404_v47 = vmul.f32 %v781_v37, %v917_v5  ;;  %v782_v52 = vunpack.c.h.bf16 %v846_v24  ;;  %v72_v37 = vld [vmem:[%s1673_s0 + $0x188] sm:$0xff] }
  0x49   :  { %v600_v49 = vmax.f32 %v536_v38, 0.0  ;;  %v474_v50 = vadd.f32 %v932_v12, %v403_v40  ;;  %v206_v51 = vadd.f32 %v908_v2, %v135_v41  ;;  %v537_v53 = vadd.f32 %v473_v45, %v203_v27 }
  0x4a   :  { %663 = vst [vmem:[%s1679_s6 + $0x120] sm:$0xff] %v599_v44  ;;  %v475_v54 = vadd.f32 %v932_v12, %v404_v47  ;;  %v136_v55 = vmul.f32 %v903_v1, %v65_v42  ;;  %v785_v56 = vunpack.c.l.bf16 %v847_v43  ;;  %v405_v58 = vmul.f32 %v782_v52, %v917_v5 }
  0x4b   :  { %664 = vst [vmem:[%s1679_s6 + $0x128] sm:$0xff] %v600_v49  ;;  %v538_v57 = vadd.f32 %v474_v50, %v204_v39  ;;  %v137_v59 = vmul.f32 %v903_v1, %v66_v48  ;;  %v786_v60 = vunpack.c.h.bf16 %v847_v43  ;;  %v601_v63 = vmax.f32 %v537_v53, 0.0  ;;  %v73_v50 = vld [vmem:[%s1673_s0 + $0x190] sm:$0xff] }
  0x4c   :  { %v539_v0 = vadd.f32 %v475_v54, %v205_v46  ;;  %v207_v3 = vadd.f32 %v908_v2, %v136_v55  ;;  %v406_v4 = vmul.f32 %v785_v56, %v917_v5  ;;  %v476_v8 = vadd.f32 %v932_v12, %v405_v58  ;;  %v74_v56 = vld [vmem:[%s1673_s0 + $0x198] sm:$0xff] }
  0x4d   :  { %v602_v7 = vmax.f32 %v538_v57, 0.0  ;;  %v208_v9 = vadd.f32 %v908_v2, %v137_v59  ;;  %v407_v10 = vmul.f32 %v786_v60, %v917_v5  ;;  %665 = vst [vmem:[%s1679_s6 + $0x130] sm:$0xff] %v601_v63  ;;  %v138_v15 = vmul.f32 %v903_v1, %v67_v61 }
  0x4e   :  { %v603_v13 = vmax.f32 %v539_v0, 0.0  ;;  %v477_v14 = vadd.f32 %v932_v12, %v406_v4  ;;  %v789_v16 = vunpack.c.l.bf16 %v848_v62  ;;  %v540_v17 = vadd.f32 %v476_v8, %v206_v51  ;;  %v851_v51 = vld [vmem:[%s1676_s3 + $0xc8] sm:$0xff]   ;;  %v75_v8 = vld [vmem:[%s1673_s0 + $0x1a0] sm:$0xff] }
  0x4f   :  { %666 = vst [vmem:[%s1679_s6 + $0x138] sm:$0xff] %v602_v7  ;;  %v478_v18 = vadd.f32 %v932_v12, %v407_v10  ;;  %v139_v19 = vmul.f32 %v903_v1, %v68_v6  ;;  %v790_v20 = vunpack.c.h.bf16 %v848_v62  ;;  %v209_v23 = vadd.f32 %v908_v2, %v138_v15  ;;  %v76_v15 = vld [vmem:[%s1673_s0 + $0x1a8] sm:$0xff] }
  0x50   :  { %667 = vst [vmem:[%s1679_s6 + $0x140] sm:$0xff] %v603_v13  ;;  %v541_v22 = vadd.f32 %v477_v14, %v207_v3  ;;  %v408_v24 = vmul.f32 %v789_v16, %v917_v5  ;;  %v140_v25 = vmul.f32 %v903_v1, %v69_v11  ;;  %v604_v27 = vmax.f32 %v540_v17, 0.0 }
  0x51   :  { %v542_v28 = vadd.f32 %v478_v18, %v208_v9  ;;  %v210_v29 = vadd.f32 %v908_v2, %v139_v19  ;;  %v409_v30 = vmul.f32 %v790_v20, %v917_v5  ;;  %v793_v36 = vunpack.c.l.bf16 %v849_v21  ;;  %v852_v9 = vld [vmem:[%s1676_s3 + $0xd0] sm:$0xff]  }
  0x52   :  { %v605_v33 = vmax.f32 %v541_v22, 0.0  ;;  %v479_v34 = vadd.f32 %v932_v12, %v408_v24  ;;  %v211_v35 = vadd.f32 %v908_v2, %v140_v25  ;;  %668 = vst [vmem:[%s1679_s6 + $0x148] sm:$0xff] %v604_v27  ;;  %v141_v40 = vmul.f32 %v903_v1, %v70_v26  ;;  %v77_v20 = vld [vmem:[%s1673_s0 + $0x1b0] sm:$0xff] }
  0x53   :  { %v606_v38 = vmax.f32 %v542_v28, 0.0  ;;  %v480_v39 = vadd.f32 %v932_v12, %v409_v30  ;;  %v794_v41 = vunpack.c.h.bf16 %v849_v21  ;;  %v410_v43 = vmul.f32 %v793_v36, %v917_v5 }
  0x54   :  { %669 = vst [vmem:[%s1679_s6 + $0x150] sm:$0xff] %v605_v33  ;;  %v543_v42 = vadd.f32 %v479_v34, %v209_v23  ;;  %v142_v44 = vmul.f32 %v903_v1, %v71_v31  ;;  %v797_v45 = vunpack.c.l.bf16 %v850_v32  ;;  %v212_v47 = vadd.f32 %v908_v2, %v141_v40  ;;  %v78_v34 = vld [vmem:[%s1673_s0 + $0x1b8] sm:$0xff]  ;;  %v854_v40 = vld [vmem:[%s1676_s3 + $0xe0] sm:$0xff]  }
  0x55   :  { %670 = vst [vmem:[%s1679_s6 + $0x158] sm:$0xff] %v606_v38  ;;  %v544_v46 = vadd.f32 %v480_v39, %v210_v29  ;;  %v411_v48 = vmul.f32 %v794_v41, %v917_v5  ;;  %v143_v49 = vmul.f32 %v903_v1, %v72_v37  ;;  %v481_v53 = vadd.f32 %v932_v12, %v410_v43  ;;  %v853_v29 = vld [vmem:[%s1676_s3 + $0xd8] sm:$0xff]   ;;  %v79_v39 = vld [vmem:[%s1673_s0 + $0x1c0] sm:$0xff] }
  0x56   :  { %v607_v52 = vmax.f32 %v543_v42, 0.0  ;;  %v213_v54 = vadd.f32 %v908_v2, %v142_v44  ;;  %v412_v55 = vmul.f32 %v797_v45, %v917_v5  ;;  %v798_v60 = vunpack.c.h.bf16 %v850_v32  ;;  %v80_v44 = vld [vmem:[%s1673_s0 + $0x1c8] sm:$0xff] }
  0x57   :  { %v608_v57 = vmax.f32 %v544_v46, 0.0  ;;  %v482_v58 = vadd.f32 %v932_v12, %v411_v48  ;;  %v214_v59 = vadd.f32 %v908_v2, %v143_v49  ;;  %v545_v61 = vadd.f32 %v481_v53, %v211_v35  ;;  %v1549_v46 = vld [vmem:[%s1674_s1] ss:$0 sm:$0xff] }
  0x58   :  { %671 = vst [vmem:[%s1679_s6 + $0x160] sm:$0xff] %v607_v52  ;;  %v483_v62 = vadd.f32 %v932_v12, %v412_v55  ;;  %v144_v63 = vmul.f32 %v903_v1, %v73_v50  ;;  %v801_v0 = vunpack.c.l.bf16 %v851_v51  ;;  %v413_v4 = vmul.f32 %v798_v60, %v917_v5  ;;  %v1558_v49 = vld [vmem:[%s1677_s4] ss:$0 sm:$0xff] }
  0x59   :  { %672 = vst [vmem:[%s1679_s6 + $0x168] sm:$0xff] %v608_v57  ;;  %v546_v3 = vadd.f32 %v482_v58, %v212_v47  ;;  %v145_v6 = vmul.f32 %v903_v1, %v74_v56  ;;  %v802_v7 = vunpack.c.h.bf16 %v851_v51  ;;  %v609_v10 = vmax.f32 %v545_v61, 0.0  ;;  %v1568_v53 = vld [vmem:[%s1675_s2] ss:$0 sm:$0xff]  ;;  %v81_v57 = vld [vmem:[%s1673_s0 + $0x1d0] sm:$0xff]  ;;  %v855_v58 = vld [vmem:[%s1676_s3 + $0xe8] sm:$0xff]  }
  0x5a   :  { %v547_v11 = vadd.f32 %v483_v62, %v213_v54  ;;  %v215_v13 = vadd.f32 %v908_v2, %v144_v63  ;;  %v414_v14 = vmul.f32 %v801_v0, %v917_v5  ;;  %v484_v17 = vadd.f32 %v932_v12, %v413_v4  ;;  %v1582_v60 = vld [vmem:[%s1678_s5] ss:$0 sm:$0xff]  ;;  %v82_v0 = vld [vmem:[%s1673_s0 + $0x1d8] sm:$0xff] }
  0x5b   :  { %v610_v16 = vmax.f32 %v546_v3, 0.0  ;;  %v216_v18 = vadd.f32 %v908_v2, %v145_v6  ;;  %v415_v19 = vmul.f32 %v802_v7, %v917_v5  ;;  %673 = vst [vmem:[%s1679_s6 + $0x170] sm:$0xff] %v609_v10  ;;  %v146_v23 = vmul.f32 %v903_v1, %v75_v8 }
  0x5c   :  { %v611_v21 = vmax.f32 %v547_v11, 0.0  ;;  %v485_v22 = vadd.f32 %v932_v12, %v414_v14  ;;  %v805_v24 = vunpack.c.l.bf16 %v852_v9  ;;  %v548_v25 = vadd.f32 %v484_v17, %v214_v59  ;;  %v83_v17 = vld [vmem:[%s1673_s0 + $0x1e0] sm:$0xff] }
  0x5d   :  { %674 = vst [vmem:[%s1679_s6 + $0x178] sm:$0xff] %v610_v16  ;;  %v486_v26 = vadd.f32 %v932_v12, %v415_v19  ;;  %v147_v27 = vmul.f32 %v903_v1, %v76_v15  ;;  %v806_v28 = vunpack.c.h.bf16 %v852_v9  ;;  %v217_v31 = vadd.f32 %v908_v2, %v146_v23  ;;  %v84_v23 = vld [vmem:[%s1673_s0 + $0x1e8] sm:$0xff] }
  0x5e   :  { %675 = vst [vmem:[%s1679_s6 + $0x180] sm:$0xff] %v611_v21  ;;  %v549_v30 = vadd.f32 %v485_v22, %v215_v13  ;;  %v416_v32 = vmul.f32 %v805_v24, %v917_v5  ;;  %v148_v33 = vmul.f32 %v903_v1, %v77_v20  ;;  %v612_v35 = vmax.f32 %v548_v25, 0.0 }
  0x5f   :  { %v550_v36 = vadd.f32 %v486_v26, %v216_v18  ;;  %v218_v37 = vadd.f32 %v908_v2, %v147_v27  ;;  %v417_v38 = vmul.f32 %v806_v28, %v917_v5  ;;  %v809_v43 = vunpack.c.l.bf16 %v853_v29  ;;  %v856_v18 = vld [vmem:[%s1676_s3 + $0xf0] sm:$0xff]  }
  0x60   :  { %v613_v41 = vmax.f32 %v549_v30, 0.0  ;;  %v487_v1 = vadd.f32 %v932_v12, %v416_v32  ;;  %v219_v42 = vadd.f32 %v908_v2, %v148_v33  ;;  %676 = vst [vmem:[%s1679_s6 + $0x188] sm:$0xff] %v612_v35  ;;  %v149_v47 = vmul.f32 %v1549_v46, %v78_v34  ;;  %v85_v28 = vld [vmem:[%s1673_s0 + $0x1f0] sm:$0xff] }
  0x61   :  { %v614_v5 = vmax.f32 %v550_v36, 0.0  ;;  %v488_v45 = vadd.f32 %v932_v12, %v417_v38  ;;  %v810_v2 = vunpack.c.h.bf16 %v853_v29  ;;  %v418_v12 = vmul.f32 %v1558_v49, %v809_v43 }
  0x62   :  { %677 = vst [vmem:[%s1679_s6 + $0x190] sm:$0xff] %v613_v41  ;;  %v551_v48 = vadd.f32 %v487_v1, %v217_v31  ;;  %v150_v50 = vmul.f32 %v1549_v46, %v79_v39  ;;  %v813_v51 = vunpack.c.l.bf16 %v854_v40  ;;  %v220_v54 = vadd.f32 %v1568_v53, %v149_v47  ;;  %v86_v1 = vld [vmem:[%s1673_s0 + $0x1f8] sm:$0xff] }
  0x63   :  { %678 = vst [vmem:[%s1679_s6 + $0x198] sm:$0xff] %v614_v5  ;;  %v552_v52 = vadd.f32 %v488_v45, %v218_v37  ;;  %v419_v55 = vmul.f32 %v1558_v49, %v810_v2  ;;  %v151_v56 = vmul.f32 %v1549_v46, %v80_v44  ;;  %v489_v61 = vadd.f32 %v1582_v60, %v418_v12  ;;  %v857_v37 = vld [vmem:[%s1676_s3 + $0xf8] sm:$0xff]  }
  0x64   :  { %v615_v59 = vmax.f32 %v551_v48, 0.0  ;;  %v221_v62 = vadd.f32 %v1568_v53, %v150_v50  ;;  %v420_v63 = vmul.f32 %v1558_v49, %v813_v51  ;;  %v814_v7 = vunpack.c.h.bf16 %v854_v40 }
  0x65   :  { %v616_v3 = vmax.f32 %v552_v52, 0.0  ;;  %v490_v4 = vadd.f32 %v1582_v60, %v419_v55  ;;  %v222_v6 = vadd.f32 %v1568_v53, %v151_v56  ;;  %v553_v8 = vadd.f32 %v489_v61, %v219_v42 }
  0x66   :  { %679 = vst [vmem:[%s1679_s6 + $0x1a0] sm:$0xff] %v615_v59  ;;  %v491_v9 = vadd.f32 %v1582_v60, %v420_v63  ;;  %v152_v10 = vmul.f32 %v1549_v46, %v81_v57  ;;  %v817_v11 = vunpack.c.l.bf16 %v855_v58  ;;  %v421_v14 = vmul.f32 %v1558_v49, %v814_v7 }
  0x67   :  { %680 = vst [vmem:[%s1679_s6 + $0x1a8] sm:$0xff] %v616_v3  ;;  %v554_v13 = vadd.f32 %v490_v4, %v220_v54  ;;  %v153_v15 = vmul.f32 %v1549_v46, %v82_v0  ;;  %v818_v16 = vunpack.c.h.bf16 %v855_v58  ;;  %v617_v19 = vmax.f32 %v553_v8, 0.0 }
  0x68   :  { %v555_v20 = vadd.f32 %v491_v9, %v221_v62  ;;  %v223_v21 = vadd.f32 %v1568_v53, %v152_v10  ;;  %v422_v22 = vmul.f32 %v1558_v49, %v817_v11  ;;  %v492_v25 = vadd.f32 %v1582_v60, %v421_v14 }
  0x69   :  { %v618_v24 = vmax.f32 %v554_v13, 0.0  ;;  %v224_v26 = vadd.f32 %v1568_v53, %v153_v15  ;;  %v423_v27 = vmul.f32 %v1558_v49, %v818_v16  ;;  %681 = vst [vmem:[%s1679_s6 + $0x1b0] sm:$0xff] %v617_v19  ;;  %v154_v31 = vmul.f32 %v1549_v46, %v83_v17 }
  0x6a   :  { %v619_v29 = vmax.f32 %v555_v20, 0.0  ;;  %v493_v30 = vadd.f32 %v1582_v60, %v422_v22  ;;  %v821_v32 = vunpack.c.l.bf16 %v856_v18  ;;  %v556_v33 = vadd.f32 %v492_v25, %v222_v6 }
  0x6b   :  { %682 = vst [vmem:[%s1679_s6 + $0x1b8] sm:$0xff] %v618_v24  ;;  %v494_v34 = vadd.f32 %v1582_v60, %v423_v27  ;;  %v155_v35 = vmul.f32 %v1549_v46, %v84_v23  ;;  %v822_v36 = vunpack.c.h.bf16 %v856_v18  ;;  %v225_v39 = vadd.f32 %v1568_v53, %v154_v31 }
  0x6c   :  { %683 = vst [vmem:[%s1679_s6 + $0x1c0] sm:$0xff] %v619_v29  ;;  %v557_v38 = vadd.f32 %v493_v30, %v223_v21  ;;  %v424_v40 = vmul.f32 %v1558_v49, %v821_v32  ;;  %v156_v41 = vmul.f32 %v1549_v46, %v85_v28  ;;  %v620_v42 = vmax.f32 %v556_v33, 0.0 }
  0x6d   :  { %v558_v43 = vadd.f32 %v494_v34, %v224_v26  ;;  %v226_v44 = vadd.f32 %v1568_v53, %v155_v35  ;;  %v425_v5 = vmul.f32 %v1558_v49, %v822_v36  ;;  %v825_v2 = vunpack.c.l.bf16 %v857_v37 }
  0x6e   :  { %v621_v45 = vmax.f32 %v557_v38, 0.0  ;;  %v495_v47 = vadd.f32 %v1582_v60, %v424_v40  ;;  %684 = vst [vmem:[%s1679_s6 + $0x1c8] sm:$0xff] %v620_v42  ;;  %v157_v50 = vmul.f32 %v1549_v46, %v86_v1  ;;  %v826_v51 = vunpack.c.h.bf16 %v857_v37 }
  0x6f   :  { %v622_v48 = vmax.f32 %v558_v43, 0.0  ;;  %v496_v12 = vadd.f32 %v1582_v60, %v425_v5  ;;  %v227_v54 = vadd.f32 %v1568_v53, %v156_v41  ;;  %v426_v55 = vmul.f32 %v1558_v49, %v825_v2 }
  0x70   :  { %685 = vst [vmem:[%s1679_s6 + $0x1d0] sm:$0xff] %v621_v45  ;;  %v559_v52 = vadd.f32 %v495_v47, %v225_v39  ;;  %v228_v57 = vadd.f32 %v1568_v53, %v157_v50  ;;  %v427_v58 = vmul.f32 %v1558_v49, %v826_v51 }
  0x71   :  { %686 = vst [vmem:[%s1679_s6 + $0x1d8] sm:$0xff] %v622_v48  ;;  %v560_v56 = vadd.f32 %v496_v12, %v226_v44  ;;  %v497_v59 = vadd.f32 %v1582_v60, %v426_v55 }
  0x72   :  { %v623_v46 = vmax.f32 %v559_v52, 0.0  ;;  %v498_v62 = vadd.f32 %v1582_v60, %v427_v58 }
  0x73   :  { %v624_v61 = vmax.f32 %v560_v56, 0.0  ;;  %v561_v63 = vadd.f32 %v497_v59, %v227_v54 }
  0x74   :  { %687 = vst [vmem:[%s1679_s6 + $0x1e0] sm:$0xff] %v623_v46  ;;  %v562_v0 = vadd.f32 %v498_v62, %v228_v57 }
  0x75   :  { %688 = vst [vmem:[%s1679_s6 + $0x1e8] sm:$0xff] %v624_v61  ;;  %v625_v3 = vmax.f32 %v561_v63, 0.0 }
  0x76   :  { %v626_v53 = vmax.f32 %v562_v0, 0.0 }
  0x77   :  { %689 = vst [vmem:[%s1679_s6 + $0x1f0] sm:$0xff] %v625_v3 }
  0x78   :  { %690 = vst [vmem:[%s1679_s6 + $0x1f8] sm:$0xff] %v626_v53 }

// kernel: a_call__.4
= control target key start
LH: loop header
LB: loop body
LE: loop exit
PB: predicated region body
PF: predicated region fallthrough
CT: control target
= control target key end

     0   :  { %v7130_v1 = vmov 0.0   ;;  %s8825_s3 = inlined_call_operand.vmem [shape: bf16[9,128,128], index: 3, kind: input, shape index: {}]   ;;  %s8826_s0 = inlined_call_operand.vmem [shape: f32[2,16,16,128], index: 0, kind: input, shape index: {}]   ;;  %s8827_s1 = inlined_call_operand.vmem [shape: f32[1,128], index: 1, kind: input, shape index: {}]   ;;  %s8828_s2 = inlined_call_operand.vmem [shape: f32[1,128], index: 2, kind: input, shape index: {}]   ;;  %s8829_s4 = inlined_call_operand.vmem [shape: f32[2,16,16,128], index: 4, kind: output, shape index: {0}]   ;;  %s8830_s5 = inlined_call_operand.vmem [shape: f32[1,2,128], index: 5, kind: output, shape index: {1}]  }
   0x1   :  { %v7164_v0 = vld [vmem:[%s8825_s3 + $0x40] sm:$0xff]   ;;  %290 = vst [vmem:[#allocation2] sm:$0xff] %v7130_v1  ;;  %291 = vst [vmem:[#allocation2 + $0x8] sm:$0xff] %v7130_v1  ;;  %v7050_v3 = vld [vmem:[%s8825_s3 + $0x48] sm:$0xff]  }
   0x2   :  { %292 = vst [vmem:[#allocation2 + $0x10] sm:$0x3] %v7130_v1  ;;  %293 = vst [vmem:[#allocation2 + $0x18] sm:$0xff] %v7130_v1  ;;  %v7049_v2 = vld [vmem:[%s8825_s3 + $0x100] sm:$0xff]   ;;  %5799 = vmatprep.subr.bf16.mxu1 %v7164_v0  ;;  %v7051_v4 = vld [vmem:[%s8825_s3 + $0x108] sm:$0xff]  }
   0x3   :  { %294 = vst [vmem:[#allocation2 + $0x20] sm:$0xff] %v7130_v1  ;;  %295 = vst [vmem:[#allocation2 + $0x28] sm:$0x3] %v7130_v1  ;;  %6119 = vmatprep.subr.bf16.mxu0 %v7049_v2  ;;  %5800 = vmatpush3.bf16.msra.mxu1 %v7164_v0  ;;  %v7052_v5 = vld [vmem:[%s8825_s3 + $0x50] sm:$0xff]   ;;  %v7054_v7 = vld [vmem:[%s8825_s3 + $0x58] sm:$0xff]  }
   0x4   :  { %296 = vst [vmem:[#allocation2 + $0x30] sm:$0xff] %v7130_v1  ;;  %297 = vst [vmem:[#allocation2 + $0x38] sm:$0xff] %v7130_v1  ;;  %6120 = vmatpush3.bf16.msra.mxu0 %v7049_v2  ;;  %5801 = vmatprep.subr.bf16.mxu1 %v7050_v3  ;;  %v7053_v6 = vld [vmem:[%s8825_s3 + $0x110] sm:$0xff]   ;;  %v7055_v8 = vld [vmem:[%s8825_s3 + $0x118] sm:$0xff]  }
   0x5   :  { %298 = vst [vmem:[#allocation2 + $0x40] sm:$0x3] %v7130_v1  ;;  %299 = vst [vmem:[#allocation2 + $0x48] sm:$0xff] %v7130_v1  ;;  %6121 = vmatprep.subr.bf16.mxu0 %v7051_v4  ;;  %v7056_v9 = vld [vmem:[%s8825_s3 + $0x60] sm:$0xff]   ;;  %v7058_v11 = vld [vmem:[%s8825_s3 + $0x68] sm:$0xff]  }
   0x6   :  { %300 = vst [vmem:[#allocation2 + $0x50] sm:$0xff] %v7130_v1  ;;  %301 = vst [vmem:[#allocation2 + $0x58] sm:$0x3] %v7130_v1  ;;  %v7057_v10 = vld [vmem:[%s8825_s3 + $0x120] sm:$0xff]   ;;  %v7059_v12 = vld [vmem:[%s8825_s3 + $0x128] sm:$0xff]  }
   0x7   :  { %302 = vst [vmem:[#allocation2 + $0x60] sm:$0xff] %v7130_v1  ;;  %303 = vst [vmem:[#allocation2 + $0x68] sm:$0xff] %v7130_v1  ;;  %5802 = vmatpush3.bf16.msra.mxu1 %v7050_v3  ;;  %v20_v15 = vld [vmem:[%s8826_s0] sm:$0xff]  ;;  %v21_v17 = vld [vmem:[%s8826_s0 + $0x8] sm:$0xff] }
   0x8   :  { %304 = vst [vmem:[#allocation2 + $0x70] sm:$0x3] %v7130_v1  ;;  %305 = vst [vmem:[#allocation2 + $0x78] sm:$0xff] %v7130_v1  ;;  %6122 = vmatpush3.bf16.msra.mxu0 %v7051_v4  ;;  %5803 = vmatprep.subr.bf16.mxu1 %v7052_v5  ;;  %v575_v13 = vld [vmem:[#allocation2 + $0x1] sm:$0xff]  ;;  %v7318_v18 = vld [vmem:[%s8827_s1] ss:$0 sm:$0xff] }
   0x9   :  { %306 = vst [vmem:[#allocation2 + $0x80] sm:$0xff] %v7130_v1  ;;  %307 = vst [vmem:[#allocation2 + $0x88] sm:$0x3] %v7130_v1  ;;  %6123 = vmatprep.subr.bf16.mxu0 %v7053_v6  ;;  %v576_v14 = vld [vmem:[#allocation2 + $0x9] sm:$0xff]  ;;  %v7323_v19 = vld [vmem:[%s8828_s2] ss:$0 sm:$0xff]  ;;  %v91_v21 = vmul.f32 %v7318_v18, %v20_v15  ;;  %v92_v22 = vmul.f32 %v7318_v18, %v21_v17 }
   0xa   :  { %308 = vst [vmem:[#allocation2 + $0x90] sm:$0xff] %v7130_v1  ;;  %309 = vst [vmem:[#allocation2 + $0x98] sm:$0xff] %v7130_v1  ;;  %v639_v16 = vpack.c.bf16 %v576_v14, %v575_v13  ;;  %v7060_v20 = vld [vmem:[%s8825_s3 + $0x70] sm:$0xff]   ;;  %v23_v24 = vld [vmem:[%s8826_s0 + $0x18] sm:$0xff] }
   0xb   :  { %310 = vst [vmem:[#allocation2 + $0xa0] sm:$0x3] %v7130_v1  ;;  %311 = vst [vmem:[#allocation2 + $0xa8] sm:$0xff] %v7130_v1  ;;  %5804 = vmatpush3.bf16.msra.mxu1 %v7052_v5  ;;  %v22_v23 = vld [vmem:[%s8826_s0 + $0x10] sm:$0xff]  ;;  %v162_v26 = vadd.f32 %v7323_v19, %v91_v21  ;;  %v163_v27 = vadd.f32 %v7323_v19, %v92_v22  ;;  %v24_v29 = vld [vmem:[%s8826_s0 + $0x20] sm:$0xff]  ;;  %v94_v30 = vmul.f32 %v7318_v18, %v23_v24 }
   0xc   :  { %312 = vst [vmem:[#allocation2 + $0xb0] sm:$0xff] %v7130_v1  ;;  %313 = vst [vmem:[#allocation2 + $0xb8] sm:$0x3] %v7130_v1  ;;  %6124 = vmatpush3.bf16.msra.mxu0 %v7053_v6  ;;  %5805 = vmatprep.subr.bf16.mxu1 %v7054_v7  ;;  %v7061_v25 = vld [vmem:[%s8825_s3 + $0x130] sm:$0xff]   ;;  %v93_v28 = vmul.f32 %v7318_v18, %v22_v23  ;;  %v25_v31 = vld [vmem:[%s8826_s0 + $0x28] sm:$0xff]  ;;  %v95_v32 = vmul.f32 %v7318_v18, %v24_v29 }
   0xd   :  { %314 = vst [vmem:[#allocation2 + $0xc0] sm:$0xff] %v7130_v1  ;;  %315 = vst [vmem:[#allocation2 + $0xc8] sm:$0xff] %v7130_v1  ;;  %6125 = vmatprep.subr.bf16.mxu0 %v7055_v8  ;;  %5815 = vmatprep.mubr.bf16.mxu1 %v639_v16  ;;  %v26_v33 = vld [vmem:[%s8826_s0 + $0x30] sm:$0xff]  ;;  %v27_v34 = vld [vmem:[%s8826_s0 + $0x38] sm:$0xff]  ;;  %v226_v35 = vmax.f32 %v162_v26, 0.0  ;;  %v227_v36 = vmax.f32 %v163_v27, 0.0  ;;  %v96_v38 = vmul.f32 %v7318_v18, %v25_v31 }
   0xe   :  { %316 = vst [vmem:[#allocation2 + $0xd0] sm:$0x3] %v7130_v1  ;;  %317 = vst [vmem:[#allocation2 + $0xd8] sm:$0xff] %v7130_v1  ;;  %v164_v37 = vadd.f32 %v7323_v19, %v93_v28  ;;  %v7062_v39 = vld [vmem:[%s8825_s3 + $0x78] sm:$0xff]   ;;  %v165_v40 = vadd.f32 %v7323_v19, %v94_v30  ;;  %v7363_v41 = vadd.f32 %v7323_v19, %v95_v32  ;;  %v28_v44 = vld [vmem:[%s8826_s0 + $0x40] sm:$0xff] }
   0xf   :  { %318 = vst [vmem:[#allocation2 + $0xe0] sm:$0xff] %v7130_v1  ;;  %319 = vst [vmem:[#allocation2 + $0xe8] sm:$0x3] %v7130_v1  ;;  %5806 = vmatpush3.bf16.msra.mxu1 %v7054_v7  ;;  %v97_v42 = vmul.f32 %v7318_v18, %v26_v33  ;;  %v98_v43 = vmul.f32 %v7318_v18, %v27_v34  ;;  %v29_v45 = vld [vmem:[%s8826_s0 + $0x48] sm:$0xff]  ;;  %v7063_v46 = vld [vmem:[%s8825_s3 + $0x138] sm:$0xff]   ;;  %v7376_v47 = vpack.c.bf16 %v227_v36, %v226_v35 }
  0x10   :  { %320 = vst [vmem:[#allocation2 + $0xf0] sm:$0xff] %v7130_v1  ;;  %321 = vst [vmem:[#allocation2 + $0xf8] sm:$0xff] %v7130_v1  ;;  %6126 = vmatpush3.bf16.msra.mxu0 %v7055_v8  ;;  %5807 = vmatprep.subr.bf16.mxu1 %v7056_v9  ;;  %v228_v48 = vmax.f32 %v164_v37, 0.0  ;;  %v7379_v49 = vadd.f32 %v7323_v19, %v96_v38  ;;  %v99_v50 = vmul.f32 %v7318_v18, %v28_v44  ;;  %v30_v55 = vld [vmem:[%s8826_s0 + $0x50] sm:$0xff]  ;;  %v31_v56 = vld [vmem:[%s8826_s0 + $0x58] sm:$0xff] }
  0x11   :  { %322 = vst [vmem:[#allocation2 + $0x100] sm:$0x3] %v7130_v1  ;;  %323 = vst [vmem:[#allocation2 + $0x108] sm:$0xff] %v7130_v1  ;;  %6127 = vmatprep.subr.bf16.mxu0 %v7057_v10  ;;  %v229_v51 = vmax.f32 %v165_v40, 0.0  ;;  %v230_v52 = vmax.f32 %v7363_v41, 0.0  ;;  %v7384_v53 = vadd.f32 %v7323_v19, %v97_v42  ;;  %v7387_v54 = vadd.f32 %v7323_v19, %v98_v43  ;;  %v32_v61 = vld [vmem:[%s8826_s0 + $0x60] sm:$0xff] }
  0x12   :  { %324 = vst [vmem:[#allocation2 + $0x110] sm:$0xff] %v7130_v1  ;;  %325 = vst [vmem:[#allocation2 + $0x118] sm:$0x3] %v7130_v1  ;;  %6135 = vmatprep.mubr.bf16.mxu0 %v7376_v47  ;;  %v231_v57 = vmax.f32 %v7379_v49, 0.0  ;;  %v100_v58 = vmul.f32 %v7318_v18, %v29_v45  ;;  %v7399_v59 = vadd.f32 %v7323_v19, %v99_v50  ;;  %v34_v2 = vld [vmem:[%s8826_s0 + $0x70] sm:$0xff]  ;;  %v35_v3 = vld [vmem:[%s8826_s0 + $0x78] sm:$0xff] }
  0x13   :  { %326 = vst [vmem:[#allocation2 + $0x120] sm:$0xff] %v7130_v1  ;;  %327 = vst [vmem:[#allocation2 + $0x128] sm:$0xff] %v7130_v1  ;;  %5808 = vmatpush3.bf16.msra.mxu1 %v7056_v9  ;;  %v101_v60 = vmul.f32 %v7318_v18, %v30_v55  ;;  %v232_v62 = vmax.f32 %v7384_v53, 0.0  ;;  %v233_v63 = vmax.f32 %v7387_v54, 0.0  ;;  %v102_v0 = vmul.f32 %v7318_v18, %v31_v56  ;;  %v7064_v4 = vld [vmem:[%s8825_s3] sm:$0xff]   ;;  %v7066_v26 = vld [vmem:[%s8825_s3 + $0x148] sm:$0xff]  }
  0x14   :  { %328 = vst [vmem:[#allocation2 + $0x130] sm:$0x3] %v7130_v1  ;;  %329 = vst [vmem:[#allocation2 + $0x138] sm:$0xff] %v7130_v1  ;;  %6128 = vmatpush3.bf16.msra.mxu0 %v7057_v10  ;;  %5809 = vmatprep.subr.bf16.mxu1 %v7058_v11  ;;  %v7421_v5 = vadd.f32 %v7323_v19, %v100_v58  ;;  %v234_v6 = vmax.f32 %v7399_v59, 0.0  ;;  %v2455_v8 = vpack.c.bf16 %v229_v51, %v228_v48  ;;  %v7065_v9 = vld [vmem:[%s8825_s3 + $0x140] sm:$0xff]   ;;  %v7067_v27 = vld [vmem:[%s8825_s3 + $0x8] sm:$0xff]  }
  0x15   :  { %330 = vst [vmem:[#allocation2 + $0x140] sm:$0xff] %v7130_v1  ;;  %331 = vst [vmem:[#allocation2 + $0x148] sm:$0x3] %v7130_v1  ;;  %6129 = vmatprep.subr.bf16.mxu0 %v7059_v12  ;;  %v7425_v7 = vadd.f32 %v7323_v19, %v101_v60  ;;  %v7435_v10 = vadd.f32 %v7323_v19, %v102_v0  ;;  %v36_v13 = vld [vmem:[%s8826_s0 + $0x80] sm:$0xff]  ;;  %v105_v16 = vmul.f32 %v7318_v18, %v34_v2  ;;  %v39_v30 = vld [vmem:[%s8826_s0 + $0x98] sm:$0xff] }
  0x16   :  { %332 = vst [vmem:[#allocation2 + $0x150] sm:$0xff] %v7130_v1  ;;  %333 = vst [vmem:[#allocation2 + $0x158] sm:$0xff] %v7130_v1  ;;  %v235_v14 = vmax.f32 %v7421_v5, 0.0  ;;  %v106_v17 = vmul.f32 %v7318_v18, %v35_v3  ;;  %v107_v24 = vmul.f32 %v7318_v18, %v36_v13  ;;  %v7481_v31 = vpack.c.bf16 %v231_v57, %v230_v52  ;;  %v42_v41 = vld [vmem:[%s8826_s0 + $0xb0] sm:$0xff]  ;;  %v43_v42 = vld [vmem:[%s8826_s0 + $0xb8] sm:$0xff] }
  0x17   :  { %334 = vst [vmem:[#allocation2 + $0x160] sm:$0x3] %v7130_v1  ;;  %335 = vst [vmem:[#allocation2 + $0x168] sm:$0xff] %v7130_v1  ;;  %5810 = vmatpush3.bf16.msra.mxu1 %v7058_v11  ;;  %v103_v11 = vmul.f32 %v7318_v18, %v32_v61  ;;  %v236_v15 = vmax.f32 %v7425_v7, 0.0  ;;  %v237_v21 = vmax.f32 %v7435_v10, 0.0  ;;  %v7473_v28 = vadd.f32 %v7323_v19, %v105_v16  ;;  %v44_v45 = vld [vmem:[%s8826_s0 + $0xc0] sm:$0xff] }
  0x18   :  { %336 = vst [vmem:[#allocation2 + $0x170] sm:$0xff] %v7130_v1  ;;  %337 = vst [vmem:[#allocation2 + $0x178] sm:$0x3] %v7130_v1  ;;  %6130 = vmatpush3.bf16.msra.mxu0 %v7059_v12  ;;  %5811 = vmatprep.subr.bf16.mxu1 %v7060_v20  ;;  %v7476_v29 = vadd.f32 %v7323_v19, %v106_v17  ;;  %v110_v44 = vmul.f32 %v7318_v18, %v39_v30  ;;  %v7070_v49 = vld [vmem:[%s8825_s3 + $0x10] sm:$0xff]   ;;  %v45_v56 = vld [vmem:[%s8826_s0 + $0xc8] sm:$0xff] }
  0x19   :  { %338 = vst [vmem:[#allocation2 + $0x180] sm:$0xff] %v7130_v1  ;;  %339 = vst [vmem:[#allocation2 + $0x188] sm:$0xff] %v7130_v1  ;;  %6131 = vmatprep.subr.bf16.mxu0 %v7061_v25  ;;  %v7453_v22 = vadd.f32 %v7323_v19, %v103_v11  ;;  %v240_v37 = vmax.f32 %v7473_v28, 0.0  ;;  %v113_v55 = vmul.f32 %v7318_v18, %v42_v41  ;;  %v47_v59 = vld [vmem:[%s8826_s0 + $0xd8] sm:$0xff]  ;;  %v49_v16 = vld [vmem:[%s8826_s0 + $0xe8] sm:$0xff] }
  0x1a   :  { %340 = vst [vmem:[#allocation2 + $0x190] sm:$0x3] %v7130_v1  ;;  %341 = vst [vmem:[#allocation2 + $0x198] sm:$0xff] %v7130_v1  ;;  %v241_v38 = vmax.f32 %v7476_v29, 0.0  ;;  %v7540_v53 = vadd.f32 %v7323_v19, %v110_v44  ;;  %v114_v60 = vmul.f32 %v7318_v18, %v43_v42  ;;  %v115_v61 = vmul.f32 %v7318_v18, %v44_v45  ;;  %v7073_v13 = vld [vmem:[%s8825_s3 + $0x18] sm:$0xff]   ;;  %v7072_v7 = vld [vmem:[%s8825_s3 + $0x168] sm:$0xff]  }
  0x1b   :  { %342 = vst [vmem:[#allocation2 + $0x1a0] sm:$0xff] %v7130_v1  ;;  %343 = vst [vmem:[#allocation2 + $0x1a8] sm:$0x3] %v7130_v1  ;;  %5812 = vmatpush3.bf16.msra.mxu1 %v7060_v20  ;;  %v37_v20 = vld [vmem:[%s8826_s0 + $0x88] sm:$0xff]  ;;  %v238_v32 = vmax.f32 %v7453_v22, 0.0  ;;  %v7571_v2 = vadd.f32 %v7323_v19, %v113_v55  ;;  %v116_v5 = vmul.f32 %v7318_v18, %v45_v56  ;;  %v54_v55 = vld [vmem:[%s8826_s0 + $0x110] sm:$0xff] }
  0x1c   :  { %344 = vst [vmem:[#allocation2 + $0x1b0] sm:$0xff] %v7130_v1  ;;  %345 = vst [vmem:[#allocation2 + $0x1b8] sm:$0xff] %v7130_v1  ;;  %6132 = vmatpush3.bf16.msra.mxu0 %v7061_v25  ;;  %5813 = vmatprep.subr.bf16.mxu1 %v7062_v39  ;;  %v38_v25 = vld [vmem:[%s8826_s0 + $0x90] sm:$0xff]  ;;  %v108_v34 = vmul.f32 %v7318_v18, %v37_v20  ;;  %v245_v0 = vmax.f32 %v7540_v53, 0.0  ;;  %v2459_v56 = vpack.c.bf16 %v237_v21, %v236_v15  ;;  %v55_v22 = vld [vmem:[%s8826_s0 + $0x118] sm:$0xff] }
  0x1d   :  { %346 = vst [vmem:[#allocation2 + $0x1c0] sm:$0x3] %v7130_v1  ;;  %347 = vst [vmem:[#allocation2 + $0x1c8] sm:$0xff] %v7130_v1  ;;  %6133 = vmatprep.subr.bf16.mxu0 %v7063_v46  ;;  %v109_v40 = vmul.f32 %v7318_v18, %v38_v25  ;;  %v7608_v20 = vadd.f32 %v7323_v19, %v116_v5  ;;  %v118_v25 = vmul.f32 %v7318_v18, %v47_v59  ;;  %v56_v5 = vld [vmem:[%s8826_s0 + $0x120] sm:$0xff] }
  0x1e   :  { %348 = vst [vmem:[#allocation2 + $0x1d0] sm:$0xff] %v7130_v1  ;;  %349 = vst [vmem:[#allocation2 + $0x1d8] sm:$0x3] %v7130_v1  ;;  %v7512_v43 = vadd.f32 %v7323_v19, %v108_v34 }
  0x1f   :  { %350 = vst [vmem:[#allocation2 + $0x1e0] sm:$0xff] %v7130_v1  ;;  %351 = vst [vmem:[#allocation2 + $0x1e8] sm:$0xff] %v7130_v1  ;;  %5814 = vmatpush3.bf16.msra.mxu1 %v7062_v39  ;;  %v7498_v39 = vadd.f32 %v7323_v19, %v107_v24  ;;  %v7534_v50 = vadd.f32 %v7323_v19, %v109_v40  ;;  %v251_v34 = vmax.f32 %v7608_v20, 0.0  ;;  %v7071_v40 = vld [vmem:[%s8825_s3 + $0x160] sm:$0xff]  }
  0x20   :  { %352 = vst [vmem:[#allocation2 + $0x1f0] sm:$0x3] %v7130_v1  ;;  %353 = vst [vmem:[#allocation2 + $0x1f8] sm:$0xff] %v7130_v1  ;;  %6134 = vmatpush3.bf16.msra.mxu0 %v7063_v46  ;;  %5879 = vmatprep.subr.bf16.mxu1 %v7064_v4  ;;  %v2457_v46 = vpack.c.bf16 %v233_v63, %v232_v62 }
  0x21   :  { %354 = vst [vmem:[#allocation2 + $0x200] sm:$0xff] %v7130_v1  ;;  %355 = vst [vmem:[#allocation2 + $0x208] sm:$0x3] %v7130_v1  ;;  %6199 = vmatprep.subr.bf16.mxu0 %v7065_v9 }
  0x22   :  { %356 = vst [vmem:[#allocation2 + $0x210] sm:$0xff] %v7130_v1  ;;  %357 = vst [vmem:[#allocation2 + $0x218] sm:$0xff] %v7130_v1  ;;  %5816 = vmatmul.mubr.bf16.vlgmr.msra.gmra.mrb[0].mxu1 %v7376_v47  ;;  %v7068_v47 = vld [vmem:[%s8825_s3 + $0x150] sm:$0xff]  }
  0x23   :  { %358 = vst [vmem:[#allocation2 + $0x220] sm:$0x3] %v7130_v1  ;;  %359 = vst [vmem:[#allocation2 + $0x228] sm:$0xff] %v7130_v1  ;;  %6136 = vmatmul.mubr.bf16.vlgmr.msra.gmra.mrb[0].mxu0 %v2455_v8  ;;  %5880 = vmatpush3.bf16.msra.mxu1 %v7064_v4  ;;  %v7580_v4 = vadd.f32 %v7323_v19, %v114_v60 }
  0x24   :  { %360 = vst [vmem:[#allocation2 + $0x230] sm:$0xff] %v7130_v1  ;;  %361 = vst [vmem:[#allocation2 + $0x238] sm:$0x3] %v7130_v1  ;;  %6200 = vmatpush3.bf16.msra.mxu0 %v7065_v9  ;;  %5819 = vmatprep.mubr.bf16.mxu1 %v2455_v8  ;;  %v48_v8 = vld [vmem:[%s8826_s0 + $0xe0] sm:$0xff]  ;;  %v7069_v9 = vld [vmem:[%s8825_s3 + $0x158] sm:$0xff]  }
  0x25   :  { %362 = vst [vmem:[#allocation2 + $0x240] sm:$0xff] %v7130_v1  ;;  %363 = vst [vmem:[#allocation2 + $0x248] sm:$0xff] %v7130_v1  ;;  %6139 = vmatprep.mubr.bf16.mxu0 %v7481_v31  ;;  %6201 = vmatprep.subr.bf16.mxu0 %v7066_v26  ;;  %v249_v17 = vmax.f32 %v7580_v4, 0.0 }
  0x26   :  { %364 = vst [vmem:[#allocation2 + $0x250] sm:$0x3] %v7130_v1  ;;  %365 = vst [vmem:[#allocation2 + $0x258] sm:$0xff] %v7130_v1  ;;  %5881 = vmatprep.subr.bf16.mxu1 %v7067_v27 }
  0x27   :  { %366 = vst [vmem:[#allocation2 + $0x260] sm:$0xff] %v7130_v1  ;;  %367 = vst [vmem:[#allocation2 + $0x268] sm:$0x3] %v7130_v1  ;;  %5882 = vmatpush3.bf16.msra.mxu1 %v7067_v27  ;;  %v51_v27 = vld [vmem:[%s8826_s0 + $0xf8] sm:$0xff] }
  0x28   :  { %368 = vst [vmem:[#allocation2 + $0x270] sm:$0xff] %v7130_v1  ;;  %369 = vst [vmem:[#allocation2 + $0x278] sm:$0xff] %v7130_v1  ;;  %6202 = vmatpush3.bf16.msra.mxu0 %v7066_v26  ;;  %5883 = vmatprep.subr.bf16.mxu1 %v7070_v49  ;;  %v50_v26 = vld [vmem:[%s8826_s0 + $0xf0] sm:$0xff]  ;;  %v122_v45 = vmul.f32 %v7318_v18, %v51_v27 }
  0x29   :  { %370 = vst [vmem:[#allocation2 + $0x280] sm:$0x3] %v7130_v1  ;;  %371 = vst [vmem:[#allocation2 + $0x288] sm:$0xff] %v7130_v1  ;;  %6203 = vmatprep.subr.bf16.mxu0 %v7068_v47  ;;  %v121_v44 = vmul.f32 %v7318_v18, %v50_v26  ;;  %v59_v26 = vld [vmem:[%s8826_s0 + $0x138] sm:$0xff] }
  0x2a   :  { %372 = vst [vmem:[#allocation2 + $0x290] sm:$0xff] %v7130_v1  ;;  %373 = vst [vmem:[#allocation2 + $0x298] sm:$0x3] %v7130_v1  ;;  %5820 = vmatmul.mubr.bf16.gmra.mrb[4].mxu1 %v7481_v31  ;;  %v119_v31 = vmul.f32 %v7318_v18, %v48_v8  ;;  %v57_v8 = vld [vmem:[%s8826_s0 + $0x128] sm:$0xff] }
  0x2b   :  { %374 = vst [vmem:[#allocation2 + $0x2a0] sm:$0xff] %v7130_v1  ;;  %375 = vst [vmem:[#allocation2 + $0x2a8] sm:$0xff] %v7130_v1  ;;  %6140 = vmatmul.mubr.bf16.gmra.mrb[4].mxu0 %v2457_v46  ;;  %5823 = vmatprep.mubr.bf16.mxu1 %v2457_v46  ;;  %v52_v46 = vld [vmem:[%s8826_s0 + $0x100] sm:$0xff] }
  0x2c   :  { %376 = vst [vmem:[#allocation2 + $0x2b0] sm:$0x3] %v7130_v1  ;;  %377 = vst [vmem:[#allocation2 + $0x2b8] sm:$0xff] %v7130_v1  ;;  %6204 = vmatpush3.bf16.msra.mxu0 %v7068_v47  ;;  %5884 = vmatpush3.bf16.msra.mxu1 %v7070_v49  ;;  %v7641_v42 = vadd.f32 %v7323_v19, %v119_v31  ;;  %v53_v47 = vld [vmem:[%s8826_s0 + $0x108] sm:$0xff] }
  0x2d   :  { %378 = vst [vmem:[#allocation2 + $0x2c0] sm:$0xff] %v7130_v1  ;;  %379 = vst [vmem:[#allocation2 + $0x2c8] sm:$0x3] %v7130_v1  ;;  %6205 = vmatprep.subr.bf16.mxu0 %v7069_v9  ;;  %5885 = vmatprep.subr.bf16.mxu1 %v7073_v13 }
  0x2e   :  { %380 = vst [vmem:[#allocation2 + $0x2d0] sm:$0xff] %v7130_v1  ;;  %381 = vst [vmem:[#allocation2 + $0x2d8] sm:$0xff] %v7130_v1  ;;  %v254_v60 = vmax.f32 %v7641_v42, 0.0 }
  0x2f   :  { %382 = vst [vmem:[#allocation2 + $0x2e0] sm:$0x3] %v7130_v1  ;;  %383 = vst [vmem:[#allocation2 + $0x2e8] sm:$0xff] %v7130_v1 }
  0x30   :  { %384 = vst [vmem:[#allocation2 + $0x2f0] sm:$0xff] %v7130_v1  ;;  %385 = vst [vmem:[#allocation2 + $0x2f8] sm:$0x3] %v7130_v1  ;;  %6206 = vmatpush3.bf16.msra.mxu0 %v7069_v9  ;;  %5886 = vmatpush3.bf16.msra.mxu1 %v7073_v13 }
  0x31   :  { %386 = vst [vmem:[#allocation2 + $0x300] sm:$0xff] %v7130_v1  ;;  %387 = vst [vmem:[#allocation2 + $0x308] sm:$0xff] %v7130_v1  ;;  %6207 = vmatprep.subr.bf16.mxu0 %v7071_v40 }
  0x32   :  { %388 = vst [vmem:[#allocation2 + $0x310] sm:$0x3] %v7130_v1  ;;  %389 = vst [vmem:[#allocation2 + $0x318] sm:$0xff] %v7130_v1 }
  0x33   :  { %390 = vst [vmem:[#allocation2 + $0x320] sm:$0xff] %v7130_v1  ;;  %391 = vst [vmem:[#allocation2 + $0x328] sm:$0x3] %v7130_v1 }
  0x34   :  { %392 = vst [vmem:[#allocation2 + $0x330] sm:$0xff] %v7130_v1  ;;  %393 = vst [vmem:[#allocation2 + $0x338] sm:$0xff] %v7130_v1  ;;  %6208 = vmatpush3.bf16.msra.mxu0 %v7071_v40 }
  0x35   :  { %394 = vst [vmem:[#allocation2 + $0x340] sm:$0x3] %v7130_v1  ;;  %395 = vst [vmem:[#allocation2 + $0x348] sm:$0xff] %v7130_v1  ;;  %6209 = vmatprep.subr.bf16.mxu0 %v7072_v7 }
  0x36   :  { %396 = vst [vmem:[#allocation2 + $0x350] sm:$0xff] %v7130_v1  ;;  %397 = vst [vmem:[#allocation2 + $0x358] sm:$0x3] %v7130_v1  ;;  %v33_v1 = vld [vmem:[%s8826_s0 + $0x68] sm:$0xff] }
  0x37   :  { %399 = vst [vmem:[#allocation2 + $0x19] sm:$0xff] %v226_v35  ;;  %400 = vst [vmem:[#allocation2 + $0x21] sm:$0xff] %v227_v36  ;;  %v104_v12 = vmul.f32 %v7318_v18, %v33_v1  ;;  %v40_v35 = vld [vmem:[%s8826_s0 + $0xa0] sm:$0xff]  ;;  %v41_v36 = vld [vmem:[%s8826_s0 + $0xa8] sm:$0xff] }
  0x38   :  { %401 = vst [vmem:[#allocation2 + $0x31] sm:$0xff] %v228_v48  ;;  %402 = vst [vmem:[#allocation2 + $0x39] sm:$0xff] %v229_v51  ;;  %v242_v48 = vmax.f32 %v7498_v39, 0.0  ;;  %v111_v51 = vmul.f32 %v7318_v18, %v40_v35  ;;  %v112_v54 = vmul.f32 %v7318_v18, %v41_v36  ;;  %v7633_v35 = vadd.f32 %v7323_v19, %v118_v25  ;;  %v7075_v39 = vld [vmem:[%s8825_s3 + $0x178] sm:$0xff]  }
  0x39   :  { %403 = vst [vmem:[#allocation2 + $0x49] sm:$0xff] %v230_v52  ;;  %404 = vst [vmem:[#allocation2 + $0x51] sm:$0xff] %v231_v57  ;;  %v7456_v23 = vadd.f32 %v7323_v19, %v104_v12  ;;  %v243_v52 = vmax.f32 %v7512_v43, 0.0  ;;  %v244_v57 = vmax.f32 %v7534_v50, 0.0  ;;  %v248_v12 = vmax.f32 %v7571_v2, 0.0  ;;  %6210 = vmatpush3.bf16.msra.mxu0 %v7072_v7  ;;  %v64_v7 = vld [vmem:[%s8826_s0 + $0x160] sm:$0xff] }
  0x3a   :  { %405 = vst [vmem:[#allocation2 + $0x61] sm:$0xff] %v232_v62  ;;  %406 = vst [vmem:[#allocation2 + $0x69] sm:$0xff] %v233_v63  ;;  %v7551_v58 = vadd.f32 %v7323_v19, %v111_v51  ;;  %v46_v62 = vld [vmem:[%s8826_s0 + $0xd0] sm:$0xff]  ;;  %v7562_v63 = vpack.c.bf16 %v235_v14, %v234_v6  ;;  %v7568_v1 = vadd.f32 %v7323_v19, %v112_v54  ;;  %v253_v49 = vmax.f32 %v7633_v35, 0.0  ;;  %v7076_v54 = vld [vmem:[%s8825_s3 + $0x20] sm:$0xff]  }
  0x3b   :  { %407 = vst [vmem:[#allocation2 + $0x79] sm:$0xff] %v234_v6  ;;  %408 = vst [vmem:[#allocation2 + $0x81] sm:$0xff] %v235_v14  ;;  %v239_v33 = vmax.f32 %v7456_v23, 0.0  ;;  %v7584_v6 = vadd.f32 %v7323_v19, %v115_v61  ;;  %v117_v14 = vmul.f32 %v7318_v18, %v46_v62  ;;  %v120_v36 = vmul.f32 %v7318_v18, %v49_v16  ;;  %v7078_v16 = vld [vmem:[%s8825_s3 + $0x28] sm:$0xff]  }
  0x3c   :  { %409 = vst [vmem:[#allocation2 + $0x91] sm:$0xff] %v236_v15  ;;  %410 = vst [vmem:[#allocation2 + $0x99] sm:$0xff] %v237_v21  ;;  %v246_v3 = vmax.f32 %v7551_v58, 0.0  ;;  %v247_v11 = vmax.f32 %v7568_v1, 0.0  ;;  %6143 = vmatprep.mubr.bf16.mxu0 %v7562_v63  ;;  %v7671_v61 = vadd.f32 %v7323_v19, %v121_v44  ;;  %v7674_v62 = vadd.f32 %v7323_v19, %v122_v45  ;;  %v60_v44 = vld [vmem:[%s8826_s0 + $0x140] sm:$0xff]  ;;  %v7074_v45 = vld [vmem:[%s8825_s3 + $0x170] sm:$0xff]  }
  0x3d   :  { %411 = vst [vmem:[#allocation2 + $0xa9] sm:$0xff] %v238_v32  ;;  %412 = vst [vmem:[#allocation2 + $0xb1] sm:$0xff] %v239_v33  ;;  %v250_v24 = vmax.f32 %v7584_v6, 0.0  ;;  %v7623_v30 = vadd.f32 %v7323_v19, %v117_v14  ;;  %v7655_v51 = vadd.f32 %v7323_v19, %v120_v36  ;;  %v7680_v59 = vpack.c.bf16 %v239_v33, %v238_v32  ;;  %v58_v14 = vld [vmem:[%s8826_s0 + $0x130] sm:$0xff] }
  0x3e   :  { %413 = vst [vmem:[#allocation2 + $0xc1] sm:$0xff] %v240_v37  ;;  %414 = vst [vmem:[#allocation2 + $0xc9] sm:$0xff] %v241_v38  ;;  %v123_v15 = vmul.f32 %v7318_v18, %v52_v46  ;;  %v124_v21 = vmul.f32 %v7318_v18, %v53_v47  ;;  %v256_v23 = vmax.f32 %v7671_v61, 0.0  ;;  %v257_v32 = vmax.f32 %v7674_v62, 0.0  ;;  %5824 = vmatmul.mubr.bf16.gmra.mrb[8].mxu1 %v7562_v63  ;;  %v2904_v42 = vld [vmem:[#allocation2 + $0x1a] sm:$0xff] }
  0x3f   :  { %415 = vst [vmem:[#allocation2 + $0xd9] sm:$0xff] %v242_v48  ;;  %416 = vst [vmem:[#allocation2 + $0xe1] sm:$0xff] %v243_v52  ;;  %v252_v41 = vmax.f32 %v7623_v30, 0.0  ;;  %v255_v10 = vmax.f32 %v7655_v51, 0.0  ;;  %v125_v33 = vmul.f32 %v7318_v18, %v54_v55  ;;  %5887 = vmatprep.subr.bf16.mxu1 %v7076_v54  ;;  %6144 = vmatmul.mubr.bf16.gmra.mrb[8].mxu0 %v2459_v56  ;;  %v61_v55 = vld [vmem:[%s8826_s0 + $0x148] sm:$0xff] }
  0x40   :  { %417 = vst [vmem:[#allocation2 + $0xf1] sm:$0xff] %v244_v57  ;;  %418 = vst [vmem:[#allocation2 + $0xf9] sm:$0xff] %v245_v0  ;;  %v7708_v9 = vadd.f32 %v7323_v19, %v123_v15  ;;  %v7711_v13 = vadd.f32 %v7323_v19, %v124_v21  ;;  %5827 = vmatprep.mubr.bf16.mxu1 %v2459_v56  ;;  %v126_v63 = vmul.f32 %v7318_v18, %v55_v22  ;;  %v62_v22 = vld [vmem:[%s8826_s0 + $0x150] sm:$0xff] }
  0x41   :  { %419 = vst [vmem:[#allocation2 + $0x109] sm:$0xff] %v246_v3  ;;  %420 = vst [vmem:[#allocation2 + $0x111] sm:$0xff] %v247_v11  ;;  %v7725_v25 = vadd.f32 %v7323_v19, %v125_v33  ;;  %6147 = vmatprep.mubr.bf16.mxu0 %v7680_v59  ;;  %v127_v36 = vmul.f32 %v7318_v18, %v56_v5  ;;  %5888 = vmatpush3.bf16.msra.mxu1 %v7076_v54  ;;  %v63_v5 = vld [vmem:[%s8826_s0 + $0x158] sm:$0xff] }
  0x42   :  { %421 = vst [vmem:[#allocation2 + $0x121] sm:$0xff] %v248_v12  ;;  %422 = vst [vmem:[#allocation2 + $0x129] sm:$0xff] %v249_v17  ;;  %v258_v27 = vmax.f32 %v7708_v9, 0.0  ;;  %v259_v31 = vmax.f32 %v7711_v13, 0.0  ;;  %v7741_v46 = vadd.f32 %v7323_v19, %v126_v63  ;;  %v128_v47 = vmul.f32 %v7318_v18, %v57_v8  ;;  %5889 = vmatprep.subr.bf16.mxu1 %v7078_v16  ;;  %v65_v63 = vld [vmem:[%s8826_s0 + $0x168] sm:$0xff]  ;;  %v83_v9 = vld [vmem:[%s8826_s0 + $0x1f8] sm:$0xff] }
  0x43   :  { %423 = vst [vmem:[#allocation2 + $0x139] sm:$0xff] %v250_v24  ;;  %424 = vst [vmem:[#allocation2 + $0x141] sm:$0xff] %v251_v34  ;;  %v260_v40 = vmax.f32 %v7725_v25, 0.0  ;;  %v2461_v56 = vpack.c.bf16 %v241_v38, %v240_v37  ;;  %v7757_v54 = vadd.f32 %v7323_v19, %v127_v36  ;;  %v129_v15 = vmul.f32 %v7318_v18, %v58_v14  ;;  %v2910_v25 = vld [vmem:[#allocation2 + $0x62] sm:$0xff] }
  0x44   :  { %425 = vst [vmem:[#allocation2 + $0x151] sm:$0xff] %v252_v41  ;;  %426 = vst [vmem:[#allocation2 + $0x159] sm:$0xff] %v253_v49  ;;  %v130_v21 = vmul.f32 %v7318_v18, %v59_v26  ;;  %v7765_v28 = vpack.c.bf16 %v243_v52, %v242_v48  ;;  %v261_v29 = vmax.f32 %v7741_v46, 0.0  ;;  %v7771_v37 = vadd.f32 %v7323_v19, %v128_v47  ;;  %v7120_v46 = vld [vmem:[%s8828_s2] ss:$0 sm:$0xff] }
  0x45   :  { %427 = vst [vmem:[#allocation2 + $0x169] sm:$0xff] %v254_v60  ;;  %428 = vst [vmem:[#allocation2 + $0x171] sm:$0xff] %v255_v10  ;;  %v131_v38 = vmul.f32 %v7318_v18, %v60_v44  ;;  %v262_v43 = vmax.f32 %v7757_v54, 0.0  ;;  %v7782_v48 = vadd.f32 %v7323_v19, %v129_v15  ;;  %v132_v33 = vmul.f32 %v7318_v18, %v61_v55  ;;  %v2914_v54 = vld [vmem:[#allocation2 + $0x92] sm:$0xff] }
  0x46   :  { %429 = vst [vmem:[#allocation2 + $0x181] sm:$0xff] %v256_v23  ;;  %430 = vst [vmem:[#allocation2 + $0x189] sm:$0xff] %v257_v32  ;;  %v7785_v52 = vadd.f32 %v7323_v19, %v130_v21  ;;  %6211 = vmatprep.subr.bf16.mxu0 %v7074_v45  ;;  %v263_v8 = vmax.f32 %v7771_v37, 0.0  ;;  %5890 = vmatpush3.bf16.msra.mxu1 %v7078_v16  ;;  %v133_v47 = vmul.f32 %v7318_v18, %v62_v22  ;;  %v66_v16 = vld [vmem:[%s8826_s0 + $0x170] sm:$0xff]  ;;  %v67_v21 = vld [vmem:[%s8826_s0 + $0x178] sm:$0xff] }
  0x47   :  { %431 = vst [vmem:[#allocation2 + $0x1c9] sm:$0xff] %v258_v27  ;;  %432 = vst [vmem:[#allocation2 + $0x1d1] sm:$0xff] %v259_v31  ;;  %v7798_v14 = vadd.f32 %v7323_v19, %v131_v38  ;;  %5828 = vmatmul.mubr.bf16.gmra.mrb[12].mxu1 %v7680_v59  ;;  %v8833_v26 = vmax.f32 %v7782_v48, 0.0  ;;  %v7809_v44 = vadd.f32 %v7323_v19, %v132_v33  ;;  %v7080_v59 = vld [vmem:[%s8825_s3 + $0x30] sm:$0xff]   ;;  %6148 = vmatmul.mubr.bf16.gmra.mrb[12].mxu0 %v2461_v56  ;;  %v7838_v33 = vld [vmem:[%s8825_s3 + $0x180] sm:$0xff]  }
  0x48   :  { %433 = vst [vmem:[#allocation2 + $0x1e1] sm:$0xff] %v260_v40  ;;  %434 = vst [vmem:[#allocation2 + $0x1e9] sm:$0xff] %v261_v29  ;;  %v8831_v36 = vmax.f32 %v7785_v52, 0.0  ;;  %5831 = vmatprep.mubr.bf16.mxu1 %v2461_v56  ;;  %v134_v15 = vmul.f32 %v7318_v18, %v63_v5  ;;  %6151 = vmatprep.mubr.bf16.mxu0 %v7765_v28  ;;  %v7832_v38 = vadd.f32 %v7323_v19, %v133_v47  ;;  %v69_v47 = vld [vmem:[%s8826_s0 + $0x188] sm:$0xff]  ;;  %v2915_v37 = vld [vmem:[#allocation2 + $0x9a] sm:$0xff] }
  0x49   :  { %435 = vst [vmem:[#allocation2 + $0x1f9] sm:$0xff] %v262_v43  ;;  %436 = vst [vmem:[#allocation2 + $0x201] sm:$0xff] %v263_v8  ;;  %v8832_v55 = vmax.f32 %v7798_v14, 0.0  ;;  %6212 = vmatpush3.bf16.msra.mxu0 %v7074_v45  ;;  %v267_v56 = vmax.f32 %v7809_v44, 0.0  ;;  %v135_v22 = vmul.f32 %v7318_v18, %v64_v7  ;;  %v136_v5 = vmul.f32 %v7318_v18, %v65_v63  ;;  %v68_v7 = vld [vmem:[%s8826_s0 + $0x180] sm:$0xff] }
  0x4a   :  { %437 = vst [vmem:[#allocation2 + $0x211] sm:$0xff] %v8833_v26  ;;  %438 = vst [vmem:[#allocation2 + $0x219] sm:$0xff] %v8831_v36  ;;  %6213 = vmatprep.subr.bf16.mxu0 %v7075_v39  ;;  %v7843_v45 = vadd.f32 %v7323_v19, %v134_v15  ;;  %v137_v36 = vmul.f32 %v7318_v18, %v66_v16  ;;  %v8838_v63 = vmax.f32 %v7832_v38, 0.0  ;;  %5891 = vmatprep.subr.bf16.mxu1 %v7080_v59  ;;  %v2920_v44 = vld [vmem:[#allocation2 + $0xda] sm:$0xff] }
  0x4b   :  { %439 = vst [vmem:[#allocation2 + $0x229] sm:$0xff] %v8832_v55  ;;  %v2463_v55 = vpack.c.bf16 %v245_v0, %v244_v57  ;;  %440 = vst [vmem:[#allocation2 + $0x231] sm:$0xff] %v267_v56  ;;  %v7861_v16 = vadd.f32 %v7323_v19, %v135_v22  ;;  %v138_v15 = vmul.f32 %v7318_v18, %v67_v21  ;;  %5892 = vmatpush3.bf16.msra.mxu1 %v7080_v59  ;;  %v70_v0 = vld [vmem:[%s8826_s0 + $0x190] sm:$0xff]  ;;  %v72_v21 = vld [vmem:[%s8826_s0 + $0x1a0] sm:$0xff] }
  0x4c   :  { %v7868_v26 = vpack.c.bf16 %v247_v11, %v246_v3  ;;  %v8834_v50 = vmax.f32 %v7843_v45, 0.0  ;;  %v7872_v53 = vadd.f32 %v7323_v19, %v136_v5  ;;  %v7875_v57 = vadd.f32 %v7323_v19, %v137_v36  ;;  %441 = vst [vmem:[#allocation2 + $0x241] sm:$0xff] %v8838_v63  ;;  %v71_v36 = vld [vmem:[%s8826_s0 + $0x198] sm:$0xff]  ;;  %v76_v63 = vld [vmem:[%s8826_s0 + $0x1c0] sm:$0xff] }
  0x4d   :  { %6214 = vmatpush3.bf16.msra.mxu0 %v7075_v39  ;;  %v8837_v58 = vmax.f32 %v7861_v16, 0.0  ;;  %v7884_v1 = vadd.f32 %v7323_v19, %v138_v15  ;;  %v139_v3 = vmul.f32 %v7318_v18, %v68_v7  ;;  %v140_v11 = vmul.f32 %v7318_v18, %v69_v47  ;;  %v7082_v22 = vld [vmem:[%s8825_s3 + $0x38] sm:$0xff]  }
  0x4e   :  { %6279 = vmatprep.subr.bf16.mxu0 %v7838_v33  ;;  %442 = vst [vmem:[#allocation2 + $0x249] sm:$0xff] %v8834_v50  ;;  %v8836_v39 = vmax.f32 %v7872_v53, 0.0  ;;  %v8835_v59 = vmax.f32 %v7875_v57, 0.0  ;;  %v141_v15 = vmul.f32 %v7318_v18, %v70_v0  ;;  %v73_v50 = vld [vmem:[%s8826_s0 + $0x1a8] sm:$0xff]  ;;  %v75_v0 = vld [vmem:[%s8826_s0 + $0x1b8] sm:$0xff]  ;;  %5893 = vmatprep.subr.bf16.mxu1 %v7082_v22  ;;  %v2466_v2 = vpack.c.bf16 %v251_v34, %v250_v24 }
  0x4f   :  { %5832 = vmatmul.mubr.bf16.gmra.mrb[16].mxu1 %v7765_v28  ;;  %443 = vst [vmem:[#allocation2 + $0x259] sm:$0xff] %v8837_v58  ;;  %v8839_v5 = vmax.f32 %v7884_v1, 0.0  ;;  %v7907_v7 = vadd.f32 %v7323_v19, %v139_v3  ;;  %v7910_v47 = vadd.f32 %v7323_v19, %v140_v11  ;;  %6152 = vmatmul.mubr.bf16.gmra.mrb[16].mxu0 %v2463_v55  ;;  %v74_v3 = vld [vmem:[%s8826_s0 + $0x1b0] sm:$0xff] }
  0x50   :  { %5835 = vmatprep.mubr.bf16.mxu1 %v2463_v55  ;;  %444 = vst [vmem:[#allocation2 + $0x261] sm:$0xff] %v8836_v39  ;;  %445 = vst [vmem:[#allocation2 + $0x271] sm:$0xff] %v8835_v59  ;;  %v142_v28 = vmul.f32 %v7318_v18, %v71_v36  ;;  %6155 = vmatprep.mubr.bf16.mxu0 %v7868_v26  ;;  %v7933_v59 = vadd.f32 %v7323_v19, %v141_v15 }
  0x51   :  { %446 = vst [vmem:[#allocation2 + $0x279] sm:$0xff] %v8839_v5  ;;  %v8844_v55 = vmax.f32 %v7907_v7, 0.0  ;;  %v8842_v11 = vmax.f32 %v7910_v47, 0.0  ;;  %v143_v39 = vmul.f32 %v7318_v18, %v72_v21  ;;  %v144_v58 = vmul.f32 %v7318_v18, %v73_v50  ;;  %v77_v5 = vld [vmem:[%s8826_s0 + $0x1c8] sm:$0xff]  ;;  %5894 = vmatpush3.bf16.msra.mxu1 %v7082_v22  ;;  %v7971_v22 = vld [vmem:[%s8825_s3 + $0x80] sm:$0xff]  }
  0x52   :  { %v7936_v36 = vadd.f32 %v7323_v19, %v142_v28  ;;  %v2465_v15 = vpack.c.bf16 %v249_v17, %v248_v12  ;;  %v8841_v50 = vmax.f32 %v7933_v59, 0.0  ;;  %v145_v21 = vmul.f32 %v7318_v18, %v74_v3  ;;  %5959 = vmatprep.subr.bf16.mxu1 %v7971_v22 }
  0x53   :  { %447 = vst [vmem:[#allocation2 + $0x289] sm:$0xff] %v8844_v55  ;;  %448 = vst [vmem:[#allocation2 + $0x291] sm:$0xff] %v8842_v11  ;;  %v146_v28 = vmul.f32 %v7318_v18, %v75_v0  ;;  %v7963_v12 = vadd.f32 %v7323_v19, %v143_v39  ;;  %v7966_v17 = vadd.f32 %v7323_v19, %v144_v58  ;;  %v78_v58 = vld [vmem:[%s8826_s0 + $0x1d0] sm:$0xff]  ;;  %v79_v39 = vld [vmem:[%s8826_s0 + $0x1d8] sm:$0xff] }
  0x54   :  { %v8840_v4 = vmax.f32 %v7936_v36, 0.0  ;;  %449 = vst [vmem:[#allocation2 + $0x2a1] sm:$0xff] %v8841_v50  ;;  %v7976_v6 = vadd.f32 %v7323_v19, %v145_v21  ;;  %v147_v24 = vmul.f32 %v7318_v18, %v76_v63  ;;  %v148_v34 = vmul.f32 %v7318_v18, %v77_v5  ;;  %v81_v50 = vld [vmem:[%s8826_s0 + $0x1e8] sm:$0xff] }
  0x55   :  { %v7979_v20 = vadd.f32 %v7323_v19, %v146_v28  ;;  %v8843_v3 = vmax.f32 %v7963_v12, 0.0  ;;  %v8845_v0 = vmax.f32 %v7966_v17, 0.0  ;;  %v2469_v51 = vpack.c.bf16 %v257_v32, %v256_v23  ;;  %v7079_v23 = vld [vmem:[%s8825_s3 + $0x188] sm:$0xff]   ;;  %v82_v32 = vld [vmem:[%s8826_s0 + $0x1f0] sm:$0xff] }
  0x56   :  { %450 = vst [vmem:[#allocation2 + $0x2a9] sm:$0xff] %v8840_v4  ;;  %v280_v63 = vmax.f32 %v7976_v6, 0.0  ;;  %v218_v21 = vadd.f32 %v7323_v19, %v147_v24  ;;  %v219_v28 = vadd.f32 %v7323_v19, %v148_v34  ;;  %v80_v4 = vld [vmem:[%s8826_s0 + $0x1e0] sm:$0xff]  ;;  %v150_v24 = vmul.f32 %v7318_v18, %v79_v39  ;;  %v2935_v6 = vld [vmem:[#allocation2 + $0x18a] sm:$0xff] }
  0x57   :  { %5836 = vmatmul.mubr.bf16.gmra.mrb[20].mxu1 %v7868_v26  ;;  %v8846_v5 = vmax.f32 %v7979_v20, 0.0  ;;  %6156 = vmatmul.mubr.bf16.gmra.mrb[20].mxu0 %v2465_v15  ;;  %451 = vst [vmem:[#allocation2 + $0x2b9] sm:$0xff] %v8843_v3  ;;  %452 = vst [vmem:[#allocation2 + $0x2c1] sm:$0xff] %v8845_v0  ;;  %v149_v26 = vmul.f32 %v7318_v18, %v78_v58  ;;  %v151_v55 = vmul.f32 %v7318_v18, %v80_v4  ;;  %v2907_v4 = vld [vmem:[#allocation2 + $0x3a] sm:$0xff] }
  0x58   :  { %5839 = vmatprep.mubr.bf16.mxu1 %v2465_v15  ;;  %6159 = vmatprep.mubr.bf16.mxu0 %v2466_v2  ;;  %453 = vst [vmem:[#allocation2 + $0x2d1] sm:$0xff] %v280_v63  ;;  %v282_v34 = vmax.f32 %v218_v21, 0.0  ;;  %v283_v11 = vmax.f32 %v219_v28, 0.0  ;;  %v221_v3 = vadd.f32 %v7323_v19, %v150_v24  ;;  %v152_v0 = vmul.f32 %v7318_v18, %v81_v50 }
  0x59   :  { %454 = vst [vmem:[#allocation2 + $0x2d9] sm:$0xff] %v8846_v5  ;;  %v220_v15 = vadd.f32 %v7323_v19, %v149_v26  ;;  %v2467_v58 = vpack.c.bf16 %v253_v49, %v252_v41  ;;  %v222_v28 = vadd.f32 %v7323_v19, %v151_v55  ;;  %v2468_v50 = vpack.c.bf16 %v255_v10, %v254_v60  ;;  %v608_v55 = vld [vmem:[#allocation2 + $0x1b9] sm:$0xff] }
  0x5a   :  { %455 = vst [vmem:[#allocation2 + $0x2e9] sm:$0xff] %v282_v34  ;;  %456 = vst [vmem:[#allocation2 + $0x2f1] sm:$0xff] %v283_v11  ;;  %v8023_v39 = vpack.c.bf16 %v283_v11, %v282_v34  ;;  %v285_v21 = vmax.f32 %v221_v3, 0.0  ;;  %v223_v26 = vadd.f32 %v7323_v19, %v152_v0  ;;  %v607_v19 = vld [vmem:[#allocation2 + $0x1b1] sm:$0xff]  ;;  %v2905_v11 = vld [vmem:[#allocation2 + $0x22] sm:$0xff]  ;;  %v657_v61 = vpack.c.bf16 %v261_v29, %v260_v40 }
  0x5b   :  { %v284_v5 = vmax.f32 %v220_v15, 0.0  ;;  %v286_v35 = vmax.f32 %v222_v28, 0.0  ;;  %v655_v60 = vpack.c.bf16 %v608_v55, %v607_v19  ;;  %v2968_v10 = vpack.c.bf16 %v2905_v11, %v2904_v42  ;;  %v2908_v3 = vld [vmem:[#allocation2 + $0x4a] sm:$0xff]  ;;  %v2909_v0 = vld [vmem:[#allocation2 + $0x52] sm:$0xff]  ;;  %v2912_v29 = vld [vmem:[#allocation2 + $0x7a] sm:$0xff] }
  0x5c   :  { %458 = vst [vmem:[#allocation2 + $0x309] sm:$0xff] %v285_v21  ;;  %v287_v41 = vmax.f32 %v223_v26, 0.0  ;;  %v2970_v62 = vpack.c.bf16 %v2909_v0, %v2908_v3  ;;  %v153_v13 = vmul.f32 %v7318_v18, %v82_v32  ;;  %v2913_v34 = vld [vmem:[#allocation2 + $0x82] sm:$0xff]  ;;  %v7081_v15 = vld [vmem:[%s8825_s3 + $0x190] sm:$0xff]   ;;  %v8847_v28 = vmax.f32 %v7782_v48, 0.0 }
  0x5d   :  { %457 = vst [vmem:[#allocation2 + $0x301] sm:$0xff] %v284_v5  ;;  %v8031_v30 = vpack.c.bf16 %v285_v21, %v284_v5  ;;  %459 = vst [vmem:[#allocation2 + $0x319] sm:$0xff] %v286_v35  ;;  %v656_v5 = vpack.c.bf16 %v259_v31, %v258_v27  ;;  %v154_v27 = vmul.f32 %v7318_v18, %v83_v9  ;;  %v2911_v31 = vld [vmem:[#allocation2 + $0x6a] sm:$0xff]  ;;  %v8848_v26 = vmax.f32 %v7785_v52, 0.0  ;;  %v2917_v48 = vld [vmem:[#allocation2 + $0xb2] sm:$0xff] }
  0x5e   :  { %460 = vst [vmem:[#allocation2 + $0x321] sm:$0xff] %v287_v41  ;;  %v8033_v49 = vpack.c.bf16 %v287_v41, %v286_v35  ;;  %v224_v40 = vadd.f32 %v7120_v46, %v153_v13  ;;  %v658_v18 = vpack.c.bf16 %v263_v8, %v262_v43  ;;  %v2971_v21 = vpack.c.bf16 %v2911_v31, %v2910_v25  ;;  %v7083_v35 = vld [vmem:[%s8825_s3 + $0x198] sm:$0xff]   ;;  %v2916_v43 = vld [vmem:[#allocation2 + $0xaa] sm:$0xff]  ;;  %v7085_v52 = vld [vmem:[%s8825_s3 + $0x1a0] sm:$0xff]  }
  0x5f   :  { %5840 = vmatmul.mubr.bf16.gmra.mrb[24].mxu1 %v2466_v2  ;;  %6160 = vmatmul.mubr.bf16.gmra.mrb[24].mxu0 %v2467_v58  ;;  %v2906_v2 = vld [vmem:[#allocation2 + $0x32] sm:$0xff]  ;;  %v2972_v19 = vpack.c.bf16 %v2913_v34, %v2912_v29  ;;  %v8849_v8 = vmax.f32 %v7798_v14, 0.0  ;;  %v2973_v42 = vpack.c.bf16 %v2915_v37, %v2914_v54  ;;  %v8850_v11 = vmax.f32 %v7832_v38, 0.0  ;;  %v2918_v14 = vld [vmem:[#allocation2 + $0xc2] sm:$0xff]  ;;  %v2924_v9 = vld [vmem:[#allocation2 + $0x10a] sm:$0xff] }
  0x60   :  { %5843 = vmatprep.mubr.bf16.mxu1 %v2467_v58  ;;  %6163 = vmatprep.mubr.bf16.mxu0 %v2468_v50  ;;  %v2969_v24 = vpack.c.bf16 %v2907_v4, %v2906_v2  ;;  %v225_v58 = vadd.f32 %v7120_v46, %v154_v27  ;;  %v7087_v2 = vld [vmem:[%s8825_s3 + $0x1a8] sm:$0xff]   ;;  %v7089_v38 = vld [vmem:[%s8825_s3 + $0x1b0] sm:$0xff]   ;;  %v8853_v3 = vmax.f32 %v7872_v53, 0.0  ;;  %v2923_v53 = vld [vmem:[#allocation2 + $0xfa] sm:$0xff]  ;;  %v8857_v25 = vmax.f32 %v7910_v47, 0.0 }
  0x61   :  { %v660_v55 = vpack.c.bf16 %v267_v56, %v8849_v8  ;;  %v2919_v4 = vld [vmem:[#allocation2 + $0xca] sm:$0xff]  ;;  %v2921_v56 = vld [vmem:[#allocation2 + $0xe2] sm:$0xff]  ;;  %v2925_v13 = vld [vmem:[#allocation2 + $0x112] sm:$0xff]  ;;  %v8858_v46 = vmax.f32 %v7933_v59, 0.0  ;;  %v8860_v47 = vmax.f32 %v7963_v12, 0.0 }
  0x62   :  { %v289_v41 = vmax.f32 %v225_v58, 0.0  ;;  %v2976_v32 = vpack.c.bf16 %v2921_v56, %v2920_v44  ;;  %v2978_v34 = vpack.c.bf16 %v2925_v13, %v2924_v9  ;;  %v2927_v58 = vld [vmem:[#allocation2 + $0x12a] sm:$0xff]  ;;  %v465_v8 = vld [vmem:[#allocation2 + $0x18] sm:$0xff]  ;;  %v474_v9 = vld [vmem:[#allocation2 + $0x80] sm:$0xff] }
  0x63   :  { %v469_v44 = vld [vmem:[#allocation2 + $0x48] sm:$0xff]  ;;  %v470_v56 = vld [vmem:[#allocation2 + $0x50] sm:$0xff] }
  0x64   :  { %462 = vst [vmem:[#allocation2 + $0x339] sm:$0xff] %v289_v41  ;;  %v2932_v41 = vld [vmem:[#allocation2 + $0x16a] sm:$0xff]  ;;  %v2946_v13 = vld [vmem:[#allocation2 + $0x242] sm:$0xff] }
  0x67   :  { %5844 = vmatmul.mubr.bf16.gmra.mrb[28].mxu1 %v2468_v50  ;;  %6164 = vmatmul.mubr.bf16.gmra.mrb[28].mxu0 %v2469_v51  ;;  %v659_v50 = vpack.c.bf16 %v8848_v26, %v8847_v28  ;;  %v8851_v51 = vmax.f32 %v7843_v45, 0.0  ;;  %v8852_v45 = vmax.f32 %v7861_v16, 0.0  ;;  %v2922_v16 = vld [vmem:[#allocation2 + $0xf2] sm:$0xff] }
  0x68   :  { %5847 = vmatprep.mubr.bf16.mxu1 %v655_v60  ;;  %6215 = vmatprep.mubr.bf16.mxu0 %v2968_v10  ;;  %v2974_v10 = vpack.c.bf16 %v2917_v48, %v2916_v43  ;;  %v2977_v31 = vpack.c.bf16 %v2923_v53, %v2922_v16  ;;  %v7121_v43 = vld [vmem:[#allocation2] sm:$0xff]  ;;  %v7090_v16 = vld [vmem:[%s8825_s3 + $0x98] sm:$0xff]  }
  0x69   :  { %v661_v60 = vpack.c.bf16 %v8851_v51, %v8850_v11  ;;  %v662_v0 = vpack.c.bf16 %v8853_v3, %v8852_v45  ;;  %v8128_v48 = vpack.c.bf16 %v7121_v43, %v7121_v43  ;;  %v468_v11 = vld [vmem:[#allocation2 + $0x38] sm:$0xff]  ;;  %v471_v3 = vld [vmem:[#allocation2 + $0x60] sm:$0xff] }
  0x6a   :  { %v2940_v51 = vld [vmem:[#allocation2 + $0x1fa] sm:$0xff] }
  0x6b   :  { %v2943_v45 = vld [vmem:[#allocation2 + $0x21a] sm:$0xff] }
  0x6c   :  { %v473_v53 = vld [vmem:[#allocation2 + $0x78] sm:$0xff] }
  0x6d   :  { %v484_v43 = vld [vmem:[#allocation2 + $0xf8] sm:$0xff] }
  0x6f   :  { %5848 = vmatmul.mubr.bf16.gmra.mrb[32].mxu1 %v656_v5  ;;  %6216 = vmatmul.mubr.bf16.vlgmr.msra.gmra.mrb[0].mxu0 %v2969_v24  ;;  %v2975_v5 = vpack.c.bf16 %v2919_v4, %v2918_v14  ;;  %v8854_v24 = vmax.f32 %v7875_v57, 0.0  ;;  %v8107_v57 = vld [vmem:[%s8825_s3 + $0x1c0] sm:$0xff]  }
  0x70   :  { %5851 = vmatprep.mubr.bf16.mxu1 %v657_v61  ;;  %6280 = vmatpush3.bf16.msra.mxu0 %v7838_v33  ;;  %v288_v33 = vmax.f32 %v224_v40, 0.0  ;;  %v8855_v61 = vmax.f32 %v7884_v1, 0.0  ;;  %v8856_v1 = vmax.f32 %v7907_v7, 0.0  ;;  %v8859_v40 = vmax.f32 %v7936_v36, 0.0  ;;  %v2928_v7 = vld [vmem:[#allocation2 + $0x13a] sm:$0xff] }
  0x71   :  { %6219 = vmatprep.mubr.bf16.mxu0 %v2970_v62  ;;  %6281 = vmatprep.subr.bf16.mxu0 %v7079_v23  ;;  %v8862_v36 = vmax.f32 %v7979_v20, 0.0  ;;  %v2936_v20 = vld [vmem:[#allocation2 + $0x1ca] sm:$0xff] }
  0x72   :  { %461 = vst [vmem:[#allocation2 + $0x331] sm:$0xff] %v288_v33  ;;  %v663_v62 = vpack.c.bf16 %v8855_v61, %v8854_v24  ;;  %v664_v27 = vpack.c.bf16 %v8857_v25, %v8856_v1  ;;  %v665_v29 = vpack.c.bf16 %v8859_v40, %v8858_v46  ;;  %v8861_v33 = vmax.f32 %v7966_v17, 0.0  ;;  %v2934_v17 = vld [vmem:[#allocation2 + $0x182] sm:$0xff]  ;;  %v2944_v24 = vld [vmem:[#allocation2 + $0x22a] sm:$0xff]  ;;  %v2945_v61 = vld [vmem:[#allocation2 + $0x232] sm:$0xff] }
  0x73   :  { %v667_v28 = vpack.c.bf16 %v8862_v36, %v280_v63  ;;  %v2937_v63 = vld [vmem:[#allocation2 + $0x1d2] sm:$0xff]  ;;  %v2983_v37 = vpack.c.bf16 %v2935_v6, %v2934_v17  ;;  %v2947_v1 = vld [vmem:[#allocation2 + $0x24a] sm:$0xff]  ;;  %v2949_v46 = vld [vmem:[#allocation2 + $0x262] sm:$0xff] }
  0x74   :  { %6282 = vmatpush3.bf16.msra.mxu0 %v7079_v23  ;;  %v7091_v23 = vld [vmem:[%s8825_s3 + $0x1b8] sm:$0xff]   ;;  %v666_v59 = vpack.c.bf16 %v8861_v33, %v8860_v47  ;;  %v475_v25 = vld [vmem:[#allocation2 + $0x90] sm:$0xff]  ;;  %v7092_v40 = vld [vmem:[%s8825_s3 + $0xa0] sm:$0xff]  }
  0x75   :  { %6283 = vmatprep.subr.bf16.mxu0 %v7081_v15  ;;  %v478_v47 = vld [vmem:[#allocation2 + $0xb0] sm:$0xff]  ;;  %v480_v36 = vld [vmem:[#allocation2 + $0xc8] sm:$0xff]  ;;  %v481_v17 = vld [vmem:[#allocation2 + $0xd8] sm:$0xff] }
  0x76   :  { %v2950_v33 = vld [vmem:[#allocation2 + $0x272] sm:$0xff]  ;;  %v482_v6 = vld [vmem:[#allocation2 + $0xe0] sm:$0xff] }
  0x77   :  { %5852 = vmatmul.mubr.bf16.gmra.mrb[36].mxu1 %v658_v18  ;;  %6220 = vmatmul.mubr.bf16.gmra.mrb[4].mxu0 %v2971_v21  ;;  %v2929_v18 = vld [vmem:[#allocation2 + $0x142] sm:$0xff] }
  0x78   :  { %5855 = vmatprep.mubr.bf16.mxu1 %v659_v50  ;;  %6223 = vmatprep.mubr.bf16.mxu0 %v2972_v19  ;;  %v2980_v26 = vpack.c.bf16 %v2929_v18, %v2928_v7  ;;  %v2930_v50 = vld [vmem:[#allocation2 + $0x152] sm:$0xff]  ;;  %v7094_v7 = vld [vmem:[%s8825_s3 + $0xa8] sm:$0xff]  }
  0x79   :  { %6284 = vmatpush3.bf16.msra.mxu0 %v7081_v15  ;;  %v2926_v15 = vld [vmem:[#allocation2 + $0x122] sm:$0xff]  ;;  %v2933_v19 = vld [vmem:[#allocation2 + $0x172] sm:$0xff] }
  0x7a   :  { %6285 = vmatprep.subr.bf16.mxu0 %v7083_v35  ;;  %v2979_v21 = vpack.c.bf16 %v2927_v58, %v2926_v15  ;;  %v2982_v12 = vpack.c.bf16 %v2933_v19, %v2932_v41  ;;  %v477_v18 = vld [vmem:[#allocation2 + $0xa8] sm:$0xff] }
  0x7d   :  { %6286 = vmatpush3.bf16.msra.mxu0 %v7083_v35  ;;  %v2931_v35 = vld [vmem:[#allocation2 + $0x15a] sm:$0xff] }
  0x7e   :  { %6287 = vmatprep.subr.bf16.mxu0 %v7085_v52  ;;  %v2981_v54 = vpack.c.bf16 %v2931_v35, %v2930_v50  ;;  %v7096_v50 = vld [vmem:[%s8825_s3 + $0xb0] sm:$0xff]   ;;  %v8166_v35 = vpack.c.bf16 %v478_v47, %v477_v18  ;;  %v497_v18 = vld [vmem:[#allocation2 + $0x1c8] sm:$0xff] }
  0x7f   :  { %5856 = vmatmul.mubr.bf16.gmra.mrb[40].mxu1 %v660_v55  ;;  %6224 = vmatmul.mubr.bf16.gmra.mrb[8].mxu0 %v2973_v42  ;;  %v2938_v55 = vld [vmem:[#allocation2 + $0x1e2] sm:$0xff]  ;;  %v467_v42 = vld [vmem:[#allocation2 + $0x30] sm:$0xff] }
  0x80   :  { %5859 = vmatprep.mubr.bf16.mxu1 %v661_v60  ;;  %6227 = vmatprep.mubr.bf16.mxu0 %v2974_v10  ;;  %v2941_v60 = vld [vmem:[#allocation2 + $0x202] sm:$0xff]  ;;  %v8132_v14 = vpack.c.bf16 %v468_v11, %v467_v42  ;;  %v498_v47 = vld [vmem:[#allocation2 + $0x1d0] sm:$0xff] }
  0x81   :  { %6288 = vmatpush3.bf16.msra.mxu0 %v7085_v52  ;;  %v2984_v52 = vpack.c.bf16 %v2937_v63, %v2936_v20  ;;  %v2986_v4 = vpack.c.bf16 %v2941_v60, %v2940_v51  ;;  %v2954_v20 = vld [vmem:[#allocation2 + $0x2a2] sm:$0xff]  ;;  %v2955_v63 = vld [vmem:[#allocation2 + $0x2aa] sm:$0xff] }
  0x82   :  { %6289 = vmatprep.subr.bf16.mxu0 %v7087_v2  ;;  %v485_v51 = vld [vmem:[#allocation2 + $0x108] sm:$0xff]  ;;  %v486_v60 = vld [vmem:[#allocation2 + $0x110] sm:$0xff] }
  0x85   :  { %6290 = vmatpush3.bf16.msra.mxu0 %v7087_v2 }
  0x86   :  { %6291 = vmatprep.subr.bf16.mxu0 %v7089_v38 }
  0x87   :  { %5860 = vmatmul.mubr.bf16.gmra.mrb[44].mxu1 %v662_v0  ;;  %6228 = vmatmul.mubr.bf16.gmra.mrb[12].mxu0 %v2975_v5  ;;  %v472_v0 = vld [vmem:[#allocation2 + $0x68] sm:$0xff]  ;;  %v7088_v5 = vld [vmem:[%s8825_s3 + $0x90] sm:$0xff]  }
  0x88   :  { %5863 = vmatprep.mubr.bf16.mxu1 %v663_v62  ;;  %6231 = vmatprep.mubr.bf16.mxu0 %v2976_v32  ;;  %v8142_v62 = vpack.c.bf16 %v470_v56, %v469_v44  ;;  %v8144_v32 = vpack.c.bf16 %v472_v0, %v471_v3  ;;  %v2960_v44 = vld [vmem:[#allocation2 + $0x2ea] sm:$0xff]  ;;  %v2961_v56 = vld [vmem:[#allocation2 + $0x2f2] sm:$0xff] }
  0x89   :  { %6292 = vmatpush3.bf16.msra.mxu0 %v7089_v38  ;;  %v2942_v38 = vld [vmem:[#allocation2 + $0x212] sm:$0xff]  ;;  %v2996_v0 = vpack.c.bf16 %v2961_v56, %v2960_v44 }
  0x8a   :  { %6293 = vmatprep.subr.bf16.mxu0 %v7091_v23 }
  0x8d   :  { %6294 = vmatpush3.bf16.msra.mxu0 %v7091_v23  ;;  %v2987_v23 = vpack.c.bf16 %v2943_v45, %v2942_v38  ;;  %v8187_v38 = vpack.c.bf16 %v486_v60, %v485_v51 }
  0x8e   :  { %6359 = vmatprep.subr.bf16.mxu0 %v8107_v57 }
  0x8f   :  { %5864 = vmatmul.mubr.bf16.gmra.mrb[48].mxu1 %v664_v27  ;;  %6232 = vmatmul.mubr.bf16.gmra.mrb[16].mxu0 %v2977_v31  ;;  %v476_v27 = vld [vmem:[#allocation2 + $0x98] sm:$0xff] }
  0x90   :  { %5867 = vmatprep.mubr.bf16.mxu1 %v665_v29  ;;  %6235 = vmatprep.mubr.bf16.mxu0 %v2978_v34  ;;  %v2948_v31 = vld [vmem:[#allocation2 + $0x25a] sm:$0xff]  ;;  %v8154_v29 = vpack.c.bf16 %v474_v9, %v473_v53  ;;  %v2989_v34 = vpack.c.bf16 %v2947_v1, %v2946_v13  ;;  %v8156_v15 = vpack.c.bf16 %v476_v27, %v475_v25  ;;  %v2965_v9 = vld [vmem:[#allocation2 + $0x322] sm:$0xff] }
  0x91   :  { %v2990_v58 = vpack.c.bf16 %v2949_v46, %v2948_v31  ;;  %v2964_v53 = vld [vmem:[#allocation2 + $0x31a] sm:$0xff]  ;;  %v493_v31 = vld [vmem:[#allocation2 + $0x168] sm:$0xff]  ;;  %v494_v46 = vld [vmem:[#allocation2 + $0x170] sm:$0xff] }
  0x92   :  { %v2998_v27 = vpack.c.bf16 %v2965_v9, %v2964_v53 }
  0x97   :  { %5868 = vmatmul.mubr.bf16.gmra.mrb[52].mxu1 %v666_v59  ;;  %6236 = vmatmul.mubr.bf16.gmra.mrb[20].mxu0 %v2979_v21  ;;  %v2951_v59 = vld [vmem:[#allocation2 + $0x27a] sm:$0xff] }
  0x98   :  { %5871 = vmatprep.mubr.bf16.mxu1 %v667_v28  ;;  %6239 = vmatprep.mubr.bf16.mxu0 %v2980_v26  ;;  %v479_v21 = vld [vmem:[#allocation2 + $0xc0] sm:$0xff]  ;;  %v2952_v28 = vld [vmem:[#allocation2 + $0x28a] sm:$0xff]  ;;  %v2953_v26 = vld [vmem:[#allocation2 + $0x292] sm:$0xff]  ;;  %v2991_v41 = vpack.c.bf16 %v2951_v59, %v2950_v33 }
  0x99   :  { %v8168_v19 = vpack.c.bf16 %v480_v36, %v479_v21  ;;  %v499_v33 = vld [vmem:[#allocation2 + $0x1e0] sm:$0xff]  ;;  %v500_v59 = vld [vmem:[#allocation2 + $0x1e8] sm:$0xff]  ;;  %v544_v21 = vpack.c.bf16 %v498_v47, %v497_v18 }
  0x9a   :  { %v8204_v36 = vpack.c.bf16 %v500_v59, %v499_v33  ;;  %v1367_v18 = vld [vmem:[#allocation2 + $0x3a] sm:$0xff]  ;;  %v7102_v59 = vld [vmem:[%s8825_s3 + $0xc8] sm:$0xff]  }
  0x9f   :  { %5872 = vmatmul.mubr.bf16.gmra.mrb[56].mxu1 %v8023_v39  ;;  %6240 = vmatmul.mubr.bf16.gmra.mrb[24].mxu0 %v2981_v54  ;;  %v466_v39 = vld [vmem:[#allocation2 + $0x20] sm:$0xff]  ;;  %v2992_v54 = vpack.c.bf16 %v2953_v26, %v2952_v28  ;;  %v7095_v28 = vld [vmem:[%s8825_s3 + $0x1c8] sm:$0xff]   ;;  %v501_v26 = vld [vmem:[#allocation2 + $0x1f8] sm:$0xff] }
  0xa0   :  { %5875 = vmatprep.mubr.bf16.mxu1 %v8031_v30  ;;  %6243 = vmatprep.mubr.bf16.mxu0 %v2982_v12  ;;  %v2939_v30 = vld [vmem:[#allocation2 + $0x1ea] sm:$0xff]  ;;  %v528_v10 = vpack.c.bf16 %v466_v39, %v465_v8  ;;  %v7098_v12 = vld [vmem:[%s8825_s3 + $0xb8] sm:$0xff]   ;;  %v2957_v8 = vld [vmem:[#allocation2 + $0x2c2] sm:$0xff] }
  0xa1   :  { %v2985_v2 = vpack.c.bf16 %v2939_v30, %v2938_v55  ;;  %v8178_v39 = vld [vmem:[%s8825_s3 + $0xc0] sm:$0xff]   ;;  %v8180_v55 = vpack.c.bf16 %v482_v6, %v481_v17  ;;  %v2993_v30 = vpack.c.bf16 %v2955_v63, %v2954_v20  ;;  %v508_v20 = vld [vmem:[#allocation2 + $0x248] sm:$0xff] }
  0xa2   :  { %v507_v6 = vld [vmem:[#allocation2 + $0x240] sm:$0xff] }
  0xa3   :  { %v7101_v63 = vld [vmem:[%s8825_s3 + $0x1e0] sm:$0xff]  }
  0xa7   :  { %5876 = vmatmul.mubr.bf16.gmra.mrb[60].mxu1 %v8033_v49  ;;  %6244 = vmatmul.mubr.bf16.gmra.mrb[28].mxu0 %v2983_v37  ;;  %v7086_v49 = vld [vmem:[%s8825_s3 + $0x88] sm:$0xff]   ;;  %v483_v37 = vld [vmem:[#allocation2 + $0xf0] sm:$0xff] }
  0xa8   :  { %5895 = vmatprep.mubr.bf16.mxu1 %v8128_v48  ;;  %6247 = vmatprep.mubr.bf16.mxu0 %v2984_v52  ;;  %v2956_v52 = vld [vmem:[#allocation2 + $0x2ba] sm:$0xff]  ;;  %v8182_v42 = vpack.c.bf16 %v484_v43, %v483_v37  ;;  %v8232_v43 = vpack.c.bf16 %v508_v20, %v507_v6  ;;  %v7110_v20 = vld [vmem:[%s8825_s3 + $0xe8] sm:$0xff]  }
  0xa9   :  { %v2994_v11 = vpack.c.bf16 %v2957_v8, %v2956_v52  ;;  %v510_v52 = vld [vmem:[#allocation2 + $0x260] sm:$0xff]  ;;  %v511_v8 = vld [vmem:[#allocation2 + $0x270] sm:$0xff] }
  0xaf   :  { %5896 = vmatmul.mubr.bf16.vlgmr.msra.gmra.mrb[0].mxu1 %v528_v10  ;;  %6248 = vmatmul.mubr.bf16.gmra.mrb[32].mxu0 %v2985_v2  ;;  %v2958_v10 = vld [vmem:[#allocation2 + $0x2d2] sm:$0xff]  ;;  %v2959_v2 = vld [vmem:[#allocation2 + $0x2da] sm:$0xff] }
  0xb0   :  { %5960 = vmatpush3.bf16.msra.mxu1 %v7971_v22  ;;  %5899 = vmatprep.mubr.bf16.mxu1 %v8132_v14  ;;  %v2988_v22 = vpack.c.bf16 %v2945_v61, %v2944_v24  ;;  %v2995_v45 = vpack.c.bf16 %v2959_v2, %v2958_v10  ;;  %v490_v24 = vld [vmem:[#allocation2 + $0x140] sm:$0xff]  ;;  %v514_v10 = vld [vmem:[#allocation2 + $0x290] sm:$0xff] }
  0xb1   :  { %6251 = vmatprep.mubr.bf16.mxu0 %v2986_v4  ;;  %5961 = vmatprep.subr.bf16.mxu1 %v7086_v49  ;;  %v487_v4 = vld [vmem:[#allocation2 + $0x120] sm:$0xff] }
  0xb2   :  { %v2962_v61 = vld [vmem:[#allocation2 + $0x302] sm:$0xff] }
  0xb3   :  { %v515_v2 = vld [vmem:[#allocation2 + $0x2a0] sm:$0xff] }
  0xb4   :  { %5962 = vmatpush3.bf16.msra.mxu1 %v7086_v49  ;;  %v488_v49 = vld [vmem:[#allocation2 + $0x128] sm:$0xff] }
  0xb5   :  { %5963 = vmatprep.subr.bf16.mxu1 %v7088_v5  ;;  %v8189_v3 = vpack.c.bf16 %v488_v49, %v487_v4  ;;  %v516_v4 = vld [vmem:[#allocation2 + $0x2a8] sm:$0xff]  ;;  %v8258_v49 = vld [vmem:[%s8825_s3 + $0x200] sm:$0xff]  }
  0xb6   :  { %v8262_v56 = vpack.c.bf16 %v516_v4, %v515_v2  ;;  %v8350_v2 = vld [vmem:[%s8825_s3 + $0x100] sm:$0xff]   ;;  %v1384_v4 = vld [vmem:[#allocation2 + $0x10a] sm:$0xff] }
  0xb7   :  { %5900 = vmatmul.mubr.bf16.gmra.mrb[4].mxu1 %v8142_v62  ;;  %6252 = vmatmul.mubr.bf16.gmra.mrb[36].mxu0 %v2987_v23  ;;  %v2963_v23 = vld [vmem:[#allocation2 + $0x30a] sm:$0xff] }
  0xb8   :  { %5903 = vmatprep.mubr.bf16.mxu1 %v8144_v32  ;;  %6255 = vmatprep.mubr.bf16.mxu0 %v2988_v22  ;;  %v491_v22 = vld [vmem:[#allocation2 + $0x150] sm:$0xff]  ;;  %v2997_v1 = vpack.c.bf16 %v2963_v23, %v2962_v61  ;;  %v521_v61 = vld [vmem:[#allocation2 + $0x2e8] sm:$0xff]  ;;  %v523_v23 = vld [vmem:[#allocation2 + $0x300] sm:$0xff] }
  0xb9   :  { %5964 = vmatpush3.bf16.msra.mxu1 %v7088_v5  ;;  %v489_v5 = vld [vmem:[#allocation2 + $0x138] sm:$0xff] }
  0xba   :  { %5965 = vmatprep.subr.bf16.mxu1 %v7090_v16  ;;  %v8193_v13 = vpack.c.bf16 %v490_v24, %v489_v5 }
  0xbd   :  { %5966 = vmatpush3.bf16.msra.mxu1 %v7090_v16  ;;  %v492_v16 = vld [vmem:[#allocation2 + $0x158] sm:$0xff] }
  0xbe   :  { %5967 = vmatprep.subr.bf16.mxu1 %v7092_v40  ;;  %v8195_v25 = vpack.c.bf16 %v492_v16, %v491_v22  ;;  %v524_v22 = vld [vmem:[#allocation2 + $0x308] sm:$0xff]  ;;  %v3447_v16 = vld [vmem:[#allocation2 + $0x180] sm:$0xff] }
  0xbf   :  { %5904 = vmatmul.mubr.bf16.gmra.mrb[8].mxu1 %v8154_v29  ;;  %6256 = vmatmul.mubr.bf16.gmra.mrb[40].mxu0 %v2989_v34  ;;  %v2967_v34 = vld [vmem:[#allocation2 + $0x33a] sm:$0xff]  ;;  %v8279_v9 = vpack.c.bf16 %v524_v22, %v523_v23  ;;  %v3479_v23 = vld [vmem:[#allocation2 + $0x330] sm:$0xff] }
  0xc0   :  { %5907 = vmatprep.mubr.bf16.mxu1 %v8156_v15  ;;  %6259 = vmatprep.mubr.bf16.mxu0 %v2990_v58  ;;  %v8199_v58 = vpack.c.bf16 %v494_v46, %v493_v31  ;;  %v1363_v31 = vld [vmem:[#allocation2 + $0xa] sm:$0xff] }
  0xc1   :  { %5968 = vmatpush3.bf16.msra.mxu1 %v7092_v40  ;;  %v2966_v40 = vld [vmem:[#allocation2 + $0x332] sm:$0xff] }
  0xc2   :  { %5969 = vmatprep.subr.bf16.mxu1 %v7094_v7 }
  0xc5   :  { %5970 = vmatpush3.bf16.msra.mxu1 %v7094_v7  ;;  %v2999_v7 = vpack.c.bf16 %v2967_v34, %v2966_v40  ;;  %v1364_v34 = vld [vmem:[#allocation2 + $0x1a] sm:$0xff] }
  0xc6   :  { %5971 = vmatprep.subr.bf16.mxu1 %v7096_v50 }
  0xc7   :  { %5908 = vmatmul.mubr.bf16.gmra.mrb[12].mxu1 %v8166_v35  ;;  %6260 = vmatmul.mubr.bf16.gmra.mrb[44].mxu0 %v2991_v41  ;;  %v504_v41 = vld [vmem:[#allocation2 + $0x218] sm:$0xff] }
  0xc8   :  { %5911 = vmatprep.mubr.bf16.mxu1 %v8168_v19  ;;  %6263 = vmatprep.mubr.bf16.mxu0 %v2992_v54  ;;  %v7097_v54 = vld [vmem:[%s8825_s3 + $0x1d0] sm:$0xff]  }
  0xc9   :  { %5972 = vmatpush3.bf16.msra.mxu1 %v7096_v50  ;;  %v502_v50 = vld [vmem:[#allocation2 + $0x200] sm:$0xff] }
  0xca   :  { %5973 = vmatprep.subr.bf16.mxu1 %v7098_v12 }
  0xcd   :  { %5974 = vmatpush3.bf16.msra.mxu1 %v7098_v12  ;;  %v8216_v12 = vpack.c.bf16 %v502_v50, %v501_v26  ;;  %v1371_v26 = vld [vmem:[#allocation2 + $0x6a] sm:$0xff] }
  0xce   :  { %6039 = vmatprep.subr.bf16.mxu1 %v8178_v39  ;;  %v7104_v50 = vld [vmem:[%s8825_s3 + $0xd0] sm:$0xff]  }
  0xcf   :  { %5912 = vmatmul.mubr.bf16.gmra.mrb[16].mxu1 %v8180_v55  ;;  %6264 = vmatmul.mubr.bf16.gmra.mrb[48].mxu0 %v2993_v30  ;;  %v512_v30 = vld [vmem:[#allocation2 + $0x278] sm:$0xff] }
  0xd0   :  { %5915 = vmatprep.mubr.bf16.mxu1 %v8182_v42  ;;  %6267 = vmatprep.mubr.bf16.mxu0 %v2994_v11  ;;  %v7105_v11 = vld [vmem:[%s8825_s3 + $0x1f0] sm:$0xff]   ;;  %v8246_v60 = vpack.c.bf16 %v512_v30, %v511_v8  ;;  %v7114_v30 = vld [vmem:[%s8825_s3 + $0xf8] sm:$0xff]  }
  0xd7   :  { %5916 = vmatmul.mubr.bf16.gmra.mrb[20].mxu1 %v8187_v38  ;;  %6268 = vmatmul.mubr.bf16.gmra.mrb[52].mxu0 %v2995_v45  ;;  %v519_v45 = vld [vmem:[#allocation2 + $0x2d0] sm:$0xff] }
  0xd8   :  { %5919 = vmatprep.mubr.bf16.mxu1 %v8189_v3  ;;  %6271 = vmatprep.mubr.bf16.mxu0 %v2996_v0  ;;  %v520_v0 = vld [vmem:[#allocation2 + $0x2d8] sm:$0xff] }
  0xd9   :  { %v8271_v24 = vpack.c.bf16 %v520_v0, %v519_v45  ;;  %v1388_v0 = vld [vmem:[#allocation2 + $0x13a] sm:$0xff] }
  0xdf   :  { %5920 = vmatmul.mubr.bf16.gmra.mrb[24].mxu1 %v8193_v13  ;;  %6272 = vmatmul.mubr.bf16.gmra.mrb[56].mxu0 %v2997_v1 }
  0xe0   :  { %5923 = vmatprep.mubr.bf16.mxu1 %v8195_v25  ;;  %6275 = vmatprep.mubr.bf16.mxu0 %v2998_v27  ;;  %v526_v27 = vld [vmem:[#allocation2 + $0x320] sm:$0xff] }
  0xe7   :  { %5924 = vmatmul.mubr.bf16.gmra.mrb[28].mxu1 %v8199_v58  ;;  %6276 = vmatmul.mubr.bf16.gmra.mrb[60].mxu0 %v2999_v7  ;;  %v1365_v7 = vld [vmem:[#allocation2 + $0x22] sm:$0xff] }
  0xe8   :  { %5927 = vmatprep.mubr.bf16.mxu1 %v8128_v48  ;;  %6295 = vmatprep.mubr.bf16.mxu0 %v8132_v14  ;;  %v503_v14 = vld [vmem:[#allocation2 + $0x210] sm:$0xff]  ;;  %v1427_v47 = vpack.c.bf16 %v1365_v7, %v1364_v34 }
  0xe9   :  { %v8218_v17 = vpack.c.bf16 %v504_v41, %v503_v14 }
  0xef   :  { %5928 = vmatmul.mubr.bf16.gmra.mrb[32].mxu1 %v544_v21  ;;  %6296 = vmatmul.mubr.bf16.vlgmr.msra.gmra.mrb[0].mxu0 %v8142_v62  ;;  %v7099_v62 = vld [vmem:[%s8825_s3 + $0x1d8] sm:$0xff]   ;;  %v1368_v21 = vld [vmem:[#allocation2 + $0x4a] sm:$0xff] }
  0xf0   :  { %5931 = vmatprep.mubr.bf16.mxu1 %v8204_v36  ;;  %6360 = vmatpush3.bf16.msra.mxu0 %v8107_v57  ;;  %v505_v57 = vld [vmem:[#allocation2 + $0x228] sm:$0xff] }
  0xf1   :  { %6299 = vmatprep.mubr.bf16.mxu0 %v8144_v32  ;;  %6361 = vmatprep.subr.bf16.mxu0 %v7095_v28  ;;  %v506_v32 = vld [vmem:[#allocation2 + $0x230] sm:$0xff] }
  0xf2   :  { %v8230_v37 = vpack.c.bf16 %v506_v32, %v505_v57  ;;  %v7108_v57 = vld [vmem:[%s8825_s3 + $0xe0] sm:$0xff]  }
  0xf4   :  { %6362 = vmatpush3.bf16.msra.mxu0 %v7095_v28  ;;  %v1369_v28 = vld [vmem:[#allocation2 + $0x52] sm:$0xff] }
  0xf5   :  { %6363 = vmatprep.subr.bf16.mxu0 %v7097_v54  ;;  %v8304_v14 = vpack.c.bf16 %v1369_v28, %v1368_v21  ;;  %v1399_v21 = vld [vmem:[#allocation2 + $0x1ea] sm:$0xff]  ;;  %v3937_v28 = vld [vmem:[#allocation2 + $0x61] sm:$0xff] }
  0xf7   :  { %5932 = vmatmul.mubr.bf16.gmra.mrb[36].mxu1 %v8216_v12  ;;  %6300 = vmatmul.mubr.bf16.gmra.mrb[4].mxu0 %v8154_v29  ;;  %v7103_v29 = vld [vmem:[%s8825_s3 + $0x1e8] sm:$0xff]  }
  0xf8   :  { %5935 = vmatprep.mubr.bf16.mxu1 %v8218_v17  ;;  %6303 = vmatprep.mubr.bf16.mxu0 %v8156_v15  ;;  %v509_v15 = vld [vmem:[#allocation2 + $0x258] sm:$0xff] }
  0xf9   :  { %6364 = vmatpush3.bf16.msra.mxu0 %v7097_v54  ;;  %v8244_v51 = vpack.c.bf16 %v510_v52, %v509_v15  ;;  %v1372_v54 = vld [vmem:[#allocation2 + $0x7a] sm:$0xff]  ;;  %v7112_v15 = vld [vmem:[%s8825_s3 + $0xf0] sm:$0xff]  }
  0xfa   :  { %6365 = vmatprep.subr.bf16.mxu0 %v7099_v62 }
  0xfd   :  { %6366 = vmatpush3.bf16.msra.mxu0 %v7099_v62  ;;  %v1375_v62 = vld [vmem:[#allocation2 + $0x9a] sm:$0xff] }
  0xfe   :  { %6367 = vmatprep.subr.bf16.mxu0 %v7101_v63 }
  0xff   :  { %5936 = vmatmul.mubr.bf16.gmra.mrb[40].mxu1 %v8230_v37  ;;  %6304 = vmatmul.mubr.bf16.gmra.mrb[8].mxu0 %v8166_v35  ;;  %v7107_v35 = vld [vmem:[%s8825_s3 + $0x1f8] sm:$0xff]  }
 0x100   :  { %5939 = vmatprep.mubr.bf16.mxu1 %v8232_v43  ;;  %6307 = vmatprep.mubr.bf16.mxu0 %v8168_v19  ;;  %v513_v19 = vld [vmem:[#allocation2 + $0x288] sm:$0xff] }
 0x101   :  { %6368 = vmatpush3.bf16.msra.mxu0 %v7101_v63  ;;  %v8260_v44 = vpack.c.bf16 %v514_v10, %v513_v19  ;;  %v1376_v63 = vld [vmem:[#allocation2 + $0xaa] sm:$0xff] }
 0x102   :  { %6369 = vmatprep.subr.bf16.mxu0 %v7103_v29 }
 0x105   :  { %6370 = vmatpush3.bf16.msra.mxu0 %v7103_v29  ;;  %v1379_v29 = vld [vmem:[#allocation2 + $0xca] sm:$0xff] }
 0x106   :  { %6371 = vmatprep.subr.bf16.mxu0 %v7105_v11 }
 0x107   :  { %5940 = vmatmul.mubr.bf16.gmra.mrb[44].mxu1 %v8244_v51  ;;  %6308 = vmatmul.mubr.bf16.gmra.mrb[12].mxu0 %v8180_v55  ;;  %v517_v55 = vld [vmem:[#allocation2 + $0x2b8] sm:$0xff] }
 0x108   :  { %5943 = vmatprep.mubr.bf16.mxu1 %v8246_v60  ;;  %6311 = vmatprep.mubr.bf16.mxu0 %v8182_v42  ;;  %v518_v42 = vld [vmem:[#allocation2 + $0x2c0] sm:$0xff] }
 0x109   :  { %6372 = vmatpush3.bf16.msra.mxu0 %v7105_v11  ;;  %v8269_v5 = vpack.c.bf16 %v518_v42, %v517_v55  ;;  %v1380_v11 = vld [vmem:[#allocation2 + $0xda] sm:$0xff]  ;;  %v1387_v55 = vld [vmem:[#allocation2 + $0x12a] sm:$0xff] }
 0x10a   :  { %6373 = vmatprep.subr.bf16.mxu0 %v7107_v35 }
 0x10d   :  { %6374 = vmatpush3.bf16.msra.mxu0 %v7107_v35  ;;  %v1383_v35 = vld [vmem:[#allocation2 + $0xfa] sm:$0xff] }
 0x10e   :  { %6439 = vmatprep.subr.bf16.mxu0 %v8258_v49 }
 0x10f   :  { %5944 = vmatmul.mubr.bf16.gmra.mrb[48].mxu1 %v8260_v44  ;;  %6312 = vmatmul.mubr.bf16.gmra.mrb[16].mxu0 %v8187_v38  ;;  %v522_v38 = vld [vmem:[#allocation2 + $0x2f0] sm:$0xff] }
 0x110   :  { %5947 = vmatprep.mubr.bf16.mxu1 %v8262_v56  ;;  %6315 = vmatprep.mubr.bf16.mxu0 %v8189_v3  ;;  %v3448_v3 = vld [vmem:[#allocation2 + $0x188] sm:$0xff]  ;;  %v8277_v53 = vpack.c.bf16 %v522_v38, %v521_v61  ;;  %v1390_v61 = vld [vmem:[#allocation2 + $0x152] sm:$0xff]  ;;  %v1391_v38 = vld [vmem:[#allocation2 + $0x15a] sm:$0xff] }
 0x111   :  { %v8281_v1 = vpack.c.bf16 %v3448_v3, %v3447_v16  ;;  %v8367_v16 = vpack.c.bf16 %v1391_v38, %v1390_v61  ;;  %v7116_v61 = vld [vmem:[%s8825_s3 + $0x220] sm:$0xff]  }
 0x117   :  { %5948 = vmatmul.mubr.bf16.gmra.mrb[52].mxu1 %v8269_v5  ;;  %6316 = vmatmul.mubr.bf16.gmra.mrb[20].mxu0 %v8193_v13  ;;  %v525_v13 = vld [vmem:[#allocation2 + $0x318] sm:$0xff] }
 0x118   :  { %5951 = vmatprep.mubr.bf16.mxu1 %v8271_v24  ;;  %6319 = vmatprep.mubr.bf16.mxu0 %v8195_v25  ;;  %v1362_v25 = vld [vmem:[#allocation2 + $0x2] sm:$0xff]  ;;  %v8287_v46 = vpack.c.bf16 %v526_v27, %v525_v13  ;;  %v1393_v13 = vld [vmem:[#allocation2 + $0x172] sm:$0xff]  ;;  %v1395_v27 = vld [vmem:[#allocation2 + $0x1ba] sm:$0xff] }
 0x119   :  { %v1426_v40 = vpack.c.bf16 %v1363_v31, %v1362_v25  ;;  %v3933_v25 = vld [vmem:[#allocation2 + $0x31] sm:$0xff]  ;;  %v3934_v31 = vld [vmem:[#allocation2 + $0x39] sm:$0xff] }
 0x11a   :  { %v3997_v7 = vpack.c.bf16 %v3934_v31, %v3933_v25  ;;  %v3947_v25 = vld [vmem:[#allocation2 + $0xd9] sm:$0xff]  ;;  %v3948_v31 = vld [vmem:[#allocation2 + $0xe1] sm:$0xff] }
 0x11f   :  { %5952 = vmatmul.mubr.bf16.gmra.mrb[56].mxu1 %v8277_v53  ;;  %6320 = vmatmul.mubr.bf16.gmra.mrb[24].mxu0 %v8199_v58  ;;  %v1366_v58 = vld [vmem:[#allocation2 + $0x32] sm:$0xff] }
 0x120   :  { %5955 = vmatprep.mubr.bf16.mxu1 %v8279_v9  ;;  %6323 = vmatprep.mubr.bf16.mxu0 %v8281_v1  ;;  %v8292_v33 = vpack.c.bf16 %v1367_v18, %v1366_v58  ;;  %v1397_v58 = vld [vmem:[#allocation2 + $0x1d2] sm:$0xff]  ;;  %v3935_v18 = vld [vmem:[#allocation2 + $0x49] sm:$0xff] }
 0x127   :  { %5956 = vmatmul.mubr.bf16.gmra.mrb[60].mxu1 %v8287_v46  ;;  %6324 = vmatmul.mubr.bf16.gmra.mrb[28].mxu0 %v8128_v48 }
 0x128   :  { %5975 = vmatprep.mubr.bf16.mxu1 %v1426_v40  ;;  %6327 = vmatprep.mubr.bf16.mxu0 %v8204_v36  ;;  %v1370_v36 = vld [vmem:[#allocation2 + $0x62] sm:$0xff] }
 0x129   :  { %v8306_v41 = vpack.c.bf16 %v1371_v26, %v1370_v36  ;;  %v3938_v36 = vld [vmem:[#allocation2 + $0x69] sm:$0xff] }
 0x12f   :  { %5976 = vmatmul.mubr.bf16.vlgmr.msra.gmra.mrb[0].mxu1 %v1427_v47  ;;  %6328 = vmatmul.mubr.bf16.gmra.mrb[32].mxu0 %v8216_v12  ;;  %v1373_v12 = vld [vmem:[#allocation2 + $0x82] sm:$0xff]  ;;  %v3936_v47 = vld [vmem:[#allocation2 + $0x51] sm:$0xff] }
 0x130   :  { %6040 = vmatpush3.bf16.msra.mxu1 %v8178_v39  ;;  %5979 = vmatprep.mubr.bf16.mxu1 %v8292_v33  ;;  %v7106_v39 = vld [vmem:[%s8825_s3 + $0xd8] sm:$0xff]   ;;  %v8318_v32 = vpack.c.bf16 %v1373_v12, %v1372_v54  ;;  %v3999_v54 = vpack.c.bf16 %v3938_v36, %v3937_v28  ;;  %v7111_v12 = vld [vmem:[%s8825_s3 + $0x208] sm:$0xff]  }
 0x131   :  { %6331 = vmatprep.mubr.bf16.mxu0 %v8218_v17  ;;  %6041 = vmatprep.subr.bf16.mxu1 %v7102_v59  ;;  %v1374_v17 = vld [vmem:[#allocation2 + $0x92] sm:$0xff] }
 0x132   :  { %v8320_v6 = vpack.c.bf16 %v1375_v62, %v1374_v17  ;;  %v1401_v17 = vld [vmem:[#allocation2 + $0x202] sm:$0xff]  ;;  %v3939_v62 = vld [vmem:[#allocation2 + $0x79] sm:$0xff] }
 0x133   :  { %v7119_v36 = vld [vmem:[%s8825_s3 + $0x238] sm:$0xff]  }
 0x134   :  { %6042 = vmatpush3.bf16.msra.mxu1 %v7102_v59  ;;  %v1398_v59 = vld [vmem:[#allocation2 + $0x1e2] sm:$0xff] }
 0x135   :  { %6043 = vmatprep.subr.bf16.mxu1 %v7104_v50 }
 0x137   :  { %5980 = vmatmul.mubr.bf16.gmra.mrb[4].mxu1 %v8304_v14  ;;  %6332 = vmatmul.mubr.bf16.gmra.mrb[36].mxu0 %v8230_v37  ;;  %v1377_v37 = vld [vmem:[#allocation2 + $0xb2] sm:$0xff] }
 0x138   :  { %5983 = vmatprep.mubr.bf16.mxu1 %v8306_v41  ;;  %6335 = vmatprep.mubr.bf16.mxu0 %v8232_v43  ;;  %v1378_v43 = vld [vmem:[#allocation2 + $0xc2] sm:$0xff]  ;;  %v8332_v52 = vpack.c.bf16 %v1377_v37, %v1376_v63  ;;  %v1403_v63 = vld [vmem:[#allocation2 + $0x21a] sm:$0xff]  ;;  %v3941_v37 = vld [vmem:[#allocation2 + $0x91] sm:$0xff] }
 0x139   :  { %6044 = vmatpush3.bf16.msra.mxu1 %v7104_v50  ;;  %v8334_v8 = vpack.c.bf16 %v1379_v29, %v1378_v43  ;;  %v3998_v50 = vpack.c.bf16 %v3936_v47, %v3935_v18  ;;  %v3942_v43 = vld [vmem:[#allocation2 + $0x99] sm:$0xff]  ;;  %v7113_v29 = vld [vmem:[%s8825_s3 + $0x210] sm:$0xff]  }
 0x13a   :  { %6045 = vmatprep.subr.bf16.mxu1 %v7106_v39  ;;  %v7118_v18 = vld [vmem:[%s8825_s3 + $0x230] sm:$0xff]  }
 0x13d   :  { %6046 = vmatpush3.bf16.msra.mxu1 %v7106_v39  ;;  %v8379_v39 = vpack.c.bf16 %v1399_v21, %v1398_v59  ;;  %v4004_v59 = vpack.c.bf16 %v3948_v31, %v3947_v25  ;;  %v3961_v25 = vld [vmem:[#allocation2 + $0x181] sm:$0xff]  ;;  %v3962_v31 = vld [vmem:[#allocation2 + $0x189] sm:$0xff] }
 0x13e   :  { %6047 = vmatprep.subr.bf16.mxu1 %v7108_v57 }
 0x13f   :  { %5984 = vmatmul.mubr.bf16.gmra.mrb[8].mxu1 %v8318_v32  ;;  %6336 = vmatmul.mubr.bf16.gmra.mrb[40].mxu0 %v8244_v51  ;;  %v1381_v51 = vld [vmem:[#allocation2 + $0xe2] sm:$0xff] }
 0x140   :  { %5987 = vmatprep.mubr.bf16.mxu1 %v8320_v6  ;;  %6339 = vmatprep.mubr.bf16.mxu0 %v8246_v60  ;;  %v1382_v60 = vld [vmem:[#allocation2 + $0xf2] sm:$0xff]  ;;  %v8343_v19 = vpack.c.bf16 %v1381_v51, %v1380_v11  ;;  %v4001_v51 = vpack.c.bf16 %v3942_v43, %v3941_v37 }
 0x141   :  { %6048 = vmatpush3.bf16.msra.mxu1 %v7108_v57  ;;  %v8345_v10 = vpack.c.bf16 %v1383_v35, %v1382_v60  ;;  %v3940_v57 = vld [vmem:[#allocation2 + $0x81] sm:$0xff]  ;;  %v1404_v60 = vld [vmem:[#allocation2 + $0x22a] sm:$0xff]  ;;  %v1405_v35 = vld [vmem:[#allocation2 + $0x232] sm:$0xff] }
 0x142   :  { %6049 = vmatprep.subr.bf16.mxu1 %v7110_v20  ;;  %v8401_v38 = vpack.c.bf16 %v1405_v35, %v1404_v60  ;;  %v1418_v60 = vld [vmem:[#allocation2 + $0x2d2] sm:$0xff]  ;;  %v1419_v35 = vld [vmem:[#allocation2 + $0x2da] sm:$0xff] }
 0x145   :  { %6050 = vmatpush3.bf16.msra.mxu1 %v7110_v20  ;;  %v1402_v20 = vld [vmem:[#allocation2 + $0x212] sm:$0xff] }
 0x146   :  { %6051 = vmatprep.subr.bf16.mxu1 %v7112_v15  ;;  %v8391_v11 = vpack.c.bf16 %v1403_v63, %v1402_v20 }
 0x147   :  { %5988 = vmatmul.mubr.bf16.gmra.mrb[12].mxu1 %v8332_v52  ;;  %6340 = vmatmul.mubr.bf16.gmra.mrb[44].mxu0 %v8260_v44  ;;  %v1385_v44 = vld [vmem:[#allocation2 + $0x112] sm:$0xff] }
 0x148   :  { %5991 = vmatprep.mubr.bf16.mxu1 %v8334_v8  ;;  %6343 = vmatprep.mubr.bf16.mxu0 %v8262_v56  ;;  %v1386_v56 = vld [vmem:[#allocation2 + $0x122] sm:$0xff]  ;;  %v8357_v42 = vpack.c.bf16 %v1385_v44, %v1384_v4  ;;  %v3944_v44 = vld [vmem:[#allocation2 + $0xb1] sm:$0xff] }
 0x149   :  { %6052 = vmatpush3.bf16.msra.mxu1 %v7112_v15  ;;  %v8359_v45 = vpack.c.bf16 %v1387_v55, %v1386_v56  ;;  %v3943_v4 = vld [vmem:[#allocation2 + $0xa9] sm:$0xff] }
 0x14a   :  { %6053 = vmatprep.subr.bf16.mxu1 %v7114_v30  ;;  %v1406_v56 = vld [vmem:[#allocation2 + $0x242] sm:$0xff]  ;;  %v1407_v55 = vld [vmem:[#allocation2 + $0x24a] sm:$0xff] }
 0x14d   :  { %6054 = vmatpush3.bf16.msra.mxu1 %v7114_v30  ;;  %v4000_v30 = vpack.c.bf16 %v3940_v57, %v3939_v62  ;;  %v3953_v62 = vld [vmem:[#allocation2 + $0x121] sm:$0xff]  ;;  %v3954_v57 = vld [vmem:[#allocation2 + $0x129] sm:$0xff] }
 0x14e   :  { %6519 = vmatprep.subr.bf16.mxu1 %v8350_v2  ;;  %v4007_v43 = vpack.c.bf16 %v3954_v57, %v3953_v62 }
 0x14f   :  { %5992 = vmatmul.mubr.bf16.gmra.mrb[16].mxu1 %v8343_v19  ;;  %6344 = vmatmul.mubr.bf16.gmra.mrb[48].mxu0 %v8269_v5  ;;  %v1389_v5 = vld [vmem:[#allocation2 + $0x142] sm:$0xff] }
 0x150   :  { %5995 = vmatprep.mubr.bf16.mxu1 %v8345_v10  ;;  %6347 = vmatprep.mubr.bf16.mxu0 %v8271_v24  ;;  %v3480_v24 = vld [vmem:[#allocation2 + $0x338] sm:$0xff]  ;;  %v8365_v22 = vpack.c.bf16 %v1389_v5, %v1388_v0  ;;  %v3945_v0 = vld [vmem:[#allocation2 + $0xc1] sm:$0xff]  ;;  %v3946_v5 = vld [vmem:[#allocation2 + $0xc9] sm:$0xff] }
 0x151   :  { %v8369_v3 = vpack.c.bf16 %v3480_v24, %v3479_v23  ;;  %v4002_v23 = vpack.c.bf16 %v3944_v44, %v3943_v4  ;;  %v8403_v24 = vpack.c.bf16 %v1407_v55, %v1406_v56  ;;  %v3957_v4 = vld [vmem:[#allocation2 + $0x151] sm:$0xff]  ;;  %v3958_v44 = vld [vmem:[#allocation2 + $0x159] sm:$0xff] }
 0x157   :  { %5996 = vmatmul.mubr.bf16.gmra.mrb[20].mxu1 %v8357_v42  ;;  %6348 = vmatmul.mubr.bf16.gmra.mrb[52].mxu0 %v8277_v53  ;;  %v1392_v53 = vld [vmem:[#allocation2 + $0x16a] sm:$0xff] }
 0x158   :  { %5999 = vmatprep.mubr.bf16.mxu1 %v8359_v45  ;;  %6351 = vmatprep.mubr.bf16.mxu0 %v8279_v9  ;;  %v1394_v9 = vld [vmem:[#allocation2 + $0x1b2] sm:$0xff]  ;;  %v8375_v40 = vpack.c.bf16 %v1393_v13, %v1392_v53  ;;  %v4003_v53 = vpack.c.bf16 %v3946_v5, %v3945_v0  ;;  %v7117_v13 = vld [vmem:[%s8825_s3 + $0x228] sm:$0xff]   ;;  %v8430_v0 = vpack.c.bf16 %v1419_v35, %v1418_v60 }
 0x159   :  { %v1442_v34 = vpack.c.bf16 %v1395_v27, %v1394_v9  ;;  %v1408_v9 = vld [vmem:[#allocation2 + $0x25a] sm:$0xff]  ;;  %v1409_v27 = vld [vmem:[#allocation2 + $0x262] sm:$0xff]  ;;  %v4009_v5 = vpack.c.bf16 %v3958_v44, %v3957_v4  ;;  %v3969_v60 = vld [vmem:[#allocation2 + $0x211] sm:$0xff] }
 0x15a   :  { %v8413_v47 = vpack.c.bf16 %v1409_v27, %v1408_v9  ;;  %v1422_v9 = vld [vmem:[#allocation2 + $0x302] sm:$0xff]  ;;  %v1423_v27 = vld [vmem:[#allocation2 + $0x30a] sm:$0xff]  ;;  %v3970_v35 = vld [vmem:[#allocation2 + $0x219] sm:$0xff] }
 0x15f   :  { %6000 = vmatmul.mubr.bf16.gmra.mrb[24].mxu1 %v8365_v22  ;;  %6352 = vmatmul.mubr.bf16.gmra.mrb[56].mxu0 %v8287_v46  ;;  %v1396_v46 = vld [vmem:[#allocation2 + $0x1ca] sm:$0xff] }
 0x160   :  { %6003 = vmatprep.mubr.bf16.mxu1 %v8367_v16  ;;  %6355 = vmatprep.mubr.bf16.mxu0 %v8369_v3  ;;  %v1443_v26 = vpack.c.bf16 %v1397_v58, %v1396_v46  ;;  %v3949_v46 = vld [vmem:[#allocation2 + $0xf1] sm:$0xff]  ;;  %v3950_v58 = vld [vmem:[#allocation2 + $0xf9] sm:$0xff] }
 0x161   :  { %v4005_v28 = vpack.c.bf16 %v3950_v58, %v3949_v46  ;;  %v8436_v46 = vpack.c.bf16 %v1423_v27, %v1422_v9  ;;  %v4011_v58 = vpack.c.bf16 %v3962_v31, %v3961_v25  ;;  %v1884_v9 = vld [vmem:[#allocation2 + $0x78] sm:$0xff]  ;;  %v1885_v27 = vld [vmem:[#allocation2 + $0x80] sm:$0xff]  ;;  %v3974_v31 = vld [vmem:[#allocation2 + $0x249] sm:$0xff] }
 0x162   :  { %v3973_v25 = vld [vmem:[#allocation2 + $0x241] sm:$0xff] }
 0x167   :  { %6004 = vmatmul.mubr.bf16.gmra.mrb[28].mxu1 %v8375_v40  ;;  %6356 = vmatmul.mubr.bf16.gmra.mrb[60].mxu0 %v8128_v48  ;;  %v1400_v48 = vld [vmem:[#allocation2 + $0x1fa] sm:$0xff] }
 0x168   :  { %6007 = vmatprep.mubr.bf16.mxu1 %v1442_v34  ;;  %6375 = vmatprep.mubr.bf16.mxu0 %v3997_v7  ;;  %v8389_v15 = vpack.c.bf16 %v1401_v17, %v1400_v48  ;;  %v1410_v34 = vld [vmem:[#allocation2 + $0x272] sm:$0xff]  ;;  %v1411_v7 = vld [vmem:[#allocation2 + $0x27a] sm:$0xff]  ;;  %v1414_v48 = vld [vmem:[#allocation2 + $0x2a2] sm:$0xff] }
 0x169   :  { %v8415_v21 = vpack.c.bf16 %v1411_v7, %v1410_v34  ;;  %v1415_v17 = vld [vmem:[#allocation2 + $0x2aa] sm:$0xff] }
 0x16a   :  { %v8424_v37 = vpack.c.bf16 %v1415_v17, %v1414_v48 }
 0x16f   :  { %6008 = vmatmul.mubr.bf16.gmra.mrb[32].mxu1 %v1443_v26  ;;  %6376 = vmatmul.mubr.bf16.vlgmr.msra.gmra.mrb[0].mxu0 %v3998_v50  ;;  %v1412_v26 = vld [vmem:[#allocation2 + $0x28a] sm:$0xff]  ;;  %v1413_v50 = vld [vmem:[#allocation2 + $0x292] sm:$0xff] }
 0x170   :  { %6011 = vmatprep.mubr.bf16.mxu1 %v8379_v39  ;;  %6440 = vmatpush3.bf16.msra.mxu0 %v8258_v49  ;;  %v7115_v49 = vld [vmem:[%s8825_s3 + $0x218] sm:$0xff]   ;;  %v8422_v20 = vpack.c.bf16 %v1413_v50, %v1412_v26  ;;  %v1877_v50 = vld [vmem:[#allocation2 + $0x20] sm:$0xff] }
 0x171   :  { %6379 = vmatprep.mubr.bf16.mxu0 %v3999_v54  ;;  %6441 = vmatprep.subr.bf16.mxu0 %v7111_v12  ;;  %v3951_v54 = vld [vmem:[#allocation2 + $0x109] sm:$0xff]  ;;  %v1876_v26 = vld [vmem:[#allocation2 + $0x18] sm:$0xff] }
 0x172   :  { %v1940_v62 = vpack.c.bf16 %v1877_v50, %v1876_v26  ;;  %v1887_v26 = vld [vmem:[#allocation2 + $0x98] sm:$0xff] }
 0x173   :  { %v3975_v50 = vld [vmem:[#allocation2 + $0x259] sm:$0xff] }
 0x174   :  { %6442 = vmatpush3.bf16.msra.mxu0 %v7111_v12  ;;  %v3952_v12 = vld [vmem:[#allocation2 + $0x111] sm:$0xff] }
 0x175   :  { %6443 = vmatprep.subr.bf16.mxu0 %v7113_v29  ;;  %v4006_v63 = vpack.c.bf16 %v3952_v12, %v3951_v54  ;;  %v3965_v54 = vld [vmem:[#allocation2 + $0x1e1] sm:$0xff]  ;;  %v3966_v12 = vld [vmem:[#allocation2 + $0x1e9] sm:$0xff] }
 0x176   :  { %v8442_v57 = vpack.c.bf16 %v3966_v12, %v3965_v54  ;;  %v3976_v54 = vld [vmem:[#allocation2 + $0x261] sm:$0xff] }
 0x177   :  { %6012 = vmatmul.mubr.bf16.gmra.mrb[36].mxu1 %v8389_v15  ;;  %6380 = vmatmul.mubr.bf16.gmra.mrb[4].mxu0 %v4000_v30  ;;  %v1417_v30 = vld [vmem:[#allocation2 + $0x2c2] sm:$0xff] }
 0x178   :  { %6015 = vmatprep.mubr.bf16.mxu1 %v8391_v11  ;;  %6383 = vmatprep.mubr.bf16.mxu0 %v4001_v51  ;;  %v3955_v51 = vld [vmem:[#allocation2 + $0x139] sm:$0xff]  ;;  %v1888_v12 = vld [vmem:[#allocation2 + $0xa8] sm:$0xff] }
 0x179   :  { %6444 = vmatpush3.bf16.msra.mxu0 %v7113_v29  ;;  %v1416_v29 = vld [vmem:[#allocation2 + $0x2ba] sm:$0xff] }
 0x17a   :  { %6445 = vmatprep.subr.bf16.mxu0 %v7115_v49  ;;  %v8428_v56 = vpack.c.bf16 %v1417_v30, %v1416_v29  ;;  %v3967_v29 = vld [vmem:[#allocation2 + $0x1f9] sm:$0xff]  ;;  %v3968_v30 = vld [vmem:[#allocation2 + $0x201] sm:$0xff] }
 0x17b   :  { %v8446_v44 = vpack.c.bf16 %v3968_v30, %v3967_v29  ;;  %v8468_v30 = vpack.c.bf16 %v3976_v54, %v3975_v50  ;;  %v3984_v50 = vld [vmem:[#allocation2 + $0x2c1] sm:$0xff] }
 0x17c   :  { %v1896_v54 = vld [vmem:[#allocation2 + $0x108] sm:$0xff] }
 0x17d   :  { %6446 = vmatpush3.bf16.msra.mxu0 %v7115_v49  ;;  %v3956_v49 = vld [vmem:[#allocation2 + $0x141] sm:$0xff] }
 0x17e   :  { %6447 = vmatprep.subr.bf16.mxu0 %v7116_v61  ;;  %v4008_v55 = vpack.c.bf16 %v3956_v49, %v3955_v51  ;;  %v1880_v51 = vld [vmem:[#allocation2 + $0x48] sm:$0xff]  ;;  %v1881_v49 = vld [vmem:[#allocation2 + $0x50] sm:$0xff] }
 0x17f   :  { %6016 = vmatmul.mubr.bf16.gmra.mrb[40].mxu1 %v8401_v38  ;;  %6384 = vmatmul.mubr.bf16.gmra.mrb[8].mxu0 %v4002_v23  ;;  %v1421_v23 = vld [vmem:[#allocation2 + $0x2f2] sm:$0xff] }
 0x180   :  { %6019 = vmatprep.mubr.bf16.mxu1 %v8403_v24  ;;  %6387 = vmatprep.mubr.bf16.mxu0 %v4003_v53  ;;  %v3959_v53 = vld [vmem:[#allocation2 + $0x169] sm:$0xff] }
 0x181   :  { %6448 = vmatpush3.bf16.msra.mxu0 %v7116_v61  ;;  %v1420_v61 = vld [vmem:[#allocation2 + $0x2ea] sm:$0xff] }
 0x182   :  { %6449 = vmatprep.subr.bf16.mxu0 %v7117_v13  ;;  %v8434_v34 = vpack.c.bf16 %v1421_v23, %v1420_v61  ;;  %v1882_v61 = vld [vmem:[#allocation2 + $0x60] sm:$0xff]  ;;  %v1883_v23 = vld [vmem:[#allocation2 + $0x68] sm:$0xff] }
 0x185   :  { %6450 = vmatpush3.bf16.msra.mxu0 %v7117_v13  ;;  %v3960_v13 = vld [vmem:[#allocation2 + $0x171] sm:$0xff] }
 0x186   :  { %6451 = vmatprep.subr.bf16.mxu0 %v7118_v18  ;;  %v4010_v7 = vpack.c.bf16 %v3960_v13, %v3959_v53  ;;  %v3971_v53 = vld [vmem:[#allocation2 + $0x229] sm:$0xff]  ;;  %v3972_v13 = vld [vmem:[#allocation2 + $0x231] sm:$0xff] }
 0x187   :  { %6020 = vmatmul.mubr.bf16.gmra.mrb[44].mxu1 %v8413_v47  ;;  %6388 = vmatmul.mubr.bf16.gmra.mrb[12].mxu0 %v4004_v59  ;;  %v1425_v59 = vld [vmem:[#allocation2 + $0x322] sm:$0xff] }
 0x188   :  { %6023 = vmatprep.mubr.bf16.mxu1 %v8415_v21  ;;  %6391 = vmatprep.mubr.bf16.mxu0 %v4005_v28  ;;  %v3963_v28 = vld [vmem:[#allocation2 + $0x199] sm:$0xff] }
 0x189   :  { %6452 = vmatpush3.bf16.msra.mxu0 %v7118_v18  ;;  %v1424_v18 = vld [vmem:[#allocation2 + $0x31a] sm:$0xff] }
 0x18a   :  { %6453 = vmatprep.subr.bf16.mxu0 %v7119_v36  ;;  %v8440_v48 = vpack.c.bf16 %v1425_v59, %v1424_v18  ;;  %v8456_v18 = vpack.c.bf16 %v3972_v13, %v3971_v53  ;;  %v8458_v59 = vpack.c.bf16 %v3974_v31, %v3973_v25  ;;  %v1893_v53 = vld [vmem:[#allocation2 + $0xe0] sm:$0xff] }
 0x18b   :  { %v3981_v13 = vld [vmem:[#allocation2 + $0x2a1] sm:$0xff] }
 0x18d   :  { %6454 = vmatpush3.bf16.msra.mxu0 %v7119_v36  ;;  %v3964_v36 = vld [vmem:[#allocation2 + $0x1a1] sm:$0xff] }
 0x18e   :  { %v4012_v17 = vpack.c.bf16 %v3964_v36, %v3963_v28  ;;  %v7124_v28 = vld [vmem:[%s8825_s3 + $0x110] sm:$0xff]  }
 0x18f   :  { %6024 = vmatmul.mubr.bf16.gmra.mrb[48].mxu1 %v8422_v20  ;;  %6392 = vmatmul.mubr.bf16.gmra.mrb[16].mxu0 %v4006_v63  ;;  %v1878_v63 = vld [vmem:[#allocation2 + $0x30] sm:$0xff] }
 0x190   :  { %6027 = vmatprep.mubr.bf16.mxu1 %v8424_v37  ;;  %6395 = vmatprep.mubr.bf16.mxu0 %v4007_v43  ;;  %v1879_v43 = vld [vmem:[#allocation2 + $0x38] sm:$0xff]  ;;  %v1886_v36 = vld [vmem:[#allocation2 + $0x90] sm:$0xff] }
 0x191   :  { %v1941_v4 = vpack.c.bf16 %v1879_v43, %v1878_v63  ;;  %v3978_v63 = vld [vmem:[#allocation2 + $0x279] sm:$0xff]  ;;  %v1945_v29 = vpack.c.bf16 %v1887_v26, %v1886_v36 }
 0x192   :  { %v7125_v43 = vld [vmem:[%s8825_s3 + $0x118] sm:$0xff]  }
 0x193   :  { %v1895_v36 = vld [vmem:[#allocation2 + $0xf8] sm:$0xff] }
 0x194   :  { %v3983_v26 = vld [vmem:[#allocation2 + $0x2b9] sm:$0xff] }
 0x197   :  { %6028 = vmatmul.mubr.bf16.gmra.mrb[52].mxu1 %v8428_v56  ;;  %6396 = vmatmul.mubr.bf16.gmra.mrb[20].mxu0 %v4008_v55  ;;  %v1942_v55 = vpack.c.bf16 %v1881_v49, %v1880_v51 }
 0x198   :  { %6031 = vmatprep.mubr.bf16.mxu1 %v8430_v0  ;;  %6399 = vmatprep.mubr.bf16.mxu0 %v4009_v5  ;;  %v8448_v5 = vpack.c.bf16 %v3970_v35, %v3969_v60  ;;  %v7126_v60 = vld [vmem:[%s8825_s3 + $0x120] sm:$0xff]  }
 0x199   :  { %v1890_v35 = vld [vmem:[#allocation2 + $0xc0] sm:$0xff] }
 0x19f   :  { %6032 = vmatmul.mubr.bf16.gmra.mrb[56].mxu1 %v8434_v34  ;;  %6400 = vmatmul.mubr.bf16.gmra.mrb[24].mxu0 %v4010_v7  ;;  %v7123_v7 = vld [vmem:[%s8825_s3 + $0x108] sm:$0xff]  }
 0x1a0   :  { %6035 = vmatprep.mubr.bf16.mxu1 %v8436_v46  ;;  %6403 = vmatprep.mubr.bf16.mxu0 %v4011_v58  ;;  %v1943_v58 = vpack.c.bf16 %v1883_v23, %v1882_v61  ;;  %v3980_v61 = vld [vmem:[#allocation2 + $0x291] sm:$0xff] }
 0x1a1   :  { %v1892_v23 = vld [vmem:[#allocation2 + $0xd8] sm:$0xff] }
 0x1a7   :  { %6036 = vmatmul.mubr.bf16.gmra.mrb[60].mxu1 %v8440_v48  ;;  %6404 = vmatmul.mubr.bf16.gmra.mrb[28].mxu0 %v4012_v17  ;;  %v1889_v17 = vld [vmem:[#allocation2 + $0xb0] sm:$0xff] }
 0x1a8   :  { %6055 = vmatprep.mubr.bf16.mxu1 %v1940_v62  ;;  %6407 = vmatprep.mubr.bf16.mxu0 %v8442_v57  ;;  %v3977_v62 = vld [vmem:[#allocation2 + $0x271] sm:$0xff]  ;;  %v1946_v51 = vpack.c.bf16 %v1889_v17, %v1888_v12 }
 0x1a9   :  { %v8470_v49 = vpack.c.bf16 %v3978_v63, %v3977_v62  ;;  %v1897_v12 = vld [vmem:[#allocation2 + $0x110] sm:$0xff]  ;;  %v3986_v62 = vld [vmem:[#allocation2 + $0x2d9] sm:$0xff] }
 0x1aa   :  { %v3985_v17 = vld [vmem:[#allocation2 + $0x2d1] sm:$0xff] }
 0x1ab   :  { %v7129_v63 = vld [vmem:[%s8825_s3 + $0x138] sm:$0xff]  }
 0x1af   :  { %6056 = vmatmul.mubr.bf16.vlgmr.msra.gmra.mrb[0].mxu1 %v1941_v4  ;;  %6408 = vmatmul.mubr.bf16.gmra.mrb[32].mxu0 %v8446_v44  ;;  %v1891_v4 = vld [vmem:[#allocation2 + $0xc8] sm:$0xff] }
 0x1b0   :  { %6527 = vmatpush3.bf16.msra.mxu1 %v8350_v2  ;;  %6059 = vmatprep.mubr.bf16.mxu1 %v1942_v55  ;;  %v1944_v2 = vpack.c.bf16 %v1885_v27, %v1884_v9  ;;  %v3979_v55 = vld [vmem:[#allocation2 + $0x289] sm:$0xff]  ;;  %v1947_v25 = vpack.c.bf16 %v1891_v4, %v1890_v35  ;;  %v1898_v35 = vld [vmem:[#allocation2 + $0x120] sm:$0xff] }
 0x1b1   :  { %6411 = vmatprep.mubr.bf16.mxu0 %v8448_v5  ;;  %6520 = vmatprep.subr.bf16.mxu1 %v7123_v7  ;;  %v3982_v9 = vld [vmem:[#allocation2 + $0x2a9] sm:$0xff]  ;;  %v8480_v31 = vpack.c.bf16 %v3980_v61, %v3979_v55  ;;  %v3988_v61 = vld [vmem:[#allocation2 + $0x2f1] sm:$0xff] }
 0x1b2   :  { %v7127_v27 = vld [vmem:[%s8825_s3 + $0x128] sm:$0xff]  }
 0x1b3   :  { %v1899_v4 = vld [vmem:[#allocation2 + $0x128] sm:$0xff] }
 0x1b4   :  { %6528 = vmatpush3.bf16.msra.mxu1 %v7123_v7  ;;  %v1948_v7 = vpack.c.bf16 %v1893_v53, %v1892_v23  ;;  %v3987_v55 = vld [vmem:[#allocation2 + $0x2e9] sm:$0xff]  ;;  %v1900_v23 = vld [vmem:[#allocation2 + $0x138] sm:$0xff]  ;;  %v1901_v53 = vld [vmem:[#allocation2 + $0x140] sm:$0xff] }
 0x1b5   :  { %6521 = vmatprep.subr.bf16.mxu1 %v7124_v28 }
 0x1b7   :  { %6060 = vmatmul.mubr.bf16.gmra.mrb[4].mxu1 %v1943_v58  ;;  %6412 = vmatmul.mubr.bf16.gmra.mrb[36].mxu0 %v8456_v18  ;;  %v8482_v58 = vpack.c.bf16 %v3982_v9, %v3981_v13  ;;  %v3989_v13 = vld [vmem:[#allocation2 + $0x301] sm:$0xff]  ;;  %v3990_v9 = vld [vmem:[#allocation2 + $0x309] sm:$0xff] }
 0x1b8   :  { %6063 = vmatprep.mubr.bf16.mxu1 %v1944_v2  ;;  %6415 = vmatprep.mubr.bf16.mxu0 %v8458_v59  ;;  %v7128_v2 = vld [vmem:[%s8825_s3 + $0x130] sm:$0xff]  }
 0x1b9   :  { %6529 = vmatpush3.bf16.msra.mxu1 %v7124_v28  ;;  %v1894_v28 = vld [vmem:[#allocation2 + $0xf0] sm:$0xff] }
 0x1ba   :  { %6522 = vmatprep.subr.bf16.mxu1 %v7125_v43 }
 0x1bd   :  { %6530 = vmatpush3.bf16.msra.mxu1 %v7125_v43  ;;  %v1949_v43 = vpack.c.bf16 %v1895_v36, %v1894_v28  ;;  %v1902_v28 = vld [vmem:[#allocation2 + $0x150] sm:$0xff]  ;;  %v1903_v36 = vld [vmem:[#allocation2 + $0x158] sm:$0xff] }
 0x1be   :  { %6523 = vmatprep.subr.bf16.mxu1 %v7126_v60 }
 0x1bf   :  { %6064 = vmatmul.mubr.bf16.gmra.mrb[8].mxu1 %v1945_v29  ;;  %6416 = vmatmul.mubr.bf16.gmra.mrb[40].mxu0 %v8468_v30  ;;  %v8492_v29 = vpack.c.bf16 %v3984_v50, %v3983_v26  ;;  %v3991_v26 = vld [vmem:[#allocation2 + $0x319] sm:$0xff]  ;;  %v3992_v50 = vld [vmem:[#allocation2 + $0x321] sm:$0xff] }
 0x1c0   :  { %6067 = vmatprep.mubr.bf16.mxu1 %v1946_v51  ;;  %6419 = vmatprep.mubr.bf16.mxu0 %v8470_v49  ;;  %v1950_v51 = vpack.c.bf16 %v1897_v12, %v1896_v54  ;;  %v1904_v54 = vld [vmem:[#allocation2 + $0x168] sm:$0xff]  ;;  %v1905_v12 = vld [vmem:[#allocation2 + $0x170] sm:$0xff] }
 0x1c1   :  { %6531 = vmatpush3.bf16.msra.mxu1 %v7126_v60  ;;  %v8494_v60 = vpack.c.bf16 %v3986_v62, %v3985_v17  ;;  %v3993_v17 = vld [vmem:[#allocation2 + $0x331] sm:$0xff]  ;;  %v3994_v62 = vld [vmem:[#allocation2 + $0x339] sm:$0xff] }
 0x1c2   :  { %6524 = vmatprep.subr.bf16.mxu1 %v7127_v27 }
 0x1c5   :  { %6532 = vmatpush3.bf16.msra.mxu1 %v7127_v27  ;;  %v1951_v27 = vpack.c.bf16 %v1899_v4, %v1898_v35  ;;  %v8506_v35 = vpack.c.bf16 %v3994_v62, %v3993_v17  ;;  %v3995_v4 = vld [vmem:[#allocation2 + $0x349] sm:$0xff] }
 0x1c6   :  { %6525 = vmatprep.subr.bf16.mxu1 %v7128_v2 }
 0x1c7   :  { %6068 = vmatmul.mubr.bf16.gmra.mrb[12].mxu1 %v1947_v25  ;;  %6420 = vmatmul.mubr.bf16.gmra.mrb[44].mxu0 %v8480_v31  ;;  %v8498_v25 = vpack.c.bf16 %v3988_v61, %v3987_v55  ;;  %v3996_v55 = vld [vmem:[#allocation2 + $0x351] sm:$0xff]  ;;  %v1908_v61 = vld [vmem:[#allocation2 + $0x1c8] sm:$0xff] }
 0x1c8   :  { %6071 = vmatprep.mubr.bf16.mxu1 %v1948_v7  ;;  %6423 = vmatprep.mubr.bf16.mxu0 %v8482_v58  ;;  %v1952_v7 = vpack.c.bf16 %v1901_v53, %v1900_v23  ;;  %v1909_v23 = vld [vmem:[#allocation2 + $0x1d0] sm:$0xff]  ;;  %v4028_v53 = vpack.c.bf16 %v3996_v55, %v3995_v4  ;;  %v1921_v4 = vld [vmem:[#allocation2 + $0x260] sm:$0xff] }
 0x1c9   :  { %6533 = vmatpush3.bf16.msra.mxu1 %v7128_v2  ;;  %v8500_v2 = vpack.c.bf16 %v3990_v9, %v3989_v13  ;;  %v1956_v13 = vpack.c.bf16 %v1909_v23, %v1908_v61  ;;  %v1910_v9 = vld [vmem:[#allocation2 + $0x1e0] sm:$0xff]  ;;  %v1923_v61 = vld [vmem:[#allocation2 + $0x278] sm:$0xff]  ;;  %v1924_v23 = vld [vmem:[#allocation2 + $0x288] sm:$0xff] }
 0x1ca   :  { %6526 = vmatprep.subr.bf16.mxu1 %v7129_v63 }
 0x1cd   :  { %6534 = vmatpush3.bf16.msra.mxu1 %v7129_v63  ;;  %v1953_v63 = vpack.c.bf16 %v1903_v36, %v1902_v28  ;;  %v1913_v28 = vld [vmem:[#allocation2 + $0x200] sm:$0xff] }
 0x1cf   :  { %6072 = vmatmul.mubr.bf16.gmra.mrb[16].mxu1 %v1949_v43  ;;  %6424 = vmatmul.mubr.bf16.gmra.mrb[48].mxu0 %v8492_v29  ;;  %v8504_v43 = vpack.c.bf16 %v3992_v50, %v3991_v26  ;;  %v1914_v50 = vld [vmem:[#allocation2 + $0x210] sm:$0xff] }
 0x1d0   :  { %6075 = vmatprep.mubr.bf16.mxu1 %v1950_v51  ;;  %6427 = vmatprep.mubr.bf16.mxu0 %v8494_v60  ;;  %v1954_v51 = vpack.c.bf16 %v1905_v12, %v1904_v54  ;;  %v1915_v54 = vld [vmem:[#allocation2 + $0x218] sm:$0xff]  ;;  %v1916_v12 = vld [vmem:[#allocation2 + $0x228] sm:$0xff] }
 0x1d1   :  { %v1959_v17 = vpack.c.bf16 %v1915_v54, %v1914_v50  ;;  %v1933_v50 = vld [vmem:[#allocation2 + $0x2f0] sm:$0xff] }
 0x1d7   :  { %6076 = vmatmul.mubr.bf16.gmra.mrb[20].mxu1 %v1951_v27  ;;  %6428 = vmatmul.mubr.bf16.gmra.mrb[52].mxu0 %v8498_v25  ;;  %v1911_v27 = vld [vmem:[#allocation2 + $0x1e8] sm:$0xff] }
 0x1d8   :  { %6079 = vmatprep.mubr.bf16.mxu1 %v1952_v7  ;;  %6431 = vmatprep.mubr.bf16.mxu0 %v8500_v2  ;;  %v1912_v7 = vld [vmem:[#allocation2 + $0x1f8] sm:$0xff]  ;;  %v1957_v36 = vpack.c.bf16 %v1911_v27, %v1910_v9  ;;  %v1927_v9 = vld [vmem:[#allocation2 + $0x2a8] sm:$0xff] }
 0x1d9   :  { %v1958_v26 = vpack.c.bf16 %v1913_v28, %v1912_v7  ;;  %v1928_v27 = vld [vmem:[#allocation2 + $0x2b8] sm:$0xff]  ;;  %v1929_v7 = vld [vmem:[#allocation2 + $0x2c0] sm:$0xff] }
 0x1da   :  { %v1966_v28 = vpack.c.bf16 %v1929_v7, %v1928_v27 }
 0x1df   :  { %6080 = vmatmul.mubr.bf16.gmra.mrb[24].mxu1 %v1953_v63  ;;  %6432 = vmatmul.mubr.bf16.gmra.mrb[56].mxu0 %v8504_v43  ;;  %v1919_v63 = vld [vmem:[#allocation2 + $0x248] sm:$0xff] }
 0x1e0   :  { %6083 = vmatprep.mubr.bf16.mxu1 %v1954_v51  ;;  %6435 = vmatprep.mubr.bf16.mxu0 %v8506_v35  ;;  %v1920_v51 = vld [vmem:[#allocation2 + $0x258] sm:$0xff] }
 0x1e1   :  { %v1962_v55 = vpack.c.bf16 %v1921_v4, %v1920_v51  ;;  %v4478_v4 = vld [vmem:[#allocation2 + $0x1a2] sm:$0xff] }
 0x1e7   :  { %6084 = vmatmul.mubr.bf16.gmra.mrb[28].mxu1 %v8281_v1  ;;  %6436 = vmatmul.mubr.bf16.gmra.mrb[60].mxu0 %v4028_v53  ;;  %v1917_v1 = vld [vmem:[#allocation2 + $0x230] sm:$0xff] }
 0x1e8   :  { %6087 = vmatprep.mubr.bf16.mxu1 %v1956_v13  ;;  %6455 = vmatprep.mubr.bf16.mxu0 %v8292_v33  ;;  %v1960_v62 = vpack.c.bf16 %v1917_v1, %v1916_v12  ;;  %v1918_v33 = vld [vmem:[#allocation2 + $0x240] sm:$0xff]  ;;  %v1925_v53 = vld [vmem:[#allocation2 + $0x290] sm:$0xff]  ;;  %v1935_v12 = vld [vmem:[#allocation2 + $0x308] sm:$0xff] }
 0x1e9   :  { %v1964_v13 = vpack.c.bf16 %v1925_v53, %v1924_v23  ;;  %v1936_v1 = vld [vmem:[#allocation2 + $0x318] sm:$0xff] }
 0x1ef   :  { %6088 = vmatmul.mubr.bf16.gmra.mrb[32].mxu1 %v1957_v36  ;;  %6456 = vmatmul.mubr.bf16.vlgmr.msra.gmra.mrb[0].mxu0 %v8304_v14  ;;  %v1961_v14 = vpack.c.bf16 %v1919_v63, %v1918_v33  ;;  %v1931_v36 = vld [vmem:[#allocation2 + $0x2d8] sm:$0xff] }
 0x1f0   :  { %6091 = vmatprep.mubr.bf16.mxu1 %v1958_v26  ;;  %6459 = vmatprep.mubr.bf16.mxu0 %v8306_v41  ;;  %v1922_v41 = vld [vmem:[#allocation2 + $0x270] sm:$0xff]  ;;  %v1932_v26 = vld [vmem:[#allocation2 + $0x2e8] sm:$0xff] }
 0x1f1   :  { %v1968_v54 = vpack.c.bf16 %v1933_v50, %v1932_v26 }
 0x1f7   :  { %6092 = vmatmul.mubr.bf16.gmra.mrb[36].mxu1 %v1959_v17  ;;  %6460 = vmatmul.mubr.bf16.gmra.mrb[4].mxu0 %v8318_v32  ;;  %v1963_v32 = vpack.c.bf16 %v1923_v61, %v1922_v41  ;;  %v1937_v17 = vld [vmem:[#allocation2 + $0x320] sm:$0xff] }
 0x1f8   :  { %6095 = vmatprep.mubr.bf16.mxu1 %v1960_v62  ;;  %6463 = vmatprep.mubr.bf16.mxu0 %v8320_v6  ;;  %v1926_v6 = vld [vmem:[#allocation2 + $0x2a0] sm:$0xff]  ;;  %v4476_v62 = vld [vmem:[#allocation2 + $0x18a] sm:$0xff]  ;;  %v1970_v63 = vpack.c.bf16 %v1937_v17, %v1936_v1 }
 0x1ff   :  { %6096 = vmatmul.mubr.bf16.gmra.mrb[40].mxu1 %v1961_v14  ;;  %6464 = vmatmul.mubr.bf16.gmra.mrb[8].mxu0 %v8332_v52  ;;  %v1965_v52 = vpack.c.bf16 %v1927_v9, %v1926_v6  ;;  %v2423_v14 = vld [vmem:[#allocation2 + $0x1d1] sm:$0xff] }
 0x200   :  { %6099 = vmatprep.mubr.bf16.mxu1 %v1962_v55  ;;  %6467 = vmatprep.mubr.bf16.mxu0 %v8334_v8  ;;  %v1930_v8 = vld [vmem:[#allocation2 + $0x2d0] sm:$0xff] }
 0x207   :  { %6100 = vmatmul.mubr.bf16.gmra.mrb[44].mxu1 %v1963_v32  ;;  %6468 = vmatmul.mubr.bf16.gmra.mrb[12].mxu0 %v8343_v19  ;;  %v1967_v19 = vpack.c.bf16 %v1931_v36, %v1930_v8 }
 0x208   :  { %6103 = vmatprep.mubr.bf16.mxu1 %v1964_v13  ;;  %6471 = vmatprep.mubr.bf16.mxu0 %v8345_v10  ;;  %v1934_v10 = vld [vmem:[#allocation2 + $0x300] sm:$0xff] }
 0x209   :  { %v1969_v33 = vpack.c.bf16 %v1935_v12, %v1934_v10 }
 0x20f   :  { %6104 = vmatmul.mubr.bf16.gmra.mrb[48].mxu1 %v1965_v52  ;;  %6472 = vmatmul.mubr.bf16.gmra.mrb[16].mxu0 %v8357_v42  ;;  %v4475_v42 = vld [vmem:[#allocation2 + $0x182] sm:$0xff] }
 0x210   :  { %6107 = vmatprep.mubr.bf16.mxu1 %v1966_v28  ;;  %6475 = vmatprep.mubr.bf16.mxu0 %v8359_v45  ;;  %v4525_v51 = vpack.c.bf16 %v4476_v62, %v4475_v42  ;;  %v4477_v45 = vld [vmem:[#allocation2 + $0x19a] sm:$0xff] }
 0x211   :  { %v4526_v55 = vpack.c.bf16 %v4478_v4, %v4477_v45 }
 0x217   :  { %6108 = vmatmul.mubr.bf16.gmra.mrb[52].mxu1 %v1967_v19  ;;  %6476 = vmatmul.mubr.bf16.gmra.mrb[20].mxu0 %v8365_v22  ;;  %v2422_v22 = vld [vmem:[#allocation2 + $0x1c9] sm:$0xff] }
 0x218   :  { %6111 = vmatprep.mubr.bf16.mxu1 %v1968_v54  ;;  %6479 = vmatprep.mubr.bf16.mxu0 %v8367_v16  ;;  %v2470_v41 = vpack.c.bf16 %v2423_v14, %v2422_v22  ;;  %v4507_v16 = vld [vmem:[#allocation2 + $0x332] sm:$0xff] }
 0x21f   :  { %6112 = vmatmul.mubr.bf16.gmra.mrb[56].mxu1 %v1969_v33  ;;  %6480 = vmatmul.mubr.bf16.gmra.mrb[24].mxu0 %v8375_v40 }
 0x220   :  { %6115 = vmatprep.mubr.bf16.mxu1 %v1970_v63  ;;  %6483 = vmatprep.mubr.bf16.mxu0 %v4525_v51 }
 0x227   :  { %6116 = vmatmul.mubr.bf16.gmra.mrb[60].mxu1 %v8369_v3  ;;  %6484 = vmatmul.mubr.bf16.gmra.mrb[28].mxu0 %v4526_v55  ;;  %v4508_v3 = vld [vmem:[#allocation2 + $0x33a] sm:$0xff] }
 0x228   :  { %6167 = vmatprep.mubr.bf16.mxu1 %v2470_v41  ;;  %6487 = vmatprep.mubr.bf16.mxu0 %v8379_v39  ;;  %v4541_v40 = vpack.c.bf16 %v4508_v3, %v4507_v16  ;;  %v4509_v39 = vld [vmem:[#allocation2 + $0x34a] sm:$0xff] }
 0x22f   :  { %6168 = vmatmul.mubr.bf16.vlgmr.msra.gmra.mrb[32].mxu1 %v8442_v57  ;;  %6488 = vmatmul.mubr.bf16.gmra.mrb[32].mxu0 %v8389_v15  ;;  %v4510_v15 = vld [vmem:[#allocation2 + $0x352] sm:$0xff] }
 0x230   :  { %6171 = vmatprep.mubr.bf16.mxu1 %v8446_v44  ;;  %6491 = vmatprep.mubr.bf16.mxu0 %v8391_v11  ;;  %v4542_v11 = vpack.c.bf16 %v4510_v15, %v4509_v39 }
 0x237   :  { %6172 = vmatmul.mubr.bf16.gmra.mrb[36].mxu1 %v8448_v5  ;;  %6492 = vmatmul.mubr.bf16.gmra.mrb[36].mxu0 %v8401_v38 }
 0x238   :  { %6175 = vmatprep.mubr.bf16.mxu1 %v8456_v18  ;;  %6495 = vmatprep.mubr.bf16.mxu0 %v8403_v24 }
 0x23f   :  { %6176 = vmatmul.mubr.bf16.gmra.mrb[40].mxu1 %v8458_v59  ;;  %6496 = vmatmul.mubr.bf16.gmra.mrb[40].mxu0 %v8413_v47 }
 0x240   :  { %6179 = vmatprep.mubr.bf16.mxu1 %v8468_v30  ;;  %6499 = vmatprep.mubr.bf16.mxu0 %v8415_v21 }
 0x247   :  { %6180 = vmatmul.mubr.bf16.gmra.mrb[44].mxu1 %v8470_v49  ;;  %6500 = vmatmul.mubr.bf16.gmra.mrb[44].mxu0 %v8422_v20 }
 0x248   :  { %6183 = vmatprep.mubr.bf16.mxu1 %v8480_v31  ;;  %6503 = vmatprep.mubr.bf16.mxu0 %v8424_v37 }
 0x24f   :  { %6184 = vmatmul.mubr.bf16.gmra.mrb[48].mxu1 %v8482_v58  ;;  %6504 = vmatmul.mubr.bf16.gmra.mrb[48].mxu0 %v8428_v56 }
 0x250   :  { %6187 = vmatprep.mubr.bf16.mxu1 %v8492_v29  ;;  %6507 = vmatprep.mubr.bf16.mxu0 %v8430_v0 }
 0x257   :  { %6188 = vmatmul.mubr.bf16.gmra.mrb[52].mxu1 %v8494_v60  ;;  %6508 = vmatmul.mubr.bf16.gmra.mrb[52].mxu0 %v8434_v34 }
 0x258   :  { %6191 = vmatprep.mubr.bf16.mxu1 %v8498_v25  ;;  %6511 = vmatprep.mubr.bf16.mxu0 %v8436_v46 }
 0x25f   :  { %6192 = vmatmul.mubr.bf16.gmra.mrb[56].mxu1 %v8500_v2  ;;  %6512 = vmatmul.mubr.bf16.gmra.mrb[56].mxu0 %v8440_v48 }
 0x260   :  { %6195 = vmatprep.mubr.bf16.mxu1 %v8504_v43  ;;  %6515 = vmatprep.mubr.bf16.mxu0 %v4541_v40 }
 0x267   :  { %6196 = vmatmul.mubr.bf16.gmra.mrb[60].mxu1 %v8506_v35  ;;  %6516 = vmatmul.mubr.bf16.gmra.mrb[60].mxu0 %v4542_v11 }
 0x282   :  { %v6057_v38 = vpop.f32.mrb[0].mxu1 }
 0x283   :  { %v2071_v24 = vpop.f32.mrb[1].mxu1 }
 0x284   :  { %v6058_v47 = vpop.f32.mrb[2].mxu1 }
 0x285   :  { %v2074_v21 = vpop.f32.mrb[3].mxu1 }
 0x28a   :  { %v6061_v20 = vpop.f32.mrb[4].mxu1 }
 0x28b   :  { %v2087_v37 = vpop.f32.mrb[5].mxu1 }
 0x28c   :  { %v6062_v56 = vpop.f32.mrb[6].mxu1 }
 0x28d   :  { %v2090_v0 = vpop.f32.mrb[7].mxu1 }
 0x292   :  { %v8555_v34 = vpop.f32.mrb[8].mxu1 }
 0x293   :  { %v8557_v46 = vpop.f32.mrb[9].mxu1 }
 0x294   :  { %v8559_v48 = vpop.f32.mrb[10].mxu1 }
 0x295   :  { %v8561_v57 = vpop.f32.mrb[11].mxu1 }
 0x29a   :  { %v8563_v44 = vpop.f32.mrb[12].mxu1 }
 0x29b   :  { %v8565_v5 = vpop.f32.mrb[13].mxu1 }
 0x29c   :  { %v8567_v18 = vpop.f32.mrb[14].mxu1 }
 0x29d   :  { %v8569_v59 = vpop.f32.mrb[15].mxu1 }
 0x2a2   :  { %v8571_v30 = vpop.f32.mrb[16].mxu1 }
 0x2a3   :  { %v8573_v49 = vpop.f32.mrb[17].mxu1 }
 0x2a4   :  { %v8575_v31 = vpop.f32.mrb[18].mxu1 }
 0x2a5   :  { %v8577_v58 = vpop.f32.mrb[19].mxu1 }
 0x2aa   :  { %v8579_v29 = vpop.f32.mrb[20].mxu1 }
 0x2ab   :  { %v8581_v60 = vpop.f32.mrb[21].mxu1 }
 0x2ac   :  { %v8583_v25 = vpop.f32.mrb[22].mxu1 }
 0x2ad   :  { %v8585_v2 = vpop.f32.mrb[23].mxu1 }
 0x2b2   :  { %v8587_v43 = vpop.f32.mrb[24].mxu1 }
 0x2b3   :  { %v8589_v35 = vpop.f32.mrb[25].mxu1 }
 0x2b4   :  { %v8591_v61 = vpop.f32.mrb[26].mxu1 }
 0x2b5   :  { %v8593_v23 = vpop.f32.mrb[27].mxu1 }
 0x2ba   :  { %v8595_v53 = vpop.f32.mrb[28].mxu1 }
 0x2bb   :  { %v8597_v32 = vpop.f32.mrb[29].mxu1 }
 0x2bc   :  { %v8599_v13 = vpop.f32.mrb[30].mxu1 }
 0x2bd   :  { %v8601_v6 = vpop.f32.mrb[31].mxu1 }
 0x2c2   :  { %v6457_v9 = vpop.f32.mrb[0].mxu0 }
 0x2c3   :  { %v6535_v27 = vadd.f32 %v6457_v9, %v6057_v38  ;;  %v4642_v7 = vpop.f32.mrb[1].mxu0 }
 0x2c4   :  { %v6536_v52 = vadd.f32 %v4642_v7, %v2071_v24  ;;  %v6458_v28 = vpop.f32.mrb[2].mxu0 }
 0x2c5   :  { %4963 = vst [vmem:[%s8829_s4 + $0x10] sm:$0xff] %v6535_v27  ;;  %v6537_v8 = vadd.f32 %v6458_v28, %v6058_v47  ;;  %v4645_v36 = vpop.f32.mrb[3].mxu0  ;;  %v5097_v10 = vmul.f32 %v6535_v27, %v6535_v27 }
 0x2c6   :  { %4961 = vst [vmem:[%s8829_s4] sm:$0xff] %v6536_v52  ;;  %v6538_v26 = vadd.f32 %v4645_v36, %v2074_v21  ;;  %v5095_v50 = vmul.f32 %v6536_v52, %v6536_v52 }
 0x2c7   :  { %4964 = vst [vmem:[%s8829_s4 + $0x18] sm:$0xff] %v6537_v8  ;;  %v5098_v33 = vmul.f32 %v6537_v8, %v6537_v8 }
 0x2c8   :  { %4962 = vst [vmem:[%s8829_s4 + $0x8] sm:$0xff] %v6538_v26  ;;  %v5025_v19 = vadd.f32 %v6538_v26, %v6536_v52  ;;  %v5096_v54 = vmul.f32 %v6538_v26, %v6538_v26 }
 0x2ca   :  { %v5026_v12 = vadd.f32 %v6535_v27, %v5025_v19  ;;  %v5159_v1 = vadd.f32 %v5096_v54, %v5095_v50  ;;  %v6461_v17 = vpop.f32.mrb[4].mxu0 }
 0x2cb   :  { %v6539_v42 = vadd.f32 %v6461_v17, %v6061_v20  ;;  %v4658_v62 = vpop.f32.mrb[5].mxu0 }
 0x2cc   :  { %v5160_v63 = vadd.f32 %v5159_v1, %v5097_v10  ;;  %v6540_v51 = vadd.f32 %v4658_v62, %v2087_v37  ;;  %v5027_v45 = vadd.f32 %v6537_v8, %v5026_v12  ;;  %v6462_v4 = vpop.f32.mrb[6].mxu0 }
 0x2cd   :  { %4967 = vst [vmem:[%s8829_s4 + $0x30] sm:$0xff] %v6539_v42  ;;  %v6541_v22 = vadd.f32 %v6462_v4, %v6062_v56  ;;  %v4661_v14 = vpop.f32.mrb[7].mxu0  ;;  %v5101_v11 = vmul.f32 %v6539_v42, %v6539_v42 }
 0x2ce   :  { %4965 = vst [vmem:[%s8829_s4 + $0x20] sm:$0xff] %v6540_v51  ;;  %v5028_v55 = vadd.f32 %v6540_v51, %v5027_v45  ;;  %v5099_v41 = vmul.f32 %v6540_v51, %v6540_v51  ;;  %v5161_v16 = vadd.f32 %v5160_v63, %v5098_v33  ;;  %v6542_v3 = vadd.f32 %v4661_v14, %v2090_v0 }
 0x2cf   :  { %4968 = vst [vmem:[%s8829_s4 + $0x38] sm:$0xff] %v6541_v22  ;;  %v5102_v37 = vmul.f32 %v6541_v22, %v6541_v22 }
 0x2d0   :  { %v5162_v40 = vadd.f32 %v5161_v16, %v5099_v41  ;;  %4966 = vst [vmem:[%s8829_s4 + $0x28] sm:$0xff] %v6542_v3  ;;  %v5029_v39 = vadd.f32 %v6542_v3, %v5028_v55  ;;  %v5100_v15 = vmul.f32 %v6542_v3, %v6542_v3 }
 0x2d2   :  { %v5030_v38 = vadd.f32 %v6539_v42, %v5029_v39  ;;  %v5163_v24 = vadd.f32 %v5162_v40, %v5100_v15  ;;  %v6465_v47 = vpop.f32.mrb[8].mxu0 }
 0x2d3   :  { %v6543_v21 = vadd.f32 %v6465_v47, %v8555_v34  ;;  %v4674_v20 = vpop.f32.mrb[9].mxu0 }
 0x2d4   :  { %v5164_v56 = vadd.f32 %v5163_v24, %v5101_v11  ;;  %v6544_v0 = vadd.f32 %v4674_v20, %v8557_v46  ;;  %v5031_v9 = vadd.f32 %v6541_v22, %v5030_v38  ;;  %v6466_v27 = vpop.f32.mrb[10].mxu0 }
 0x2d5   :  { %4971 = vst [vmem:[%s8829_s4 + $0x50] sm:$0xff] %v6543_v21  ;;  %v6545_v7 = vadd.f32 %v6466_v27, %v8559_v48  ;;  %v4677_v52 = vpop.f32.mrb[11].mxu0  ;;  %v5105_v50 = vmul.f32 %v6543_v21, %v6543_v21 }
 0x2d6   :  { %4969 = vst [vmem:[%s8829_s4 + $0x40] sm:$0xff] %v6544_v0  ;;  %v5032_v28 = vadd.f32 %v6544_v0, %v5031_v9  ;;  %v5103_v34 = vmul.f32 %v6544_v0, %v6544_v0  ;;  %v5165_v8 = vadd.f32 %v5164_v56, %v5102_v37  ;;  %v6546_v36 = vadd.f32 %v4677_v52, %v8561_v57 }
 0x2d7   :  { %4972 = vst [vmem:[%s8829_s4 + $0x58] sm:$0xff] %v6545_v7  ;;  %v5106_v17 = vmul.f32 %v6545_v7, %v6545_v7 }
 0x2d8   :  { %v5166_v46 = vadd.f32 %v5165_v8, %v5103_v34  ;;  %4970 = vst [vmem:[%s8829_s4 + $0x48] sm:$0xff] %v6546_v36  ;;  %v5033_v48 = vadd.f32 %v6546_v36, %v5032_v28  ;;  %v5104_v26 = vmul.f32 %v6546_v36, %v6546_v36 }
 0x2da   :  { %v5034_v19 = vadd.f32 %v6543_v21, %v5033_v48  ;;  %v5167_v54 = vadd.f32 %v5166_v46, %v5104_v26  ;;  %v6469_v10 = vpop.f32.mrb[12].mxu0 }
 0x2db   :  { %v6547_v12 = vadd.f32 %v6469_v10, %v8563_v44  ;;  %v4690_v1 = vpop.f32.mrb[13].mxu0 }
 0x2dc   :  { %v5168_v57 = vadd.f32 %v5167_v54, %v5105_v50  ;;  %v6548_v42 = vadd.f32 %v4690_v1, %v8565_v5  ;;  %v5035_v62 = vadd.f32 %v6545_v7, %v5034_v19  ;;  %v6470_v33 = vpop.f32.mrb[14].mxu0 }
 0x2dd   :  { %4975 = vst [vmem:[%s8829_s4 + $0x70] sm:$0xff] %v6547_v12  ;;  %v6549_v63 = vadd.f32 %v6470_v33, %v8567_v18  ;;  %v4693_v51 = vpop.f32.mrb[15].mxu0  ;;  %v5109_v55 = vmul.f32 %v6547_v12, %v6547_v12 }
 0x2de   :  { %4973 = vst [vmem:[%s8829_s4 + $0x60] sm:$0xff] %v6548_v42  ;;  %v5036_v45 = vadd.f32 %v6548_v42, %v5035_v62  ;;  %v5107_v44 = vmul.f32 %v6548_v42, %v6548_v42  ;;  %v5169_v4 = vadd.f32 %v5168_v57, %v5106_v17  ;;  %v6550_v22 = vadd.f32 %v4693_v51, %v8569_v59 }
 0x2df   :  { %4976 = vst [vmem:[%s8829_s4 + $0x78] sm:$0xff] %v6549_v63  ;;  %v5110_v15 = vmul.f32 %v6549_v63, %v6549_v63 }
 0x2e0   :  { %v5170_v5 = vadd.f32 %v5169_v4, %v5107_v44  ;;  %4974 = vst [vmem:[%s8829_s4 + $0x68] sm:$0xff] %v6550_v22  ;;  %v5037_v18 = vadd.f32 %v6550_v22, %v5036_v45  ;;  %v5108_v14 = vmul.f32 %v6550_v22, %v6550_v22 }
 0x2e2   :  { %v5038_v41 = vadd.f32 %v6547_v12, %v5037_v18  ;;  %v5171_v16 = vadd.f32 %v5170_v5, %v5108_v14  ;;  %v6473_v3 = vpop.f32.mrb[16].mxu0 }
 0x2e3   :  { %v6551_v40 = vadd.f32 %v6473_v3, %v8571_v30  ;;  %v4706_v39 = vpop.f32.mrb[17].mxu0 }
 0x2e4   :  { %v5172_v59 = vadd.f32 %v5171_v16, %v5109_v55  ;;  %v6552_v11 = vadd.f32 %v4706_v39, %v8573_v49  ;;  %v5039_v38 = vadd.f32 %v6549_v63, %v5038_v41  ;;  %v6474_v24 = vpop.f32.mrb[18].mxu0 }
 0x2e5   :  { %4979 = vst [vmem:[%s8829_s4 + $0x90] sm:$0xff] %v6551_v40  ;;  %v6553_v47 = vadd.f32 %v6474_v24, %v8575_v31  ;;  %v4709_v21 = vpop.f32.mrb[19].mxu0  ;;  %v5113_v9 = vmul.f32 %v6551_v40, %v6551_v40 }
 0x2e6   :  { %4977 = vst [vmem:[%s8829_s4 + $0x80] sm:$0xff] %v6552_v11  ;;  %v5040_v20 = vadd.f32 %v6552_v11, %v5039_v38  ;;  %v5111_v30 = vmul.f32 %v6552_v11, %v6552_v11  ;;  %v5173_v37 = vadd.f32 %v5172_v59, %v5110_v15  ;;  %v6554_v56 = vadd.f32 %v4709_v21, %v8577_v58 }
 0x2e7   :  { %4980 = vst [vmem:[%s8829_s4 + $0x98] sm:$0xff] %v6553_v47  ;;  %v5114_v8 = vmul.f32 %v6553_v47, %v6553_v47 }
 0x2e8   :  { %v5174_v49 = vadd.f32 %v5173_v37, %v5111_v30  ;;  %4978 = vst [vmem:[%s8829_s4 + $0x88] sm:$0xff] %v6554_v56  ;;  %v5041_v31 = vadd.f32 %v6554_v56, %v5040_v20  ;;  %v5112_v0 = vmul.f32 %v6554_v56, %v6554_v56 }
 0x2ea   :  { %v5042_v27 = vadd.f32 %v6551_v40, %v5041_v31  ;;  %v5175_v7 = vadd.f32 %v5174_v49, %v5112_v0  ;;  %v6477_v52 = vpop.f32.mrb[20].mxu0 }
 0x2eb   :  { %v6555_v28 = vadd.f32 %v6477_v52, %v8579_v29  ;;  %v4722_v34 = vpop.f32.mrb[21].mxu0 }
 0x2ec   :  { %v5176_v58 = vadd.f32 %v5175_v7, %v5113_v9  ;;  %v6556_v36 = vadd.f32 %v4722_v34, %v8581_v60  ;;  %v5043_v46 = vadd.f32 %v6553_v47, %v5042_v27  ;;  %v6478_v48 = vpop.f32.mrb[22].mxu0 }
 0x2ed   :  { %4983 = vst [vmem:[%s8829_s4 + $0xb0] sm:$0xff] %v6555_v28  ;;  %v6557_v26 = vadd.f32 %v6478_v48, %v8583_v25  ;;  %v4725_v50 = vpop.f32.mrb[23].mxu0  ;;  %v5117_v1 = vmul.f32 %v6555_v28, %v6555_v28 }
 0x2ee   :  { %4981 = vst [vmem:[%s8829_s4 + $0xa0] sm:$0xff] %v6556_v36  ;;  %v5044_v19 = vadd.f32 %v6556_v36, %v5043_v46  ;;  %v5115_v29 = vmul.f32 %v6556_v36, %v6556_v36  ;;  %v5177_v54 = vadd.f32 %v5176_v58, %v5114_v8  ;;  %v6558_v10 = vadd.f32 %v4725_v50, %v8585_v2 }
 0x2ef   :  { %4984 = vst [vmem:[%s8829_s4 + $0xb8] sm:$0xff] %v6557_v26  ;;  %v5118_v63 = vmul.f32 %v6557_v26, %v6557_v26 }
 0x2f0   :  { %v5178_v60 = vadd.f32 %v5177_v54, %v5115_v29  ;;  %4982 = vst [vmem:[%s8829_s4 + $0xa8] sm:$0xff] %v6558_v10  ;;  %v5045_v25 = vadd.f32 %v6558_v10, %v5044_v19  ;;  %v5116_v12 = vmul.f32 %v6558_v10, %v6558_v10 }
 0x2f2   :  { %v5046_v17 = vadd.f32 %v6555_v28, %v5045_v25  ;;  %v5179_v57 = vadd.f32 %v5178_v60, %v5116_v12  ;;  %v6481_v42 = vpop.f32.mrb[24].mxu0 }
 0x2f3   :  { %v6559_v62 = vadd.f32 %v6481_v42, %v8587_v43  ;;  %v4738_v33 = vpop.f32.mrb[25].mxu0 }
 0x2f4   :  { %v5180_v2 = vadd.f32 %v5179_v57, %v5117_v1  ;;  %v6560_v51 = vadd.f32 %v4738_v33, %v8589_v35  ;;  %v5047_v45 = vadd.f32 %v6557_v26, %v5046_v17  ;;  %v6482_v44 = vpop.f32.mrb[26].mxu0 }
 0x2f5   :  { %4987 = vst [vmem:[%s8829_s4 + $0xd0] sm:$0xff] %v6559_v62  ;;  %v6561_v4 = vadd.f32 %v6482_v44, %v8591_v61  ;;  %v4741_v22 = vpop.f32.mrb[27].mxu0  ;;  %v5121_v41 = vmul.f32 %v6559_v62, %v6559_v62 }
 0x2f6   :  { %4985 = vst [vmem:[%s8829_s4 + $0xc0] sm:$0xff] %v6560_v51  ;;  %v5048_v5 = vadd.f32 %v6560_v51, %v5047_v45  ;;  %v5119_v43 = vmul.f32 %v6560_v51, %v6560_v51  ;;  %v5181_v18 = vadd.f32 %v5180_v2, %v5118_v63  ;;  %v6562_v14 = vadd.f32 %v4741_v22, %v8593_v23 }
 0x2f7   :  { %4988 = vst [vmem:[%s8829_s4 + $0xd8] sm:$0xff] %v6561_v4  ;;  %v5122_v59 = vmul.f32 %v6561_v4, %v6561_v4 }
 0x2f8   :  { %v5182_v35 = vadd.f32 %v5181_v18, %v5119_v43  ;;  %4986 = vst [vmem:[%s8829_s4 + $0xc8] sm:$0xff] %v6562_v14  ;;  %v5049_v61 = vadd.f32 %v6562_v14, %v5048_v5  ;;  %v5120_v55 = vmul.f32 %v6562_v14, %v6562_v14 }
 0x2fa   :  { %v5050_v16 = vadd.f32 %v6559_v62, %v5049_v61  ;;  %v5183_v3 = vadd.f32 %v5182_v35, %v5120_v55  ;;  %v6485_v40 = vpop.f32.mrb[28].mxu0 }
 0x2fb   :  { %v6563_v39 = vadd.f32 %v6485_v40, %v8595_v53  ;;  %v4754_v15 = vpop.f32.mrb[29].mxu0 }
 0x2fc   :  { %v5184_v23 = vadd.f32 %v5183_v3, %v5121_v41  ;;  %v6564_v11 = vadd.f32 %v4754_v15, %v8597_v32  ;;  %v5051_v38 = vadd.f32 %v6561_v4, %v5050_v16  ;;  %v6486_v24 = vpop.f32.mrb[30].mxu0 }
 0x2fd   :  { %4991 = vst [vmem:[%s8829_s4 + $0xf0] sm:$0xff] %v6563_v39  ;;  %v6565_v47 = vadd.f32 %v6486_v24, %v8599_v13  ;;  %v4757_v21 = vpop.f32.mrb[31].mxu0  ;;  %v5125_v31 = vmul.f32 %v6563_v39, %v6563_v39 }
 0x2fe   :  { %4989 = vst [vmem:[%s8829_s4 + $0xe0] sm:$0xff] %v6564_v11  ;;  %v5052_v20 = vadd.f32 %v6564_v11, %v5051_v38  ;;  %v5123_v53 = vmul.f32 %v6564_v11, %v6564_v11  ;;  %v5185_v30 = vadd.f32 %v5184_v23, %v5122_v59  ;;  %v6566_v37 = vadd.f32 %v4757_v21, %v8601_v6 }
 0x2ff   :  { %4992 = vst [vmem:[%s8829_s4 + $0xf8] sm:$0xff] %v6565_v47  ;;  %v5126_v34 = vmul.f32 %v6565_v47, %v6565_v47 }
 0x300   :  { %v5186_v32 = vadd.f32 %v5185_v30, %v5123_v53  ;;  %4990 = vst [vmem:[%s8829_s4 + $0xe8] sm:$0xff] %v6566_v37  ;;  %v5053_v13 = vadd.f32 %v6566_v37, %v5052_v20  ;;  %v5124_v56 = vmul.f32 %v6566_v37, %v6566_v37 }
 0x302   :  { %v6169_v49 = vpop.f32.mrb[32].mxu1  ;;  %v5054_v0 = vadd.f32 %v6563_v39, %v5053_v13  ;;  %v5187_v9 = vadd.f32 %v5186_v32, %v5124_v56  ;;  %v6489_v27 = vpop.f32.mrb[32].mxu0 }
 0x303   :  { %v2713_v7 = vpop.f32.mrb[33].mxu1  ;;  %v6567_v52 = vadd.f32 %v6489_v27, %v6169_v49  ;;  %v4770_v28 = vpop.f32.mrb[33].mxu0 }
 0x304   :  { %v6170_v6 = vpop.f32.mrb[34].mxu1  ;;  %v5188_v8 = vadd.f32 %v5187_v9, %v5125_v31  ;;  %v6568_v58 = vadd.f32 %v4770_v28, %v2713_v7  ;;  %v5055_v36 = vadd.f32 %v6565_v47, %v5054_v0  ;;  %v6490_v46 = vpop.f32.mrb[34].mxu0 }
 0x305   :  { %v2716_v48 = vpop.f32.mrb[35].mxu1  ;;  %4995 = vst [vmem:[%s8829_s4 + $0x110] sm:$0xff] %v6567_v52  ;;  %v6569_v26 = vadd.f32 %v6490_v46, %v6170_v6  ;;  %v4773_v50 = vpop.f32.mrb[35].mxu0  ;;  %v5129_v17 = vmul.f32 %v6567_v52, %v6567_v52 }
 0x306   :  { %4993 = vst [vmem:[%s8829_s4 + $0x100] sm:$0xff] %v6568_v58  ;;  %v5056_v19 = vadd.f32 %v6568_v58, %v5055_v36  ;;  %v5127_v29 = vmul.f32 %v6568_v58, %v6568_v58  ;;  %v5189_v54 = vadd.f32 %v5188_v8, %v5126_v34  ;;  %v6570_v10 = vadd.f32 %v4773_v50, %v2716_v48 }
 0x307   :  { %4996 = vst [vmem:[%s8829_s4 + $0x118] sm:$0xff] %v6569_v26  ;;  %v5130_v45 = vmul.f32 %v6569_v26, %v6569_v26 }
 0x308   :  { %v5190_v60 = vadd.f32 %v5189_v54, %v5127_v29  ;;  %4994 = vst [vmem:[%s8829_s4 + $0x108] sm:$0xff] %v6570_v10  ;;  %v5057_v25 = vadd.f32 %v6570_v10, %v5056_v19  ;;  %v5128_v12 = vmul.f32 %v6570_v10, %v6570_v10 }
 0x30a   :  { %v6173_v1 = vpop.f32.mrb[36].mxu1  ;;  %v5058_v57 = vadd.f32 %v6567_v52, %v5057_v25  ;;  %v5191_v42 = vadd.f32 %v5190_v60, %v5128_v12  ;;  %v6493_v62 = vpop.f32.mrb[36].mxu0 }
 0x30b   :  { %v2729_v33 = vpop.f32.mrb[37].mxu1  ;;  %v6571_v63 = vadd.f32 %v6493_v62, %v6173_v1  ;;  %v4786_v2 = vpop.f32.mrb[37].mxu0 }
 0x30c   :  { %v6174_v51 = vpop.f32.mrb[38].mxu1  ;;  %v5192_v44 = vadd.f32 %v5191_v42, %v5129_v17  ;;  %v6572_v4 = vadd.f32 %v4786_v2, %v2729_v33  ;;  %v5059_v22 = vadd.f32 %v6569_v26, %v5058_v57  ;;  %v6494_v5 = vpop.f32.mrb[38].mxu0 }
 0x30d   :  { %v2732_v43 = vpop.f32.mrb[39].mxu1  ;;  %4999 = vst [vmem:[%s8829_s4 + $0x130] sm:$0xff] %v6571_v63  ;;  %v6573_v18 = vadd.f32 %v6494_v5, %v6174_v51  ;;  %v4789_v14 = vpop.f32.mrb[39].mxu0  ;;  %v5133_v15 = vmul.f32 %v6571_v63, %v6571_v63 }
 0x30e   :  { %4997 = vst [vmem:[%s8829_s4 + $0x120] sm:$0xff] %v6572_v4  ;;  %v5060_v35 = vadd.f32 %v6572_v4, %v5059_v22  ;;  %v5131_v61 = vmul.f32 %v6572_v4, %v6572_v4  ;;  %v5193_v55 = vadd.f32 %v5192_v44, %v5130_v45  ;;  %v6574_v41 = vadd.f32 %v4789_v14, %v2732_v43 }
 0x30f   :  { %5000 = vst [vmem:[%s8829_s4 + $0x138] sm:$0xff] %v6573_v18  ;;  %v5134_v20 = vmul.f32 %v6573_v18, %v6573_v18 }
 0x310   :  { %v5194_v16 = vadd.f32 %v5193_v55, %v5131_v61  ;;  %4998 = vst [vmem:[%s8829_s4 + $0x128] sm:$0xff] %v6574_v41  ;;  %v5061_v3 = vadd.f32 %v6574_v41, %v5060_v35  ;;  %v5132_v40 = vmul.f32 %v6574_v41, %v6574_v41 }
 0x312   :  { %v6177_v39 = vpop.f32.mrb[40].mxu1  ;;  %v5062_v59 = vadd.f32 %v6571_v63, %v5061_v3  ;;  %v5195_v23 = vadd.f32 %v5194_v16, %v5132_v40  ;;  %v6497_v11 = vpop.f32.mrb[40].mxu0 }
 0x313   :  { %v2745_v38 = vpop.f32.mrb[41].mxu1  ;;  %v6575_v24 = vadd.f32 %v6497_v11, %v6177_v39  ;;  %v4802_v47 = vpop.f32.mrb[41].mxu0 }
 0x314   :  { %v6178_v21 = vpop.f32.mrb[42].mxu1  ;;  %v5196_v53 = vadd.f32 %v5195_v23, %v5133_v15  ;;  %v6576_v30 = vadd.f32 %v4802_v47, %v2745_v38  ;;  %v5063_v37 = vadd.f32 %v6573_v18, %v5062_v59  ;;  %v6498_v32 = vpop.f32.mrb[42].mxu0 }
 0x315   :  { %v2748_v13 = vpop.f32.mrb[43].mxu1  ;;  %5003 = vst [vmem:[%s8829_s4 + $0x150] sm:$0xff] %v6575_v24  ;;  %v6577_v56 = vadd.f32 %v6498_v32, %v6178_v21  ;;  %v4805_v49 = vpop.f32.mrb[43].mxu0  ;;  %v5137_v34 = vmul.f32 %v6575_v24, %v6575_v24 }
 0x316   :  { %5001 = vst [vmem:[%s8829_s4 + $0x140] sm:$0xff] %v6576_v30  ;;  %v5064_v31 = vadd.f32 %v6576_v30, %v5063_v37  ;;  %v5135_v0 = vmul.f32 %v6576_v30, %v6576_v30  ;;  %v5197_v9 = vadd.f32 %v5196_v53, %v5134_v20  ;;  %v6578_v27 = vadd.f32 %v4805_v49, %v2748_v13 }
 0x317   :  { %5004 = vst [vmem:[%s8829_s4 + $0x158] sm:$0xff] %v6577_v56  ;;  %v5138_v19 = vmul.f32 %v6577_v56, %v6577_v56 }
 0x318   :  { %v5198_v7 = vadd.f32 %v5197_v9, %v5135_v0  ;;  %5002 = vst [vmem:[%s8829_s4 + $0x148] sm:$0xff] %v6578_v27  ;;  %v5065_v52 = vadd.f32 %v6578_v27, %v5064_v31  ;;  %v5136_v28 = vmul.f32 %v6578_v27, %v6578_v27 }
 0x31a   :  { %v6181_v6 = vpop.f32.mrb[44].mxu1  ;;  %v5066_v8 = vadd.f32 %v6575_v24, %v5065_v52  ;;  %v5199_v58 = vadd.f32 %v5198_v7, %v5136_v28  ;;  %v6501_v36 = vpop.f32.mrb[44].mxu0 }
 0x31b   :  { %v2761_v46 = vpop.f32.mrb[45].mxu1  ;;  %v6579_v48 = vadd.f32 %v6501_v36, %v6181_v6  ;;  %v4818_v26 = vpop.f32.mrb[45].mxu0 }
 0x31c   :  { %v6182_v50 = vpop.f32.mrb[46].mxu1  ;;  %v5200_v29 = vadd.f32 %v5199_v58, %v5137_v34  ;;  %v6580_v54 = vadd.f32 %v4818_v26, %v2761_v46  ;;  %v5067_v10 = vadd.f32 %v6577_v56, %v5066_v8  ;;  %v6502_v60 = vpop.f32.mrb[46].mxu0 }
 0x31d   :  { %v2764_v25 = vpop.f32.mrb[47].mxu1  ;;  %5007 = vst [vmem:[%s8829_s4 + $0x170] sm:$0xff] %v6579_v48  ;;  %v6581_v12 = vadd.f32 %v6502_v60, %v6182_v50  ;;  %v4821_v1 = vpop.f32.mrb[47].mxu0  ;;  %v5141_v45 = vmul.f32 %v6579_v48, %v6579_v48 }
 0x31e   :  { %5005 = vst [vmem:[%s8829_s4 + $0x160] sm:$0xff] %v6580_v54  ;;  %v5068_v17 = vadd.f32 %v6580_v54, %v5067_v10  ;;  %v5139_v57 = vmul.f32 %v6580_v54, %v6580_v54  ;;  %v5201_v42 = vadd.f32 %v5200_v29, %v5138_v19  ;;  %v6582_v62 = vadd.f32 %v4821_v1, %v2764_v25 }
 0x31f   :  { %5008 = vst [vmem:[%s8829_s4 + $0x178] sm:$0xff] %v6581_v12  ;;  %v5142_v35 = vmul.f32 %v6581_v12, %v6581_v12 }
 0x320   :  { %v5202_v33 = vadd.f32 %v5201_v42, %v5139_v57  ;;  %5006 = vst [vmem:[%s8829_s4 + $0x168] sm:$0xff] %v6582_v62  ;;  %v5069_v63 = vadd.f32 %v6582_v62, %v5068_v17  ;;  %v5140_v2 = vmul.f32 %v6582_v62, %v6582_v62 }
 0x322   :  { %v6185_v51 = vpop.f32.mrb[48].mxu1  ;;  %v5070_v44 = vadd.f32 %v6579_v48, %v5069_v63  ;;  %v5203_v4 = vadd.f32 %v5202_v33, %v5140_v2  ;;  %v6505_v22 = vpop.f32.mrb[48].mxu0 }
 0x323   :  { %v2777_v5 = vpop.f32.mrb[49].mxu1  ;;  %v6583_v43 = vadd.f32 %v6505_v22, %v6185_v51  ;;  %v4834_v18 = vpop.f32.mrb[49].mxu0 }
 0x324   :  { %v6186_v14 = vpop.f32.mrb[50].mxu1  ;;  %v5204_v61 = vadd.f32 %v5203_v4, %v5141_v45  ;;  %v6584_v55 = vadd.f32 %v4834_v18, %v2777_v5  ;;  %v5071_v41 = vadd.f32 %v6581_v12, %v5070_v44  ;;  %v6506_v16 = vpop.f32.mrb[50].mxu0 }
 0x325   :  { %v2780_v3 = vpop.f32.mrb[51].mxu1  ;;  %5011 = vst [vmem:[%s8829_s4 + $0x190] sm:$0xff] %v6583_v43  ;;  %v6585_v40 = vadd.f32 %v6506_v16, %v6186_v14  ;;  %v4837_v39 = vpop.f32.mrb[51].mxu0  ;;  %v5145_v20 = vmul.f32 %v6583_v43, %v6583_v43 }
 0x326   :  { %5009 = vst [vmem:[%s8829_s4 + $0x180] sm:$0xff] %v6584_v55  ;;  %v5072_v15 = vadd.f32 %v6584_v55, %v5071_v41  ;;  %v5143_v59 = vmul.f32 %v6584_v55, %v6584_v55  ;;  %v5205_v23 = vadd.f32 %v5204_v61, %v5142_v35  ;;  %v6586_v11 = vadd.f32 %v4837_v39, %v2780_v3 }
 0x327   :  { %5012 = vst [vmem:[%s8829_s4 + $0x198] sm:$0xff] %v6585_v40  ;;  %v5146_v31 = vmul.f32 %v6585_v40, %v6585_v40 }
 0x328   :  { %v5206_v38 = vadd.f32 %v5205_v23, %v5143_v59  ;;  %5010 = vst [vmem:[%s8829_s4 + $0x188] sm:$0xff] %v6586_v11  ;;  %v5073_v24 = vadd.f32 %v6586_v11, %v5072_v15  ;;  %v5144_v47 = vmul.f32 %v6586_v11, %v6586_v11 }
 0x32a   :  { %v6189_v21 = vpop.f32.mrb[52].mxu1  ;;  %v5074_v53 = vadd.f32 %v6583_v43, %v5073_v24  ;;  %v5207_v30 = vadd.f32 %v5206_v38, %v5144_v47  ;;  %v6509_v37 = vpop.f32.mrb[52].mxu0 }
 0x32b   :  { %v2793_v32 = vpop.f32.mrb[53].mxu1  ;;  %v6587_v13 = vadd.f32 %v6509_v37, %v6189_v21  ;;  %v4850_v56 = vpop.f32.mrb[53].mxu0 }
 0x32c   :  { %v6190_v49 = vpop.f32.mrb[54].mxu1  ;;  %v5208_v0 = vadd.f32 %v5207_v30, %v5145_v20  ;;  %v6588_v9 = vadd.f32 %v4850_v56, %v2793_v32  ;;  %v5075_v27 = vadd.f32 %v6585_v40, %v5074_v53  ;;  %v6510_v7 = vpop.f32.mrb[54].mxu0 }
 0x32d   :  { %v2796_v52 = vpop.f32.mrb[55].mxu1  ;;  %5015 = vst [vmem:[%s8829_s4 + $0x1b0] sm:$0xff] %v6587_v13  ;;  %v6589_v28 = vadd.f32 %v6510_v7, %v6190_v49  ;;  %v4853_v6 = vpop.f32.mrb[55].mxu0  ;;  %v5149_v19 = vmul.f32 %v6587_v13, %v6587_v13 }
 0x32e   :  { %5013 = vst [vmem:[%s8829_s4 + $0x1a0] sm:$0xff] %v6588_v9  ;;  %v5076_v34 = vadd.f32 %v6588_v9, %v5075_v27  ;;  %v5147_v8 = vmul.f32 %v6588_v9, %v6588_v9  ;;  %v5209_v58 = vadd.f32 %v5208_v0, %v5146_v31  ;;  %v6590_v36 = vadd.f32 %v4853_v6, %v2796_v52 }
 0x32f   :  { %5016 = vst [vmem:[%s8829_s4 + $0x1b8] sm:$0xff] %v6589_v28  ;;  %v5150_v17 = vmul.f32 %v6589_v28, %v6589_v28 }
 0x330   :  { %v5210_v46 = vadd.f32 %v5209_v58, %v5147_v8  ;;  %5014 = vst [vmem:[%s8829_s4 + $0x1a8] sm:$0xff] %v6590_v36  ;;  %v5077_v48 = vadd.f32 %v6590_v36, %v5076_v34  ;;  %v5148_v26 = vmul.f32 %v6590_v36, %v6590_v36 }
 0x332   :  { %v6193_v50 = vpop.f32.mrb[56].mxu1  ;;  %v5078_v29 = vadd.f32 %v6587_v13, %v5077_v48  ;;  %v5211_v54 = vadd.f32 %v5210_v46, %v5148_v26  ;;  %v6513_v10 = vpop.f32.mrb[56].mxu0 }
 0x333   :  { %v2809_v60 = vpop.f32.mrb[57].mxu1  ;;  %v6591_v25 = vadd.f32 %v6513_v10, %v6193_v50  ;;  %v4866_v12 = vpop.f32.mrb[57].mxu0 }
 0x334   :  { %v6194_v1 = vpop.f32.mrb[58].mxu1  ;;  %v5212_v57 = vadd.f32 %v5211_v54, %v5149_v19  ;;  %v6592_v42 = vadd.f32 %v4866_v12, %v2809_v60  ;;  %v5079_v62 = vadd.f32 %v6589_v28, %v5078_v29  ;;  %v6514_v33 = vpop.f32.mrb[58].mxu0 }
 0x335   :  { %v2812_v63 = vpop.f32.mrb[59].mxu1  ;;  %5019 = vst [vmem:[%s8829_s4 + $0x1d0] sm:$0xff] %v6591_v25  ;;  %v6593_v2 = vadd.f32 %v6514_v33, %v6194_v1  ;;  %v4869_v51 = vpop.f32.mrb[59].mxu0  ;;  %v5153_v35 = vmul.f32 %v6591_v25, %v6591_v25 }
 0x336   :  { %5017 = vst [vmem:[%s8829_s4 + $0x1c0] sm:$0xff] %v6592_v42  ;;  %v5080_v45 = vadd.f32 %v6592_v42, %v5079_v62  ;;  %v5151_v44 = vmul.f32 %v6592_v42, %v6592_v42  ;;  %v5213_v4 = vadd.f32 %v5212_v57, %v5150_v17  ;;  %v6594_v22 = vadd.f32 %v4869_v51, %v2812_v63 }
 0x337   :  { %5020 = vst [vmem:[%s8829_s4 + $0x1d8] sm:$0xff] %v6593_v2  ;;  %v5154_v15 = vmul.f32 %v6593_v2, %v6593_v2 }
 0x338   :  { %v5214_v5 = vadd.f32 %v5213_v4, %v5151_v44  ;;  %5018 = vst [vmem:[%s8829_s4 + $0x1c8] sm:$0xff] %v6594_v22  ;;  %v5081_v43 = vadd.f32 %v6594_v22, %v5080_v45  ;;  %v5152_v18 = vmul.f32 %v6594_v22, %v6594_v22 }
 0x33a   :  { %v6197_v14 = vpop.f32.mrb[60].mxu1  ;;  %v5082_v61 = vadd.f32 %v6591_v25, %v5081_v43  ;;  %v5215_v55 = vadd.f32 %v5214_v5, %v5152_v18  ;;  %v6517_v41 = vpop.f32.mrb[60].mxu0 }
 0x33b   :  { %v2825_v16 = vpop.f32.mrb[61].mxu1  ;;  %v6595_v3 = vadd.f32 %v6517_v41, %v6197_v14  ;;  %v4882_v40 = vpop.f32.mrb[61].mxu0 }
 0x33c   :  { %v6198_v39 = vpop.f32.mrb[62].mxu1  ;;  %v5216_v59 = vadd.f32 %v5215_v55, %v5153_v35  ;;  %v6596_v23 = vadd.f32 %v4882_v40, %v2825_v16  ;;  %v5083_v11 = vadd.f32 %v6593_v2, %v5082_v61  ;;  %v6518_v38 = vpop.f32.mrb[62].mxu0 }
 0x33d   :  { %v2828_v24 = vpop.f32.mrb[63].mxu1  ;;  %5023 = vst [vmem:[%s8829_s4 + $0x1f0] sm:$0xff] %v6595_v3  ;;  %v6597_v47 = vadd.f32 %v6518_v38, %v6198_v39  ;;  %v4885_v21 = vpop.f32.mrb[63].mxu0  ;;  %v5157_v49 = vmul.f32 %v6595_v3, %v6595_v3 }
 0x33e   :  { %5021 = vst [vmem:[%s8829_s4 + $0x1e0] sm:$0xff] %v6596_v23  ;;  %v5084_v20 = vadd.f32 %v6596_v23, %v5083_v11  ;;  %v5155_v53 = vmul.f32 %v6596_v23, %v6596_v23  ;;  %v5217_v30 = vadd.f32 %v5216_v59, %v5154_v15  ;;  %v6598_v37 = vadd.f32 %v4885_v21, %v2828_v24 }
 0x33f   :  { %5024 = vst [vmem:[%s8829_s4 + $0x1f8] sm:$0xff] %v6597_v47  ;;  %v5158_v9 = vmul.f32 %v6597_v47, %v6597_v47 }
 0x340   :  { %v5218_v32 = vadd.f32 %v5217_v30, %v5155_v53  ;;  %5022 = vst [vmem:[%s8829_s4 + $0x1e8] sm:$0xff] %v6598_v37  ;;  %v5085_v13 = vadd.f32 %v6598_v37, %v5084_v20  ;;  %v5156_v56 = vmul.f32 %v6598_v37, %v6598_v37 }
 0x342   :  { %v5086_v31 = vadd.f32 %v6595_v3, %v5085_v13  ;;  %v5219_v0 = vadd.f32 %v5218_v32, %v5156_v56 }
 0x344   :  { %v5087_v27 = vadd.f32 %v6597_v47, %v5086_v31  ;;  %v5220_v7 = vadd.f32 %v5219_v0, %v5157_v49 }
 0x346   :  { %v5088_v52 = vrot.slane %v5087_v27, 4  ;;  %v5221_v28 = vadd.f32 %v5220_v7, %v5158_v9 }
 0x348   :  { %v5089_v6 = vadd.f32 %v5088_v52, %v5087_v27  ;;  %v5222_v34 = vrot.slane %v5221_v28, 4 }
 0x34a   :  { %v5090_v8 = vrot.slane %v5089_v6, 2  ;;  %v5223_v58 = vadd.f32 %v5222_v34, %v5221_v28 }
 0x34c   :  { %v5091_v36 = vadd.f32 %v5090_v8, %v5089_v6  ;;  %v5224_v46 = vrot.slane %v5223_v58, 2 }
 0x34e   :  { %v5092_v48 = vrot.slane %v5091_v36, 1  ;;  %v5225_v26 = vadd.f32 %v5224_v46, %v5223_v58 }
 0x350   :  { %v5093_v50 = vadd.f32 %v5092_v48, %v5091_v36  ;;  %v5226_v19 = vrot.slane %v5225_v26, 1 }
 0x352   :  { %5094 = vst [vmem:[%s8830_s5] sm:$0x1] %v5093_v50  ;;  %v5227_v29 = vadd.f32 %v5226_v19, %v5225_v26 }
 0x354   :  { %5228 = vst [vmem:[%s8830_s5 + $0x1] sm:$0x1] %v5227_v29 }

// kernel: a_call__.3
= control target key start
LH: loop header
LB: loop body
LE: loop exit
PB: predicated region body
PF: predicated region fallthrough
CT: control target
= control target key end

     0   :  { %vm1077_vm0 = vcmask 1041408   ;;  %vm111_vm1 = vsmask.f32 3328  ;;  %vm112_vm2 = vsmask.f32 7440  ;;  %vm980_vm4 = vcmask 31744   ;;  %s16302_s1 = inlined_call_operand.vmem [shape: bf16[9,4,128], index: 1, kind: input, shape index: {}]   ;;  %s16303_s0 = inlined_call_operand.vmem [shape: bf16[1,2,18,18,4], index: 0, kind: input, shape index: {}]   ;;  %s16304_s2 = inlined_call_operand.vmem [shape: f32[2,16,16,128], index: 2, kind: output, shape index: {0}]   ;;  %s16305_s3 = inlined_call_operand.vmem [shape: f32[1,2,128], index: 3, kind: output, shape index: {1}]  }
   0x1   :  { %v9057_v0 = vld [vmem:[%s16302_s1 + $0x2] sm:$0x3]  ;;  %v9508_v1 = vld [vmem:[%s16302_s1 + $0x8] sm:$0x3]  ;;  %v15_v5 = vld [vmem:[%s16303_s0 + $0x4] sm:$0xf] }
   0x2   :  { %v14_v2 = vld [vmem:[%s16303_s0] sm:$0xf]  ;;  %11526 = vmatprep.subr.msk.bf16.mxu1 %vm1077_vm0, %v9057_v0  ;;  %11530 = vmatprep.subr.msk.bf16.mxu0 %vm1077_vm0, %v9508_v1  ;;  %v1079_v3 = vsel %vm1077_vm0, %v9057_v0, 0  ;;  %v11882_v4 = vsel %vm1077_vm0, %v9508_v1, 0  ;;  %v79_v6 = vld [vmem:[%s16303_s0 + $0x8] sm:$0x1]  ;;  %vm11923_vm3 = vmor %vm111_vm1, %vm112_vm2 }
   0x3   :  { %16318 = vst [vmem:[#allocation2_spill] sm:$0xff] %v11882_v4  ;;  %10419 = vmatpush3.bf16.msra.mxu1 %v1079_v3  ;;  %10683 = vmatpush3.bf16.msra.mxu0 %v11882_v4  ;;  %v115_v7 = vshrl.u32 %v14_v2, 16  ;;  %v118_v8 = vshll.u32 %v14_v2, 16  ;;  %v124_v9 = vshll.u32 %v15_v5, 16  ;;  %v128_v10 = vshrl.u32 %v15_v5, 16 }
   0x4   :  { %v78_v11 = vld [vmem:[%s16302_s1] sm:$0x3]  ;;  %v134_v12 = vshll.u32 %v79_v6, 16  ;;  %v9412_v13 = vld [vmem:[%s16303_s0 + $0xc] sm:$0xf]  ;;  %vm2014_vm5 = vcmask 1042432  }
   0x5   :  { %11527 = vmatprep.subr.msk.bf16.mxu1 %vm1077_vm0, %v78_v11  ;;  %v11901_v14 = vld [vmem:[%s16303_s0 + $0x10] sm:$0xf]  ;;  %v117_v15 = vrot.slane %v115_v7, 4  ;;  %v120_v16 = vrot.slane %v118_v8, 5  ;;  %v126_v17 = vrot.slane %v124_v9, 5  ;;  %v130_v18 = vrot.slane %v128_v10, 4 }
   0x6   :  { %v11906_v19 = vld [vmem:[%s16303_s0 + $0x14] sm:$0x1]  ;;  %v136_v20 = vrot.slane %v134_v12, 5  ;;  %v3567_v21 = vshrl.u32 %v9412_v13, 16  ;;  %v3570_v22 = vshll.u32 %v9412_v13, 16  ;;  %v3576_v23 = vshll.u32 %v11901_v14, 16 }
   0x7   :  { %v11912_v24 = vld [vmem:[%s16302_s1 + $0xa] sm:$0x3]  ;;  %v121_v25 = vor.u32 %v120_v16, %v117_v15  ;;  %v131_v26 = vor.u32 %v130_v18, %v126_v17  ;;  %v3580_v27 = vshrl.u32 %v11901_v14, 16  ;;  %v3586_v28 = vshll.u32 %v11906_v19, 16  ;;  %v16_v29 = vld [vmem:[%s16303_s0 + $0xc] sm:$0xf] }
   0x8   :  { %11532 = vmatprep.subr.msk.bf16.mxu0 %vm1077_vm0, %v11912_v24  ;;  %v3569_v31 = vrot.slane %v3567_v21, 4  ;;  %v3572_v32 = vrot.slane %v3570_v22, 5  ;;  %v3578_v33 = vrot.slane %v3576_v23, 5  ;;  %v17_v34 = vld [vmem:[%s16303_s0 + $0x10] sm:$0xf]  ;;  %v139_v41 = vshrl.u32 %v16_v29, 16 }
   0x9   :  { %v122_v35 = vrot.slane %v121_v25, 4  ;;  %v132_v36 = vrot.slane %v131_v26, 4  ;;  %v3582_v37 = vrot.slane %v3580_v27, 4  ;;  %v3588_v39 = vrot.slane %v3586_v28, 5  ;;  %v80_v40 = vld [vmem:[%s16303_s0 + $0x14] sm:$0x1] }
   0xa   :  { %v3573_v38 = vor.u32 %v3572_v32, %v3569_v31  ;;  %v142_v42 = vshll.u32 %v16_v29, 16  ;;  %v148_v46 = vshll.u32 %v17_v34, 16  ;;  %v141_v49 = vrot.slane %v139_v41, 4  ;;  %v9415_v55 = vld [vmem:[%s16303_s0 + $0x18] sm:$0xf] }
   0xb   :  { %v127_v43 = vsel %vm11923_vm3, %v122_v35, %v126_v17  ;;  %v137_v44 = vsel %vm11923_vm3, %v132_v36, %v136_v20  ;;  %v3583_v45 = vor.u32 %v3582_v37, %v3578_v33  ;;  %v152_v53 = vshrl.u32 %v17_v34, 16  ;;  %v11948_v60 = vld [vmem:[%s16303_s0 + $0x1c] sm:$0xf]  ;;  %v11953_v61 = vld [vmem:[%s16303_s0 + $0x20] sm:$0x1] }
   0xc   :  { %v9058_v47 = vcombine.low %v127_v43, %v137_v44  ;;  %v3574_v48 = vrot.slane %v3573_v38, 4  ;;  %v144_v50 = vrot.slane %v142_v42, 5  ;;  %v150_v52 = vrot.slane %v148_v46, 5  ;;  %v18_v16 = vld [vmem:[%s16303_s0 + $0x18] sm:$0xf] }
   0xd   :  { %v3584_v51 = vrot.slane %v3583_v45, 4  ;;  %v158_v54 = vshll.u32 %v80_v40, 16  ;;  %v5014_v57 = vrot.slane %v11901_v14, 5  ;;  %v5017_v58 = vrot.slane %v11906_v19, 5  ;;  %v19_v22 = vld [vmem:[%s16303_s0 + $0x1c] sm:$0xf] }
   0xe   :  { %10420 = vmatprep.mubr.msk.bf16.mxu1 %vm980_vm4, %v9058_v47  ;;  %v3579_v56 = vsel %vm11923_vm3, %v3574_v48, %v3578_v33  ;;  %v145_v59 = vor.u32 %v144_v50, %v141_v49  ;;  %v154_v63 = vrot.slane %v152_v53, 4  ;;  %v1627_v1 = vsel %vm1077_vm0, %v78_v11, 0  ;;  %v81_v28 = vld [vmem:[%s16303_s0 + $0x20] sm:$0x1]  ;;  %v9418_v34 = vld [vmem:[%s16303_s0 + $0x24] sm:$0xf] }
   0xf   :  { %v3589_v62 = vsel %vm11923_vm3, %v3584_v51, %v3588_v39  ;;  %v160_v0 = vrot.slane %v158_v54, 5  ;;  %v3591_v5 = vshrl.u32 %v9415_v55, 16  ;;  %v3594_v6 = vshll.u32 %v9415_v55, 16  ;;  %v9419_v42 = vld [vmem:[%s16303_s0 + $0x28] sm:$0xf] }
  0x10   :  { %v9509_v2 = vcombine.low %v3579_v56, %v3589_v62  ;;  %v146_v3 = vrot.slane %v145_v59, 4  ;;  %v155_v7 = vor.u32 %v154_v63, %v150_v52  ;;  %v3600_v8 = vshll.u32 %v11948_v60, 16  ;;  %v9420_v46 = vld [vmem:[%s16303_s0 + $0x2c] sm:$0x1]  ;;  %v51_v19 = vld [vmem:[%s16303_s0 + $0xf4] sm:$0xf] }
  0x11   :  { %v3604_v9 = vshrl.u32 %v11948_v60, 16  ;;  %v3610_v10 = vshll.u32 %v11953_v61, 16  ;;  %v3593_v13 = vrot.slane %v3591_v5, 4  ;;  %v3596_v15 = vrot.slane %v3594_v6, 5 }
  0x12   :  { %10684 = vmatprep.mubr.msk.bf16.mxu0 %vm980_vm4, %v9509_v2  ;;  %v151_v12 = vsel %vm11923_vm3, %v146_v3, %v150_v52  ;;  %v5021_v11 = vrot.slane %v11948_v60, 5  ;;  %v156_v17 = vrot.slane %v155_v7, 4  ;;  %v3602_v18 = vrot.slane %v3600_v8, 5  ;;  %v20_v52 = vld [vmem:[%s16303_s0 + $0x24] sm:$0xf] }
  0x13   :  { %v3606_v20 = vrot.slane %v3604_v9, 4  ;;  %v3612_v21 = vrot.slane %v3610_v10, 5  ;;  %v3597_v23 = vor.u32 %v3596_v15, %v3593_v13  ;;  %v5024_v26 = vrot.slane %v11953_v61, 5  ;;  %v9421_v13 = vld [vmem:[%s16303_s0 + $0x30] sm:$0xf] }
  0x14   :  { %v11973_v25 = vrot.slane %v5021_v11, 4  ;;  %v5431_v27 = vsel %vm1077_vm0, %v11912_v24, 0  ;;  %v161_v29 = vsel %vm11923_vm3, %v156_v17, %v160_v0  ;;  %v163_v32 = vshrl.u32 %v18_v16, 16 }
  0x15   :  { %v3607_v31 = vor.u32 %v3606_v20, %v3602_v18  ;;  %v166_v33 = vshll.u32 %v18_v16, 16  ;;  %v9059_v35 = vcombine.low %v151_v12, %v161_v29  ;;  %v3598_v36 = vrot.slane %v3597_v23, 4  ;;  %v82_v12 = vld [vmem:[%s16303_s0 + $0x2c] sm:$0x1] }
  0x16   :  { %v172_v37 = vshll.u32 %v19_v22, 16  ;;  %v176_v38 = vshrl.u32 %v19_v22, 16  ;;  %v165_v24 = vrot.slane %v163_v32, 4  ;;  %v182_v41 = vshll.u32 %v81_v28, 16 }
  0x17   :  { %v3608_v39 = vrot.slane %v3607_v31, 4  ;;  %v168_v40 = vrot.slane %v166_v33, 5  ;;  %10421 = vmatmul.mubr.msk.bf16.vlgmr.msra.gmra.mrb[0].mxu1 %vm980_vm4, %v9059_v35  ;;  %v3603_v43 = vsel %vm11923_vm3, %v3598_v36, %v3602_v18  ;;  %v3615_v47 = vshrl.u32 %v9418_v34, 16  ;;  %v9423_v36 = vld [vmem:[%s16303_s0 + $0x38] sm:$0x1] }
  0x18   :  { %v174_v44 = vrot.slane %v172_v37, 5  ;;  %v178_v45 = vrot.slane %v176_v38, 4  ;;  %10485 = vmatpush3.bf16.msra.mxu1 %v1627_v1  ;;  %v184_v50 = vrot.slane %v182_v41, 5  ;;  %v3618_v51 = vshll.u32 %v9418_v34, 16  ;;  %v21_v1 = vld [vmem:[%s16303_s0 + $0x28] sm:$0xf] }
  0x19   :  { %v3613_v48 = vsel %vm11923_vm3, %v3608_v39, %v3612_v21  ;;  %v169_v49 = vor.u32 %v168_v40, %v165_v24  ;;  %v3617_v55 = vrot.slane %v3615_v47, 4  ;;  %v3624_v56 = vshll.u32 %v9419_v42, 16  ;;  %v22_v41 = vld [vmem:[%s16303_s0 + $0x30] sm:$0xf] }
  0x1a   :  { %v9510_v53 = vcombine.low %v3603_v43, %v3613_v48  ;;  %v179_v54 = vor.u32 %v178_v45, %v174_v44  ;;  %v3620_v62 = vrot.slane %v3618_v51, 5  ;;  %v3628_v63 = vshrl.u32 %v9419_v42, 16 }
  0x1b   :  { %v170_v59 = vrot.slane %v169_v49, 4  ;;  %v3634_v0 = vshll.u32 %v9420_v46, 16  ;;  %v3626_v3 = vrot.slane %v3624_v56, 5  ;;  %v187_v5 = vshrl.u32 %v20_v52, 16  ;;  %v23_v46 = vld [vmem:[%s16303_s0 + $0x34] sm:$0xf] }
  0x1c   :  { %10685 = vmatmul.mubr.msk.bf16.vlgmr.msra.gmra.mrb[0].mxu0 %vm980_vm4, %v9510_v53  ;;  %v180_v2 = vrot.slane %v179_v54, 4  ;;  %v190_v6 = vshll.u32 %v20_v52, 16  ;;  %v3621_v8 = vor.u32 %v3620_v62, %v3617_v55  ;;  %v3630_v9 = vrot.slane %v3628_v63, 4  ;;  %v83_v54 = vld [vmem:[%s16303_s0 + $0x38] sm:$0x1] }
  0x1d   :  { %10749 = vmatpush3.bf16.msra.mxu0 %v5431_v27  ;;  %v175_v7 = vsel %vm11923_vm3, %v170_v59, %v174_v44  ;;  %v3636_v10 = vrot.slane %v3634_v0, 5  ;;  %v189_v16 = vrot.slane %v187_v5, 4  ;;  %v196_v18 = vshll.u32 %v21_v1, 16  ;;  %v9422_v27 = vld [vmem:[%s16303_s0 + $0x34] sm:$0xf] }
  0x1e   :  { %v185_v15 = vsel %vm11923_vm3, %v180_v2, %v184_v50  ;;  %v192_v17 = vrot.slane %v190_v6, 5  ;;  %v3622_v21 = vrot.slane %v3621_v8, 4  ;;  %v3631_v22 = vor.u32 %v3630_v9, %v3626_v3  ;;  %v9424_v0 = vld [vmem:[%s16303_s0 + $0x3c] sm:$0xf]  ;;  %v9425_v6 = vld [vmem:[%s16303_s0 + $0x40] sm:$0xf] }
  0x1f   :  { %v9060_v20 = vcombine.low %v175_v7, %v185_v15  ;;  %v200_v23 = vshrl.u32 %v21_v1, 16  ;;  %v198_v29 = vrot.slane %v196_v18, 5  ;;  %v206_v31 = vshll.u32 %v82_v12, 16 }
  0x20   :  { %v193_v28 = vor.u32 %v192_v17, %v189_v16  ;;  %v3639_v32 = vshrl.u32 %v9421_v13, 16  ;;  %v3627_v33 = vsel %vm11923_vm3, %v3622_v21, %v3626_v3  ;;  %v3632_v34 = vrot.slane %v3631_v22, 4 }
  0x21   :  { %10424 = vmatprep.mubr.msk.bf16.mxu1 %vm980_vm4, %v9060_v20  ;;  %v202_v35 = vrot.slane %v200_v23, 4  ;;  %v3642_v37 = vshll.u32 %v9421_v13, 16  ;;  %v208_v39 = vrot.slane %v206_v31, 5  ;;  %v3648_v40 = vshll.u32 %v9422_v27, 16  ;;  %v9426_v20 = vld [vmem:[%s16303_s0 + $0x44] sm:$0x1] }
  0x22   :  { %v194_v38 = vrot.slane %v193_v28, 4  ;;  %v3641_v24 = vrot.slane %v3639_v32, 4  ;;  %v3637_v42 = vsel %vm11923_vm3, %v3632_v34, %v3636_v10  ;;  %v3652_v45 = vshrl.u32 %v9422_v27, 16  ;;  %v24_v23 = vld [vmem:[%s16303_s0 + $0x3c] sm:$0xf] }
  0x23   :  { %v203_v43 = vor.u32 %v202_v35, %v198_v29  ;;  %v3644_v44 = vrot.slane %v3642_v37, 5  ;;  %v9511_v47 = vcombine.low %v3627_v33, %v3637_v42  ;;  %v3650_v49 = vrot.slane %v3648_v40, 5 }
  0x24   :  { %v199_v48 = vsel %vm11923_vm3, %v194_v38, %v198_v29  ;;  %v3658_v50 = vshll.u32 %v9423_v36, 16  ;;  %v3654_v53 = vrot.slane %v3652_v45, 4  ;;  %v211_v55 = vshrl.u32 %v22_v41, 16  ;;  %v9427_v45 = vld [vmem:[%s16303_s0 + $0x48] sm:$0xf] }
  0x25   :  { %v204_v51 = vrot.slane %v203_v43, 4  ;;  %v3645_v52 = vor.u32 %v3644_v44, %v3641_v24  ;;  %10688 = vmatprep.mubr.msk.bf16.mxu0 %vm980_vm4, %v9511_v47  ;;  %v214_v59 = vshll.u32 %v22_v41, 16  ;;  %v220_v62 = vshll.u32 %v23_v46, 16  ;;  %v84_v43 = vld [vmem:[%s16303_s0 + $0x44] sm:$0x1] }
  0x26   :  { %v3660_v56 = vrot.slane %v3658_v50, 5  ;;  %v224_v63 = vshrl.u32 %v23_v46, 16  ;;  %v3655_v3 = vor.u32 %v3654_v53, %v3650_v49  ;;  %v213_v5 = vrot.slane %v211_v55, 4 }
  0x27   :  { %v209_v1 = vsel %vm11923_vm3, %v204_v51, %v208_v39  ;;  %v3646_v2 = vrot.slane %v3645_v52, 4  ;;  %v216_v8 = vrot.slane %v214_v59, 5  ;;  %v222_v9 = vrot.slane %v220_v62, 5  ;;  %v25_v39 = vld [vmem:[%s16303_s0 + $0x40] sm:$0xf] }
  0x28   :  { %v9061_v7 = vcombine.low %v199_v48, %v209_v1  ;;  %v226_v10 = vrot.slane %v224_v63, 4  ;;  %v3656_v13 = vrot.slane %v3655_v3, 4  ;;  %v230_v15 = vshll.u32 %v83_v54, 16  ;;  %v9429_v3 = vld [vmem:[%s16303_s0 + $0x50] sm:$0x1] }
  0x29   :  { %v3651_v12 = vsel %vm11923_vm3, %v3646_v2, %v3650_v49  ;;  %v3663_v16 = vshrl.u32 %v9424_v0, 16  ;;  %v217_v17 = vor.u32 %v216_v8, %v213_v5  ;;  %v3666_v21 = vshll.u32 %v9424_v0, 16  ;;  %v26_v5 = vld [vmem:[%s16303_s0 + $0x48] sm:$0xf] }
  0x2a   :  { %10425 = vmatmul.mubr.msk.bf16.gmra.mrb[4].mxu1 %vm980_vm4, %v9061_v7  ;;  %v227_v18 = vor.u32 %v226_v10, %v222_v9  ;;  %v3672_v22 = vshll.u32 %v9425_v6, 16  ;;  %v3661_v27 = vsel %vm11923_vm3, %v3656_v13, %v3660_v56  ;;  %v232_v28 = vrot.slane %v230_v15, 5  ;;  %v9428_v56 = vld [vmem:[%s16303_s0 + $0x4c] sm:$0xf] }
  0x2b   :  { %v3665_v29 = vrot.slane %v3663_v16, 4  ;;  %v3676_v31 = vshrl.u32 %v9425_v6, 16  ;;  %v9512_v32 = vcombine.low %v3651_v12, %v3661_v27  ;;  %v218_v33 = vrot.slane %v217_v17, 4 }
  0x2c   :  { %v228_v34 = vrot.slane %v227_v18, 4  ;;  %v3668_v35 = vrot.slane %v3666_v21, 5  ;;  %v3674_v36 = vrot.slane %v3672_v22, 5  ;;  %v3682_v38 = vshll.u32 %v9426_v20, 16  ;;  %v27_v20 = vld [vmem:[%s16303_s0 + $0x4c] sm:$0xf] }
  0x2d   :  { %v3678_v37 = vrot.slane %v3676_v31, 4  ;;  %v235_v24 = vshrl.u32 %v24_v23, 16  ;;  %10689 = vmatmul.mubr.msk.bf16.gmra.mrb[4].mxu0 %vm980_vm4, %v9512_v32  ;;  %v223_v40 = vsel %vm11923_vm3, %v218_v33, %v222_v9  ;;  %v238_v44 = vshll.u32 %v24_v23, 16 }
  0x2e   :  { %v233_v41 = vsel %vm11923_vm3, %v228_v34, %v232_v28  ;;  %v3669_v42 = vor.u32 %v3668_v35, %v3665_v29  ;;  %v3684_v48 = vrot.slane %v3682_v38, 5  ;;  %v244_v52 = vshll.u32 %v25_v39, 16  ;;  %v85_v28 = vld [vmem:[%s16303_s0 + $0x50] sm:$0x1]  ;;  %v9430_v35 = vld [vmem:[%s16303_s0 + $0x54] sm:$0xf] }
  0x2f   :  { %v9062_v46 = vcombine.low %v223_v40, %v233_v41  ;;  %v3679_v47 = vor.u32 %v3678_v37, %v3674_v36  ;;  %v237_v49 = vrot.slane %v235_v24, 4  ;;  %v240_v51 = vrot.slane %v238_v44, 5  ;;  %v9431_v24 = vld [vmem:[%s16303_s0 + $0x58] sm:$0xf] }
  0x30   :  { %v3670_v50 = vrot.slane %v3669_v42, 4  ;;  %v248_v53 = vshrl.u32 %v25_v39, 16  ;;  %v254_v55 = vshll.u32 %v84_v43, 16  ;;  %v3687_v59 = vshrl.u32 %v9427_v45, 16 }
  0x31   :  { %10428 = vmatprep.mubr.msk.bf16.mxu1 %vm980_vm4, %v9062_v46  ;;  %v3680_v54 = vrot.slane %v3679_v47, 4  ;;  %v3690_v62 = vshll.u32 %v9427_v45, 16  ;;  %v241_v0 = vor.u32 %v240_v51, %v237_v49  ;;  %v246_v1 = vrot.slane %v244_v52, 5  ;;  %v9432_v47 = vld [vmem:[%s16303_s0 + $0x5c] sm:$0x1] }
  0x32   :  { %v3675_v63 = vsel %vm11923_vm3, %v3670_v50, %v3674_v36  ;;  %v250_v2 = vrot.slane %v248_v53, 4  ;;  %v256_v7 = vrot.slane %v254_v55, 5  ;;  %v3689_v8 = vrot.slane %v3687_v59, 4  ;;  %v28_v59 = vld [vmem:[%s16303_s0 + $0x54] sm:$0xf] }
  0x33   :  { %v3685_v6 = vsel %vm11923_vm3, %v3680_v54, %v3684_v48  ;;  %v3692_v9 = vrot.slane %v3690_v62, 5  ;;  %v242_v12 = vrot.slane %v241_v0, 4  ;;  %v3696_v15 = vshll.u32 %v9428_v56, 16 }
  0x34   :  { %v9513_v10 = vcombine.low %v3675_v63, %v3685_v6  ;;  %v251_v13 = vor.u32 %v250_v2, %v246_v1  ;;  %v3700_v17 = vshrl.u32 %v9428_v56, 16  ;;  %v3706_v18 = vshll.u32 %v9429_v3, 16  ;;  %v29_v2 = vld [vmem:[%s16303_s0 + $0x58] sm:$0xf] }
  0x35   :  { %v3693_v16 = vor.u32 %v3692_v9, %v3689_v8  ;;  %v259_v21 = vshrl.u32 %v26_v5, 16  ;;  %v247_v22 = vsel %vm11923_vm3, %v242_v12, %v246_v1  ;;  %v3698_v27 = vrot.slane %v3696_v15, 5 }
  0x36   :  { %10692 = vmatprep.mubr.msk.bf16.mxu0 %vm980_vm4, %v9513_v10  ;;  %v252_v23 = vrot.slane %v251_v13, 4  ;;  %v262_v29 = vshll.u32 %v26_v5, 16  ;;  %v3702_v32 = vrot.slane %v3700_v17, 4  ;;  %v3708_v33 = vrot.slane %v3706_v18, 5  ;;  %v86_v10 = vld [vmem:[%s16303_s0 + $0x5c] sm:$0x1] }
  0x37   :  { %v3694_v31 = vrot.slane %v3693_v16, 4  ;;  %v261_v34 = vrot.slane %v259_v21, 4  ;;  %v268_v38 = vshll.u32 %v27_v20, 16  ;;  %v272_v39 = vshrl.u32 %v27_v20, 16  ;;  %v9433_v20 = vld [vmem:[%s16303_s0 + $0x60] sm:$0xf] }
  0x38   :  { %v257_v36 = vsel %vm11923_vm3, %v252_v23, %v256_v7  ;;  %v264_v37 = vrot.slane %v262_v29, 5  ;;  %v3703_v42 = vor.u32 %v3702_v32, %v3698_v27  ;;  %v278_v43 = vshll.u32 %v85_v28, 16  ;;  %v9434_v28 = vld [vmem:[%s16303_s0 + $0x64] sm:$0xf] }
  0x39   :  { %v9063_v40 = vcombine.low %v247_v22, %v257_v36  ;;  %v3699_v41 = vsel %vm11923_vm3, %v3694_v31, %v3698_v27  ;;  %v270_v45 = vrot.slane %v268_v38, 5  ;;  %v274_v46 = vrot.slane %v272_v39, 4  ;;  %v9435_v36 = vld [vmem:[%s16303_s0 + $0x68] sm:$0x1] }
  0x3a   :  { %v265_v44 = vor.u32 %v264_v37, %v261_v34  ;;  %v3711_v48 = vshrl.u32 %v9430_v35, 16  ;;  %v3704_v49 = vrot.slane %v3703_v42, 4  ;;  %v280_v50 = vrot.slane %v278_v43, 5  ;;  %v30_v42 = vld [vmem:[%s16303_s0 + $0x60] sm:$0xf] }
  0x3b   :  { %10429 = vmatmul.mubr.msk.bf16.gmra.mrb[8].mxu1 %vm980_vm4, %v9063_v40  ;;  %v3714_v51 = vshll.u32 %v9430_v35, 16  ;;  %v3720_v52 = vshll.u32 %v9431_v24, 16  ;;  %v275_v54 = vor.u32 %v274_v46, %v270_v45  ;;  %v3724_v56 = vshrl.u32 %v9431_v24, 16 }
  0x3c   :  { %v266_v53 = vrot.slane %v265_v44, 4  ;;  %v3713_v55 = vrot.slane %v3711_v48, 4  ;;  %v3709_v62 = vsel %vm11923_vm3, %v3704_v49, %v3708_v33  ;;  %v3730_v1 = vshll.u32 %v9432_v47, 16  ;;  %v31_v47 = vld [vmem:[%s16303_s0 + $0x64] sm:$0xf] }
  0x3d   :  { %v3716_v63 = vrot.slane %v3714_v51, 5  ;;  %v3722_v0 = vrot.slane %v3720_v52, 5  ;;  %v9514_v3 = vcombine.low %v3699_v41, %v3709_v62  ;;  %v276_v6 = vrot.slane %v275_v54, 4  ;;  %v87_v54 = vld [vmem:[%s16303_s0 + $0x68] sm:$0x1] }
  0x3e   :  { %v271_v5 = vsel %vm11923_vm3, %v266_v53, %v270_v45  ;;  %v3726_v7 = vrot.slane %v3724_v56, 4  ;;  %v3732_v9 = vrot.slane %v3730_v1, 5  ;;  %v283_v12 = vshrl.u32 %v28_v59, 16  ;;  %v9436_v1 = vld [vmem:[%s16303_s0 + $0x6c] sm:$0xf] }
  0x3f   :  { %v3717_v8 = vor.u32 %v3716_v63, %v3713_v55  ;;  %v286_v13 = vshll.u32 %v28_v59, 16  ;;  %10693 = vmatmul.mubr.msk.bf16.gmra.mrb[8].mxu0 %vm980_vm4, %v9514_v3  ;;  %v281_v15 = vsel %vm11923_vm3, %v276_v6, %v280_v50  ;;  %v292_v17 = vshll.u32 %v29_v2, 16 }
  0x40   :  { %v3727_v16 = vor.u32 %v3726_v7, %v3722_v0  ;;  %v296_v18 = vshrl.u32 %v29_v2, 16  ;;  %v9064_v21 = vcombine.low %v271_v5, %v281_v15  ;;  %v285_v23 = vrot.slane %v283_v12, 4  ;;  %v9437_v7 = vld [vmem:[%s16303_s0 + $0x70] sm:$0xf] }
  0x41   :  { %v3718_v22 = vrot.slane %v3717_v8, 4  ;;  %v288_v27 = vrot.slane %v286_v13, 5  ;;  %v294_v31 = vrot.slane %v292_v17, 5  ;;  %v302_v33 = vshll.u32 %v86_v10, 16 }
  0x42   :  { %v3728_v29 = vrot.slane %v3727_v16, 4  ;;  %v298_v32 = vrot.slane %v296_v18, 4  ;;  %10432 = vmatprep.mubr.msk.bf16.mxu1 %vm980_vm4, %v9064_v21  ;;  %v3735_v37 = vshrl.u32 %v9433_v20, 16  ;;  %v3738_v38 = vshll.u32 %v9433_v20, 16  ;;  %v9438_v16 = vld [vmem:[%s16303_s0 + $0x74] sm:$0x1] }
  0x43   :  { %v3723_v34 = vsel %vm11923_vm3, %v3718_v22, %v3722_v0  ;;  %v289_v35 = vor.u32 %v288_v27, %v285_v23  ;;  %v304_v40 = vrot.slane %v302_v33, 5  ;;  %v3744_v41 = vshll.u32 %v9434_v28, 16 }
  0x44   :  { %v3733_v39 = vsel %vm11923_vm3, %v3728_v29, %v3732_v9  ;;  %v299_v24 = vor.u32 %v298_v32, %v294_v31  ;;  %v3737_v45 = vrot.slane %v3735_v37, 4  ;;  %v3740_v46 = vrot.slane %v3738_v38, 5  ;;  %v32_v32 = vld [vmem:[%s16303_s0 + $0x6c] sm:$0xf]  ;;  %v33_v37 = vld [vmem:[%s16303_s0 + $0x70] sm:$0xf] }
  0x45   :  { %v9515_v43 = vcombine.low %v3723_v34, %v3733_v39  ;;  %v290_v44 = vrot.slane %v289_v35, 4  ;;  %v3746_v49 = vrot.slane %v3744_v41, 5  ;;  %v3748_v50 = vshrl.u32 %v9434_v28, 16  ;;  %v12174_v38 = vld [vmem:[%s16302_s1 + $0xc] sm:$0x3] }
  0x46   :  { %v300_v48 = vrot.slane %v299_v24, 4  ;;  %v3754_v51 = vshll.u32 %v9435_v36, 16  ;;  %v3741_v53 = vor.u32 %v3740_v46, %v3737_v45  ;;  %v307_v55 = vshrl.u32 %v30_v42, 16  ;;  %11533 = vmatprep.subr.msk.bf16.mxu0 %vm1077_vm0, %v12174_v38 }
  0x47   :  { %10696 = vmatprep.mubr.msk.bf16.mxu0 %vm980_vm4, %v9515_v43  ;;  %v295_v52 = vsel %vm11923_vm3, %v290_v44, %v294_v31  ;;  %v310_v56 = vshll.u32 %v30_v42, 16  ;;  %v3750_v62 = vrot.slane %v3748_v50, 4  ;;  %v316_v0 = vshll.u32 %v31_v47, 16  ;;  %v88_v42 = vld [vmem:[%s16303_s0 + $0x74] sm:$0x1] }
  0x48   :  { %v305_v59 = vsel %vm11923_vm3, %v300_v48, %v304_v40  ;;  %v3756_v63 = vrot.slane %v3754_v51, 5  ;;  %v3742_v3 = vrot.slane %v3741_v53, 4  ;;  %v309_v5 = vrot.slane %v307_v55, 4  ;;  %v9439_v51 = vld [vmem:[%s16303_s0 + $0x78] sm:$0xf] }
  0x49   :  { %v9065_v2 = vcombine.low %v295_v52, %v305_v59  ;;  %v312_v6 = vrot.slane %v310_v56, 5  ;;  %v3751_v8 = vor.u32 %v3750_v62, %v3746_v49  ;;  %v318_v9 = vrot.slane %v316_v0, 5  ;;  %v9440_v56 = vld [vmem:[%s16303_s0 + $0x7c] sm:$0xf] }
  0x4a   :  { %v320_v10 = vshrl.u32 %v31_v47, 16  ;;  %v326_v12 = vshll.u32 %v87_v54, 16  ;;  %v3747_v13 = vsel %vm11923_vm3, %v3742_v3, %v3746_v49  ;;  %v3759_v17 = vshrl.u32 %v9436_v1, 16 }
  0x4b   :  { %10433 = vmatmul.mubr.msk.bf16.gmra.mrb[12].mxu1 %vm980_vm4, %v9065_v2  ;;  %v313_v15 = vor.u32 %v312_v6, %v309_v5  ;;  %v3762_v18 = vshll.u32 %v9436_v1, 16  ;;  %v3752_v20 = vrot.slane %v3751_v8, 4  ;;  %v3768_v23 = vshll.u32 %v9437_v7, 16  ;;  %v9441_v5 = vld [vmem:[%s16303_s0 + $0x80] sm:$0x1] }
  0x4c   :  { %v322_v21 = vrot.slane %v320_v10, 4  ;;  %v328_v22 = vrot.slane %v326_v12, 5  ;;  %v3761_v28 = vrot.slane %v3759_v17, 4  ;;  %v3772_v31 = vshrl.u32 %v9437_v7, 16  ;;  %v34_v12 = vld [vmem:[%s16303_s0 + $0x78] sm:$0xf] }
  0x4d   :  { %v314_v27 = vrot.slane %v313_v15, 4  ;;  %v3764_v29 = vrot.slane %v3762_v18, 5  ;;  %v3757_v33 = vsel %vm11923_vm3, %v3752_v20, %v3756_v63  ;;  %v3770_v35 = vrot.slane %v3768_v23, 5  ;;  %v35_v18 = vld [vmem:[%s16303_s0 + $0x7c] sm:$0xf] }
  0x4e   :  { %v323_v34 = vor.u32 %v322_v21, %v318_v9  ;;  %v3778_v36 = vshll.u32 %v9438_v16, 16  ;;  %v9516_v39 = vcombine.low %v3747_v13, %v3757_v33  ;;  %v3774_v41 = vrot.slane %v3772_v31, 4 }
  0x4f   :  { %v319_v24 = vsel %vm11923_vm3, %v314_v27, %v318_v9  ;;  %v3765_v40 = vor.u32 %v3764_v29, %v3761_v28  ;;  %v331_v45 = vshrl.u32 %v32_v32, 16  ;;  %v334_v46 = vshll.u32 %v32_v32, 16 }
  0x50   :  { %v324_v43 = vrot.slane %v323_v34, 4  ;;  %v3780_v44 = vrot.slane %v3778_v36, 5  ;;  %10697 = vmatmul.mubr.msk.bf16.gmra.mrb[12].mxu0 %vm980_vm4, %v9516_v39  ;;  %v3775_v48 = vor.u32 %v3774_v41, %v3770_v35  ;;  %v340_v49 = vshll.u32 %v33_v37, 16 }
  0x51   :  { %v3766_v47 = vrot.slane %v3765_v40, 4  ;;  %v344_v50 = vshrl.u32 %v33_v37, 16  ;;  %v333_v53 = vrot.slane %v331_v45, 4  ;;  %v336_v54 = vrot.slane %v334_v46, 5  ;;  %v9442_v37 = vld [vmem:[%s16303_s0 + $0x84] sm:$0xf] }
  0x52   :  { %v329_v52 = vsel %vm11923_vm3, %v324_v43, %v328_v22  ;;  %v350_v55 = vshll.u32 %v88_v42, 16  ;;  %v3776_v63 = vrot.slane %v3775_v48, 4  ;;  %v342_v0 = vrot.slane %v340_v49, 5  ;;  %v9443_v42 = vld [vmem:[%s16303_s0 + $0x88] sm:$0xf] }
  0x53   :  { %v9066_v59 = vcombine.low %v319_v24, %v329_v52  ;;  %v3771_v62 = vsel %vm11923_vm3, %v3766_v47, %v3770_v35  ;;  %v337_v1 = vor.u32 %v336_v54, %v333_v53  ;;  %v346_v2 = vrot.slane %v344_v50, 4  ;;  %v89_v35 = vld [vmem:[%s16303_s0 + $0x80] sm:$0x1]  ;;  %v9444_v53 = vld [vmem:[%s16303_s0 + $0x8c] sm:$0x1] }
  0x54   :  { %v352_v3 = vrot.slane %v350_v55, 5  ;;  %v3783_v6 = vshrl.u32 %v9439_v51, 16  ;;  %v3781_v7 = vsel %vm11923_vm3, %v3776_v63, %v3780_v44  ;;  %v3786_v8 = vshll.u32 %v9439_v51, 16 }
  0x55   :  { %10436 = vmatprep.mubr.msk.bf16.mxu1 %vm980_vm4, %v9066_v59  ;;  %v3792_v9 = vshll.u32 %v9440_v56, 16  ;;  %v3796_v10 = vshrl.u32 %v9440_v56, 16  ;;  %v9517_v13 = vcombine.low %v3771_v62, %v3781_v7  ;;  %v338_v15 = vrot.slane %v337_v1, 4  ;;  %v36_v56 = vld [vmem:[%s16303_s0 + $0x84] sm:$0xf] }
  0x56   :  { %v347_v16 = vor.u32 %v346_v2, %v342_v0  ;;  %v3785_v17 = vrot.slane %v3783_v6, 4  ;;  %v3788_v20 = vrot.slane %v3786_v8, 5  ;;  %v3802_v23 = vshll.u32 %v9441_v5, 16  ;;  %v37_v1 = vld [vmem:[%s16303_s0 + $0x88] sm:$0xf] }
  0x57   :  { %v3794_v21 = vrot.slane %v3792_v9, 5  ;;  %v3798_v22 = vrot.slane %v3796_v10, 4  ;;  %10700 = vmatprep.mubr.msk.bf16.mxu0 %vm980_vm4, %v9517_v13  ;;  %v343_v27 = vsel %vm11923_vm3, %v338_v15, %v342_v0  ;;  %v355_v29 = vshrl.u32 %v34_v12, 16  ;;  %v90_v10 = vld [vmem:[%s16303_s0 + $0x8c] sm:$0x1] }
  0x58   :  { %v348_v28 = vrot.slane %v347_v16, 4  ;;  %v358_v31 = vshll.u32 %v34_v12, 16  ;;  %v3789_v32 = vor.u32 %v3788_v20, %v3785_v17  ;;  %v3804_v34 = vrot.slane %v3802_v23, 5 }
  0x59   :  { %v3799_v33 = vor.u32 %v3798_v22, %v3794_v21  ;;  %v364_v36 = vshll.u32 %v35_v18, 16  ;;  %v357_v24 = vrot.slane %v355_v29, 4  ;;  %v368_v41 = vshrl.u32 %v35_v18, 16  ;;  %v9445_v18 = vld [vmem:[%s16303_s0 + $0x90] sm:$0xf] }
  0x5a   :  { %v353_v39 = vsel %vm11923_vm3, %v348_v28, %v352_v3  ;;  %v360_v40 = vrot.slane %v358_v31, 5  ;;  %v3790_v44 = vrot.slane %v3789_v32, 4  ;;  %v374_v49 = vshll.u32 %v89_v35, 16  ;;  %v9446_v32 = vld [vmem:[%s16303_s0 + $0x94] sm:$0xf] }
  0x5b   :  { %v9067_v43 = vcombine.low %v343_v27, %v353_v39  ;;  %v3800_v45 = vrot.slane %v3799_v33, 4  ;;  %v366_v46 = vrot.slane %v364_v36, 5  ;;  %v370_v48 = vrot.slane %v368_v41, 4 }
  0x5c   :  { %v361_v47 = vor.u32 %v360_v40, %v357_v24  ;;  %v3807_v50 = vshrl.u32 %v9442_v37, 16  ;;  %v3795_v51 = vsel %vm11923_vm3, %v3790_v44, %v3794_v21  ;;  %v3810_v54 = vshll.u32 %v9442_v37, 16  ;;  %v9447_v40 = vld [vmem:[%s16303_s0 + $0x98] sm:$0x1] }
  0x5d   :  { %10437 = vmatmul.mubr.msk.bf16.gmra.mrb[16].mxu1 %vm980_vm4, %v9067_v43  ;;  %v3805_v52 = vsel %vm11923_vm3, %v3800_v45, %v3804_v34  ;;  %v3816_v55 = vshll.u32 %v9443_v42, 16  ;;  %v371_v63 = vor.u32 %v370_v48, %v366_v46  ;;  %v376_v0 = vrot.slane %v374_v49, 5 }
  0x5e   :  { %v9518_v59 = vcombine.low %v3795_v51, %v3805_v52  ;;  %v362_v62 = vrot.slane %v361_v47, 4  ;;  %v3809_v2 = vrot.slane %v3807_v50, 4  ;;  %v3812_v3 = vrot.slane %v3810_v54, 5  ;;  %v39_v51 = vld [vmem:[%s16303_s0 + $0x94] sm:$0xf] }
  0x5f   :  { %v3818_v5 = vrot.slane %v3816_v55, 5  ;;  %v3820_v6 = vshrl.u32 %v9443_v42, 16  ;;  %v372_v8 = vrot.slane %v371_v63, 4  ;;  %v3826_v9 = vshll.u32 %v9444_v53, 16  ;;  %v91_v63 = vld [vmem:[%s16303_s0 + $0x98] sm:$0x1] }
  0x60   :  { %10701 = vmatmul.mubr.msk.bf16.gmra.mrb[16].mxu0 %vm980_vm4, %v9518_v59  ;;  %v367_v7 = vsel %vm11923_vm3, %v362_v62, %v366_v46  ;;  %v379_v12 = vshrl.u32 %v36_v56, 16  ;;  %v3813_v13 = vor.u32 %v3812_v3, %v3809_v2  ;;  %v382_v16 = vshll.u32 %v36_v56, 16  ;;  %v38_v46 = vld [vmem:[%s16303_s0 + $0x90] sm:$0xf] }
  0x61   :  { %v3822_v15 = vrot.slane %v3820_v6, 4  ;;  %v388_v17 = vshll.u32 %v37_v1, 16  ;;  %v377_v20 = vsel %vm11923_vm3, %v372_v8, %v376_v0  ;;  %v3828_v21 = vrot.slane %v3826_v9, 5  ;;  %v9448_v6 = vld [vmem:[%s16303_s0 + $0x9c] sm:$0xf] }
  0x62   :  { %v381_v22 = vrot.slane %v379_v12, 4  ;;  %v392_v23 = vshrl.u32 %v37_v1, 16  ;;  %v9068_v27 = vcombine.low %v367_v7, %v377_v20  ;;  %v3814_v28 = vrot.slane %v3813_v13, 4  ;;  %v9449_v12 = vld [vmem:[%s16303_s0 + $0xa0] sm:$0xf] }
  0x63   :  { %v3823_v29 = vor.u32 %v3822_v15, %v3818_v5  ;;  %v384_v31 = vrot.slane %v382_v16, 5  ;;  %v390_v33 = vrot.slane %v388_v17, 5  ;;  %v398_v35 = vshll.u32 %v90_v10, 16 }
  0x64   :  { %v394_v34 = vrot.slane %v392_v23, 4  ;;  %v3831_v36 = vshrl.u32 %v9445_v18, 16  ;;  %10440 = vmatprep.mubr.msk.bf16.mxu1 %vm980_vm4, %v9068_v27  ;;  %v3819_v37 = vsel %vm11923_vm3, %v3814_v28, %v3818_v5  ;;  %v3834_v41 = vshll.u32 %v9445_v18, 16 }
  0x65   :  { %v3824_v39 = vrot.slane %v3823_v29, 4  ;;  %v385_v24 = vor.u32 %v384_v31, %v381_v22  ;;  %v400_v43 = vrot.slane %v398_v35, 5  ;;  %v3840_v45 = vshll.u32 %v9446_v32, 16 }
  0x66   :  { %v395_v42 = vor.u32 %v394_v34, %v390_v33  ;;  %v3833_v44 = vrot.slane %v3831_v36, 4  ;;  %v3836_v49 = vrot.slane %v3834_v41, 5  ;;  %v3844_v50 = vshrl.u32 %v9446_v32, 16  ;;  %v40_v32 = vld [vmem:[%s16303_s0 + $0x9c] sm:$0xf] }
  0x67   :  { %v3829_v47 = vsel %vm11923_vm3, %v3824_v39, %v3828_v21  ;;  %v386_v48 = vrot.slane %v385_v24, 4  ;;  %v3842_v54 = vrot.slane %v3840_v45, 5  ;;  %v3850_v55 = vshll.u32 %v9447_v40, 16  ;;  %v9450_v21 = vld [vmem:[%s16303_s0 + $0xa4] sm:$0x1] }
  0x68   :  { %v9519_v52 = vcombine.low %v3819_v37, %v3829_v47  ;;  %v396_v53 = vrot.slane %v395_v42, 4  ;;  %v3837_v59 = vor.u32 %v3836_v49, %v3833_v44  ;;  %v3846_v62 = vrot.slane %v3844_v50, 4  ;;  %v41_v37 = vld [vmem:[%s16303_s0 + $0xa0] sm:$0xf] }
  0x69   :  { %v391_v56 = vsel %vm11923_vm3, %v386_v48, %v390_v33  ;;  %v403_v0 = vshrl.u32 %v38_v46, 16  ;;  %v3852_v2 = vrot.slane %v3850_v55, 5  ;;  %v406_v3 = vshll.u32 %v38_v46, 16  ;;  %v92_v48 = vld [vmem:[%s16303_s0 + $0xa4] sm:$0x1] }
  0x6a   :  { %10704 = vmatprep.mubr.msk.bf16.mxu0 %vm980_vm4, %v9519_v52  ;;  %v401_v1 = vsel %vm11923_vm3, %v396_v53, %v400_v43  ;;  %v412_v5 = vshll.u32 %v39_v51, 16  ;;  %v3838_v8 = vrot.slane %v3837_v59, 4  ;;  %v3847_v9 = vor.u32 %v3846_v62, %v3842_v54  ;;  %v9451_v55 = vld [vmem:[%s16303_s0 + $0xa8] sm:$0xf] }
  0x6b   :  { %v9069_v7 = vcombine.low %v391_v56, %v401_v1  ;;  %v405_v10 = vrot.slane %v403_v0, 4  ;;  %v408_v13 = vrot.slane %v406_v3, 5  ;;  %v416_v16 = vshrl.u32 %v39_v51, 16  ;;  %v9452_v0 = vld [vmem:[%s16303_s0 + $0xac] sm:$0xf] }
  0x6c   :  { %v414_v15 = vrot.slane %v412_v5, 5  ;;  %v422_v17 = vshll.u32 %v91_v63, 16  ;;  %v3843_v18 = vsel %vm11923_vm3, %v3838_v8, %v3842_v54  ;;  %v3848_v20 = vrot.slane %v3847_v9, 4  ;;  %v9453_v8 = vld [vmem:[%s16303_s0 + $0xb0] sm:$0x1] }
  0x6d   :  { %10441 = vmatmul.mubr.msk.bf16.gmra.mrb[20].mxu1 %vm980_vm4, %v9069_v7  ;;  %v3855_v22 = vshrl.u32 %v9448_v6, 16  ;;  %v3858_v23 = vshll.u32 %v9448_v6, 16  ;;  %v409_v27 = vor.u32 %v408_v13, %v405_v10  ;;  %v418_v28 = vrot.slane %v416_v16, 4 }
  0x6e   :  { %v424_v29 = vrot.slane %v422_v17, 5  ;;  %v3864_v31 = vshll.u32 %v9449_v12, 16  ;;  %v3853_v33 = vsel %vm11923_vm3, %v3848_v20, %v3852_v2  ;;  %v3868_v36 = vshrl.u32 %v9449_v12, 16  ;;  %v42_v17 = vld [vmem:[%s16303_s0 + $0xa8] sm:$0xf] }
  0x6f   :  { %v3857_v34 = vrot.slane %v3855_v22, 4  ;;  %v3860_v35 = vrot.slane %v3858_v23, 5  ;;  %v9520_v39 = vcombine.low %v3843_v18, %v3853_v33  ;;  %v410_v24 = vrot.slane %v409_v27, 4  ;;  %v43_v23 = vld [vmem:[%s16303_s0 + $0xac] sm:$0xf] }
  0x70   :  { %v419_v40 = vor.u32 %v418_v28, %v414_v15  ;;  %v3866_v41 = vrot.slane %v3864_v31, 5  ;;  %v3870_v43 = vrot.slane %v3868_v36, 4  ;;  %v3874_v44 = vshll.u32 %v9450_v21, 16 }
  0x71   :  { %v3861_v42 = vor.u32 %v3860_v35, %v3857_v34  ;;  %v427_v45 = vshrl.u32 %v40_v32, 16  ;;  %10705 = vmatmul.mubr.msk.bf16.gmra.mrb[20].mxu0 %vm980_vm4, %v9520_v39  ;;  %v415_v46 = vsel %vm11923_vm3, %v410_v24, %v414_v15  ;;  %v430_v49 = vshll.u32 %v40_v32, 16  ;;  %v93_v34 = vld [vmem:[%s16303_s0 + $0xb0] sm:$0x1] }
  0x72   :  { %v420_v47 = vrot.slane %v419_v40, 4  ;;  %v436_v50 = vshll.u32 %v41_v37, 16  ;;  %v3871_v52 = vor.u32 %v3870_v43, %v3866_v41  ;;  %v3876_v53 = vrot.slane %v3874_v44, 5 }
  0x73   :  { %v3862_v51 = vrot.slane %v3861_v42, 4  ;;  %v429_v54 = vrot.slane %v427_v45, 4  ;;  %v432_v59 = vrot.slane %v430_v49, 5  ;;  %v440_v63 = vshrl.u32 %v41_v37, 16  ;;  %v9455_v42 = vld [vmem:[%s16303_s0 + $0xb8] sm:$0xf] }
  0x74   :  { %v425_v56 = vsel %vm11923_vm3, %v420_v47, %v424_v29  ;;  %v438_v62 = vrot.slane %v436_v50, 5  ;;  %v3872_v3 = vrot.slane %v3871_v52, 4  ;;  %v446_v5 = vshll.u32 %v92_v48, 16  ;;  %v9218_v47 = vld [vmem:[%s16302_s1 + $0x4] sm:$0x3] }
  0x75   :  { %v9070_v1 = vcombine.low %v415_v46, %v425_v56  ;;  %v3867_v2 = vsel %vm11923_vm3, %v3862_v51, %v3866_v41  ;;  %v433_v6 = vor.u32 %v432_v59, %v429_v54  ;;  %v442_v7 = vrot.slane %v440_v63, 4  ;;  %v9454_v41 = vld [vmem:[%s16303_s0 + $0xb4] sm:$0xf]  ;;  %11528 = vmatprep.subr.msk.bf16.mxu1 %vm1077_vm0, %v9218_v47 }
  0x76   :  { %v3879_v9 = vshrl.u32 %v9451_v55, 16  ;;  %v3882_v10 = vshll.u32 %v9451_v55, 16  ;;  %v3877_v12 = vsel %vm11923_vm3, %v3872_v3, %v3876_v53  ;;  %v448_v13 = vrot.slane %v446_v5, 5 }
  0x77   :  { %10444 = vmatprep.mubr.msk.bf16.mxu1 %vm980_vm4, %v9070_v1  ;;  %v3888_v15 = vshll.u32 %v9452_v0, 16  ;;  %v3892_v16 = vshrl.u32 %v9452_v0, 16  ;;  %v9521_v18 = vcombine.low %v3867_v2, %v3877_v12  ;;  %v434_v20 = vrot.slane %v433_v6, 4  ;;  %v44_v1 = vld [vmem:[%s16303_s0 + $0xb4] sm:$0xf] }
  0x78   :  { %v443_v21 = vor.u32 %v442_v7, %v438_v62  ;;  %v3881_v22 = vrot.slane %v3879_v9, 4  ;;  %v3884_v27 = vrot.slane %v3882_v10, 5  ;;  %v3898_v31 = vshll.u32 %v9453_v8, 16  ;;  %v45_v7 = vld [vmem:[%s16303_s0 + $0xb8] sm:$0xf] }
  0x79   :  { %v3890_v28 = vrot.slane %v3888_v15, 5  ;;  %v3894_v29 = vrot.slane %v3892_v16, 4  ;;  %10708 = vmatprep.mubr.msk.bf16.mxu0 %vm980_vm4, %v9521_v18  ;;  %v439_v32 = vsel %vm11923_vm3, %v434_v20, %v438_v62  ;;  %v451_v35 = vshrl.u32 %v42_v17, 16  ;;  %v9456_v62 = vld [vmem:[%s16303_s0 + $0xbc] sm:$0x1] }
  0x7a   :  { %v444_v33 = vrot.slane %v443_v21, 4  ;;  %v454_v36 = vshll.u32 %v42_v17, 16  ;;  %v3885_v37 = vor.u32 %v3884_v27, %v3881_v22  ;;  %v3900_v24 = vrot.slane %v3898_v31, 5  ;;  %v94_v17 = vld [vmem:[%s16303_s0 + $0xbc] sm:$0x1] }
  0x7b   :  { %v3895_v39 = vor.u32 %v3894_v29, %v3890_v28  ;;  %v460_v40 = vshll.u32 %v43_v23, 16  ;;  %v453_v44 = vrot.slane %v451_v35, 4  ;;  %v464_v46 = vshrl.u32 %v43_v23, 16  ;;  %v9457_v27 = vld [vmem:[%s16303_s0 + $0xc0] sm:$0xf] }
  0x7c   :  { %v449_v43 = vsel %vm11923_vm3, %v444_v33, %v448_v13  ;;  %v456_v45 = vrot.slane %v454_v36, 5  ;;  %v3886_v49 = vrot.slane %v3885_v37, 4  ;;  %v470_v54 = vshll.u32 %v93_v34, 16  ;;  %v9458_v37 = vld [vmem:[%s16303_s0 + $0xc4] sm:$0xf] }
  0x7d   :  { %v9071_v48 = vcombine.low %v439_v32, %v449_v43  ;;  %v3896_v50 = vrot.slane %v3895_v39, 4  ;;  %v462_v51 = vrot.slane %v460_v40, 5  ;;  %v466_v53 = vrot.slane %v464_v46, 4 }
  0x7e   :  { %v457_v52 = vor.u32 %v456_v45, %v453_v44  ;;  %v3903_v55 = vshrl.u32 %v9454_v41, 16  ;;  %v3891_v56 = vsel %vm11923_vm3, %v3886_v49, %v3890_v28  ;;  %v3906_v63 = vshll.u32 %v9454_v41, 16  ;;  %v9459_v45 = vld [vmem:[%s16303_s0 + $0xc8] sm:$0x1] }
  0x7f   :  { %10445 = vmatmul.mubr.msk.bf16.gmra.mrb[24].mxu1 %vm980_vm4, %v9071_v48  ;;  %v3901_v59 = vsel %vm11923_vm3, %v3896_v50, %v3900_v24  ;;  %v3912_v0 = vshll.u32 %v9455_v42, 16  ;;  %v467_v5 = vor.u32 %v466_v53, %v462_v51  ;;  %v472_v6 = vrot.slane %v470_v54, 5 }
  0x80   :  { %v9522_v2 = vcombine.low %v3891_v56, %v3901_v59  ;;  %v458_v3 = vrot.slane %v457_v52, 4  ;;  %v3905_v8 = vrot.slane %v3903_v55, 4  ;;  %v3908_v9 = vrot.slane %v3906_v63, 5  ;;  %v47_v56 = vld [vmem:[%s16303_s0 + $0xdc] sm:$0xf] }
  0x81   :  { %v3914_v10 = vrot.slane %v3912_v0, 5  ;;  %v3916_v12 = vshrl.u32 %v9455_v42, 16  ;;  %v468_v15 = vrot.slane %v467_v5, 4  ;;  %v3922_v16 = vshll.u32 %v9456_v62, 16  ;;  %v95_v5 = vld [vmem:[%s16303_s0 + $0xe0] sm:$0x1] }
  0x82   :  { %10709 = vmatmul.mubr.msk.bf16.gmra.mrb[24].mxu0 %vm980_vm4, %v9522_v2  ;;  %v463_v13 = vsel %vm11923_vm3, %v458_v3, %v462_v51  ;;  %v475_v18 = vshrl.u32 %v44_v1, 16  ;;  %v3909_v20 = vor.u32 %v3908_v9, %v3905_v8  ;;  %v478_v22 = vshll.u32 %v44_v1, 16  ;;  %v46_v51 = vld [vmem:[%s16303_s0 + $0xd8] sm:$0xf] }
  0x83   :  { %v3918_v21 = vrot.slane %v3916_v12, 4  ;;  %v484_v23 = vshll.u32 %v45_v7, 16  ;;  %v473_v28 = vsel %vm11923_vm3, %v468_v15, %v472_v6  ;;  %v3924_v29 = vrot.slane %v3922_v16, 5 }
  0x84   :  { %v477_v31 = vrot.slane %v475_v18, 4  ;;  %v488_v32 = vshrl.u32 %v45_v7, 16  ;;  %v9072_v33 = vcombine.low %v463_v13, %v473_v28  ;;  %v3910_v34 = vrot.slane %v3909_v20, 4  ;;  %v48_v18 = vld [vmem:[%s16303_s0 + $0xe4] sm:$0xf] }
  0x85   :  { %v3919_v35 = vor.u32 %v3918_v21, %v3914_v10  ;;  %v480_v36 = vrot.slane %v478_v22, 5  ;;  %v486_v39 = vrot.slane %v484_v23, 5  ;;  %v494_v40 = vshll.u32 %v94_v17, 16  ;;  %v9573_v17 = vld [vmem:[%s16303_s0 + $0xc] sm:$0xe] }
  0x86   :  { %v490_v24 = vrot.slane %v488_v32, 4  ;;  %v3927_v41 = vshrl.u32 %v9457_v27, 16  ;;  %10448 = vmatprep.mubr.msk.bf16.mxu1 %vm980_vm4, %v9072_v33  ;;  %v3915_v42 = vsel %vm11923_vm3, %v3910_v34, %v3914_v10  ;;  %v3930_v46 = vshll.u32 %v9457_v27, 16  ;;  %v49_v27 = vld [vmem:[%s16303_s0 + $0xe8] sm:$0xf] }
  0x87   :  { %v3920_v43 = vrot.slane %v3919_v35, 4  ;;  %v481_v44 = vor.u32 %v480_v36, %v477_v31  ;;  %v496_v48 = vrot.slane %v494_v40, 5  ;;  %v3936_v50 = vshll.u32 %v9458_v37, 16 }
  0x88   :  { %v491_v47 = vor.u32 %v490_v24, %v486_v39  ;;  %v3929_v49 = vrot.slane %v3927_v41, 4  ;;  %v3932_v54 = vrot.slane %v3930_v46, 5  ;;  %v3940_v55 = vshrl.u32 %v9458_v37, 16 }
  0x89   :  { %v3925_v52 = vsel %vm11923_vm3, %v3920_v43, %v3924_v29  ;;  %v482_v53 = vrot.slane %v481_v44, 4  ;;  %v3938_v63 = vrot.slane %v3936_v50, 5  ;;  %v3946_v0 = vshll.u32 %v9459_v45, 16  ;;  %v9574_v45 = vld [vmem:[%s16303_s0 + $0x18] sm:$0xe] }
  0x8a   :  { %v9523_v59 = vcombine.low %v3915_v42, %v3925_v52  ;;  %v492_v62 = vrot.slane %v491_v47, 4  ;;  %v3933_v2 = vor.u32 %v3932_v54, %v3929_v49  ;;  %v3942_v3 = vrot.slane %v3940_v55, 4  ;;  %v50_v50 = vld [vmem:[%s16303_s0 + $0xf0] sm:$0xf] }
  0x8b   :  { %v487_v1 = vsel %vm11923_vm3, %v482_v53, %v486_v39  ;;  %v499_v6 = vshrl.u32 %v46_v51, 16  ;;  %v3948_v8 = vrot.slane %v3946_v0, 5  ;;  %v502_v9 = vshll.u32 %v46_v51, 16  ;;  %v96_v39 = vld [vmem:[%s16303_s0 + $0xec] sm:$0x1] }
  0x8c   :  { %10712 = vmatprep.mubr.msk.bf16.mxu0 %vm980_vm4, %v9523_v59  ;;  %v497_v7 = vsel %vm11923_vm3, %v492_v62, %v496_v48  ;;  %v508_v10 = vshll.u32 %v47_v56, 16  ;;  %v3934_v13 = vrot.slane %v3933_v2, 4  ;;  %v3943_v15 = vor.u32 %v3942_v3, %v3938_v63  ;;  %v9575_v59 = vld [vmem:[%s16303_s0 + $0x24] sm:$0xe] }
  0x8d   :  { %v9073_v12 = vcombine.low %v487_v1, %v497_v7  ;;  %v501_v16 = vrot.slane %v499_v6, 4  ;;  %v504_v20 = vrot.slane %v502_v9, 5  ;;  %v512_v22 = vshrl.u32 %v47_v56, 16 }
  0x8e   :  { %v510_v21 = vrot.slane %v508_v10, 5  ;;  %v518_v23 = vshll.u32 %v95_v5, 16  ;;  %v3939_v28 = vsel %vm11923_vm3, %v3934_v13, %v3938_v63  ;;  %v3944_v29 = vrot.slane %v3943_v15, 4 }
  0x8f   :  { %10449 = vmatmul.mubr.msk.bf16.gmra.mrb[28].mxu1 %vm980_vm4, %v9073_v12  ;;  %vm2015_vm6 = vcmask 1046532   ;;  %v505_v31 = vor.u32 %v504_v20, %v501_v16  ;;  %v514_v32 = vrot.slane %v512_v22, 4  ;;  %v9605_v35 = vrot.slane %v9573_v17, 9  ;;  %v52_v12 = vld [vmem:[%s16303_s0 + $0xfc] sm:$0xf] }
  0x90   :  { %v520_v33 = vrot.slane %v518_v23, 5  ;;  %vm12398_vm7 = vmor %vm2014_vm5, %vm2015_vm6  ;;  %v3949_v36 = vsel %vm11923_vm3, %v3944_v29, %v3948_v8  ;;  %v5016_v37 = vrot.slane %v5014_v57, 4  ;;  %v523_v24 = vshrl.u32 %v48_v18, 16  ;;  %v11632_v20 = vld [vmem:[%s16303_s0 + $0x28] sm:$0xf] }
  0x91   :  { %v526_v40 = vshll.u32 %v48_v18, 16  ;;  %v9524_v41 = vcombine.low %v3939_v28, %v3949_v36  ;;  %v506_v42 = vrot.slane %v505_v31, 4  ;;  %v515_v43 = vor.u32 %v514_v32, %v510_v21  ;;  %v53_v22 = vld [vmem:[%s16303_s0 + $0x100] sm:$0xf]  ;;  %v11633_v28 = vld [vmem:[%s16303_s0 + $0x2c] sm:$0x1] }
  0x92   :  { %v5015_v44 = vsel %vm12398_vm7, %v9605_v35, %v5014_v57  ;;  %v5018_v46 = vsel %vm12398_vm7, %v5016_v37, %v5017_v58  ;;  %v525_v47 = vrot.slane %v523_v24, 4  ;;  %v532_v49 = vshll.u32 %v49_v27, 16  ;;  %v97_v58 = vld [vmem:[%s16303_s0 + $0xf8] sm:$0x1]  ;;  %v98_v31 = vld [vmem:[%s16303_s0 + $0x104] sm:$0x1] }
  0x93   :  { %v528_v48 = vrot.slane %v526_v40, 5  ;;  %10713 = vmatmul.mubr.msk.bf16.gmra.mrb[28].mxu0 %vm980_vm4, %v9524_v41  ;;  %v511_v14 = vsel %vm11923_vm3, %v506_v42, %v510_v21  ;;  %v516_v57 = vrot.slane %v515_v43, 4  ;;  %v9638_v51 = vcombine.low %v5015_v44, %v5018_v46  ;;  %v54_v43 = vld [vmem:[%s16303_s0 + $0x108] sm:$0xf]  ;;  %v55_v44 = vld [vmem:[%s16303_s0 + $0x10c] sm:$0xf] }
  0x94   :  { %v536_v52 = vshrl.u32 %v49_v27, 16  ;;  %v534_v54 = vrot.slane %v532_v49, 5  ;;  %v542_v55 = vshll.u32 %v96_v39, 16  ;;  %v9606_v56 = vrot.slane %v9574_v45, 9  ;;  %v9576_v39 = vld [vmem:[%s16303_s0 + $0x30] sm:$0xe] }
  0x95   :  { %v529_v53 = vor.u32 %v528_v48, %v525_v47  ;;  %v521_v62 = vsel %vm11923_vm3, %v516_v57, %v520_v33  ;;  %10750 = vmatprep.mubr.msk.bf16.mxu0 %vm980_vm4, %v9638_v51  ;;  %v5025_v0 = vsel %vm12398_vm7, %v11973_v25, %v5024_v26  ;;  %v6110_v1 = vsel %vm1077_vm0, %v12174_v38, 0 }
  0x96   :  { %v538_v63 = vrot.slane %v536_v52, 4  ;;  %v9074_v2 = vcombine.low %v511_v14, %v521_v62  ;;  %v544_v5 = vrot.slane %v542_v55, 5  ;;  %v5022_v6 = vsel %vm12398_vm7, %v9606_v56, %v5021_v11  ;;  %v11634_v55 = vld [vmem:[%s16303_s0 + $0x34] sm:$0xf] }
  0x97   :  { %v530_v3 = vrot.slane %v529_v53, 4  ;;  %v9639_v8 = vcombine.low %v5022_v6, %v5025_v0  ;;  %v547_v9 = vshrl.u32 %v50_v50, 16  ;;  %v550_v10 = vshll.u32 %v50_v50, 16  ;;  %v99_v0 = vld [vmem:[%s16303_s0 + $0x110] sm:$0x1] }
  0x98   :  { %v539_v7 = vor.u32 %v538_v63, %v534_v54  ;;  %10452 = vmatprep.mubr.msk.bf16.mxu1 %vm980_vm4, %v9074_v2  ;;  %v556_v25 = vshll.u32 %v51_v19, 16  ;;  %v560_v26 = vshrl.u32 %v51_v19, 16  ;;  %v566_v38 = vshll.u32 %v97_v58, 16 }
  0x99   :  { %v535_v61 = vsel %vm11923_vm3, %v530_v3, %v534_v54  ;;  %v549_v13 = vrot.slane %v547_v9, 4  ;;  %v552_v15 = vrot.slane %v550_v10, 5  ;;  %v9607_v11 = vrot.slane %v9575_v59, 9  ;;  %v11635_v59 = vld [vmem:[%s16303_s0 + $0x38] sm:$0x1] }
  0x9a   :  { %v540_v60 = vrot.slane %v539_v7, 4  ;;  %v558_v16 = vrot.slane %v556_v25, 5  ;;  %v562_v17 = vrot.slane %v560_v26, 4  ;;  %v568_v18 = vrot.slane %v566_v38, 5  ;;  %v9577_v9 = vld [vmem:[%s16303_s0 + $0x3c] sm:$0xe] }
  0x9b   :  { %v5028_v21 = vrot.slane %v11632_v20, 5  ;;  %10751 = vmatmul.mubr.msk.bf16.vlgmr.msra.gmra.mrb[0].mxu0 %vm980_vm4, %v9639_v8  ;;  %v553_v27 = vor.u32 %v552_v15, %v549_v13  ;;  %v5031_v29 = vrot.slane %v11633_v28, 5  ;;  %v571_v32 = vshrl.u32 %v52_v12, 16  ;;  %v56_v38 = vld [vmem:[%s16303_s0 + $0x114] sm:$0xf] }
  0x9c   :  { %v545_v23 = vsel %vm11923_vm3, %v540_v60, %v544_v5  ;;  %10815 = vmatpush3.bf16.msra.mxu0 %v6110_v1  ;;  %v563_v35 = vor.u32 %v562_v17, %v558_v16  ;;  %v574_v41 = vshll.u32 %v52_v12, 16  ;;  %v580_v42 = vshll.u32 %v53_v22, 16 }
  0x9d   :  { %v9075_v33 = vcombine.low %v535_v61, %v545_v23  ;;  %v5029_v36 = vsel %vm12398_vm7, %v9607_v11, %v5028_v21  ;;  %v5030_v37 = vrot.slane %v5028_v21, 4  ;;  %v554_v24 = vrot.slane %v553_v27, 4  ;;  %v57_v11 = vld [vmem:[%s16303_s0 + $0x118] sm:$0xf]  ;;  %v11636_v27 = vld [vmem:[%s16303_s0 + $0x40] sm:$0xf] }
  0x9e   :  { %v573_v40 = vrot.slane %v571_v32, 4  ;;  %v564_v45 = vrot.slane %v563_v35, 4  ;;  %v584_v47 = vshrl.u32 %v53_v22, 16  ;;  %v590_v48 = vshll.u32 %v98_v31, 16  ;;  %v11637_v31 = vld [vmem:[%s16303_s0 + $0x44] sm:$0x1] }
  0x9f   :  { %10453 = vmatmul.mubr.msk.bf16.gmra.mrb[32].mxu1 %vm980_vm4, %v9075_v33  ;;  %v5032_v46 = vsel %vm12398_vm7, %v5030_v37, %v5031_v29  ;;  %v559_v49 = vsel %vm11923_vm3, %v554_v24, %v558_v16  ;;  %v576_v14 = vrot.slane %v574_v41, 5  ;;  %v582_v57 = vrot.slane %v580_v42, 5  ;;  %v100_v33 = vld [vmem:[%s16303_s0 + $0x11c] sm:$0x1] }
  0xa0   :  { %v9640_v50 = vcombine.low %v5029_v36, %v5032_v46  ;;  %v569_v51 = vsel %vm11923_vm3, %v564_v45, %v568_v18  ;;  %v586_v52 = vrot.slane %v584_v47, 4  ;;  %v592_v19 = vrot.slane %v590_v48, 5  ;;  %v9578_v45 = vld [vmem:[%s16303_s0 + $0x48] sm:$0xe] }
  0xa1   :  { %v9608_v58 = vrot.slane %v9576_v39, 9  ;;  %v9076_v53 = vcombine.low %v559_v49, %v569_v51  ;;  %v577_v54 = vor.u32 %v576_v14, %v573_v40  ;;  %v5035_v56 = vrot.slane %v11634_v55, 5  ;;  %v59_v14 = vld [vmem:[%s16303_s0 + $0x124] sm:$0xf]  ;;  %v11638_v55 = vld [vmem:[%s16303_s0 + $0x4c] sm:$0xf] }
  0xa2   :  { %10754 = vmatprep.mubr.msk.bf16.mxu0 %vm980_vm4, %v9640_v50  ;;  %v5038_v62 = vrot.slane %v11635_v59, 5  ;;  %v587_v63 = vor.u32 %v586_v52, %v582_v57  ;;  %v595_v1 = vshrl.u32 %v54_v43, 16  ;;  %v598_v2 = vshll.u32 %v54_v43, 16  ;;  %v58_v50 = vld [vmem:[%s16303_s0 + $0x120] sm:$0xf] }
  0xa3   :  { %v604_v3 = vshll.u32 %v55_v44, 16  ;;  %10456 = vmatprep.mubr.msk.bf16.mxu1 %vm980_vm4, %v9076_v53  ;;  %v578_v5 = vrot.slane %v577_v54, 4  ;;  %v5036_v6 = vsel %vm12398_vm7, %v9608_v58, %v5035_v56  ;;  %v5037_v7 = vrot.slane %v5035_v56, 4  ;;  %v101_v58 = vld [vmem:[%s16303_s0 + $0x128] sm:$0x1] }
  0xa4   :  { %v608_v8 = vshrl.u32 %v55_v44, 16  ;;  %v588_v10 = vrot.slane %v587_v63, 4  ;;  %v597_v61 = vrot.slane %v595_v1, 4  ;;  %v600_v25 = vrot.slane %v598_v2, 5  ;;  %v11639_v59 = vld [vmem:[%s16303_s0 + $0x50] sm:$0x1] }
  0xa5   :  { %v606_v26 = vrot.slane %v604_v3, 5  ;;  %v583_v12 = vsel %vm11923_vm3, %v578_v5, %v582_v57  ;;  %v5039_v60 = vsel %vm12398_vm7, %v5037_v7, %v5038_v62  ;;  %v614_v15 = vshll.u32 %v99_v0, 16  ;;  %v9579_v63 = vld [vmem:[%s16303_s0 + $0x54] sm:$0xe] }
  0xa6   :  { %v610_v13 = vrot.slane %v608_v8, 4  ;;  %v593_v16 = vsel %vm11923_vm3, %v588_v10, %v592_v19  ;;  %v9641_v17 = vcombine.low %v5036_v6, %v5039_v60  ;;  %v601_v18 = vor.u32 %v600_v25, %v597_v61 }
  0xa7   :  { %v9609_v20 = vrot.slane %v9577_v9, 9  ;;  %v9077_v21 = vcombine.low %v583_v12, %v593_v16  ;;  %v616_v23 = vrot.slane %v614_v15, 5  ;;  %v5042_v28 = vrot.slane %v11636_v27, 5  ;;  %v60_v9 = vld [vmem:[%s16303_s0 + $0x12c] sm:$0xf] }
  0xa8   :  { %v611_v22 = vor.u32 %v610_v13, %v606_v26  ;;  %10755 = vmatmul.mubr.msk.bf16.gmra.mrb[4].mxu0 %vm980_vm4, %v9641_v17  ;;  %v602_v29 = vrot.slane %v601_v18, 4  ;;  %v5045_v32 = vrot.slane %v11637_v31, 5  ;;  %v619_v35 = vshrl.u32 %v56_v38, 16 }
  0xa9   :  { %v622_v36 = vshll.u32 %v56_v38, 16  ;;  %10457 = vmatmul.mubr.msk.bf16.gmra.mrb[36].mxu1 %vm980_vm4, %v9077_v21  ;;  %v5043_v39 = vsel %vm12398_vm7, %v9609_v20, %v5042_v28  ;;  %v5044_v24 = vrot.slane %v5042_v28, 4  ;;  %v628_v40 = vshll.u32 %v57_v11, 16  ;;  %v61_v38 = vld [vmem:[%s16303_s0 + $0x130] sm:$0xf] }
  0xaa   :  { %v612_v37 = vrot.slane %v611_v22, 4  ;;  %v607_v41 = vsel %vm11923_vm3, %v602_v29, %v606_v26  ;;  %v621_v42 = vrot.slane %v619_v35, 4  ;;  %v632_v44 = vshrl.u32 %v57_v11, 16  ;;  %v102_v20 = vld [vmem:[%s16303_s0 + $0x134] sm:$0x1] }
  0xab   :  { %v624_v43 = vrot.slane %v622_v36, 5  ;;  %v5046_v47 = vsel %vm12398_vm7, %v5044_v24, %v5045_v32  ;;  %v630_v48 = vrot.slane %v628_v40, 5  ;;  %v638_v49 = vshll.u32 %v100_v33, 16  ;;  %v9927_v21 = vld [vmem:[%s16302_s1 + $0xe] sm:$0x3] }
  0xac   :  { %v617_v46 = vsel %vm11923_vm3, %v612_v37, %v616_v23  ;;  %v9642_v51 = vcombine.low %v5043_v39, %v5046_v47  ;;  %v634_v19 = vrot.slane %v632_v44, 4  ;;  %v9610_v54 = vrot.slane %v9578_v45, 9  ;;  %v11640_v28 = vld [vmem:[%s16303_s0 + $0x58] sm:$0xf]  ;;  %11534 = vmatprep.subr.msk.bf16.mxu0 %vm1077_vm0, %v9927_v21  ;;  %v11641_v32 = vld [vmem:[%s16303_s0 + $0x5c] sm:$0x1] }
  0xad   :  { %v9078_v57 = vcombine.low %v607_v41, %v617_v46  ;;  %v625_v52 = vor.u32 %v624_v43, %v621_v42  ;;  %v640_v53 = vrot.slane %v638_v49, 5  ;;  %v5049_v56 = vrot.slane %v11638_v55, 5  ;;  %v9580_v37 = vld [vmem:[%s16303_s0 + $0x60] sm:$0xe]  ;;  %v62_v42 = vld [vmem:[%s16303_s0 + $0x138] sm:$0xf] }
  0xae   :  { %v5052_v62 = vrot.slane %v11639_v59, 5  ;;  %10758 = vmatprep.mubr.msk.bf16.mxu0 %vm980_vm4, %v9642_v51  ;;  %v635_v1 = vor.u32 %v634_v19, %v630_v48  ;;  %v643_v2 = vshrl.u32 %v58_v50, 16  ;;  %v646_v3 = vshll.u32 %v58_v50, 16  ;;  %v11642_v55 = vld [vmem:[%s16303_s0 + $0x64] sm:$0xf] }
  0xaf   :  { %10460 = vmatprep.mubr.msk.bf16.mxu1 %vm980_vm4, %v9078_v57  ;;  %v626_v0 = vrot.slane %v625_v52, 4  ;;  %v5050_v5 = vsel %vm12398_vm7, %v9610_v54, %v5049_v56  ;;  %v5051_v6 = vrot.slane %v5049_v56, 4  ;;  %v652_v7 = vshll.u32 %v59_v14, 16  ;;  %v11643_v59 = vld [vmem:[%s16303_s0 + $0x68] sm:$0x1] }
  0xb0   :  { %v656_v8 = vshrl.u32 %v59_v14, 16  ;;  %v636_v61 = vrot.slane %v635_v1, 4  ;;  %v645_v25 = vrot.slane %v643_v2, 4  ;;  %v648_v26 = vrot.slane %v646_v3, 5  ;;  %v63_v14 = vld [vmem:[%s16303_s0 + $0x13c] sm:$0xf] }
  0xb1   :  { %v631_v10 = vsel %vm11923_vm3, %v626_v0, %v630_v48  ;;  %v5053_v12 = vsel %vm12398_vm7, %v5051_v6, %v5052_v62  ;;  %v654_v60 = vrot.slane %v652_v7, 5  ;;  %v662_v15 = vshll.u32 %v101_v58, 16  ;;  %v103_v58 = vld [vmem:[%s16303_s0 + $0x140] sm:$0x1] }
  0xb2   :  { %v658_v13 = vrot.slane %v656_v8, 4  ;;  %v641_v11 = vsel %vm11923_vm3, %v636_v61, %v640_v53  ;;  %v9643_v16 = vcombine.low %v5050_v5, %v5053_v12  ;;  %v649_v17 = vor.u32 %v648_v26, %v645_v25 }
  0xb3   :  { %v9611_v18 = vrot.slane %v9579_v63, 9  ;;  %v9079_v22 = vcombine.low %v631_v10, %v641_v11  ;;  %v664_v27 = vrot.slane %v662_v15, 5  ;;  %v5056_v29 = vrot.slane %v11640_v28, 5  ;;  %v9581_v63 = vld [vmem:[%s16303_s0 + $0x6c] sm:$0xe] }
  0xb4   :  { %v659_v23 = vor.u32 %v658_v13, %v654_v60  ;;  %10759 = vmatmul.mubr.msk.bf16.gmra.mrb[8].mxu0 %vm980_vm4, %v9643_v16  ;;  %v650_v31 = vrot.slane %v649_v17, 4  ;;  %v5059_v33 = vrot.slane %v11641_v32, 5  ;;  %v667_v35 = vshrl.u32 %v60_v9, 16  ;;  %v104_v28 = vld [vmem:[%s16303_s0 + $0x14c] sm:$0x1] }
  0xb5   :  { %v670_v36 = vshll.u32 %v60_v9, 16  ;;  %10461 = vmatmul.mubr.msk.bf16.gmra.mrb[40].mxu1 %vm980_vm4, %v9079_v22  ;;  %v5057_v24 = vsel %vm12398_vm7, %v9611_v18, %v5056_v29  ;;  %v5058_v40 = vrot.slane %v5056_v29, 4  ;;  %v676_v41 = vshll.u32 %v61_v38, 16  ;;  %v64_v9 = vld [vmem:[%s16303_s0 + $0x144] sm:$0xf] }
  0xb6   :  { %v660_v39 = vrot.slane %v659_v23, 4  ;;  %v655_v43 = vsel %vm11923_vm3, %v650_v31, %v654_v60  ;;  %v669_v44 = vrot.slane %v667_v35, 4  ;;  %v680_v46 = vshrl.u32 %v61_v38, 16  ;;  %v65_v38 = vld [vmem:[%s16303_s0 + $0x148] sm:$0xf] }
  0xb7   :  { %v672_v45 = vrot.slane %v670_v36, 5  ;;  %v5060_v48 = vsel %vm12398_vm7, %v5058_v40, %v5059_v33  ;;  %v678_v49 = vrot.slane %v676_v41, 5  ;;  %v686_v50 = vshll.u32 %v102_v20, 16  ;;  %v11644_v23 = vld [vmem:[%s16303_s0 + $0x70] sm:$0xf] }
  0xb8   :  { %v665_v47 = vsel %vm11923_vm3, %v660_v39, %v664_v27  ;;  %v9644_v51 = vcombine.low %v5057_v24, %v5060_v48  ;;  %v682_v19 = vrot.slane %v680_v46, 4  ;;  %v9612_v54 = vrot.slane %v9580_v37, 9  ;;  %v11645_v31 = vld [vmem:[%s16303_s0 + $0x74] sm:$0x1]  ;;  %v9582_v36 = vld [vmem:[%s16303_s0 + $0x78] sm:$0xe] }
  0xb9   :  { %v9080_v57 = vcombine.low %v655_v43, %v665_v47  ;;  %v673_v52 = vor.u32 %v672_v45, %v669_v44  ;;  %v688_v53 = vrot.slane %v686_v50, 5  ;;  %v5063_v56 = vrot.slane %v11642_v55, 5  ;;  %v66_v41 = vld [vmem:[%s16303_s0 + $0x150] sm:$0xf]  ;;  %v67_v46 = vld [vmem:[%s16303_s0 + $0x154] sm:$0xf] }
  0xba   :  { %v5066_v62 = vrot.slane %v11643_v59, 5  ;;  %10762 = vmatprep.mubr.msk.bf16.mxu0 %vm980_vm4, %v9644_v51  ;;  %v683_v1 = vor.u32 %v682_v19, %v678_v49  ;;  %v691_v2 = vshrl.u32 %v62_v42, 16  ;;  %v694_v3 = vshll.u32 %v62_v42, 16  ;;  %v105_v19 = vld [vmem:[%s16303_s0 + $0x158] sm:$0x1] }
  0xbb   :  { %10464 = vmatprep.mubr.msk.bf16.mxu1 %vm980_vm4, %v9080_v57  ;;  %v674_v0 = vrot.slane %v673_v52, 4  ;;  %v5064_v5 = vsel %vm12398_vm7, %v9612_v54, %v5063_v56  ;;  %v5065_v6 = vrot.slane %v5063_v56, 4  ;;  %v700_v7 = vshll.u32 %v63_v14, 16  ;;  %v11646_v54 = vld [vmem:[%s16303_s0 + $0x7c] sm:$0xf] }
  0xbc   :  { %v704_v8 = vshrl.u32 %v63_v14, 16  ;;  %v684_v61 = vrot.slane %v683_v1, 4  ;;  %v693_v25 = vrot.slane %v691_v2, 4  ;;  %v696_v26 = vrot.slane %v694_v3, 5  ;;  %v11647_v56 = vld [vmem:[%s16303_s0 + $0x80] sm:$0x1] }
  0xbd   :  { %v679_v10 = vsel %vm11923_vm3, %v674_v0, %v678_v49  ;;  %v5067_v12 = vsel %vm12398_vm7, %v5065_v6, %v5066_v62  ;;  %v702_v60 = vrot.slane %v700_v7, 5  ;;  %v710_v15 = vshll.u32 %v103_v58, 16  ;;  %v9583_v62 = vld [vmem:[%s16303_s0 + $0x84] sm:$0xe] }
  0xbe   :  { %v706_v13 = vrot.slane %v704_v8, 4  ;;  %v689_v11 = vsel %vm11923_vm3, %v684_v61, %v688_v53  ;;  %v9645_v16 = vcombine.low %v5064_v5, %v5067_v12  ;;  %v697_v17 = vor.u32 %v696_v26, %v693_v25  ;;  %v68_v8 = vld [vmem:[%s16303_s0 + $0x15c] sm:$0xf]  ;;  %v69_v26 = vld [vmem:[%s16303_s0 + $0x160] sm:$0xf] }
  0xbf   :  { %v9613_v18 = vrot.slane %v9581_v63, 9  ;;  %v9081_v20 = vcombine.low %v679_v10, %v689_v11  ;;  %v712_v22 = vrot.slane %v710_v15, 5  ;;  %v5070_v27 = vrot.slane %v11644_v23, 5  ;;  %v11648_v23 = vld [vmem:[%s16303_s0 + $0x88] sm:$0xf] }
  0xc0   :  { %v707_v21 = vor.u32 %v706_v13, %v702_v60  ;;  %10763 = vmatmul.mubr.msk.bf16.gmra.mrb[12].mxu0 %vm980_vm4, %v9645_v16  ;;  %v698_v29 = vrot.slane %v697_v17, 4  ;;  %v5073_v32 = vrot.slane %v11645_v31, 5  ;;  %v715_v33 = vshrl.u32 %v64_v9, 16 }
  0xc1   :  { %v718_v35 = vshll.u32 %v64_v9, 16  ;;  %10465 = vmatmul.mubr.msk.bf16.gmra.mrb[44].mxu1 %vm980_vm4, %v9081_v20  ;;  %v5071_v39 = vsel %vm12398_vm7, %v9613_v18, %v5070_v27  ;;  %v5072_v24 = vrot.slane %v5070_v27, 4  ;;  %v724_v40 = vshll.u32 %v65_v38, 16  ;;  %v106_v18 = vld [vmem:[%s16303_s0 + $0x164] sm:$0x1] }
  0xc2   :  { %v708_v37 = vrot.slane %v707_v21, 4  ;;  %v703_v42 = vsel %vm11923_vm3, %v698_v29, %v702_v60  ;;  %v717_v43 = vrot.slane %v715_v33, 4  ;;  %v728_v45 = vshrl.u32 %v65_v38, 16  ;;  %v11649_v29 = vld [vmem:[%s16303_s0 + $0x8c] sm:$0x1] }
  0xc3   :  { %v720_v44 = vrot.slane %v718_v35, 5  ;;  %v5074_v48 = vsel %vm12398_vm7, %v5072_v24, %v5073_v32  ;;  %v726_v49 = vrot.slane %v724_v40, 5  ;;  %v734_v50 = vshll.u32 %v104_v28, 16  ;;  %v9584_v35 = vld [vmem:[%s16303_s0 + $0x90] sm:$0xe] }
  0xc4   :  { %v713_v47 = vsel %vm11923_vm3, %v708_v37, %v712_v22  ;;  %v9646_v57 = vcombine.low %v5071_v39, %v5074_v48  ;;  %v730_v52 = vrot.slane %v728_v45, 4  ;;  %v9614_v53 = vrot.slane %v9582_v36, 9  ;;  %v12707_v40 = vld [vmem:[%s16303_s0 + $0x168] sm:$0xf] }
  0xc5   :  { %v9082_v14 = vcombine.low %v703_v42, %v713_v47  ;;  %v721_v51 = vor.u32 %v720_v44, %v717_v43  ;;  %v736_v58 = vrot.slane %v734_v50, 5  ;;  %v5077_v55 = vrot.slane %v11646_v54, 5 }
  0xc6   :  { %v5080_v59 = vrot.slane %v11647_v56, 5  ;;  %10766 = vmatprep.mubr.msk.bf16.mxu0 %vm980_vm4, %v9646_v57  ;;  %v731_v0 = vor.u32 %v730_v52, %v726_v49  ;;  %v739_v1 = vshrl.u32 %v66_v41, 16  ;;  %v742_v2 = vshll.u32 %v66_v41, 16  ;;  %v107_v52 = vld [vmem:[%s16303_s0 + $0x170] sm:$0x1] }
  0xc7   :  { %10468 = vmatprep.mubr.msk.bf16.mxu1 %vm980_vm4, %v9082_v14  ;;  %v722_v63 = vrot.slane %v721_v51, 4  ;;  %v5078_v3 = vsel %vm12398_vm7, %v9614_v53, %v5077_v55  ;;  %v5079_v5 = vrot.slane %v5077_v55, 4  ;;  %v748_v6 = vshll.u32 %v67_v46, 16  ;;  %v11650_v53 = vld [vmem:[%s16303_s0 + $0x94] sm:$0xf] }
  0xc8   :  { %v752_v7 = vshrl.u32 %v67_v46, 16  ;;  %v732_v10 = vrot.slane %v731_v0, 4  ;;  %v741_v61 = vrot.slane %v739_v1, 4  ;;  %v744_v25 = vrot.slane %v742_v2, 5  ;;  %v11651_v55 = vld [vmem:[%s16303_s0 + $0x98] sm:$0x1] }
  0xc9   :  { %v727_v9 = vsel %vm11923_vm3, %v722_v63, %v726_v49  ;;  %v5081_v38 = vsel %vm12398_vm7, %v5079_v5, %v5080_v59  ;;  %v750_v12 = vrot.slane %v748_v6, 5  ;;  %v758_v13 = vshll.u32 %v105_v19, 16  ;;  %v12718_v49 = vld [vmem:[%s16303_s0 + $0x16c] sm:$0xf]  ;;  %v9585_v59 = vld [vmem:[%s16303_s0 + $0x9c] sm:$0xe] }
  0xca   :  { %v754_v60 = vrot.slane %v752_v7, 4  ;;  %v737_v15 = vsel %vm11923_vm3, %v732_v10, %v736_v58  ;;  %v9647_v11 = vcombine.low %v5078_v3, %v5081_v38  ;;  %v745_v16 = vor.u32 %v744_v25, %v741_v61  ;;  %v12743_v7 = vld [vmem:[%s16303_s0 + $0x174] sm:$0xf]  ;;  %v12750_v25 = vld [vmem:[%s16303_s0 + $0x178] sm:$0xf] }
  0xcb   :  { %v9615_v17 = vrot.slane %v9583_v62, 9  ;;  %v9083_v20 = vcombine.low %v727_v9, %v737_v15  ;;  %v760_v22 = vrot.slane %v758_v13, 5  ;;  %v5084_v27 = vrot.slane %v11648_v23, 5  ;;  %v108_v23 = vld [vmem:[%s16303_s0 + $0x17c] sm:$0x1] }
  0xcc   :  { %v755_v21 = vor.u32 %v754_v60, %v750_v12  ;;  %10767 = vmatmul.mubr.msk.bf16.gmra.mrb[16].mxu0 %vm980_vm4, %v9647_v11  ;;  %v746_v28 = vrot.slane %v745_v16, 4  ;;  %v5087_v31 = vrot.slane %v11649_v29, 5  ;;  %v763_v32 = vshrl.u32 %v68_v8, 16 }
  0xcd   :  { %v766_v33 = vshll.u32 %v68_v8, 16  ;;  %10469 = vmatmul.mubr.msk.bf16.gmra.mrb[48].mxu1 %vm980_vm4, %v9083_v20  ;;  %v5085_v37 = vsel %vm12398_vm7, %v9615_v17, %v5084_v27  ;;  %v5086_v39 = vrot.slane %v5084_v27, 4  ;;  %v772_v24 = vshll.u32 %v69_v26, 16 }
  0xce   :  { %v756_v36 = vrot.slane %v755_v21, 4  ;;  %v751_v41 = vsel %vm11923_vm3, %v746_v28, %v750_v12  ;;  %v765_v42 = vrot.slane %v763_v32, 4  ;;  %v776_v44 = vshrl.u32 %v69_v26, 16  ;;  %v11652_v21 = vld [vmem:[%s16303_s0 + $0xa0] sm:$0xf] }
  0xcf   :  { %v768_v43 = vrot.slane %v766_v33, 5  ;;  %v5088_v46 = vsel %vm12398_vm7, %v5086_v39, %v5087_v31  ;;  %v774_v47 = vrot.slane %v772_v24, 5  ;;  %v782_v48 = vshll.u32 %v106_v18, 16  ;;  %v11653_v28 = vld [vmem:[%s16303_s0 + $0xa4] sm:$0x1] }
  0xd0   :  { %v761_v45 = vsel %vm11923_vm3, %v756_v36, %v760_v22  ;;  %v9648_v14 = vcombine.low %v5085_v37, %v5088_v46  ;;  %v778_v51 = vrot.slane %v776_v44, 4  ;;  %v9616_v58 = vrot.slane %v9584_v35, 9  ;;  %v9586_v33 = vld [vmem:[%s16303_s0 + $0xa8] sm:$0xe]  ;;  %v12778_v24 = vld [vmem:[%s16303_s0 + $0x180] sm:$0xf] }
  0xd1   :  { %v9084_v50 = vcombine.low %v751_v41, %v761_v45  ;;  %v769_v57 = vor.u32 %v768_v43, %v765_v42  ;;  %v784_v19 = vrot.slane %v782_v48, 5  ;;  %v5091_v54 = vrot.slane %v11650_v53, 5  ;;  %v12786_v45 = vld [vmem:[%s16303_s0 + $0x184] sm:$0xf] }
  0xd2   :  { %v5094_v56 = vrot.slane %v11651_v55, 5  ;;  %10770 = vmatprep.mubr.msk.bf16.mxu0 %vm980_vm4, %v9648_v14  ;;  %v779_v63 = vor.u32 %v778_v51, %v774_v47  ;;  %v787_v0 = vshrl.u32 %v12707_v40, 16  ;;  %v790_v1 = vshll.u32 %v12707_v40, 16 }
  0xd3   :  { %10472 = vmatprep.mubr.msk.bf16.mxu1 %vm980_vm4, %v9084_v50  ;;  %v770_v62 = vrot.slane %v769_v57, 4  ;;  %v5092_v2 = vsel %vm12398_vm7, %v9616_v58, %v5091_v54  ;;  %v5093_v3 = vrot.slane %v5091_v54, 4  ;;  %v796_v5 = vshll.u32 %v12718_v49, 16  ;;  %v11654_v54 = vld [vmem:[%s16303_s0 + $0xac] sm:$0xf] }
  0xd4   :  { %v800_v6 = vshrl.u32 %v12718_v49, 16  ;;  %v780_v9 = vrot.slane %v779_v63, 4  ;;  %v789_v10 = vrot.slane %v787_v0, 4  ;;  %v792_v61 = vrot.slane %v790_v1, 5 }
  0xd5   :  { %v775_v8 = vsel %vm11923_vm3, %v770_v62, %v774_v47  ;;  %v5095_v26 = vsel %vm12398_vm7, %v5093_v3, %v5094_v56  ;;  %v798_v38 = vrot.slane %v796_v5, 5  ;;  %v806_v60 = vshll.u32 %v107_v52, 16  ;;  %v11655_v56 = vld [vmem:[%s16303_s0 + $0xb0] sm:$0x1]  ;;  %v9587_v62 = vld [vmem:[%s16303_s0 + $0xb4] sm:$0xe] }
  0xd6   :  { %v802_v12 = vrot.slane %v800_v6, 4  ;;  %v785_v13 = vsel %vm11923_vm3, %v780_v9, %v784_v19  ;;  %v9649_v15 = vcombine.low %v5092_v2, %v5095_v26  ;;  %v793_v11 = vor.u32 %v792_v61, %v789_v10  ;;  %v109_v19 = vld [vmem:[%s16303_s0 + $0x188] sm:$0x1]  ;;  %v12815_v9 = vld [vmem:[%s16303_s0 + $0x18c] sm:$0xf] }
  0xd7   :  { %v9617_v16 = vrot.slane %v9585_v59, 9  ;;  %v9085_v17 = vcombine.low %v775_v8, %v785_v13  ;;  %v808_v20 = vrot.slane %v806_v60, 5  ;;  %v5098_v22 = vrot.slane %v11652_v21, 5  ;;  %v110_v21 = vld [vmem:[%s16303_s0 + $0x194] sm:$0x1] }
  0xd8   :  { %v803_v18 = vor.u32 %v802_v12, %v798_v38  ;;  %10771 = vmatmul.mubr.msk.bf16.gmra.mrb[20].mxu0 %vm980_vm4, %v9649_v15  ;;  %v794_v27 = vrot.slane %v793_v11, 4  ;;  %v5101_v29 = vrot.slane %v11653_v28, 5  ;;  %v811_v31 = vshrl.u32 %v12743_v7, 16  ;;  %v12822_v12 = vld [vmem:[%s16303_s0 + $0x190] sm:$0xf] }
  0xd9   :  { %v814_v32 = vshll.u32 %v12743_v7, 16  ;;  %10473 = vmatmul.mubr.msk.bf16.gmra.mrb[52].mxu1 %vm980_vm4, %v9085_v17  ;;  %v5099_v36 = vsel %vm12398_vm7, %v9617_v16, %v5098_v22  ;;  %v5100_v37 = vrot.slane %v5098_v22, 4  ;;  %v820_v39 = vshll.u32 %v12750_v25, 16  ;;  %v11656_v28 = vld [vmem:[%s16303_s0 + $0xb8] sm:$0xf] }
  0xda   :  { %v804_v35 = vrot.slane %v803_v18, 4  ;;  %v799_v41 = vsel %vm11923_vm3, %v794_v27, %v798_v38  ;;  %v813_v42 = vrot.slane %v811_v31, 4  ;;  %v824_v44 = vshrl.u32 %v12750_v25, 16 }
  0xdb   :  { %v816_v43 = vrot.slane %v814_v32, 5  ;;  %v5102_v47 = vsel %vm12398_vm7, %v5100_v37, %v5101_v29  ;;  %v822_v48 = vrot.slane %v820_v39, 5  ;;  %v830_v50 = vshll.u32 %v108_v23, 16  ;;  %v11657_v32 = vld [vmem:[%s16303_s0 + $0xbc] sm:$0x1] }
  0xdc   :  { %v809_v46 = vsel %vm11923_vm3, %v804_v35, %v808_v20  ;;  %v9650_v57 = vcombine.low %v5099_v36, %v5102_v47  ;;  %v826_v52 = vrot.slane %v824_v44, 4  ;;  %v9618_v53 = vrot.slane %v9586_v33, 9  ;;  %v9588_v37 = vld [vmem:[%s16303_s0 + $0xc0] sm:$0xe] }
  0xdd   :  { %v9086_v14 = vcombine.low %v799_v41, %v809_v46  ;;  %v817_v51 = vor.u32 %v816_v43, %v813_v42  ;;  %v832_v58 = vrot.slane %v830_v50, 5  ;;  %v5105_v55 = vrot.slane %v11654_v54, 5  ;;  %v9461_v50 = vld [vmem:[%s16303_s0 + $0xe8] sm:$0xf] }
  0xde   :  { %v5108_v59 = vrot.slane %v11655_v56, 5  ;;  %10774 = vmatprep.mubr.msk.bf16.mxu0 %vm980_vm4, %v9650_v57  ;;  %v827_v0 = vor.u32 %v826_v52, %v822_v48  ;;  %v835_v1 = vshrl.u32 %v12778_v24, 16  ;;  %v838_v2 = vshll.u32 %v12778_v24, 16 }
  0xdf   :  { %10476 = vmatprep.mubr.msk.bf16.mxu1 %vm980_vm4, %v9086_v14  ;;  %v818_v63 = vrot.slane %v817_v51, 4  ;;  %v5106_v3 = vsel %vm12398_vm7, %v9618_v53, %v5105_v55  ;;  %v5107_v5 = vrot.slane %v5105_v55, 4  ;;  %v844_v6 = vshll.u32 %v12786_v45, 16  ;;  %v9462_v14 = vld [vmem:[%s16303_s0 + $0xec] sm:$0x1] }
  0xe0   :  { %v848_v8 = vshrl.u32 %v12786_v45, 16  ;;  %v828_v61 = vrot.slane %v827_v0, 4  ;;  %v837_v26 = vrot.slane %v835_v1, 4  ;;  %v840_v38 = vrot.slane %v838_v2, 5  ;;  %v11659_v0 = vld [vmem:[%s16303_s0 + $0xc8] sm:$0x1] }
  0xe1   :  { %v823_v10 = vsel %vm11923_vm3, %v818_v63, %v822_v48  ;;  %v5109_v60 = vsel %vm12398_vm7, %v5107_v5, %v5108_v59  ;;  %v846_v13 = vrot.slane %v844_v6, 5  ;;  %v854_v11 = vshll.u32 %v109_v19, 16 }
  0xe2   :  { %v850_v15 = vrot.slane %v848_v8, 4  ;;  %v833_v16 = vsel %vm11923_vm3, %v828_v61, %v832_v58  ;;  %v9651_v17 = vcombine.low %v5106_v3, %v5109_v60  ;;  %v841_v18 = vor.u32 %v840_v38, %v837_v26  ;;  %v9589_v58 = vld [vmem:[%s16303_s0 + $0xe4] sm:$0xe]  ;;  %v9590_v8 = vld [vmem:[%s16303_s0 + $0xf0] sm:$0xe] }
  0xe3   :  { %v9619_v20 = vrot.slane %v9587_v62, 9  ;;  %v9087_v22 = vcombine.low %v823_v10, %v833_v16  ;;  %v856_v27 = vrot.slane %v854_v11, 5  ;;  %v5112_v29 = vrot.slane %v11656_v28, 5  ;;  %v11658_v62 = vld [vmem:[%s16303_s0 + $0xc4] sm:$0xf] }
  0xe4   :  { %v851_v23 = vor.u32 %v850_v15, %v846_v13  ;;  %10775 = vmatmul.mubr.msk.bf16.gmra.mrb[24].mxu0 %vm980_vm4, %v9651_v17  ;;  %v842_v31 = vrot.slane %v841_v18, 4  ;;  %v5115_v33 = vrot.slane %v11657_v32, 5  ;;  %v859_v35 = vshrl.u32 %v12815_v9, 16  ;;  %v12879_v60 = vld [vmem:[%s16303_s0 + $0xf4] sm:$0xf] }
  0xe5   :  { %v862_v36 = vshll.u32 %v12815_v9, 16  ;;  %10477 = vmatmul.mubr.msk.bf16.gmra.mrb[56].mxu1 %vm980_vm4, %v9087_v22  ;;  %v5113_v41 = vsel %vm12398_vm7, %v9619_v20, %v5112_v29  ;;  %v5114_v42 = vrot.slane %v5112_v29, 4  ;;  %v868_v43 = vshll.u32 %v12822_v12, 16  ;;  %v12886_v11 = vld [vmem:[%s16303_s0 + $0xf8] sm:$0x1] }
  0xe6   :  { %v852_v39 = vrot.slane %v851_v23, 4  ;;  %v847_v44 = vsel %vm11923_vm3, %v842_v31, %v846_v13  ;;  %v861_v46 = vrot.slane %v859_v35, 4  ;;  %v872_v48 = vshrl.u32 %v12822_v12, 16  ;;  %v9467_v16 = vld [vmem:[%s16303_s0 + $0x100] sm:$0xf] }
  0xe7   :  { %v864_v47 = vrot.slane %v862_v36, 5  ;;  %v5116_v51 = vsel %vm12398_vm7, %v5114_v42, %v5115_v33  ;;  %v870_v52 = vrot.slane %v868_v43, 5  ;;  %v878_v19 = vshll.u32 %v110_v21, 16  ;;  %v9468_v21 = vld [vmem:[%s16303_s0 + $0x104] sm:$0x1] }
  0xe8   :  { %v857_v57 = vsel %vm11923_vm3, %v852_v39, %v856_v27  ;;  %v9652_v54 = vcombine.low %v5113_v41, %v5116_v51  ;;  %v874_v56 = vrot.slane %v872_v48, 4  ;;  %v9620_v59 = vrot.slane %v9588_v37, 9  ;;  %v11660_v27 = vld [vmem:[%s16303_s0] sm:$0xf]  ;;  %v12906_v28 = vld [vmem:[%s16303_s0 + $0x4] sm:$0xf] }
  0xe9   :  { %v9088_v53 = vcombine.low %v847_v44, %v857_v57  ;;  %v865_v55 = vor.u32 %v864_v47, %v861_v46  ;;  %v5119_v63 = vrot.slane %v11658_v62, 5  ;;  %v5122_v1 = vrot.slane %v11659_v0, 5  ;;  %v9591_v31 = vld [vmem:[%s16303_s0 + $0xfc] sm:$0xe]  ;;  %v9470_v36 = vld [vmem:[%s16303_s0 + $0x10c] sm:$0xf] }
  0xea   :  { %10778 = vmatprep.mubr.msk.bf16.mxu0 %vm980_vm4, %v9652_v54  ;;  %v875_v3 = vor.u32 %v874_v56, %v870_v52  ;;  %v880_v5 = vrot.slane %v878_v19, 5  ;;  %v9621_v6 = vrot.slane %v9589_v58, 9  ;;  %v5126_v26 = vrot.slane %v9461_v50, 5  ;;  %v9471_v41 = vld [vmem:[%s16303_s0 + $0x110] sm:$0x1] }
  0xeb   :  { %10480 = vmatprep.mubr.msk.bf16.mxu1 %vm980_vm4, %v9088_v53  ;;  %v866_v2 = vrot.slane %v865_v55, 4  ;;  %v5120_v10 = vsel %vm12398_vm7, %v9620_v59, %v5119_v63  ;;  %v5121_v61 = vrot.slane %v5119_v63, 4  ;;  %v5129_v38 = vrot.slane %v9462_v14, 5  ;;  %v9592_v46 = vld [vmem:[%s16303_s0 + $0x108] sm:$0xe] }
  0xec   :  { %v876_v15 = vrot.slane %v875_v3, 4  ;;  %v5127_v18 = vsel %vm12398_vm7, %v9621_v6, %v5126_v26  ;;  %v5128_v20 = vrot.slane %v5126_v26, 4  ;;  %v9122_v29 = vcombine.low %v11660_v27, %v12906_v28  ;;  %v9473_v14 = vld [vmem:[%s16303_s0 + $0x118] sm:$0xf]  ;;  %v9593_v57 = vld [vmem:[%s16303_s0 + $0x114] sm:$0xe] }
  0xed   :  { %v871_v13 = vsel %vm11923_vm3, %v866_v2, %v870_v52  ;;  %v5123_v17 = vsel %vm12398_vm7, %v5121_v61, %v5122_v1  ;;  %v9622_v35 = vrot.slane %v9590_v8, 9  ;;  %v5133_v39 = vrot.slane %v12879_v60, 5  ;;  %v9474_v19 = vld [vmem:[%s16303_s0 + $0x11c] sm:$0x1]  ;;  %v11662_v58 = vld [vmem:[%s16303_s0 + $0xc] sm:$0xf] }
  0xee   :  { %v881_v22 = vsel %vm11923_vm3, %v876_v15, %v880_v5  ;;  %v9653_v23 = vcombine.low %v5120_v10, %v5123_v17  ;;  %v5130_v33 = vsel %vm12398_vm7, %v5128_v20, %v5129_v38  ;;  %v5136_v42 = vrot.slane %v12886_v11, 5  ;;  %v12948_v53 = vld [vmem:[%s16303_s0 + $0x10] sm:$0xf]  ;;  %v9476_v62 = vld [vmem:[%s16303_s0 + $0x124] sm:$0xf] }
  0xef   :  { %v9089_v32 = vcombine.low %v871_v13, %v881_v22  ;;  %v9654_v37 = vcombine.low %v5127_v18, %v5130_v33  ;;  %v9623_v43 = vrot.slane %v9591_v31, 9  ;;  %v5140_v44 = vrot.slane %v9467_v16, 5  ;;  %v9479_v3 = vld [vmem:[%s16303_s0 + $0x130] sm:$0xf]  ;;  %v11664_v5 = vld [vmem:[%s16303_s0 + $0x18] sm:$0xf] }
  0xf0   :  { %10779 = vmatmul.mubr.msk.bf16.gmra.mrb[28].mxu0 %vm980_vm4, %v9653_v23  ;;  %v5134_v47 = vsel %vm12398_vm7, %v9622_v35, %v5133_v39  ;;  %v5135_v48 = vrot.slane %v5133_v39, 4  ;;  %v5143_v50 = vrot.slane %v9468_v21, 5  ;;  %v9123_v54 = vcombine.low %v11662_v58, %v12948_v53  ;;  %v12967_v6 = vld [vmem:[%s16303_s0 + $0x1c] sm:$0xf]  ;;  %v11666_v38 = vld [vmem:[%s16302_s1 + $0x4] sm:$0x3] }
  0xf1   :  { %10481 = vmatmul.mubr.msk.bf16.gmra.mrb[60].mxu1 %vm980_vm4, %v9089_v32  ;;  %10782 = vmatprep.mubr.msk.bf16.mxu0 %vm980_vm4, %v9654_v37  ;;  %v5141_v51 = vsel %vm12398_vm7, %v9623_v43, %v5140_v44  ;;  %v5142_v52 = vrot.slane %v5140_v44, 4  ;;  %v9624_v56 = vrot.slane %v9592_v46, 9  ;;  %v5147_v59 = vrot.slane %v9470_v36, 5  ;;  %v9594_v16 = vld [vmem:[%s16303_s0 + $0x120] sm:$0xe] }
  0xf2   :  { %10486 = vmatprep.mubr.msk.bf16.mxu1 %vm980_vm4, %v9122_v29  ;;  %v5137_v55 = vsel %vm12398_vm7, %v5135_v48, %v5136_v42  ;;  %v5150_v1 = vrot.slane %v9471_v41, 5  ;;  %v9625_v2 = vrot.slane %v9593_v57, 9  ;;  %v9124_v8 = vcombine.low %v11664_v5, %v12967_v6  ;;  %v12980_v17 = vld [vmem:[%s16302_s1 + $0x6] sm:$0x3]  ;;  %v9477_v29 = vld [vmem:[%s16303_s0 + $0x128] sm:$0x1] }
  0xf3   :  { %v9655_v63 = vcombine.low %v5134_v47, %v5137_v55  ;;  %v5144_v0 = vsel %vm12398_vm7, %v5142_v52, %v5143_v50  ;;  %v5149_v61 = vrot.slane %v5147_v59, 4  ;;  %v5154_v26 = vrot.slane %v9473_v14, 5  ;;  %v9595_v31 = vld [vmem:[%s16303_s0 + $0x12c] sm:$0xe]  ;;  %v9480_v33 = vld [vmem:[%s16303_s0 + $0x134] sm:$0x1] }
  0xf4   :  { %v9656_v10 = vcombine.low %v5141_v51, %v5144_v0  ;;  %v2436_v13 = vsel %vm1077_vm0, %v11666_v38, 0  ;;  %v5157_v15 = vrot.slane %v9474_v19, 5  ;;  %v5148_v20 = vsel %vm12398_vm7, %v9624_v56, %v5147_v59  ;;  %v11667_v35 = vld [vmem:[%s16303_s0 + $0x24] sm:$0xf]  ;;  %v13011_v36 = vld [vmem:[%s16303_s0 + $0x28] sm:$0xf] }
  0xf5   :  { %v5156_v18 = vrot.slane %v5154_v26, 4  ;;  %v5151_v21 = vsel %vm12398_vm7, %v5149_v61, %v5150_v1  ;;  %v5161_v22 = vrot.slane %v9476_v62, 5  ;;  %v5155_v23 = vsel %vm12398_vm7, %v9625_v2, %v5154_v26  ;;  %v9482_v42 = vld [vmem:[%s16303_s0 + $0x13c] sm:$0xf]  ;;  %v11669_v48 = vld [vmem:[%s16303_s0 + $0x30] sm:$0xf] }
  0xf6   :  { %v5168_v32 = vrot.slane %v9479_v3, 5  ;;  %v9125_v37 = vcombine.low %v11667_v35, %v13011_v36  ;;  %v9657_v39 = vcombine.low %v5148_v20, %v5151_v21  ;;  %v9626_v41 = vrot.slane %v9594_v16, 9  ;;  %v13023_v50 = vld [vmem:[%s16303_s0 + $0x34] sm:$0xf]  ;;  %v9485_v52 = vld [vmem:[%s16303_s0 + $0x148] sm:$0xf] }
  0xf7   :  { %v5158_v27 = vsel %vm12398_vm7, %v5156_v18, %v5157_v15  ;;  %v5163_v44 = vrot.slane %v5161_v22, 4  ;;  %v5164_v46 = vrot.slane %v9477_v29, 5  ;;  %v9627_v47 = vrot.slane %v9595_v31, 9  ;;  %v9483_v59 = vld [vmem:[%s16303_s0 + $0x140] sm:$0x1] }
  0xf8   :  { %10783 = vmatmul.mubr.msk.bf16.gmra.mrb[32].mxu0 %vm980_vm4, %v9655_v63  ;;  %v9658_v43 = vcombine.low %v5155_v23, %v5158_v27  ;;  %v9126_v14 = vcombine.low %v11669_v48, %v13023_v50  ;;  %v5170_v57 = vrot.slane %v5168_v32, 4  ;;  %v5171_v51 = vrot.slane %v9480_v33, 5  ;;  %v9596_v62 = vld [vmem:[%s16303_s0 + $0x138] sm:$0xe]  ;;  %v9486_v0 = vld [vmem:[%s16303_s0 + $0x14c] sm:$0x1] }
  0xf9   :  { %10487 = vmatmul.mubr.msk.bf16.vlgmr.msra.gmra.mrb[0].mxu1 %vm980_vm4, %v9123_v54  ;;  %10786 = vmatprep.mubr.msk.bf16.mxu0 %vm980_vm4, %v9656_v10  ;;  %v5162_v19 = vsel %vm12398_vm7, %v9626_v41, %v5161_v22  ;;  %v5165_v58 = vsel %vm12398_vm7, %v5163_v44, %v5164_v46  ;;  %v5175_v54 = vrot.slane %v9482_v42, 5  ;;  %v5169_v55 = vsel %vm12398_vm7, %v9627_v47, %v5168_v32  ;;  %v9597_v1 = vld [vmem:[%s16303_s0 + $0x144] sm:$0xe]  ;;  %v11671_v2 = vld [vmem:[%s16303_s0 + $0x3c] sm:$0xf] }
  0xfa   :  { %10551 = vmatpush3.bf16.msra.mxu1 %v2436_v13  ;;  %10490 = vmatprep.mubr.msk.bf16.mxu1 %vm980_vm4, %v9124_v8  ;;  %v5172_v56 = vsel %vm12398_vm7, %v5170_v57, %v5171_v51  ;;  %v5182_v63 = vrot.slane %v9485_v52, 5  ;;  %v13059_v3 = vld [vmem:[%s16303_s0 + $0x40] sm:$0xf]  ;;  %v9659_v8 = vcombine.low %v5162_v19, %v5165_v58  ;;  %v9628_v61 = vrot.slane %v9596_v62, 9  ;;  %v11673_v13 = vld [vmem:[%s16303_s0 + $0x48] sm:$0xf] }
  0xfb   :  { %11529 = vmatprep.subr.msk.bf16.mxu1 %vm1077_vm0, %v12980_v17  ;;  %v9127_v5 = vcombine.low %v11671_v2, %v13059_v3  ;;  %v9660_v10 = vcombine.low %v5169_v55, %v5172_v56  ;;  %v5177_v26 = vrot.slane %v5175_v54, 4  ;;  %v5178_v38 = vrot.slane %v9483_v59, 5  ;;  %v13068_v15 = vld [vmem:[%s16303_s0 + $0x4c] sm:$0xf]  ;;  %v9488_v22 = vld [vmem:[%s16303_s0 + $0x154] sm:$0xf] }
  0xfc   :  { %v9128_v16 = vcombine.low %v11673_v13, %v13068_v15  ;;  %v9629_v18 = vrot.slane %v9597_v1, 9  ;;  %v5184_v20 = vrot.slane %v5182_v63, 4  ;;  %v5185_v21 = vrot.slane %v9486_v0, 5  ;;  %v9491_v23 = vld [vmem:[%s16303_s0 + $0x160] sm:$0xf] }
  0xfd   :  { %v5176_v27 = vsel %vm12398_vm7, %v9628_v61, %v5175_v54  ;;  %v5179_v29 = vsel %vm12398_vm7, %v5177_v26, %v5178_v38  ;;  %v5189_v31 = vrot.slane %v9488_v22, 5  ;;  %v9489_v35 = vld [vmem:[%s16303_s0 + $0x158] sm:$0x1]  ;;  %v9492_v41 = vld [vmem:[%s16303_s0 + $0x164] sm:$0x1] }
  0xfe   :  { %v5183_v32 = vsel %vm12398_vm7, %v9629_v18, %v5182_v63  ;;  %v5186_v33 = vsel %vm12398_vm7, %v5184_v20, %v5185_v21  ;;  %v9599_v42 = vld [vmem:[%s16303_s0 + $0x15c] sm:$0xe]  ;;  %v13107_v44 = vld [vmem:[%s16303_s0 + $0x58] sm:$0xf]  ;;  %v9661_v47 = vcombine.low %v5176_v27, %v5179_v29  ;;  %v5192_v51 = vrot.slane %v9489_v35, 5 }
  0xff   :  { %v9662_v48 = vcombine.low %v5183_v32, %v5186_v33  ;;  %v5191_v57 = vrot.slane %v5189_v31, 4  ;;  %v11677_v52 = vld [vmem:[%s16303_s0 + $0x60] sm:$0xf]  ;;  %v13116_v19 = vld [vmem:[%s16303_s0 + $0x64] sm:$0xf]  ;;  %v9631_v54 = vrot.slane %v9599_v42, 9 }
 0x100   :  { %10787 = vmatmul.mubr.msk.bf16.gmra.mrb[36].mxu0 %vm980_vm4, %v9657_v39  ;;  %v5196_v39 = vrot.slane %v9491_v23, 5  ;;  %v9130_v58 = vcombine.low %v11677_v52, %v13116_v19  ;;  %v5199_v56 = vrot.slane %v9492_v41, 5  ;;  %v9494_v59 = vld [vmem:[%s16303_s0 + $0x16c] sm:$0xf]  ;;  %v9497_v62 = vld [vmem:[%s16303_s0 + $0x178] sm:$0xf] }
 0x101   :  { %10491 = vmatmul.mubr.msk.bf16.gmra.mrb[4].mxu1 %vm980_vm4, %v9125_v37  ;;  %10790 = vmatprep.mubr.msk.bf16.mxu0 %vm980_vm4, %v9658_v43  ;;  %v9598_v37 = vld [vmem:[%s16303_s0 + $0x150] sm:$0xe]  ;;  %v11675_v43 = vld [vmem:[%s16303_s0 + $0x54] sm:$0xf]  ;;  %v5193_v0 = vsel %vm12398_vm7, %v5191_v57, %v5192_v51  ;;  %v5203_v1 = vrot.slane %v9494_v59, 5  ;;  %v5210_v61 = vrot.slane %v9497_v62, 5 }
 0x102   :  { %10494 = vmatprep.mubr.msk.bf16.mxu1 %vm980_vm4, %v9126_v14  ;;  %v9129_v46 = vcombine.low %v11675_v43, %v13107_v44  ;;  %v9630_v14 = vrot.slane %v9598_v37, 9  ;;  %v5198_v55 = vrot.slane %v5196_v39, 4  ;;  %v5197_v2 = vsel %vm12398_vm7, %v9631_v54, %v5196_v39  ;;  %v9498_v26 = vld [vmem:[%s16303_s0 + $0x17c] sm:$0x1]  ;;  %v9601_v38 = vld [vmem:[%s16303_s0 + $0x174] sm:$0xe] }
 0x103   :  { %v11679_v13 = vld [vmem:[%s16303_s0 + $0x6c] sm:$0xf]  ;;  %v5205_v23 = vrot.slane %v5203_v1, 4  ;;  %v11681_v29 = vld [vmem:[%s16303_s0 + $0x78] sm:$0xf]  ;;  %v9633_v33 = vrot.slane %v9601_v38, 9 }
 0x104   :  { %v5190_v63 = vsel %vm12398_vm7, %v9630_v14, %v5189_v31  ;;  %v13164_v31 = vld [vmem:[%s16303_s0 + $0x7c] sm:$0xf]  ;;  %v5212_v35 = vrot.slane %v5210_v61, 4  ;;  %v5213_v37 = vrot.slane %v9498_v26, 5  ;;  %v9500_v39 = vld [vmem:[%s16303_s0 + $0x184] sm:$0xf] }
 0x105   :  { %v9663_v20 = vcombine.low %v5190_v63, %v5193_v0  ;;  %v9132_v32 = vcombine.low %v11681_v29, %v13164_v31  ;;  %v9503_v41 = vld [vmem:[%s16303_s0 + $0x190] sm:$0xf]  ;;  %v9501_v14 = vld [vmem:[%s16303_s0 + $0x188] sm:$0x1]  ;;  %v9602_v57 = vld [vmem:[%s16303_s0 + $0x180] sm:$0xe] }
 0x106   :  { %v5224_v51 = vrot.slane %v9503_v41, 5  ;;  %v9504_v52 = vld [vmem:[%s16303_s0 + $0x194] sm:$0x1]  ;;  %v11683_v54 = vld [vmem:[%s16303_s0 + $0x84] sm:$0xf]  ;;  %v9634_v63 = vrot.slane %v9602_v57, 9 }
 0x107   :  { %v5227_v26 = vrot.slane %v9504_v52, 5  ;;  %v9506_v38 = vld [vmem:[%s16303_s0 + $0x19c] sm:$0xf]  ;;  %v13268_v52 = vld [vmem:[%s16303_s0 + $0xb8] sm:$0xf] }
 0x108   :  { %10791 = vmatmul.mubr.msk.bf16.gmra.mrb[40].mxu0 %vm980_vm4, %v9659_v8  ;;  %v9495_v8 = vld [vmem:[%s16303_s0 + $0x170] sm:$0x1]  ;;  %v11687_v29 = vld [vmem:[%s16303_s0 + $0x9c] sm:$0xf] }
 0x109   :  { %10495 = vmatmul.mubr.msk.bf16.gmra.mrb[8].mxu1 %vm980_vm4, %v9127_v5  ;;  %10794 = vmatprep.mubr.msk.bf16.mxu0 %vm980_vm4, %v9660_v10  ;;  %v5200_v5 = vsel %vm12398_vm7, %v5198_v55, %v5199_v56  ;;  %v9600_v10 = vld [vmem:[%s16303_s0 + $0x168] sm:$0xe]  ;;  %v5206_v27 = vrot.slane %v9495_v8, 5 }
 0x10a   :  { %10498 = vmatprep.mubr.msk.bf16.mxu1 %vm980_vm4, %v9128_v16  ;;  %v13155_v16 = vld [vmem:[%s16303_s0 + $0x70] sm:$0xf]  ;;  %v9664_v21 = vcombine.low %v5197_v2, %v5200_v5  ;;  %v9632_v22 = vrot.slane %v9600_v10, 9  ;;  %v13203_v55 = vld [vmem:[%s16303_s0 + $0x88] sm:$0xf] }
 0x10b   :  { %v9131_v18 = vcombine.low %v11679_v13, %v13155_v16  ;;  %v5207_v43 = vsel %vm12398_vm7, %v5205_v23, %v5206_v27  ;;  %v9133_v56 = vcombine.low %v11683_v54, %v13203_v55  ;;  %v11685_v2 = vld [vmem:[%s16303_s0 + $0x90] sm:$0xf]  ;;  %v13212_v5 = vld [vmem:[%s16303_s0 + $0x94] sm:$0xf]  ;;  %v9507_v23 = vld [vmem:[%s16303_s0 + $0x1a0] sm:$0x1] }
 0x10c   :  { %v5204_v42 = vsel %vm12398_vm7, %v9632_v22, %v5203_v1  ;;  %v5220_v1 = vrot.slane %v9501_v14, 5  ;;  %v9134_v8 = vcombine.low %v11685_v2, %v13212_v5  ;;  %v9604_v27 = vld [vmem:[%s16303_s0 + $0x198] sm:$0xe] }
 0x10d   :  { %v9665_v59 = vcombine.low %v5204_v42, %v5207_v43  ;;  %v5234_v42 = vrot.slane %v9507_v23, 5  ;;  %v11689_v43 = vld [vmem:[%s16303_s0 + $0xa8] sm:$0xf]  ;;  %v11553_v54 = vld [vmem:[%s16303_s0 + $0x18] sm:$0xff]  }
 0x110   :  { %10795 = vmatmul.mubr.msk.bf16.gmra.mrb[44].mxu0 %vm980_vm4, %v9661_v47  ;;  %v5211_v47 = vsel %vm12398_vm7, %v9633_v33, %v5210_v61  ;;  %v5226_v61 = vrot.slane %v5224_v51, 4 }
 0x111   :  { %10499 = vmatmul.mubr.msk.bf16.gmra.mrb[12].mxu1 %vm980_vm4, %v9129_v46  ;;  %10798 = vmatprep.mubr.msk.bf16.mxu0 %vm980_vm4, %v9662_v48  ;;  %v5217_v46 = vrot.slane %v9500_v39, 5  ;;  %v5214_v48 = vsel %vm12398_vm7, %v5212_v35, %v5213_v37  ;;  %v9636_v39 = vrot.slane %v9604_v27, 9  ;;  %v11561_v27 = vld [vmem:[%s16303_s0 + $0x48] sm:$0xff]  }
 0x112   :  { %10502 = vmatprep.mubr.msk.bf16.mxu1 %vm980_vm4, %v9130_v58  ;;  %v9603_v58 = vld [vmem:[%s16303_s0 + $0x18c] sm:$0xe]  ;;  %v9666_v62 = vcombine.low %v5211_v47, %v5214_v48  ;;  %v5228_v22 = vsel %vm12398_vm7, %v5226_v61, %v5227_v26  ;;  %v11698_v61 = vld [vmem:[%s16303_s0 + $0xf0] sm:$0xf]  ;;  %v13309_v26 = vld [vmem:[%s16303_s0 + $0xf4] sm:$0xf] }
 0x113   :  { %v5219_v0 = vrot.slane %v5217_v46, 4  ;;  %v9635_v10 = vrot.slane %v9603_v58, 9  ;;  %v5218_v13 = vsel %vm12398_vm7, %v9634_v63, %v5217_v46  ;;  %v13251_v46 = vld [vmem:[%s16303_s0 + $0xac] sm:$0xf]  ;;  %v11555_v63 = vld [vmem:[%s16303_s0 + $0x24] sm:$0xff]  }
 0x114   :  { %v9136_v47 = vcombine.low %v11689_v43, %v13251_v46  ;;  %v11565_v43 = vld [vmem:[%s16303_s0 + $0x60] sm:$0xff]  }
 0x118   :  { %10799 = vmatmul.mubr.msk.bf16.gmra.mrb[48].mxu0 %vm980_vm4, %v9663_v20  ;;  %v5231_v20 = vrot.slane %v9506_v38, 5  ;;  %v9140_v38 = vcombine.low %v11698_v61, %v13309_v26 }
 0x119   :  { %10503 = vmatmul.mubr.msk.bf16.gmra.mrb[16].mxu1 %vm980_vm4, %v9131_v18  ;;  %10802 = vmatprep.mubr.msk.bf16.mxu0 %vm980_vm4, %v9664_v21  ;;  %v5221_v18 = vsel %vm12398_vm7, %v5219_v0, %v5220_v1  ;;  %v5225_v21 = vsel %vm12398_vm7, %v9635_v10, %v5224_v51  ;;  %v11691_v51 = vld [vmem:[%s16303_s0 + $0xb4] sm:$0xf]  ;;  %v11695_v0 = vld [vmem:[%s16303_s0 + $0xe4] sm:$0xf]  ;;  %v13296_v1 = vld [vmem:[%s16303_s0 + $0xe8] sm:$0xf] }
 0x11a   :  { %10506 = vmatprep.mubr.msk.bf16.mxu1 %vm980_vm4, %v9132_v32  ;;  %v13242_v32 = vld [vmem:[%s16303_s0 + $0xa0] sm:$0xf]  ;;  %v9667_v35 = vcombine.low %v5218_v13, %v5221_v18  ;;  %v9668_v37 = vcombine.low %v5225_v21, %v5228_v22  ;;  %v5233_v41 = vrot.slane %v5231_v20, 4  ;;  %v5232_v48 = vsel %vm12398_vm7, %v9636_v39, %v5231_v20  ;;  %v11557_v13 = vld [vmem:[%s16303_s0 + $0x30] sm:$0xff]   ;;  %v11700_v21 = vld [vmem:[%s16303_s0 + $0xfc] sm:$0xf] }
 0x11b   :  { %v9135_v33 = vcombine.low %v11687_v29, %v13242_v32  ;;  %v9137_v58 = vcombine.low %v11691_v51, %v13268_v52  ;;  %v9139_v2 = vcombine.low %v11695_v0, %v13296_v1  ;;  %v13319_v18 = vld [vmem:[%s16302_s1 + $0x10] sm:$0x3]  ;;  %v11559_v20 = vld [vmem:[%s16303_s0 + $0x3c] sm:$0xff]   ;;  %v11702_v29 = vld [vmem:[%s16303_s0 + $0x108] sm:$0xf]  ;;  %v2110_v4 = vrot.slane %v13242_v32, 5 }
 0x11c   :  { %v5235_v14 = vsel %vm12398_vm7, %v5233_v41, %v5234_v42  ;;  %v13335_v22 = vld [vmem:[%s16303_s0 + $0x100] sm:$0xf]  ;;  %v11704_v39 = vld [vmem:[%s16303_s0 + $0x114] sm:$0xf]  ;;  %v13363_v41 = vld [vmem:[%s16303_s0 + $0x118] sm:$0xf] }
 0x11d   :  { %v9669_v57 = vcombine.low %v5232_v48, %v5235_v14  ;;  %v9141_v23 = vcombine.low %v11700_v21, %v13335_v22  ;;  %v9143_v42 = vcombine.low %v11704_v39, %v13363_v41  ;;  %v13375_v48 = vld [vmem:[%s16303_s0 + $0x124] sm:$0xf]  ;;  %v11708_v51 = vld [vmem:[%s16303_s0 + $0x12c] sm:$0xf]  ;;  %v11573_v21 = vld [vmem:[%s16303_s0 + $0x90] sm:$0xff]  }
 0x11e   :  { %v11729_v32 = vld [vmem:[%s16303_s0 + $0x8c] sm:$0x1] }
 0x120   :  { %10803 = vmatmul.mubr.msk.bf16.gmra.mrb[52].mxu0 %vm980_vm4, %v9665_v59  ;;  %v13280_v59 = vld [vmem:[%s16303_s0 + $0xdc] sm:$0xf] }
 0x121   :  { %10507 = vmatmul.mubr.msk.bf16.gmra.mrb[20].mxu1 %vm980_vm4, %v9133_v56  ;;  %10806 = vmatprep.mubr.msk.bf16.mxu0 %vm980_vm4, %v9666_v62  ;;  %v11693_v56 = vld [vmem:[%s16303_s0 + $0xd8] sm:$0xf] }
 0x122   :  { %10510 = vmatprep.mubr.msk.bf16.mxu1 %vm980_vm4, %v9134_v8  ;;  %v9138_v62 = vcombine.low %v11693_v56, %v13280_v59  ;;  %v11697_v8 = vld [vmem:[%s16302_s1 + $0xe] sm:$0x3]  ;;  %v11569_v56 = vld [vmem:[%s16303_s0 + $0x78] sm:$0xff]  }
 0x123   :  { %v7524_v10 = vsel %vm1077_vm0, %v11697_v8, 0  ;;  %v3988_v8 = vshrl.u32 %v12879_v60, 16 }
 0x125   :  { %v3990_v61 = vrot.slane %v3988_v8, 4 }
 0x128   :  { %10807 = vmatmul.mubr.msk.bf16.gmra.mrb[56].mxu0 %vm980_vm4, %v9667_v35 }
 0x129   :  { %10511 = vmatmul.mubr.msk.bf16.gmra.mrb[24].mxu1 %vm980_vm4, %v9135_v33  ;;  %10810 = vmatprep.mubr.msk.bf16.mxu0 %vm980_vm4, %v9668_v37  ;;  %v13347_v33 = vld [vmem:[%s16303_s0 + $0x10c] sm:$0xf]  ;;  %v11563_v37 = vld [vmem:[%s16303_s0 + $0x54] sm:$0xff]  }
 0x12a   :  { %10514 = vmatprep.mubr.msk.bf16.mxu1 %vm980_vm4, %v9136_v47  ;;  %v9142_v35 = vcombine.low %v11702_v29, %v13347_v33  ;;  %v11706_v47 = vld [vmem:[%s16303_s0 + $0x120] sm:$0xf] }
 0x12b   :  { %v9144_v14 = vcombine.low %v11706_v47, %v13375_v48  ;;  %v11716_v47 = vld [vmem:[%s16303_s0 + $0x8] sm:$0x1] }
 0x130   :  { %10811 = vmatmul.mubr.msk.bf16.gmra.mrb[60].mxu0 %vm980_vm4, %v9669_v57  ;;  %v11567_v57 = vld [vmem:[%s16303_s0 + $0x6c] sm:$0xff]  }
 0x131   :  { %10515 = vmatmul.mubr.msk.bf16.gmra.mrb[28].mxu1 %vm980_vm4, %v9137_v58  ;;  %10816 = vmatprep.mubr.msk.bf16.mxu0 %vm980_vm4, %v11553_v54  ;;  %v13391_v58 = vld [vmem:[%s16303_s0 + $0x130] sm:$0xf] }
 0x132   :  { %10518 = vmatprep.mubr.msk.bf16.mxu1 %vm980_vm4, %v9138_v62  ;;  %v9145_v54 = vcombine.low %v11708_v51, %v13391_v58  ;;  %v11710_v62 = vld [vmem:[%s16303_s0 + $0x138] sm:$0xf] }
 0x138   :  { %10817 = vmatmul.mubr.msk.bf16.vlgmr.msra.gmra.mrb[0].mxu0 %vm980_vm4, %v11555_v63  ;;  %v13403_v63 = vld [vmem:[%s16303_s0 + $0x13c] sm:$0xf] }
 0x139   :  { %10519 = vmatmul.mubr.msk.bf16.gmra.mrb[32].mxu1 %vm980_vm4, %v9139_v2  ;;  %10881 = vmatpush3.bf16.msra.mxu0 %v7524_v10  ;;  %v9146_v0 = vcombine.low %v11710_v62, %v13403_v63  ;;  %v3984_v2 = vshll.u32 %v12879_v60, 16  ;;  %v13423_v60 = vld [vmem:[%s16303_s0 + $0x148] sm:$0xf] }
 0x13a   :  { %10522 = vmatprep.mubr.msk.bf16.mxu1 %vm980_vm4, %v9140_v38  ;;  %10820 = vmatprep.mubr.msk.bf16.mxu0 %vm980_vm4, %v11557_v13  ;;  %v11571_v38 = vld [vmem:[%s16303_s0 + $0x84] sm:$0xff]   ;;  %16324 = vst [vmem:[#allocation4_spill] sm:$0xff] %v13423_v60 }
 0x13b   :  { %11535 = vmatprep.subr.msk.bf16.mxu0 %vm1077_vm0, %v13319_v18  ;;  %v13412_v10 = vrot.slane %v3984_v2, 5  ;;  %v11712_v13 = vld [vmem:[%s16303_s0 + $0x144] sm:$0xf] }
 0x13d   :  { %16323 = vst [vmem:[#allocation3_spill] sm:$0xff] %v13412_v10  ;;  %v3991_v39 = vor.u32 %v3990_v61, %v13412_v10  ;;  %v11718_v61 = vld [vmem:[%s16303_s0 + $0x15c] sm:$0xf] }
 0x13f   :  { %v13464_v62 = vrot.slane %v3991_v39, 4 }
 0x140   :  { %10821 = vmatmul.mubr.msk.bf16.gmra.mrb[4].mxu0 %vm980_vm4, %v11559_v20  ;;  %v9147_v20 = vcombine.low %v11712_v13, %v13423_v60  ;;  %v13845_v60 = vld [vmem:[%s16303_s0 + $0xe4] sm:$0xe] }
 0x141   :  { %10523 = vmatmul.mubr.msk.bf16.gmra.mrb[36].mxu1 %vm980_vm4, %v9141_v23  ;;  %10824 = vmatprep.mubr.msk.bf16.mxu0 %vm980_vm4, %v11561_v27  ;;  %v11714_v23 = vld [vmem:[%s16303_s0 + $0x150] sm:$0xf]  ;;  %v13435_v27 = vld [vmem:[%s16303_s0 + $0x154] sm:$0xf]  ;;  %16327 = vst [vmem:[#allocation7_spill] sm:$0xff] %v13464_v62 }
 0x142   :  { %10526 = vmatprep.mubr.msk.bf16.mxu1 %vm980_vm4, %v9142_v35  ;;  %16325 = vst [vmem:[#allocation5_spill] sm:$0xff] %v13435_v27  ;;  %v9148_v29 = vcombine.low %v11714_v23, %v13435_v27  ;;  %v3994_v35 = vshll.u32 %v12886_v11, 16  ;;  %v2019_v11 = vrot.slane %v12906_v28, 5  ;;  %v11575_v28 = vld [vmem:[%s16303_s0 + $0x9c] sm:$0xff]   ;;  %v2040_v23 = vrot.slane %v13011_v36, 5 }
 0x143   :  { %v9152_v36 = vcombine.low %v12778_v24, %v12786_v45  ;;  %v11727_v24 = vld [vmem:[%s16303_s0 + $0x74] sm:$0x1] }
 0x144   :  { %v2021_v39 = vrot.slane %v2019_v11, 4  ;;  %v2085_v45 = vrot.slane %v11727_v24, 5  ;;  %v1930_v24 = vld [vmem:[%s16303_s0 + $0x90] sm:$0xe] }
 0x148   :  { %10825 = vmatmul.mubr.msk.bf16.gmra.mrb[8].mxu0 %vm980_vm4, %v11563_v37  ;;  %v2026_v37 = vrot.slane %v12948_v53, 5  ;;  %v2033_v53 = vrot.slane %v12967_v6, 5  ;;  %v11577_v6 = vld [vmem:[%s16303_s0 + $0xa8] sm:$0xff]  }
 0x149   :  { %10527 = vmatmul.mubr.msk.bf16.gmra.mrb[40].mxu1 %vm980_vm4, %v9143_v42  ;;  %10828 = vmatprep.mubr.msk.bf16.mxu0 %vm980_vm4, %v11565_v43  ;;  %v1918_v42 = vld [vmem:[%s16303_s0] sm:$0xe]  ;;  %v1919_v43 = vld [vmem:[%s16303_s0 + $0xc] sm:$0xe] }
 0x14a   :  { %10530 = vmatprep.mubr.msk.bf16.mxu1 %vm980_vm4, %v9144_v14  ;;  %v2022_v14 = vrot.slane %v11716_v47, 5  ;;  %v9187_v2 = vrot.slane %v1919_v43, 9  ;;  %v2028_v8 = vrot.slane %v2026_v37, 4  ;;  %v2035_v43 = vrot.slane %v2033_v53, 4  ;;  %v11720_v47 = vld [vmem:[%s16303_s0 + $0x20] sm:$0x1] }
 0x150   :  { %10829 = vmatmul.mubr.msk.bf16.gmra.mrb[12].mxu0 %vm980_vm4, %v11567_v57  ;;  %v11717_v57 = vld [vmem:[%s16303_s0 + $0x14] sm:$0x1] }
 0x151   :  { %10531 = vmatmul.mubr.msk.bf16.gmra.mrb[44].mxu1 %vm980_vm4, %v9145_v54  ;;  %10832 = vmatprep.mubr.msk.bf16.mxu0 %vm980_vm4, %v11569_v56  ;;  %v2029_v51 = vrot.slane %v11717_v57, 5  ;;  %v13459_v54 = vrot.slane %v3994_v35, 5  ;;  %v1920_v56 = vld [vmem:[%s16303_s0 + $0x18] sm:$0xe]  ;;  %v2047_v35 = vrot.slane %v13023_v50, 5  ;;  %v13504_v50 = vsel %vm12398_vm7, %v9187_v2, %v2026_v37  ;;  %v11584_v57 = vld [vmem:[%s16303_s0 + $0xf0] sm:$0xff]  }
 0x152   :  { %10534 = vmatprep.mubr.msk.bf16.mxu1 %vm980_vm4, %v9146_v0  ;;  %v9186_v0 = vrot.slane %v1918_v42, 9  ;;  %v9188_v42 = vrot.slane %v1920_v56, 9  ;;  %v11721_v37 = vld [vmem:[%s16303_s0 + $0x2c] sm:$0x1] }
 0x153   :  { %16326 = vst [vmem:[#allocation6_spill] sm:$0xff] %v13459_v54  ;;  %v13508_v56 = vsel %vm12398_vm7, %v2028_v8, %v2029_v51  ;;  %v2049_v2 = vrot.slane %v2047_v35, 4  ;;  %v11722_v51 = vld [vmem:[%s16303_s0 + $0x38] sm:$0x1]  ;;  %v11586_v54 = vld [vmem:[%s16303_s0 + $0x108] sm:$0xff]  }
 0x154   :  { %v2050_v8 = vrot.slane %v11722_v51, 5 }
 0x158   :  { %10833 = vmatmul.mubr.msk.bf16.gmra.mrb[16].mxu0 %vm980_vm4, %v11571_v38  ;;  %v13478_v38 = vld [vmem:[%s16303_s0 + $0x160] sm:$0xf] }
 0x159   :  { %10535 = vmatmul.mubr.msk.bf16.gmra.mrb[48].mxu1 %vm980_vm4, %v9147_v20  ;;  %10836 = vmatprep.mubr.msk.bf16.mxu0 %vm980_vm4, %v11573_v21  ;;  %16328 = vst [vmem:[#allocation8_spill] sm:$0xff] %v13478_v38  ;;  %v9149_v13 = vcombine.low %v11718_v61, %v13478_v38  ;;  %v9150_v20 = vcombine.low %v12707_v40, %v12718_v49  ;;  %v1921_v21 = vld [vmem:[%s16303_s0 + $0x24] sm:$0xe]  ;;  %v2036_v40 = vrot.slane %v11720_v47, 5  ;;  %v2054_v61 = vrot.slane %v13059_v3, 5 }
 0x15a   :  { %10538 = vmatprep.mubr.msk.bf16.mxu1 %vm980_vm4, %v9148_v29  ;;  %v1922_v29 = vld [vmem:[%s16303_s0 + $0x30] sm:$0xe]  ;;  %v9151_v49 = vcombine.low %v12743_v7, %v12750_v25  ;;  %v9189_v47 = vrot.slane %v1921_v21, 9  ;;  %v1923_v25 = vld [vmem:[%s16303_s0 + $0x3c] sm:$0xe]  ;;  %v2042_v3 = vrot.slane %v2040_v23, 4  ;;  %v13524_v21 = vsel %vm12398_vm7, %v9186_v0, %v2019_v11 }
 0x15b   :  { %v9190_v7 = vrot.slane %v1922_v29, 9  ;;  %v13536_v29 = vsel %vm12398_vm7, %v2035_v43, %v2036_v40  ;;  %v2056_v51 = vrot.slane %v2054_v61, 4  ;;  %v11723_v11 = vld [vmem:[%s16303_s0 + $0x44] sm:$0x1]  ;;  %v2061_v0 = vrot.slane %v13068_v15, 5 }
 0x15c   :  { %v13556_v43 = vsel %vm12398_vm7, %v9189_v47, %v2040_v23  ;;  %v11581_v15 = vld [vmem:[%s16303_s0 + $0xc0] sm:$0xff]   ;;  %v1925_v23 = vld [vmem:[%s16303_s0 + $0x54] sm:$0xe] }
 0x15d   :  { %v13560_v40 = vsel %vm12398_vm7, %v9190_v7, %v2047_v35  ;;  %v2068_v35 = vrot.slane %v13107_v44, 5  ;;  %v2063_v7 = vrot.slane %v2061_v0, 4 }
 0x160   :  { %10837 = vmatmul.mubr.msk.bf16.gmra.mrb[20].mxu0 %vm980_vm4, %v11575_v28  ;;  %v2043_v28 = vrot.slane %v11721_v37, 5  ;;  %v9191_v37 = vrot.slane %v1923_v25, 9 }
 0x161   :  { %10539 = vmatmul.mubr.msk.bf16.gmra.mrb[52].mxu1 %vm980_vm4, %v9149_v13  ;;  %10840 = vmatprep.mubr.msk.bf16.mxu0 %vm980_vm4, %v11577_v6  ;;  %v13528_v6 = vsel %vm12398_vm7, %v2021_v39, %v2022_v14  ;;  %v13532_v13 = vsel %vm12398_vm7, %v9188_v42, %v2033_v53  ;;  %v2057_v14 = vrot.slane %v11723_v11, 5  ;;  %v11579_v53 = vld [vmem:[%s16303_s0 + $0xb4] sm:$0xff]   ;;  %v13552_v42 = vsel %vm1077_vm0, %v12980_v17, 0  ;;  %v1927_v39 = vld [vmem:[%s16303_s0 + $0x6c] sm:$0xe] }
 0x162   :  { %10542 = vmatprep.mubr.msk.bf16.mxu1 %vm980_vm4, %v9150_v20  ;;  %v1924_v20 = vld [vmem:[%s16303_s0 + $0x48] sm:$0xe]  ;;  %v13567_v25 = vsel %vm12398_vm7, %v2042_v3, %v2043_v28  ;;  %v13571_v17 = vsel %vm12398_vm7, %v2049_v2, %v2050_v8  ;;  %v11724_v3 = vld [vmem:[%s16303_s0 + $0x50] sm:$0x1]  ;;  %v1926_v2 = vld [vmem:[%s16303_s0 + $0x60] sm:$0xe]  ;;  %v13590_v44 = vsel %vm12398_vm7, %v9191_v37, %v2054_v61 }
 0x163   :  { %v9192_v11 = vrot.slane %v1924_v20, 9  ;;  %v2064_v28 = vrot.slane %v11724_v3, 5  ;;  %v2075_v8 = vrot.slane %v13116_v19, 5  ;;  %v13594_v20 = vsel %vm12398_vm7, %v2056_v51, %v2057_v14  ;;  %v1928_v51 = vld [vmem:[%s16303_s0 + $0x78] sm:$0xe] }
 0x164   :  { %v2082_v3 = vrot.slane %v13155_v16, 5  ;;  %v9193_v37 = vrot.slane %v1925_v23, 9  ;;  %v2089_v14 = vrot.slane %v13164_v31, 5  ;;  %v11725_v61 = vld [vmem:[%s16303_s0 + $0x5c] sm:$0x1]  ;;  %v9194_v19 = vrot.slane %v1926_v2, 9 }
 0x165   :  { %v13613_v16 = vsel %vm12398_vm7, %v9192_v11, %v2061_v0  ;;  %v2071_v23 = vrot.slane %v11725_v61, 5  ;;  %v11726_v0 = vld [vmem:[%s16303_s0 + $0x68] sm:$0x1]  ;;  %v9195_v11 = vrot.slane %v1927_v39, 9  ;;  %v13629_v47 = vsel %vm12398_vm7, %v2063_v7, %v2064_v28  ;;  %v1929_v61 = vld [vmem:[%s16303_s0 + $0x84] sm:$0xe] }
 0x166   :  { %v2084_v2 = vrot.slane %v2082_v3, 4  ;;  %v13642_v39 = vsel %vm12398_vm7, %v9193_v37, %v2068_v35  ;;  %v2091_v7 = vrot.slane %v2089_v14, 4  ;;  %v11728_v28 = vld [vmem:[%s16303_s0 + $0x80] sm:$0x1]  ;;  %v13660_v37 = vsel %vm12398_vm7, %v9194_v19, %v2075_v8 }
 0x167   :  { %v2092_v31 = vrot.slane %v11728_v28, 5  ;;  %v2103_v28 = vrot.slane %v13212_v5, 5 }
 0x168   :  { %10841 = vmatmul.mubr.msk.bf16.gmra.mrb[24].mxu0 %vm980_vm4, %v11579_v53  ;;  %v2070_v53 = vrot.slane %v2068_v35, 4  ;;  %v13678_v5 = vsel %vm12398_vm7, %v2084_v2, %v2085_v45  ;;  %v11730_v2 = vld [vmem:[%s16303_s0 + $0x98] sm:$0x1] }
 0x169   :  { %10543 = vmatmul.mubr.msk.bf16.gmra.mrb[56].mxu1 %vm980_vm4, %v9151_v49  ;;  %10844 = vmatprep.mubr.msk.bf16.mxu0 %vm980_vm4, %v11581_v15  ;;  %v2077_v49 = vrot.slane %v2075_v8, 4  ;;  %v2078_v15 = vrot.slane %v11726_v0, 5  ;;  %v11583_v0 = vld [vmem:[%s16303_s0 + $0xcc] sm:$0xff]   ;;  %v2117_v8 = vrot.slane %v13251_v46, 5  ;;  %v9831_v46 = vld [vmem:[%s16303_s0 + $0x18] sm:$0xf] }
 0x16a   :  { %10546 = vmatprep.mubr.msk.bf16.mxu1 %vm980_vm4, %v9152_v36  ;;  %v9196_v36 = vrot.slane %v1928_v51, 9  ;;  %v2096_v51 = vrot.slane %v13203_v55, 5  ;;  %v13656_v35 = vsel %vm12398_vm7, %v2070_v53, %v2071_v23  ;;  %v1931_v55 = vld [vmem:[%s16303_s0 + $0x9c] sm:$0xe]  ;;  %v13673_v53 = vsel %vm12398_vm7, %v9195_v11, %v2082_v3  ;;  %v1932_v3 = vld [vmem:[%s16303_s0 + $0xa8] sm:$0xe] }
 0x16b   :  { %v13669_v10 = vsel %vm12398_vm7, %v2077_v49, %v2078_v15  ;;  %v9197_v23 = vrot.slane %v1929_v61, 9  ;;  %v2099_v49 = vrot.slane %v11729_v32, 5  ;;  %v9198_v15 = vrot.slane %v1930_v24, 9  ;;  %v11732_v32 = vld [vmem:[%s16303_s0 + $0xb0] sm:$0x1] }
 0x16c   :  { %v13682_v19 = vsel %vm12398_vm7, %v9196_v36, %v2089_v14  ;;  %v13696_v14 = vsel %vm12398_vm7, %v2091_v7, %v2092_v31  ;;  %v2098_v11 = vrot.slane %v2096_v51, 4  ;;  %v2106_v45 = vrot.slane %v11730_v2, 5  ;;  %v11731_v31 = vld [vmem:[%s16303_s0 + $0xa4] sm:$0x1] }
 0x16d   :  { %v9199_v36 = vrot.slane %v1931_v55, 9  ;;  %v16329_v61 = vcombine.low %v12815_v9, %v12822_v12  ;;  %v2105_v24 = vrot.slane %v2103_v28, 4  ;;  %v2113_v7 = vrot.slane %v11731_v31, 5 }
 0x16e   :  { %v2120_v2 = vrot.slane %v11732_v32, 5  ;;  %v16330_v55 = vcombine.low %v13524_v21, %v13528_v6  ;;  %v9200_v9 = vrot.slane %v1932_v3, 9  ;;  %v2119_v12 = vrot.slane %v2117_v8, 4  ;;  %v11585_v21 = vld [vmem:[%s16303_s0 + $0xfc] sm:$0xff]  }
 0x16f   :  { %v13731_v3 = vsel %vm12398_vm7, %v9197_v23, %v2096_v51  ;;  %v9832_v32 = vld [vmem:[%s16303_s0 + $0x1c] sm:$0xf]  ;;  %v13746_v6 = vsel %vm12398_vm7, %v9198_v15, %v2103_v28  ;;  %v13750_v51 = vsel %vm12398_vm7, %v2105_v24, %v2106_v45  ;;  %v13754_v23 = vsel %vm12398_vm7, %v9199_v36, %v2110_v4  ;;  %v9835_v36 = vld [vmem:[%s16303_s0 + $0x28] sm:$0xf] }
 0x170   :  { %10845 = vmatmul.mubr.msk.bf16.gmra.mrb[28].mxu0 %vm980_vm4, %v11583_v0  ;;  %v2112_v0 = vrot.slane %v2110_v4, 4  ;;  %v13765_v28 = vsel %vm12398_vm7, %v9200_v9, %v2117_v8  ;;  %v13769_v15 = vsel %vm12398_vm7, %v2119_v12, %v2120_v2  ;;  %v9834_v4 = vld [vmem:[%s16303_s0 + $0x24] sm:$0xf]  ;;  %v1934_v8 = vld [vmem:[%s16303_s0 + $0xd8] sm:$0xe]  ;;  %v6575_v2 = vshrl.u32 %v9832_v32, 16 }
 0x171   :  { %10547 = vmatmul.mubr.msk.bf16.gmra.mrb[60].mxu1 %vm980_vm4, %v16329_v61  ;;  %10848 = vmatprep.mubr.msk.bf16.mxu0 %vm980_vm4, %v11584_v57  ;;  %v6562_v57 = vshrl.u32 %v9831_v46, 16  ;;  %v6565_v61 = vshll.u32 %v9831_v46, 16  ;;  %v13735_v46 = vsel %vm12398_vm7, %v2098_v11, %v2099_v49  ;;  %v1933_v49 = vld [vmem:[%s16303_s0 + $0xb4] sm:$0xe]  ;;  %16332 = vst [vmem:[#allocation10_spill] sm:$0xff] %v13765_v28  ;;  %16333 = vst [vmem:[#allocation11_spill] sm:$0xff] %v13769_v15 }
 0x172   :  { %10552 = vmatprep.mubr.msk.bf16.mxu1 %vm980_vm4, %v16330_v55  ;;  %v2124_v55 = vrot.slane %v13268_v52, 5  ;;  %v13758_v52 = vsel %vm12398_vm7, %v2112_v0, %v2113_v7  ;;  %v2131_v0 = vrot.slane %v13280_v59, 5  ;;  %v6571_v7 = vshll.u32 %v9832_v32, 16  ;;  %v9837_v9 = vld [vmem:[%s16303_s0 + $0x30] sm:$0xf] }
 0x173   :  { %16331 = vst [vmem:[#allocation9_spill] sm:$0xff] %v13758_v52  ;;  %v6564_v11 = vrot.slane %v6562_v57, 4  ;;  %v6567_v45 = vrot.slane %v6565_v61, 5  ;;  %v9201_v12 = vrot.slane %v1933_v49, 9  ;;  %v11733_v61 = vld [vmem:[%s16303_s0 + $0xbc] sm:$0x1]  ;;  %v16334_v31 = vcombine.low %v13504_v50, %v13508_v56 }
 0x174   :  { %v2126_v57 = vrot.slane %v2124_v55, 4  ;;  %v2127_v24 = vrot.slane %v11733_v61, 5  ;;  %v6589_v49 = vshll.u32 %v9834_v4, 16  ;;  %v9838_v50 = vld [vmem:[%s16303_s0 + $0x34] sm:$0xf]  ;;  %v9202_v56 = vrot.slane %v1934_v8, 9 }
 0x175   :  { %v9833_v61 = vld [vmem:[%s16303_s0 + $0x20] sm:$0x1]  ;;  %v6568_v32 = vor.u32 %v6567_v45, %v6564_v11  ;;  %v6595_v59 = vshll.u32 %v9835_v36, 16  ;;  %v2133_v62 = vrot.slane %v2131_v0, 4  ;;  %v13815_v38 = vrot.slane %v6571_v7, 5 }
 0x176   :  { %v6599_v27 = vshrl.u32 %v9835_v36, 16  ;;  %v6610_v8 = vshrl.u32 %v9837_v9, 16  ;;  %v6623_v11 = vshrl.u32 %v9838_v50, 16  ;;  %v11588_v45 = vld [vmem:[%s16303_s0 + $0x120] sm:$0xff]   ;;  %v13829_v36 = vsel %vm12398_vm7, %v9201_v12, %v2124_v55 }
 0x177   :  { %16336 = vst [vmem:[#allocation12_spill] sm:$0xff] %v13829_v36  ;;  %v13833_v7 = vsel %vm12398_vm7, %v2126_v57, %v2127_v24  ;;  %v6591_v12 = vrot.slane %v6589_v49, 5 }
 0x178   :  { %10849 = vmatmul.mubr.msk.bf16.gmra.mrb[32].mxu0 %vm980_vm4, %v11585_v21  ;;  %v6586_v21 = vshrl.u32 %v9834_v4, 16  ;;  %16337 = vst [vmem:[#allocation13_spill] sm:$0xff] %v13833_v7  ;;  %v6612_v49 = vrot.slane %v6610_v8, 4 }
 0x179   :  { %10553 = vmatmul.mubr.msk.bf16.vlgmr.msra.gmra.mrb[0].mxu1 %vm980_vm4, %v16334_v31  ;;  %10852 = vmatprep.mubr.msk.bf16.mxu0 %vm980_vm4, %v11586_v54  ;;  %v16335_v54 = vcombine.low %v13532_v13, %v13536_v29  ;;  %v11734_v31 = vld [vmem:[%s16303_s0 + $0xe0] sm:$0x1]  ;;  %v11735_v13 = vld [vmem:[%s16302_s1 + $0x8] sm:$0x3]  ;;  %v11587_v29 = vld [vmem:[%s16303_s0 + $0x114] sm:$0xff]  }
 0x17a   :  { %10617 = vmatpush3.bf16.msra.mxu1 %v13552_v42  ;;  %v2134_v4 = vrot.slane %v11734_v31, 5  ;;  %v6577_v42 = vrot.slane %v6575_v2, 4  ;;  %v6619_v31 = vshll.u32 %v9838_v50, 16  ;;  %v6581_v2 = vshll.u32 %v9833_v61, 16 }
 0x17b   :  { %10556 = vmatprep.mubr.msk.bf16.mxu1 %vm980_vm4, %v16335_v54  ;;  %11531 = vmatprep.subr.msk.bf16.mxu1 %vm1077_vm0, %v11735_v13  ;;  %v6613_v54 = vshll.u32 %v9837_v9, 16  ;;  %v13838_v9 = vsel %vm12398_vm7, %v9202_v56, %v2131_v0  ;;  %v13840_v50 = vrot.slane %v6568_v32, 4  ;;  %v6588_v55 = vrot.slane %v6586_v21, 4  ;;  %v9836_v0 = vld [vmem:[%s16303_s0 + $0x2c] sm:$0x1] }
 0x17c   :  { %16338 = vst [vmem:[#allocation14_spill] sm:$0xff] %v13838_v9  ;;  %v13849_v24 = vsel %vm12398_vm7, %v2133_v62, %v2134_v4  ;;  %v6578_v57 = vor.u32 %v6577_v42, %v13815_v38  ;;  %v13855_v56 = vrot.slane %v6595_v59, 5  ;;  %v6601_v32 = vrot.slane %v6599_v27, 4  ;;  %v9839_v21 = vld [vmem:[%s16303_s0 + $0x38] sm:$0x1] }
 0x17d   :  { %16339 = vst [vmem:[#allocation15_spill] sm:$0xff] %v13849_v24  ;;  %v6615_v61 = vrot.slane %v6613_v54, 5  ;;  %v13861_v13 = vrot.slane %v6619_v31, 5  ;;  %v6625_v62 = vrot.slane %v6623_v11, 4  ;;  %v16340_v4 = vcombine.low %v13556_v43, %v13567_v25 }
 0x17e   :  { %v13870_v59 = vrot.slane %v6581_v2, 5  ;;  %v9203_v42 = vrot.slane %v13845_v60, 9  ;;  %v16341_v54 = vcombine.low %v13560_v40, %v13571_v17  ;;  %v16342_v25 = vrot.slane %v13296_v1, 5  ;;  %v9840_v60 = vld [vmem:[%s16303_s0 + $0x3c] sm:$0xf] }
 0x17f   :  { %v6592_v11 = vor.u32 %v6591_v12, %v6588_v55  ;;  %v9841_v2 = vld [vmem:[%s16303_s0 + $0x40] sm:$0xf]  ;;  %v6574_v40 = vsel %vm11923_vm3, %v13840_v50, %v13815_v38  ;;  %v6602_v17 = vor.u32 %v6601_v32, %v13855_v56  ;;  %v1936_v55 = vld [vmem:[%s16303_s0 + $0xf0] sm:$0xe]  ;;  %v2145_v12 = vrot.slane %v13309_v26, 5  ;;  %v11590_v32 = vld [vmem:[%s16303_s0 + $0x138] sm:$0xff]  }
 0x180   :  { %10853 = vmatmul.mubr.msk.bf16.gmra.mrb[36].mxu0 %vm980_vm4, %v11587_v29  ;;  %v11736_v29 = vld [vmem:[%s16303_s0 + $0xec] sm:$0x1]  ;;  %v2140_v31 = vrot.slane %v16342_v25, 4  ;;  %v6626_v25 = vor.u32 %v6625_v62, %v13861_v13  ;;  %v1937_v38 = vld [vmem:[%s16303_s0 + $0xfc] sm:$0xe]  ;;  %v2152_v50 = vrot.slane %v13335_v22, 5 }
 0x181   :  { %10557 = vmatmul.mubr.msk.bf16.gmra.mrb[4].mxu1 %vm980_vm4, %v16340_v4  ;;  %10856 = vmatprep.mubr.msk.bf16.mxu0 %vm980_vm4, %v11588_v45  ;;  %v2141_v8 = vrot.slane %v11736_v29, 5  ;;  %v6605_v45 = vshll.u32 %v9836_v0, 16  ;;  %v6629_v0 = vshll.u32 %v9839_v21, 16  ;;  %v11589_v4 = vld [vmem:[%s16303_s0 + $0x12c] sm:$0xff]   ;;  %v6579_v29 = vrot.slane %v6578_v57, 4 }
 0x182   :  { %10560 = vmatprep.mubr.msk.bf16.mxu1 %vm980_vm4, %v16341_v54  ;;  %v6616_v54 = vor.u32 %v6615_v61, %v6612_v49  ;;  %v6634_v26 = vshrl.u32 %v9840_v60, 16  ;;  %v6637_v21 = vshll.u32 %v9840_v60, 16  ;;  %v6643_v43 = vshll.u32 %v9841_v2, 16  ;;  %v11737_v49 = vld [vmem:[%s16303_s0 + $0xf8] sm:$0x1] }
 0x183   :  { %v6647_v27 = vshrl.u32 %v9841_v2, 16  ;;  %v6593_v24 = vrot.slane %v6592_v11, 4  ;;  %v6607_v9 = vrot.slane %v6605_v45, 5  ;;  %v9204_v57 = vrot.slane %v1936_v55, 9  ;;  %v11738_v11 = vld [vmem:[%s16303_s0 + $0x104] sm:$0x1] }
 0x184   :  { %v2148_v61 = vrot.slane %v11737_v49, 5  ;;  %v6603_v62 = vrot.slane %v6602_v17, 4  ;;  %v2147_v7 = vrot.slane %v2145_v12, 4  ;;  %v6631_v36 = vrot.slane %v6629_v0, 5  ;;  %v9842_v2 = vld [vmem:[%s16303_s0 + $0x44] sm:$0x1] }
 0x185   :  { %v9205_v22 = vrot.slane %v1937_v38, 9  ;;  %v6617_v15 = vrot.slane %v6616_v54, 4  ;;  %v6627_v28 = vrot.slane %v6626_v25, 4  ;;  %v2154_v52 = vrot.slane %v2152_v50, 4 }
 0x186   :  { %v2155_v45 = vrot.slane %v11738_v11, 5  ;;  %v16343_v60 = vcombine.low %v13590_v44, %v13594_v20  ;;  %v6636_v17 = vrot.slane %v6634_v26, 4  ;;  %v6639_v55 = vrot.slane %v6637_v21, 5 }
 0x187   :  { %v13925_v0 = vrot.slane %v6643_v43, 5  ;;  %v16344_v54 = vcombine.low %v13613_v16, %v13629_v47  ;;  %v6584_v44 = vsel %vm11923_vm3, %v6579_v29, %v13870_v59  ;;  %v16345_v20 = vrot.slane %v13296_v1, 5  ;;  %v9843_v16 = vld [vmem:[%s16303_s0 + $0x48] sm:$0xf]  ;;  %v11592_v29 = vld [vmem:[%s16303_s0 + $0x150] sm:$0xff]  }
 0x188   :  { %10857 = vmatmul.mubr.msk.bf16.gmra.mrb[40].mxu0 %vm980_vm4, %v11589_v4  ;;  %v6649_v4 = vrot.slane %v6647_v27, 4  ;;  %v13942_v43 = vsel %vm12398_vm7, %v2140_v31, %v2141_v8  ;;  %v6598_v47 = vsel %vm11923_vm3, %v6593_v24, %v13855_v56  ;;  %v6608_v27 = vsel %vm11923_vm3, %v6603_v62, %v6607_v9  ;;  %v9844_v24 = vld [vmem:[%s16303_s0 + $0x4c] sm:$0xf]  ;;  %v11591_v9 = vld [vmem:[%s16303_s0 + $0x144] sm:$0xff]  }
 0x189   :  { %10561 = vmatmul.mubr.msk.bf16.gmra.mrb[8].mxu1 %vm980_vm4, %v16343_v60  ;;  %10860 = vmatprep.mubr.msk.bf16.mxu0 %vm980_vm4, %v11590_v32  ;;  %v13938_v25 = vsel %vm12398_vm7, %v9203_v42, %v16345_v20  ;;  %v13954_v1 = vsel %vm12398_vm7, %v9204_v57, %v2145_v12  ;;  %v13958_v59 = vsel %vm12398_vm7, %v2147_v7, %v2148_v61  ;;  %v6653_v31 = vshll.u32 %v9842_v2, 16  ;;  %v1938_v12 = vld [vmem:[%s16303_s0 + $0x108] sm:$0xe] }
 0x18a   :  { %10564 = vmatprep.mubr.msk.bf16.mxu1 %vm980_vm4, %v16344_v54  ;;  %v13962_v42 = vsel %vm12398_vm7, %v9205_v22, %v2152_v50  ;;  %v6622_v56 = vsel %vm11923_vm3, %v6617_v15, %v13861_v13  ;;  %v6632_v7 = vsel %vm11923_vm3, %v6627_v28, %v6631_v36  ;;  %v13977_v8 = vsel %vm12398_vm7, %v2154_v52, %v2155_v45  ;;  %v9849_v45 = vld [vmem:[%s16303_s0 + $0x60] sm:$0xf] }
 0x18b   :  { %v6640_v38 = vor.u32 %v6639_v55, %v6636_v17  ;;  %v6650_v50 = vor.u32 %v6649_v4, %v13925_v0  ;;  %v6658_v15 = vshrl.u32 %v9843_v16, 16  ;;  %v6661_v13 = vshll.u32 %v9843_v16, 16  ;;  %v11593_v16 = vld [vmem:[%s16303_s0 + $0x15c] sm:$0xff]  }
 0x18c   :  { %v13986_v32 = vcombine.low %v6574_v40, %v6584_v44  ;;  %v9236_v52 = vcombine.low %v13938_v25, %v13942_v43  ;;  %v6667_v28 = vshll.u32 %v9844_v24, 16  ;;  %v6671_v36 = vshrl.u32 %v9844_v24, 16  ;;  %v9846_v40 = vld [vmem:[%s16303_s0 + $0x54] sm:$0xf] }
 0x18d   :  { %v13990_v26 = vcombine.low %v6598_v47, %v6608_v27  ;;  %v13994_v21 = vsel %vm1077_vm0, %v13319_v18, 0  ;;  %v9237_v57 = vcombine.low %v13954_v1, %v13958_v59  ;;  %v9206_v49 = vrot.slane %v1938_v12, 9  ;;  %v9847_v18 = vld [vmem:[%s16303_s0 + $0x58] sm:$0xf] }
 0x18e   :  { %v14002_v61 = vcombine.low %v6622_v56, %v6632_v7  ;;  %v9238_v62 = vcombine.low %v13962_v42, %v13977_v8  ;;  %v6655_v22 = vrot.slane %v6653_v31, 5  ;;  %v2159_v11 = vrot.slane %v13347_v33, 5  ;;  %v9850_v33 = vld [vmem:[%s16303_s0 + $0x64] sm:$0xf]  ;;  %v1939_v56 = vld [vmem:[%s16303_s0 + $0x114] sm:$0xe] }
 0x18f   :  { %v16346_v60 = vcombine.low %v13642_v39, %v13656_v35  ;;  %v6641_v2 = vrot.slane %v6640_v38, 4  ;;  %v6651_v17 = vrot.slane %v6650_v50, 4  ;;  %v6660_v55 = vrot.slane %v6658_v15, 4  ;;  %v9845_v39 = vld [vmem:[%s16303_s0 + $0x50] sm:$0x1]  ;;  %v11594_v38 = vld [vmem:[%s16303_s0 + $0x168] sm:$0xff]  }
 0x190   :  { %10861 = vmatmul.mubr.msk.bf16.gmra.mrb[44].mxu0 %vm980_vm4, %v11591_v9  ;;  %v6663_v4 = vrot.slane %v6661_v13, 5  ;;  %v16347_v54 = vcombine.low %v13660_v37, %v13669_v10  ;;  %v14028_v35 = vrot.slane %v6667_v28, 5  ;;  %v6673_v44 = vrot.slane %v6671_v36, 4  ;;  %v11739_v10 = vld [vmem:[%s16303_s0 + $0x110] sm:$0x1] }
 0x191   :  { %10565 = vmatmul.mubr.msk.bf16.gmra.mrb[12].mxu1 %vm980_vm4, %v16346_v60  ;;  %10864 = vmatprep.mubr.msk.bf16.mxu0 %vm980_vm4, %v11592_v29  ;;  %v6682_v20 = vshrl.u32 %v9846_v40, 16  ;;  %v6685_v47 = vshll.u32 %v9846_v40, 16  ;;  %v14035_v27 = vsel %vm12398_vm7, %v9206_v49, %v2159_v11  ;;  %v2162_v37 = vrot.slane %v11739_v10, 5  ;;  %v9869_v8 = vld [vmem:[%s16303_s0 + $0xb0] sm:$0x1] }
 0x192   :  { %10568 = vmatprep.mubr.msk.bf16.mxu1 %vm980_vm4, %v16347_v54  ;;  %v6691_v24 = vshll.u32 %v9847_v18, 16  ;;  %v6695_v9 = vshrl.u32 %v9847_v18, 16  ;;  %v6706_v7 = vshrl.u32 %v9849_v45, 16  ;;  %v6709_v31 = vshll.u32 %v9849_v45, 16 }
 0x193   :  { %v6715_v12 = vshll.u32 %v9850_v33, 16  ;;  %v6719_v29 = vshrl.u32 %v9850_v33, 16  ;;  %v6646_v50 = vsel %vm11923_vm3, %v6641_v2, %v13925_v0  ;;  %v6656_v15 = vsel %vm11923_vm3, %v6651_v17, %v6655_v22  ;;  %v9848_v33 = vld [vmem:[%s16303_s0 + $0x5c] sm:$0x1]  ;;  %v9851_v22 = vld [vmem:[%s16303_s0 + $0x68] sm:$0x1] }
 0x194   :  { %v2161_v13 = vrot.slane %v2159_v11, 4  ;;  %v6677_v28 = vshll.u32 %v9845_v39, 16  ;;  %v6664_v36 = vor.u32 %v6663_v4, %v6660_v55  ;;  %v6674_v49 = vor.u32 %v6673_v44, %v14028_v35 }
 0x195   :  { %v6684_v40 = vrot.slane %v6682_v20, 4  ;;  %v6687_v18 = vrot.slane %v6685_v47, 5  ;;  %v9207_v45 = vrot.slane %v1939_v56, 9  ;;  %v2166_v60 = vrot.slane %v13363_v41, 5  ;;  %v11740_v20 = vld [vmem:[%s16303_s0 + $0x11c] sm:$0x1] }
 0x196   :  { %v14056_v54 = vrot.slane %v6691_v24, 5  ;;  %v6697_v0 = vrot.slane %v6695_v9, 4  ;;  %v6708_v11 = vrot.slane %v6706_v7, 4  ;;  %v6711_v2 = vrot.slane %v6709_v31, 5  ;;  %v9853_v9 = vld [vmem:[%s16303_s0 + $0x70] sm:$0xf] }
 0x197   :  { %v14062_v17 = vrot.slane %v6715_v12, 5  ;;  %v6721_v55 = vrot.slane %v6719_v29, 4  ;;  %v16348_v41 = vcombine.low %v13673_v53, %v13678_v5  ;;  %v14069_v4 = vcombine.low %v6646_v50, %v6656_v15  ;;  %v9852_v53 = vld [vmem:[%s16303_s0 + $0x6c] sm:$0xf]  ;;  %v11595_v12 = vld [vmem:[%s16303_s0 + $0x174] sm:$0xff]  }
 0x198   :  { %10865 = vmatmul.mubr.msk.bf16.gmra.mrb[48].mxu0 %vm980_vm4, %v11593_v16  ;;  %v14073_v39 = vsel %vm12398_vm7, %v2161_v13, %v2162_v37  ;;  %v14075_v44 = vrot.slane %v6677_v28, 5  ;;  %v2169_v47 = vrot.slane %v11740_v20, 5  ;;  %v16349_v5 = vcombine.low %v13682_v19, %v13696_v14  ;;  %v1940_v19 = vld [vmem:[%s16303_s0 + $0x120] sm:$0xe]  ;;  %v1941_v15 = vld [vmem:[%s16303_s0 + $0x12c] sm:$0xe] }
 0x199   :  { %10569 = vmatmul.mubr.msk.bf16.gmra.mrb[16].mxu1 %vm980_vm4, %v16348_v41  ;;  %10868 = vmatprep.mubr.msk.bf16.mxu0 %vm980_vm4, %v11594_v38  ;;  %v14087_v16 = vrot.slane %v6664_v36, 4  ;;  %v14089_v10 = vrot.slane %v6674_v49, 4  ;;  %v6688_v37 = vor.u32 %v6687_v18, %v6684_v40  ;;  %v6701_v24 = vshll.u32 %v9848_v33, 16  ;;  %v11596_v28 = vld [vmem:[%s16303_s0 + $0x180] sm:$0xff]   ;;  %v11741_v33 = vld [vmem:[%s16303_s0 + $0x128] sm:$0x1] }
 0x19a   :  { %10572 = vmatprep.mubr.msk.bf16.mxu1 %vm980_vm4, %v16349_v5  ;;  %v14096_v56 = vsel %vm12398_vm7, %v9207_v45, %v2166_v60  ;;  %v6698_v7 = vor.u32 %v6697_v0, %v14056_v54  ;;  %v2173_v14 = vrot.slane %v13375_v48, 5  ;;  %v6725_v31 = vshll.u32 %v9851_v22, 16 }
 0x19b   :  { %v2168_v29 = vrot.slane %v2166_v60, 4  ;;  %v6712_v38 = vor.u32 %v6711_v2, %v6708_v11  ;;  %v6722_v50 = vor.u32 %v6721_v55, %v14062_v17  ;;  %v2180_v13 = vrot.slane %v13391_v58, 5 }
 0x19c   :  { %v6730_v48 = vshrl.u32 %v9852_v53, 16  ;;  %v6733_v36 = vshll.u32 %v9852_v53, 16  ;;  %v6739_v49 = vshll.u32 %v9853_v9, 16  ;;  %v6743_v40 = vshrl.u32 %v9853_v9, 16  ;;  %v11742_v53 = vld [vmem:[%s16303_s0 + $0x134] sm:$0x1] }
 0x19d   :  { %v6689_v18 = vrot.slane %v6688_v37, 4  ;;  %v6703_v45 = vrot.slane %v6701_v24, 5  ;;  %v9208_v60 = vrot.slane %v1940_v19, 9  ;;  %v2176_v0 = vrot.slane %v11741_v33, 5  ;;  %v9854_v24 = vld [vmem:[%s16303_s0 + $0x74] sm:$0x1] }
 0x19e   :  { %v6699_v22 = vrot.slane %v6698_v7, 4  ;;  %v2175_v11 = vrot.slane %v2173_v14, 4  ;;  %v6727_v2 = vrot.slane %v6725_v31, 5  ;;  %v9209_v58 = vrot.slane %v1941_v15, 9  ;;  %v9856_v15 = vld [vmem:[%s16303_s0 + $0x7c] sm:$0xf] }
 0x19f   :  { %v6713_v55 = vrot.slane %v6712_v38, 4  ;;  %v6723_v41 = vrot.slane %v6722_v50, 4  ;;  %v2182_v20 = vrot.slane %v2180_v13, 4  ;;  %v2183_v5 = vrot.slane %v11742_v53, 5  ;;  %v9858_v33 = vld [vmem:[%s16303_s0 + $0x84] sm:$0xf] }
 0x1a0   :  { %10869 = vmatmul.mubr.msk.bf16.gmra.mrb[52].mxu0 %vm980_vm4, %v11595_v12  ;;  %v16350_v37 = vcombine.low %v13731_v3, %v13735_v46  ;;  %v6732_v9 = vrot.slane %v6730_v48, 4  ;;  %v6735_v7 = vrot.slane %v6733_v36, 5  ;;  %v14129_v19 = vrot.slane %v6739_v49, 5 }
 0x1a1   :  { %10872 = vmatprep.mubr.msk.bf16.mxu0 %vm980_vm4, %v11596_v28  ;;  %v6745_v31 = vrot.slane %v6743_v40, 4  ;;  %v16351_v12 = vcombine.low %v13746_v6, %v13750_v51  ;;  %v6670_v3 = vsel %vm11923_vm3, %v14087_v16, %v14028_v35  ;;  %v6680_v46 = vsel %vm11923_vm3, %v14089_v10, %v14075_v44  ;;  %v9855_v6 = vld [vmem:[%s16303_s0 + $0x78] sm:$0xf]  ;;  %v11597_v16 = vld [vmem:[%s16303_s0 + $0x18c] sm:$0xff]  }
 0x1a2   :  { %10573 = vmatmul.mubr.msk.bf16.gmra.mrb[20].mxu1 %vm980_vm4, %v16350_v37  ;;  %v14145_v38 = vsel %vm12398_vm7, %v2168_v29, %v2169_v47  ;;  %v14149_v50 = vsel %vm12398_vm7, %v9208_v60, %v2173_v14  ;;  %v6694_v51 = vsel %vm11923_vm3, %v6689_v18, %v14056_v54  ;;  %v6704_v35 = vsel %vm11923_vm3, %v6699_v22, %v6703_v45 }
 0x1a3   :  { %10576 = vmatprep.mubr.msk.bf16.mxu1 %vm980_vm4, %v16351_v12  ;;  %v14161_v44 = vsel %vm12398_vm7, %v2175_v11, %v2176_v0  ;;  %v14165_v47 = vsel %vm12398_vm7, %v9209_v58, %v2180_v13  ;;  %v6718_v10 = vsel %vm11923_vm3, %v6713_v55, %v14062_v17  ;;  %v6728_v54 = vsel %vm11923_vm3, %v6723_v41, %v6727_v2  ;;  %v11598_v13 = vld [vmem:[%s16303_s0 + $0x198] sm:$0xff]   ;;  %v9859_v58 = vld [vmem:[%s16303_s0 + $0x88] sm:$0xf]  ;;  %v9862_v12 = vld [vmem:[%s16303_s0 + $0x94] sm:$0xf] }
 0x1a4   :  { %v14177_v14 = vsel %vm12398_vm7, %v2182_v20, %v2183_v5  ;;  %v6749_v29 = vshll.u32 %v9854_v24, 16  ;;  %v6736_v28 = vor.u32 %v6735_v7, %v6732_v9  ;;  %v6746_v48 = vor.u32 %v6745_v31, %v14129_v19  ;;  %v1942_v17 = vld [vmem:[%s16303_s0 + $0x138] sm:$0xe]  ;;  %v9861_v5 = vld [vmem:[%s16303_s0 + $0x90] sm:$0xf] }
 0x1a5   :  { %v6754_v36 = vshrl.u32 %v9855_v6, 16  ;;  %v6757_v49 = vshll.u32 %v9855_v6, 16  ;;  %v9239_v40 = vcombine.low %v14035_v27, %v14073_v39  ;;  %v14191_v18 = vcombine.low %v6670_v3, %v6680_v46  ;;  %v16354_v3 = vld [vmem:[#allocation10_spill] sm:$0xff]  ;;  %v16355_v46 = vld [vmem:[#allocation11_spill] sm:$0xff]  ;;  %v16357_v41 = vld [vmem:[#allocation4_spill] sm:$0xff] }
 0x1a6   :  { %v9240_v45 = vcombine.low %v14096_v56, %v14145_v38  ;;  %v14200_v0 = vcombine.low %v6694_v51, %v6704_v35  ;;  %v2187_v22 = vrot.slane %v13403_v63, 5  ;;  %v6763_v11 = vshll.u32 %v9856_v15, 16  ;;  %v16352_v63 = vld [vmem:[#allocation9_spill] sm:$0xff]  ;;  %v9875_v56 = vld [vmem:[%s16303_s0 + $0xc8] sm:$0x1] }
 0x1a7   :  { %v6767_v2 = vshrl.u32 %v9856_v15, 16  ;;  %v14207_v55 = vcombine.low %v6718_v10, %v6728_v54  ;;  %v6751_v20 = vrot.slane %v6749_v29, 5  ;;  %v9210_v53 = vrot.slane %v1942_v17, 9  ;;  %v11599_v54 = vld [vmem:[%s16303_s0 + $0x1a4] sm:$0xff]   ;;  %v11743_v15 = vld [vmem:[%s16303_s0 + $0x140] sm:$0x1] }
 0x1a8   :  { %10873 = vmatmul.mubr.msk.bf16.gmra.mrb[56].mxu0 %vm980_vm4, %v11597_v16  ;;  %v16353_v37 = vcombine.low %v13754_v23, %v16352_v63  ;;  %v6737_v24 = vrot.slane %v6736_v28, 4  ;;  %v6747_v9 = vrot.slane %v6746_v48, 4  ;;  %v6756_v7 = vrot.slane %v6754_v36, 4  ;;  %v9857_v23 = vld [vmem:[%s16303_s0 + $0x80] sm:$0x1] }
 0x1a9   :  { %10876 = vmatprep.mubr.msk.bf16.mxu0 %vm980_vm4, %v11598_v13  ;;  %v6759_v31 = vrot.slane %v6757_v49, 5  ;;  %v16356_v6 = vcombine.low %v16354_v3, %v16355_v46  ;;  %v6778_v51 = vshrl.u32 %v9858_v33, 16  ;;  %v6781_v35 = vshll.u32 %v9858_v33, 16  ;;  %v1943_v17 = vld [vmem:[%s16303_s0 + $0x144] sm:$0xe] }
 0x1aa   :  { %10577 = vmatmul.mubr.msk.bf16.gmra.mrb[24].mxu1 %vm980_vm4, %v16353_v37  ;;  %v6787_v16 = vshll.u32 %v9859_v58, 16  ;;  %v6791_v10 = vshrl.u32 %v9859_v58, 16  ;;  %v2189_v29 = vrot.slane %v2187_v22, 4  ;;  %v2190_v13 = vrot.slane %v11743_v15, 5  ;;  %v9876_v38 = vld [vmem:[%s16303_s0 + $0xcc] sm:$0xf] }
 0x1ab   :  { %10580 = vmatprep.mubr.msk.bf16.mxu1 %vm980_vm4, %v16356_v6  ;;  %v14235_v28 = vrot.slane %v6763_v11, 5  ;;  %v6769_v48 = vrot.slane %v6767_v2, 4  ;;  %v6802_v36 = vshrl.u32 %v9861_v5, 16  ;;  %v6805_v49 = vshll.u32 %v9861_v5, 16  ;;  %v9860_v11 = vld [vmem:[%s16303_s0 + $0x8c] sm:$0x1] }
 0x1ac   :  { %v6811_v33 = vshll.u32 %v9862_v12, 16  ;;  %v6815_v58 = vshrl.u32 %v9862_v12, 16  ;;  %v6742_v63 = vsel %vm11923_vm3, %v6737_v24, %v14129_v19  ;;  %v6752_v37 = vsel %vm11923_vm3, %v6747_v9, %v6751_v20  ;;  %v9863_v9 = vld [vmem:[%s16303_s0 + $0x98] sm:$0x1] }
 0x1ad   :  { %v6760_v3 = vor.u32 %v6759_v31, %v6756_v7  ;;  %v6773_v46 = vshll.u32 %v9857_v23, 16  ;;  %v6780_v2 = vrot.slane %v6778_v51, 4  ;;  %v6783_v6 = vrot.slane %v6781_v35, 5  ;;  %v16358_v35 = vld [vmem:[#allocation12_spill] sm:$0xff] }
 0x1ae   :  { %v14248_v15 = vrot.slane %v6787_v16, 5  ;;  %v6793_v5 = vrot.slane %v6791_v10, 4  ;;  %v14252_v12 = vsel %vm12398_vm7, %v9210_v53, %v2187_v22  ;;  %v6770_v19 = vor.u32 %v6769_v48, %v14235_v28  ;;  %v16359_v16 = vld [vmem:[#allocation13_spill] sm:$0xff]  ;;  %v16361_v48 = vld [vmem:[#allocation14_spill] sm:$0xff] }
 0x1af   :  { %v9211_v24 = vrot.slane %v1943_v17, 9  ;;  %v2194_v20 = vrot.slane %v16357_v41, 5  ;;  %v6804_v7 = vrot.slane %v6802_v36, 4  ;;  %v6807_v31 = vrot.slane %v6805_v49, 5  ;;  %v16362_v17 = vld [vmem:[#allocation15_spill] sm:$0xff] }
 0x1b0   :  { %10877 = vmatmul.mubr.msk.bf16.gmra.mrb[60].mxu0 %vm980_vm4, %v11599_v54  ;;  %v14260_v23 = vrot.slane %v6811_v33, 5  ;;  %v6817_v51 = vrot.slane %v6815_v58, 4  ;;  %v16360_v22 = vcombine.low %v16358_v35, %v16359_v16  ;;  %v14268_v41 = vcombine.low %v6742_v63, %v6752_v37 }
 0x1b1   :  { %10882 = vmatprep.mubr.msk.bf16.mxu0 %vm980_vm4, %v13986_v32  ;;  %v14272_v53 = vsel %vm12398_vm7, %v2189_v29, %v2190_v13  ;;  %v14274_v10 = vrot.slane %v6760_v3, 4  ;;  %v6797_v54 = vshll.u32 %v9860_v11, 16  ;;  %v16363_v36 = vcombine.low %v16361_v48, %v16362_v17  ;;  %v11744_v32 = vld [vmem:[%s16303_s0 + $0x14c] sm:$0x1]  ;;  %v9864_v29 = vld [vmem:[%s16303_s0 + $0x9c] sm:$0xf] }
 0x1b2   :  { %10581 = vmatmul.mubr.msk.bf16.gmra.mrb[28].mxu1 %vm980_vm4, %v16360_v22  ;;  %v14280_v49 = vrot.slane %v6773_v46, 5  ;;  %v2197_v33 = vrot.slane %v11744_v32, 5  ;;  %v6784_v58 = vor.u32 %v6783_v6, %v6780_v2  ;;  %v6794_v63 = vor.u32 %v6793_v5, %v14248_v15  ;;  %v1944_v3 = vld [vmem:[%s16303_s0 + $0x150] sm:$0xe]  ;;  %v16364_v46 = vld [vmem:[#allocation5_spill] sm:$0xff] }
 0x1b3   :  { %10584 = vmatprep.mubr.msk.bf16.mxu1 %vm980_vm4, %v16363_v36  ;;  %v14291_v13 = vsel %vm12398_vm7, %v9211_v24, %v2194_v20  ;;  %v2196_v37 = vrot.slane %v2194_v20, 4  ;;  %v2201_v11 = vrot.slane %v16364_v46, 5  ;;  %v6821_v35 = vshll.u32 %v9863_v9, 16  ;;  %v1945_v5 = vld [vmem:[%s16303_s0 + $0x15c] sm:$0xe]  ;;  %v16365_v22 = vld [vmem:[#allocation8_spill] sm:$0xff] }
 0x1b4   :  { %v6771_v16 = vrot.slane %v6770_v19, 4  ;;  %v6808_v2 = vor.u32 %v6807_v31, %v6804_v7  ;;  %v6818_v6 = vor.u32 %v6817_v51, %v14260_v23  ;;  %v2208_v48 = vrot.slane %v16365_v22, 5  ;;  %v9865_v9 = vld [vmem:[%s16303_s0 + $0xa0] sm:$0xf]  ;;  %v11745_v36 = vld [vmem:[%s16303_s0 + $0x158] sm:$0x1] }
 0x1b5   :  { %v6766_v24 = vsel %vm11923_vm3, %v14274_v10, %v14235_v28  ;;  %v6799_v20 = vrot.slane %v6797_v54, 5  ;;  %v6826_v19 = vshrl.u32 %v9864_v29, 16  ;;  %v6829_v7 = vshll.u32 %v9864_v29, 16  ;;  %v11746_v28 = vld [vmem:[%s16303_s0 + $0x164] sm:$0x1] }
 0x1b6   :  { %v6785_v31 = vrot.slane %v6784_v58, 4  ;;  %v6795_v51 = vrot.slane %v6794_v63, 4  ;;  %v9212_v17 = vrot.slane %v1944_v3, 9  ;;  %v2204_v32 = vrot.slane %v11745_v36, 5  ;;  %v9867_v54 = vld [vmem:[%s16303_s0 + $0xa8] sm:$0xf] }
 0x1b7   :  { %v2203_v46 = vrot.slane %v2201_v11, 4  ;;  %v6823_v22 = vrot.slane %v6821_v35, 5  ;;  %v9213_v60 = vrot.slane %v1945_v5, 9  ;;  %v2211_v10 = vrot.slane %v11746_v28, 5 }
 0x1b8   :  { %10883 = vmatmul.mubr.msk.bf16.vlgmr.msra.gmra.mrb[0].mxu0 %vm980_vm4, %v13990_v26  ;;  %v6809_v58 = vrot.slane %v6808_v2, 4  ;;  %v6819_v63 = vrot.slane %v6818_v6, 4  ;;  %v2210_v29 = vrot.slane %v2208_v48, 4  ;;  %v6835_v3 = vshll.u32 %v9865_v9, 16  ;;  %v1946_v6 = vld [vmem:[%s16303_s0 + $0x168] sm:$0xe] }
 0x1b9   :  { %10947 = vmatpush3.bf16.msra.mxu0 %v13994_v21  ;;  %v14327_v35 = vsel %vm12398_vm7, %v2196_v37, %v2197_v33  ;;  %v6828_v5 = vrot.slane %v6826_v19, 4  ;;  %v6831_v36 = vrot.slane %v6829_v7, 5  ;;  %v6839_v28 = vshrl.u32 %v9865_v9, 16  ;;  %10886 = vmatprep.mubr.msk.bf16.mxu0 %vm980_vm4, %v14002_v61 }
 0x1ba   :  { %10585 = vmatmul.mubr.msk.bf16.gmra.mrb[32].mxu1 %vm980_vm4, %v9236_v52  ;;  %v6776_v25 = vsel %vm11923_vm3, %v6771_v16, %v14280_v49  ;;  %v14340_v43 = vsel %vm12398_vm7, %v9212_v17, %v2201_v11  ;;  %v9866_v52 = vld [vmem:[%s16303_s0 + $0xa4] sm:$0x1]  ;;  %v6850_v26 = vshrl.u32 %v9867_v54, 16  ;;  %v6853_v21 = vshll.u32 %v9867_v54, 16  ;;  %v9868_v49 = vld [vmem:[%s16303_s0 + $0xac] sm:$0xf] }
 0x1bb   :  { %10588 = vmatprep.mubr.msk.bf16.mxu1 %vm980_vm4, %v9237_v57  ;;  %v6790_v1 = vsel %vm11923_vm3, %v6785_v31, %v14248_v15  ;;  %v6800_v59 = vsel %vm11923_vm3, %v6795_v51, %v6799_v20  ;;  %v14352_v57 = vsel %vm12398_vm7, %v2203_v46, %v2204_v32  ;;  %v14356_v61 = vsel %vm12398_vm7, %v9213_v60, %v2208_v48  ;;  %v9870_v46 = vld [vmem:[%s16303_s0 + $0xb4] sm:$0xf] }
 0x1bc   :  { %v6814_v33 = vsel %vm11923_vm3, %v6809_v58, %v14260_v23  ;;  %v6824_v15 = vsel %vm11923_vm3, %v6819_v63, %v6823_v22  ;;  %v14368_v37 = vsel %vm12398_vm7, %v2210_v29, %v2211_v10  ;;  %v14370_v11 = vrot.slane %v6835_v3, 5  ;;  %v11747_v23 = vld [vmem:[%s16303_s0 + $0x16c] sm:$0xf]  ;;  %v9871_v58 = vld [vmem:[%s16303_s0 + $0xb8] sm:$0xf] }
 0x1bd   :  { %v6832_v16 = vor.u32 %v6831_v36, %v6828_v5  ;;  %v6841_v60 = vrot.slane %v6839_v28, 4  ;;  %v6845_v2 = vshll.u32 %v9866_v52, 16  ;;  %v2215_v48 = vrot.slane %v11747_v23, 5  ;;  %v9873_v63 = vld [vmem:[%s16303_s0 + $0xc0] sm:$0xf] }
 0x1be   :  { %v6852_v20 = vrot.slane %v6850_v26, 4  ;;  %v6855_v9 = vrot.slane %v6853_v21, 5  ;;  %v6859_v19 = vshll.u32 %v9868_v49, 16  ;;  %v6863_v7 = vshrl.u32 %v9868_v49, 16  ;;  %v11748_v5 = vld [vmem:[%s16303_s0 + $0x170] sm:$0x1] }
 0x1bf   :  { %v9243_v31 = vcombine.low %v14252_v12, %v14272_v53  ;;  %v14380_v51 = vcombine.low %v6766_v24, %v6776_v25  ;;  %v9244_v17 = vcombine.low %v14291_v13, %v14327_v35  ;;  %v14384_v32 = vcombine.low %v6790_v1, %v6800_v59  ;;  %v9874_v28 = vld [vmem:[%s16303_s0 + $0xc4] sm:$0xf]  ;;  %v1947_v52 = vld [vmem:[%s16303_s0 + $0x174] sm:$0xe]  ;;  %v9879_v12 = vld [vmem:[%s16303_s0 + $0xf0] sm:$0xf] }
 0x1c0   :  { %10887 = vmatmul.mubr.msk.bf16.gmra.mrb[4].mxu0 %vm980_vm4, %v14069_v4  ;;  %v9245_v22 = vcombine.low %v14340_v43, %v14352_v57  ;;  %v14393_v10 = vcombine.low %v6814_v33, %v6824_v15  ;;  %v9246_v24 = vcombine.low %v14356_v61, %v14368_v37  ;;  %v9214_v54 = vrot.slane %v1946_v6, 9  ;;  %v9884_v43 = vld [vmem:[%s16303_s0 + $0x104] sm:$0x1] }
 0x1c1   :  { %10890 = vmatprep.mubr.msk.bf16.mxu0 %vm980_vm4, %v14191_v18  ;;  %v6842_v4 = vor.u32 %v6841_v60, %v14370_v11  ;;  %v14410_v29 = vrot.slane %v6845_v2, 5  ;;  %v2217_v3 = vrot.slane %v2215_v48, 4  ;;  %v2218_v36 = vrot.slane %v11748_v5, 5 }
 0x1c2   :  { %10589 = vmatmul.mubr.msk.bf16.gmra.mrb[36].mxu1 %vm980_vm4, %v9238_v62  ;;  %v14422_v42 = vrot.slane %v6832_v16, 4  ;;  %v6856_v62 = vor.u32 %v6855_v9, %v6852_v20  ;;  %v14427_v18 = vrot.slane %v6859_v19, 5  ;;  %v6865_v25 = vrot.slane %v6863_v7, 4  ;;  %v11749_v20 = vld [vmem:[%s16303_s0 + $0x178] sm:$0xf] }
 0x1c3   :  { %10592 = vmatprep.mubr.msk.bf16.mxu1 %vm980_vm4, %v9239_v40  ;;  %v6874_v26 = vshrl.u32 %v9870_v46, 16  ;;  %v6877_v21 = vshll.u32 %v9870_v46, 16  ;;  %v6883_v1 = vshll.u32 %v9871_v58, 16  ;;  %v6887_v27 = vshrl.u32 %v9871_v58, 16 }
 0x1c4   :  { %v6898_v39 = vshrl.u32 %v9873_v63, 16  ;;  %v6901_v40 = vshll.u32 %v9873_v63, 16  ;;  %v6907_v59 = vshll.u32 %v9874_v28, 16  ;;  %v6911_v49 = vshrl.u32 %v9874_v28, 16 }
 0x1c5   :  { %v14432_v33 = vrot.slane %v6842_v4, 4  ;;  %v14436_v15 = vsel %vm12398_vm7, %v9214_v54, %v2215_v48  ;;  %v14440_v16 = vsel %vm12398_vm7, %v2217_v3, %v2218_v36  ;;  %v6869_v60 = vshll.u32 %v9869_v8, 16  ;;  %v9872_v48 = vld [vmem:[%s16303_s0 + $0xbc] sm:$0x1] }
 0x1c6   :  { %v14442_v2 = vrot.slane %v6856_v62, 4  ;;  %v6866_v6 = vor.u32 %v6865_v25, %v14427_v18  ;;  %v9215_v23 = vrot.slane %v1947_v52, 9  ;;  %v2222_v9 = vrot.slane %v11749_v20, 5  ;;  %v9877_v62 = vld [vmem:[%s16303_s0 + $0xd0] sm:$0xf] }
 0x1c7   :  { %v6876_v19 = vrot.slane %v6874_v26, 4  ;;  %v6879_v7 = vrot.slane %v6877_v21, 5  ;;  %v14451_v46 = vrot.slane %v6883_v1, 5  ;;  %v6889_v54 = vrot.slane %v6887_v27, 4  ;;  %v11751_v26 = vld [vmem:[%s16303_s0 + $0x184] sm:$0xf] }
 0x1c8   :  { %10891 = vmatmul.mubr.msk.bf16.gmra.mrb[8].mxu0 %vm980_vm4, %v14200_v0  ;;  %v6900_v58 = vrot.slane %v6898_v39, 4  ;;  %v6903_v63 = vrot.slane %v6901_v40, 5  ;;  %v14455_v4 = vrot.slane %v6907_v59, 5  ;;  %v6913_v3 = vrot.slane %v6911_v49, 4 }
 0x1c9   :  { %10894 = vmatprep.mubr.msk.bf16.mxu0 %vm980_vm4, %v14207_v55  ;;  %v6838_v5 = vsel %vm11923_vm3, %v14422_v42, %v14370_v11  ;;  %v6848_v0 = vsel %vm11923_vm3, %v14432_v33, %v14410_v29  ;;  %v9247_v36 = vcombine.low %v14436_v15, %v14440_v16  ;;  %v6871_v28 = vrot.slane %v6869_v60, 5  ;;  %v11750_v29 = vld [vmem:[%s16303_s0 + $0x17c] sm:$0x1] }
 0x1ca   :  { %10593 = vmatmul.mubr.msk.bf16.gmra.mrb[40].mxu1 %vm980_vm4, %v9240_v45  ;;  %v16366_v45 = vcombine.low %v14149_v50, %v14161_v44  ;;  %v6867_v55 = vrot.slane %v6866_v6, 4  ;;  %v2224_v11 = vrot.slane %v2222_v9, 4  ;;  %v2225_v42 = vrot.slane %v11750_v29, 5  ;;  %v1948_v44 = vld [vmem:[%s16303_s0 + $0x180] sm:$0xe] }
 0x1cb   :  { %v6893_v8 = vshll.u32 %v9872_v48, 16  ;;  %v14491_v25 = vsel %vm12398_vm7, %v9215_v23, %v2222_v9  ;;  %v6880_v52 = vor.u32 %v6879_v7, %v6876_v19  ;;  %v6890_v50 = vor.u32 %v6889_v54, %v14451_v46 }
 0x1cc   :  { %10596 = vmatprep.mubr.msk.bf16.mxu1 %vm980_vm4, %v16366_v45  ;;  %v2229_v21 = vrot.slane %v11751_v26, 5  ;;  %v6862_v1 = vsel %vm11923_vm3, %v14442_v2, %v14427_v18  ;;  %v6904_v27 = vor.u32 %v6903_v63, %v6900_v58  ;;  %v6914_v39 = vor.u32 %v6913_v3, %v14455_v4  ;;  %v11752_v2 = vld [vmem:[%s16303_s0 + $0x188] sm:$0x1]  ;;  %v1949_v3 = vld [vmem:[%s16303_s0 + $0x18c] sm:$0xe] }
 0x1cd   :  { %v6917_v40 = vshll.u32 %v9875_v56, 16  ;;  %v6922_v59 = vshrl.u32 %v9876_v38, 16  ;;  %v6925_v49 = vshll.u32 %v9876_v38, 16  ;;  %v6931_v33 = vshll.u32 %v9877_v62, 16  ;;  %v9882_v26 = vld [vmem:[%s16303_s0 + $0xfc] sm:$0xf] }
 0x1ce   :  { %v6935_v60 = vshrl.u32 %v9877_v62, 16  ;;  %v6872_v6 = vsel %vm11923_vm3, %v6867_v55, %v6871_v28  ;;  %v14509_v23 = vsel %vm12398_vm7, %v2224_v11, %v2225_v42  ;;  %v6895_v20 = vrot.slane %v6893_v8, 5  ;;  %v11753_v28 = vld [vmem:[%s16303_s0 + $0x190] sm:$0xf]  ;;  %v9880_v8 = vld [vmem:[%s16303_s0 + $0xf4] sm:$0xf] }
 0x1cf   :  { %v9216_v9 = vrot.slane %v1948_v44, 9  ;;  %v6881_v48 = vrot.slane %v6880_v52, 4  ;;  %v6891_v19 = vrot.slane %v6890_v50, 4  ;;  %v2231_v18 = vrot.slane %v2229_v21, 4  ;;  %v11754_v50 = vld [vmem:[%s16303_s0 + $0x194] sm:$0x1] }
 0x1d0   :  { %v2232_v7 = vrot.slane %v11752_v2, 5  ;;  %10895 = vmatmul.mubr.msk.bf16.gmra.mrb[12].mxu0 %vm980_vm4, %v14268_v41  ;;  %v6905_v54 = vrot.slane %v6904_v27, 4  ;;  %v6915_v58 = vrot.slane %v6914_v39, 4  ;;  %v6919_v63 = vrot.slane %v6917_v40, 5 }
 0x1d1   :  { %v2236_v56 = vrot.slane %v11753_v28, 5  ;;  %v16367_v38 = vcombine.low %v14165_v47, %v14177_v14  ;;  %10898 = vmatprep.mubr.msk.bf16.mxu0 %vm980_vm4, %v14380_v51  ;;  %v6924_v41 = vrot.slane %v6922_v59, 4  ;;  %v6927_v45 = vrot.slane %v6925_v49, 5  ;;  %v9878_v51 = vld [vmem:[%s16303_s0 + $0xd4] sm:$0x1] }
 0x1d2   :  { %v14528_v55 = vrot.slane %v6931_v33, 5  ;;  %v6937_v11 = vrot.slane %v6935_v60, 4  ;;  %v14534_v29 = vcombine.low %v6838_v5, %v6848_v0  ;;  %v14536_v42 = vcombine.low %v6862_v1, %v6872_v6  ;;  %v9886_v28 = vld [vmem:[%s16303_s0 + $0x10c] sm:$0xf] }
 0x1d3   :  { %10597 = vmatmul.mubr.msk.bf16.gmra.mrb[44].mxu1 %vm980_vm4, %v16367_v38  ;;  %v9248_v47 = vcombine.low %v14491_v25, %v14509_v23  ;;  %v14542_v14 = vsel %vm12398_vm7, %v9216_v9, %v2229_v21  ;;  %v6886_v53 = vsel %vm11923_vm3, %v6881_v48, %v14451_v46  ;;  %v14557_v5 = vsel %vm12398_vm7, %v2231_v18, %v2232_v7 }
 0x1d4   :  { %10600 = vmatprep.mubr.msk.bf16.mxu1 %vm980_vm4, %v9243_v31  ;;  %v6896_v31 = vsel %vm11923_vm3, %v6891_v19, %v6895_v20  ;;  %v9217_v0 = vrot.slane %v1949_v3, 9  ;;  %v6910_v62 = vsel %vm11923_vm3, %v6905_v54, %v14455_v4  ;;  %v6920_v52 = vsel %vm11923_vm3, %v6915_v58, %v6919_v63  ;;  %v9883_v4 = vld [vmem:[%s16303_s0 + $0x100] sm:$0xf]  ;;  %v9881_v20 = vld [vmem:[%s16303_s0 + $0xf8] sm:$0x1] }
 0x1d5   :  { %v2238_v46 = vrot.slane %v2236_v56, 4  ;;  %v2239_v44 = vrot.slane %v11754_v50, 5  ;;  %v6928_v21 = vor.u32 %v6927_v45, %v6924_v41  ;;  %v6938_v1 = vor.u32 %v6937_v11, %v14528_v55  ;;  %v9885_v54 = vld [vmem:[%s16303_s0 + $0x108] sm:$0xf] }
 0x1d6   :  { %v6941_v27 = vshll.u32 %v9878_v51, 16  ;;  %v6946_v39 = vshrl.u32 %v9879_v12, 16  ;;  %v9249_v40 = vcombine.low %v14542_v14, %v14557_v5  ;;  %v6949_v59 = vshll.u32 %v9879_v12, 16  ;;  %v9889_v51 = vld [vmem:[%s16303_s0 + $0x118] sm:$0xf] }
 0x1d7   :  { %v6955_v49 = vshll.u32 %v9880_v8, 16  ;;  %v6959_v33 = vshrl.u32 %v9880_v8, 16  ;;  %v14579_v60 = vcombine.low %v6886_v53, %v6896_v31  ;;  %v14583_v6 = vsel %vm12398_vm7, %v9217_v0, %v2236_v56  ;;  %v9888_v56 = vld [vmem:[%s16303_s0 + $0x114] sm:$0xf] }
 0x1d8   :  { %v6970_v9 = vshrl.u32 %v9882_v26, 16  ;;  %v6973_v48 = vshll.u32 %v9882_v26, 16  ;;  %10899 = vmatmul.mubr.msk.bf16.gmra.mrb[16].mxu0 %vm980_vm4, %v14384_v32  ;;  %v14590_v19 = vcombine.low %v6910_v62, %v6920_v52  ;;  %v14594_v18 = vsel %vm12398_vm7, %v2238_v46, %v2239_v44  ;;  %v9891_v26 = vld [vmem:[%s16303_s0 + $0x120] sm:$0xf] }
 0x1d9   :  { %v6979_v2 = vshll.u32 %v9883_v4, 16  ;;  %v6983_v7 = vshrl.u32 %v9883_v4, 16  ;;  %10902 = vmatprep.mubr.msk.bf16.mxu0 %vm980_vm4, %v14393_v10  ;;  %v14605_v32 = vrot.slane %v6928_v21, 4  ;;  %v14607_v58 = vrot.slane %v6938_v1, 4 }
 0x1da   :  { %v14609_v63 = vrot.slane %v6941_v27, 5  ;;  %v6948_v3 = vrot.slane %v6946_v39, 4  ;;  %v6951_v13 = vrot.slane %v6949_v59, 5  ;;  %v14618_v35 = vrot.slane %v6955_v49, 5  ;;  %v9887_v59 = vld [vmem:[%s16303_s0 + $0x110] sm:$0x1] }
 0x1db   :  { %10601 = vmatmul.mubr.msk.bf16.gmra.mrb[48].mxu1 %vm980_vm4, %v9244_v17  ;;  %v6961_v17 = vrot.slane %v6959_v33, 4  ;;  %v6965_v10 = vshll.u32 %v9881_v20, 16  ;;  %v6972_v38 = vrot.slane %v6970_v9, 4  ;;  %v6975_v41 = vrot.slane %v6973_v48, 5  ;;  %v9892_v9 = vld [vmem:[%s16303_s0 + $0x124] sm:$0xf] }
 0x1dc   :  { %10604 = vmatprep.mubr.msk.bf16.mxu1 %vm980_vm4, %v9245_v22  ;;  %v6994_v45 = vshrl.u32 %v9885_v54, 16  ;;  %v6997_v11 = vshll.u32 %v9885_v54, 16  ;;  %v14629_v57 = vrot.slane %v6979_v2, 5  ;;  %v6985_v22 = vrot.slane %v6983_v7, 4 }
 0x1dd   :  { %v7003_v12 = vshll.u32 %v9886_v28, 16  ;;  %v7007_v53 = vshrl.u32 %v9886_v28, 16  ;;  %v6934_v31 = vsel %vm11923_vm3, %v14605_v32, %v14528_v55  ;;  %v6944_v0 = vsel %vm11923_vm3, %v14607_v58, %v14609_v63  ;;  %v9890_v63 = vld [vmem:[%s16303_s0 + $0x11c] sm:$0x1] }
 0x1de   :  { %v7018_v8 = vshrl.u32 %v9888_v56, 16  ;;  %v7021_v62 = vshll.u32 %v9888_v56, 16  ;;  %v6952_v52 = vor.u32 %v6951_v13, %v6948_v3  ;;  %v6962_v46 = vor.u32 %v6961_v17, %v14618_v35 }
 0x1df   :  { %v7027_v50 = vshll.u32 %v9889_v51, 16  ;;  %v7031_v44 = vshrl.u32 %v9889_v51, 16  ;;  %v6976_v21 = vor.u32 %v6975_v41, %v6972_v38  ;;  %v6989_v1 = vshll.u32 %v9884_v43, 16 }
 0x1e0   :  { %v6996_v27 = vrot.slane %v6994_v45, 4  ;;  %v6999_v55 = vrot.slane %v6997_v11, 5  ;;  %10903 = vmatmul.mubr.msk.bf16.gmra.mrb[20].mxu0 %vm980_vm4, %v14534_v29  ;;  %v6967_v39 = vrot.slane %v6965_v10, 5  ;;  %v6986_v4 = vor.u32 %v6985_v22, %v14629_v57  ;;  %v9894_v11 = vld [vmem:[%s16303_s0 + $0x12c] sm:$0xf] }
 0x1e1   :  { %v14649_v49 = vrot.slane %v7003_v12, 5  ;;  %v7009_v33 = vrot.slane %v7007_v53, 4  ;;  %10906 = vmatprep.mubr.msk.bf16.mxu0 %vm980_vm4, %v14536_v42  ;;  %v7020_v20 = vrot.slane %v7018_v8, 4  ;;  %v7023_v29 = vrot.slane %v7021_v62, 5 }
 0x1e2   :  { %v7042_v48 = vshrl.u32 %v9891_v26, 16  ;;  %v7045_v2 = vshll.u32 %v9891_v26, 16  ;;  %v6953_v7 = vrot.slane %v6952_v52, 4  ;;  %v6963_v61 = vrot.slane %v6962_v46, 4 }
 0x1e3   :  { %10605 = vmatmul.mubr.msk.bf16.gmra.mrb[52].mxu1 %vm980_vm4, %v9246_v24  ;;  %v14664_v37 = vrot.slane %v7027_v50, 5  ;;  %v7033_v24 = vrot.slane %v7031_v44, 4  ;;  %v6977_v54 = vrot.slane %v6976_v21, 4  ;;  %v6991_v42 = vrot.slane %v6989_v1, 5 }
 0x1e4   :  { %10608 = vmatprep.mubr.msk.bf16.mxu1 %vm980_vm4, %v9247_v36  ;;  %v7000_v32 = vor.u32 %v6999_v55, %v6996_v27  ;;  %v7013_v58 = vshll.u32 %v9887_v59, 16  ;;  %v6987_v3 = vrot.slane %v6986_v4, 4  ;;  %v7010_v28 = vor.u32 %v7009_v33, %v14649_v49  ;;  %v9463_v59 = vld [vmem:[%s16303_s0 + $0xf0] sm:$0xf] }
 0x1e5   :  { %v7051_v13 = vshll.u32 %v9892_v9, 16  ;;  %v7055_v15 = vshrl.u32 %v9892_v9, 16  ;;  %v9250_v16 = vcombine.low %v14583_v6, %v14594_v18  ;;  %v7024_v36 = vor.u32 %v7023_v29, %v7020_v20  ;;  %v9896_v20 = vld [vmem:[%s16303_s0 + $0x134] sm:$0x1] }
 0x1e6   :  { %v7044_v17 = vrot.slane %v7042_v48, 4  ;;  %v7047_v10 = vrot.slane %v7045_v2, 5  ;;  %v9943_v56 = vcombine.low %v6934_v31, %v6944_v0  ;;  %v6958_v38 = vsel %vm11923_vm3, %v6953_v7, %v14618_v35  ;;  %v9895_v35 = vld [vmem:[%s16303_s0 + $0x130] sm:$0xf]  ;;  %v9893_v0 = vld [vmem:[%s16303_s0 + $0x128] sm:$0x1] }
 0x1e7   :  { %v7034_v41 = vor.u32 %v7033_v24, %v14664_v37  ;;  %v7037_v45 = vshll.u32 %v9890_v63, 16  ;;  %v6968_v51 = vsel %vm11923_vm3, %v6963_v61, %v6967_v39  ;;  %v6982_v6 = vsel %vm11923_vm3, %v6977_v54, %v14629_v57  ;;  %v9897_v57 = vld [vmem:[%s16303_s0 + $0x138] sm:$0xf] }
 0x1e8   :  { %v7001_v18 = vrot.slane %v7000_v32, 4  ;;  %v7015_v43 = vrot.slane %v7013_v58, 5  ;;  %10907 = vmatmul.mubr.msk.bf16.gmra.mrb[24].mxu0 %vm980_vm4, %v14579_v60  ;;  %v6992_v22 = vsel %vm11923_vm3, %v6987_v3, %v6991_v42  ;;  %v7011_v12 = vrot.slane %v7010_v28, 4 }
 0x1e9   :  { %v14691_v53 = vrot.slane %v7051_v13, 5  ;;  %v7057_v31 = vrot.slane %v7055_v15, 4  ;;  %10910 = vmatprep.mubr.msk.bf16.mxu0 %vm980_vm4, %v14590_v19  ;;  %v7025_v60 = vrot.slane %v7024_v36, 4  ;;  %v7048_v8 = vor.u32 %v7047_v10, %v7044_v17  ;;  %v9898_v19 = vld [vmem:[%s16303_s0 + $0x13c] sm:$0xf] }
 0x1ea   :  { %v7066_v62 = vshrl.u32 %v9894_v11, 16  ;;  %v7069_v52 = vshll.u32 %v9894_v11, 16  ;;  %v7035_v46 = vrot.slane %v7034_v41, 4  ;;  %v7039_v25 = vrot.slane %v7037_v45, 5  ;;  %v9901_v15 = vld [vmem:[%s16303_s0 + $0x148] sm:$0xf] }
 0x1eb   :  { %10609 = vmatmul.mubr.msk.bf16.gmra.mrb[56].mxu1 %vm980_vm4, %v9248_v47  ;;  %v7075_v23 = vshll.u32 %v9895_v35, 16  ;;  %v7079_v47 = vshrl.u32 %v9895_v35, 16  ;;  %v9944_v50 = vcombine.low %v6958_v38, %v6968_v51  ;;  %v14709_v44 = vcombine.low %v6982_v6, %v6992_v22  ;;  %v9903_v10 = vld [vmem:[%s16303_s0 + $0x150] sm:$0xf]  ;;  %v9899_v38 = vld [vmem:[%s16303_s0 + $0x140] sm:$0x1] }
 0x1ec   :  { %10612 = vmatprep.mubr.msk.bf16.mxu1 %vm980_vm4, %v9249_v40  ;;  %v7090_v26 = vshrl.u32 %v9897_v57, 16  ;;  %v7093_v21 = vshll.u32 %v9897_v57, 16  ;;  %v7006_v1 = vsel %vm11923_vm3, %v7001_v18, %v14649_v49  ;;  %v7016_v14 = vsel %vm11923_vm3, %v7011_v12, %v7015_v43  ;;  %v11600_v49 = vld [vmem:[%s16303_s0 + $0xc] sm:$0xff]   ;;  %v11601_v6 = vld [vmem:[%s16303_s0 + $0x18] sm:$0xff]   ;;  %v16368_v22 = vld [vmem:[#allocation6_spill] sm:$0xff] }
 0x1ed   :  { %v7058_v5 = vor.u32 %v7057_v31, %v14691_v53  ;;  %v7061_v40 = vshll.u32 %v9893_v0, 16  ;;  %v7030_v27 = vsel %vm11923_vm3, %v7025_v60, %v14664_v37  ;;  %v14723_v55 = vrot.slane %v7048_v8, 4  ;;  %v9900_v37 = vld [vmem:[%s16303_s0 + $0x144] sm:$0xf]  ;;  %v16369_v12 = vld [vmem:[#allocation7_spill] sm:$0xff] }
 0x1ee   :  { %v7068_v39 = vrot.slane %v7066_v62, 4  ;;  %v7071_v4 = vrot.slane %v7069_v52, 5  ;;  %v7040_v33 = vsel %vm11923_vm3, %v7035_v46, %v7039_v25  ;;  %v14736_v29 = vrot.slane %v7075_v23, 5  ;;  %v11602_v31 = vld [vmem:[%s16303_s0 + $0x24] sm:$0xff]   ;;  %v9904_v60 = vld [vmem:[%s16303_s0 + $0x154] sm:$0xf] }
 0x1ef   :  { %v7081_v9 = vrot.slane %v7079_v47, 4  ;;  %v7099_v48 = vshll.u32 %v9898_v19, 16  ;;  %v7092_v2 = vrot.slane %v7090_v26, 4  ;;  %v7095_v7 = vrot.slane %v7093_v21, 5  ;;  %v9906_v47 = vld [vmem:[%s16303_s0 + $0x15c] sm:$0xf] }
 0x1f0   :  { %v7103_v61 = vshrl.u32 %v9898_v19, 16  ;;  %v3975_v24 = vshrl.u32 %v9463_v59, 16  ;;  %10911 = vmatmul.mubr.msk.bf16.gmra.mrb[28].mxu0 %vm980_vm4, %v9943_v56  ;;  %v9946_v54 = vcombine.low %v7006_v1, %v7016_v14  ;;  %v14742_v42 = vrot.slane %v7058_v5, 4  ;;  %v9907_v21 = vld [vmem:[%s16303_s0 + $0x160] sm:$0xf] }
 0x1f1   :  { %v14744_v32 = vrot.slane %v7061_v40, 5  ;;  %v3978_v58 = vshll.u32 %v9463_v59, 16  ;;  %10914 = vmatprep.mubr.msk.bf16.mxu0 %vm980_vm4, %v9944_v50  ;;  %v14748_v63 = vcombine.low %v7030_v27, %v7040_v33  ;;  %v7054_v3 = vsel %vm11923_vm3, %v14723_v55, %v14691_v53  ;;  %v9902_v14 = vld [vmem:[%s16303_s0 + $0x14c] sm:$0x1]  ;;  %v16371_v33 = vld [vmem:[#allocation2_spill] sm:$0xff] }
 0x1f2   :  { %v7072_v28 = vor.u32 %v7071_v4, %v7068_v39  ;;  %v7085_v13 = vshll.u32 %v9896_v20, 16  ;;  %v7082_v36 = vor.u32 %v7081_v9, %v14736_v29  ;;  %v7114_v17 = vshrl.u32 %v9900_v37, 16 }
 0x1f3   :  { %10613 = vmatmul.mubr.msk.bf16.gmra.mrb[60].mxu1 %vm980_vm4, %v9250_v16  ;;  %v14759_v16 = vrot.slane %v7099_v48, 5  ;;  %v3977_v56 = vrot.slane %v3975_v24, 4  ;;  %v7096_v41 = vor.u32 %v7095_v7, %v7092_v2  ;;  %v7105_v45 = vrot.slane %v7103_v61, 4 }
 0x1f4   :  { %10618 = vmatprep.mubr.msk.bf16.mxu1 %vm980_vm4, %v11600_v49  ;;  %v7117_v11 = vshll.u32 %v9900_v37, 16  ;;  %v3980_v51 = vrot.slane %v3978_v58, 5  ;;  %v7064_v18 = vsel %vm11923_vm3, %v14742_v42, %v14744_v32  ;;  %v7123_v43 = vshll.u32 %v9901_v15, 16  ;;  %v16370_v49 = vld [vmem:[#allocation3_spill] sm:$0xff]  ;;  %v9905_v32 = vld [vmem:[%s16303_s0 + $0x158] sm:$0x1] }
 0x1f5   :  { %v7127_v35 = vshrl.u32 %v9901_v15, 16  ;;  %v3997_v53 = vsel %vm11923_vm3, %v16369_v12, %v16368_v22  ;;  %v14781_v57 = vrot.slane %v7085_v13, 5  ;;  %v7138_v0 = vshrl.u32 %v9903_v10, 16  ;;  %v11603_v13 = vld [vmem:[%s16303_s0 + $0x30] sm:$0xff]   ;;  %v11604_v15 = vld [vmem:[%s16303_s0 + $0x3c] sm:$0xff]  }
 0x1f6   :  { %v7141_v8 = vshll.u32 %v9903_v10, 16  ;;  %v3981_v62 = vor.u32 %v3980_v51, %v3977_v56  ;;  %v14786_v52 = vrot.slane %v7072_v28, 4  ;;  %v14788_v46 = vrot.slane %v7082_v36, 4  ;;  %v9909_v56 = vld [vmem:[%s16303_s0 + $0x168] sm:$0xf] }
 0x1f7   :  { %v7109_v25 = vshll.u32 %v9899_v38, 16  ;;  %v7116_v23 = vrot.slane %v7114_v17, 4  ;;  %v14793_v50 = vrot.slane %v7096_v41, 4  ;;  %v7106_v19 = vor.u32 %v7105_v45, %v14759_v16 }
 0x1f8   :  { %v7119_v26 = vrot.slane %v7117_v11, 5  ;;  %v3982_v1 = vrot.slane %v3981_v62, 4  ;;  %10915 = vmatmul.mubr.msk.bf16.gmra.mrb[32].mxu0 %vm980_vm4, %v14709_v44  ;;  %v14804_v5 = vrot.slane %v7123_v43, 5  ;;  %v7129_v40 = vrot.slane %v7127_v35, 4  ;;  %v9910_v11 = vld [vmem:[%s16303_s0 + $0x16c] sm:$0xf] }
 0x1f9   :  { %v7147_v27 = vshll.u32 %v9904_v60, 16  ;;  %v7151_v55 = vshrl.u32 %v9904_v60, 16  ;;  %10918 = vmatprep.mubr.msk.bf16.mxu0 %vm980_vm4, %v9946_v54  ;;  %v7140_v39 = vrot.slane %v7138_v0, 4  ;;  %v7143_v4 = vrot.slane %v7141_v8, 5  ;;  %v9908_v43 = vld [vmem:[%s16303_s0 + $0x164] sm:$0x1] }
 0x1fa   :  { %v7162_v59 = vshrl.u32 %v9906_v47, 16  ;;  %v3987_v44 = vsel %vm11923_vm3, %v3982_v1, %v16370_v49  ;;  %v7165_v20 = vshll.u32 %v9906_v47, 16  ;;  %v7171_v9 = vshll.u32 %v9907_v21, 16  ;;  %v9911_v47 = vld [vmem:[%s16303_s0 + $0x170] sm:$0x1] }
 0x1fb   :  { %10619 = vmatmul.mubr.msk.bf16.vlgmr.msra.gmra.mrb[0].mxu1 %vm980_vm4, %v11601_v6  ;;  %v7175_v48 = vshrl.u32 %v9907_v21, 16  ;;  %v14813_v2 = vcombine.low %v3987_v44, %v3997_v53  ;;  %v7107_v7 = vrot.slane %v7106_v19, 4  ;;  %v7111_v61 = vrot.slane %v7109_v25, 5  ;;  %v11605_v19 = vld [vmem:[%s16303_s0 + $0x48] sm:$0xff]  }
 0x1fc   :  { %11013 = vmatpush3.bf16.msra.mxu1 %v16371_v33  ;;  %10622 = vmatprep.mubr.msk.bf16.mxu1 %vm980_vm4, %v11602_v31  ;;  %v7120_v37 = vor.u32 %v7119_v26, %v7116_v23  ;;  %v7133_v24 = vshll.u32 %v9902_v14, 16  ;;  %v9948_v54 = vcombine.low %v7054_v3, %v7064_v18  ;;  %v7130_v42 = vor.u32 %v7129_v40, %v14804_v5 }
 0x1fd   :  { %v14819_v58 = vrot.slane %v7147_v27, 5  ;;  %v7153_v28 = vrot.slane %v7151_v55, 4  ;;  %v7078_v3 = vsel %vm11923_vm3, %v14786_v52, %v14736_v29  ;;  %v7088_v36 = vsel %vm11923_vm3, %v14788_v46, %v14781_v57 }
 0x1fe   :  { %v7102_v17 = vsel %vm11923_vm3, %v14793_v50, %v14759_v16  ;;  %v7144_v10 = vor.u32 %v7143_v4, %v7140_v39  ;;  %v7164_v38 = vrot.slane %v7162_v59, 4  ;;  %v7167_v41 = vrot.slane %v7165_v20, 5  ;;  %v9913_v50 = vld [vmem:[%s16303_s0 + $0x178] sm:$0xf]  ;;  %v9916_v4 = vld [vmem:[%s16303_s0 + $0x184] sm:$0xf] }
 0x1ff   :  { %v14842_v45 = vrot.slane %v7171_v9, 5  ;;  %v7177_v29 = vrot.slane %v7175_v48, 4  ;;  %v7112_v51 = vsel %vm11923_vm3, %v7107_v7, %v7111_v61  ;;  %v7121_v6 = vrot.slane %v7120_v37, 4  ;;  %v11606_v59 = vld [vmem:[%s16303_s0 + $0x54] sm:$0xff]  }
 0x200   :  { %v7135_v18 = vrot.slane %v7133_v24, 5  ;;  %v7157_v16 = vshll.u32 %v9905_v32, 16  ;;  %10919 = vmatmul.mubr.msk.bf16.gmra.mrb[36].mxu0 %vm980_vm4, %v14748_v63  ;;  %v7131_v35 = vrot.slane %v7130_v42, 4  ;;  %v7154_v22 = vor.u32 %v7153_v28, %v14819_v58  ;;  %v9912_v63 = vld [vmem:[%s16303_s0 + $0x174] sm:$0xf] }
 0x201   :  { %v7186_v12 = vshrl.u32 %v9909_v56, 16  ;;  %v7189_v53 = vshll.u32 %v9909_v56, 16  ;;  %10922 = vmatprep.mubr.msk.bf16.mxu0 %vm980_vm4, %v9948_v54  ;;  %v7195_v31 = vshll.u32 %v9910_v11, 16  ;;  %v7199_v57 = vshrl.u32 %v9910_v11, 16 }
 0x202   :  { %v7145_v60 = vrot.slane %v7144_v10, 4  ;;  %v7168_v0 = vor.u32 %v7167_v41, %v7164_v38  ;;  %v7178_v8 = vor.u32 %v7177_v29, %v14842_v45  ;;  %v7181_v62 = vshll.u32 %v9908_v43, 16  ;;  %v9918_v29 = vld [vmem:[%s16303_s0 + $0x18c] sm:$0xf] }
 0x203   :  { %10623 = vmatmul.mubr.msk.bf16.gmra.mrb[4].mxu1 %vm980_vm4, %v11603_v13  ;;  %v9949_v52 = vcombine.low %v7078_v3, %v7088_v36  ;;  %v9950_v46 = vcombine.low %v7102_v17, %v7112_v51  ;;  %v7126_v25 = vsel %vm11923_vm3, %v7121_v6, %v14804_v5  ;;  %v7159_v23 = vrot.slane %v7157_v16, 5  ;;  %v9915_v5 = vld [vmem:[%s16303_s0 + $0x180] sm:$0xf]  ;;  %v9914_v17 = vld [vmem:[%s16303_s0 + $0x17c] sm:$0x1] }
 0x204   :  { %10626 = vmatprep.mubr.msk.bf16.mxu1 %vm980_vm4, %v11604_v15  ;;  %v7136_v26 = vsel %vm11923_vm3, %v7131_v35, %v7135_v18  ;;  %v7155_v21 = vrot.slane %v7154_v22, 4  ;;  %v7188_v1 = vrot.slane %v7186_v12, 4  ;;  %v7191_v14 = vrot.slane %v7189_v53, 5  ;;  %v11607_v16 = vld [vmem:[%s16303_s0 + $0x60] sm:$0xff]   ;;  %v9919_v53 = vld [vmem:[%s16303_s0 + $0x190] sm:$0xf] }
 0x205   :  { %v14879_v40 = vrot.slane %v7195_v31, 5  ;;  %v7201_v27 = vrot.slane %v7199_v57, 4  ;;  %v7210_v55 = vshrl.u32 %v9912_v63, 16  ;;  %v7213_v39 = vshll.u32 %v9912_v63, 16  ;;  %v11608_v31 = vld [vmem:[%s16303_s0 + $0x6c] sm:$0xff]  }
 0x206   :  { %v7150_v49 = vsel %vm11923_vm3, %v7145_v60, %v14819_v58  ;;  %v7169_v44 = vrot.slane %v7168_v0, 4  ;;  %v7179_v33 = vrot.slane %v7178_v8, 4  ;;  %v7183_v20 = vrot.slane %v7181_v62, 5  ;;  %v9921_v63 = vld [vmem:[%s16303_s0 + $0x198] sm:$0xf] }
 0x207   :  { %v7219_v9 = vshll.u32 %v9913_v50, 16  ;;  %v7223_v48 = vshrl.u32 %v9913_v50, 16  ;;  %v7234_v7 = vshrl.u32 %v9915_v5, 16  ;;  %v7237_v61 = vshll.u32 %v9915_v5, 16 }
 0x208   :  { %10923 = vmatmul.mubr.msk.bf16.gmra.mrb[40].mxu0 %vm980_vm4, %v9949_v52  ;;  %v7160_v37 = vsel %vm11923_vm3, %v7155_v21, %v7159_v23  ;;  %v7205_v24 = vshll.u32 %v9911_v47, 16  ;;  %v7243_v54 = vshll.u32 %v9916_v4, 16  ;;  %v7247_v42 = vshrl.u32 %v9916_v4, 16  ;;  %v9922_v52 = vld [vmem:[%s16303_s0 + $0x19c] sm:$0xf] }
 0x209   :  { %10926 = vmatprep.mubr.msk.bf16.mxu0 %vm980_vm4, %v9950_v46  ;;  %v7192_v32 = vor.u32 %v7191_v14, %v7188_v1  ;;  %v7202_v58 = vor.u32 %v7201_v27, %v14879_v40  ;;  %v7212_v28 = vrot.slane %v7210_v55, 4  ;;  %v7215_v13 = vrot.slane %v7213_v39, 5 }
 0x20a   :  { %v9951_v15 = vcombine.low %v7126_v25, %v7136_v26  ;;  %v7174_v3 = vsel %vm11923_vm3, %v7169_v44, %v14842_v45  ;;  %v7184_v36 = vsel %vm11923_vm3, %v7179_v33, %v7183_v20  ;;  %v14905_v10 = vrot.slane %v7219_v9, 5  ;;  %v9917_v45 = vld [vmem:[%s16303_s0 + $0x188] sm:$0x1] }
 0x20b   :  { %10627 = vmatmul.mubr.msk.bf16.gmra.mrb[8].mxu1 %vm980_vm4, %v11605_v19  ;;  %v7225_v56 = vrot.slane %v7223_v48, 4  ;;  %v7236_v38 = vrot.slane %v7234_v7, 4  ;;  %v7239_v41 = vrot.slane %v7237_v61, 5  ;;  %v9952_v11 = vcombine.low %v7150_v49, %v7160_v37  ;;  %v11609_v49 = vld [vmem:[%s16303_s0 + $0x78] sm:$0xff]   ;;  %v11610_v9 = vld [vmem:[%s16303_s0 + $0x84] sm:$0xff]  }
 0x20c   :  { %10630 = vmatprep.mubr.msk.bf16.mxu1 %vm980_vm4, %v11606_v59  ;;  %v7207_v51 = vrot.slane %v7205_v24, 5  ;;  %v14913_v6 = vrot.slane %v7243_v54, 5  ;;  %v7249_v18 = vrot.slane %v7247_v42, 4  ;;  %v7193_v43 = vrot.slane %v7192_v32, 4  ;;  %v9920_v7 = vld [vmem:[%s16303_s0 + $0x194] sm:$0x1] }
 0x20d   :  { %v7203_v35 = vrot.slane %v7202_v58, 4  ;;  %v7216_v22 = vor.u32 %v7215_v13, %v7212_v28  ;;  %v7229_v12 = vshll.u32 %v9914_v17, 16  ;;  %v9953_v57 = vcombine.low %v7174_v3, %v7184_v36  ;;  %v9924_v61 = vld [vmem:[%s16303_s0 + $0x1a4] sm:$0xf]  ;;  %v9925_v32 = vld [vmem:[%s16303_s0 + $0x1a8] sm:$0xf] }
 0x20e   :  { %v7226_v60 = vor.u32 %v7225_v56, %v14905_v10  ;;  %v7240_v0 = vor.u32 %v7239_v41, %v7236_v38  ;;  %v7253_v8 = vshll.u32 %v9917_v45, 16  ;;  %v7258_v62 = vshrl.u32 %v9918_v29, 16 }
 0x20f   :  { %v7250_v46 = vor.u32 %v7249_v18, %v14913_v6  ;;  %v7261_v25 = vshll.u32 %v9918_v29, 16  ;;  %v7267_v23 = vshll.u32 %v9919_v53, 16  ;;  %v7271_v47 = vshrl.u32 %v9919_v53, 16 }
 0x210   :  { %10927 = vmatmul.mubr.msk.bf16.gmra.mrb[44].mxu0 %vm980_vm4, %v9951_v15  ;;  %v7198_v50 = vsel %vm11923_vm3, %v7193_v43, %v14879_v40  ;;  %v7208_v19 = vsel %vm11923_vm3, %v7203_v35, %v7207_v51  ;;  %v7217_v26 = vrot.slane %v7216_v22, 4  ;;  %v7231_v21 = vrot.slane %v7229_v12, 5  ;;  %v9923_v15 = vld [vmem:[%s16303_s0 + $0x1a0] sm:$0x1]  ;;  %v11611_v22 = vld [vmem:[%s16303_s0 + $0x90] sm:$0xff]  }
 0x211   :  { %10930 = vmatprep.mubr.msk.bf16.mxu0 %vm980_vm4, %v9952_v11  ;;  %v7282_v1 = vshrl.u32 %v9921_v63, 16  ;;  %v7285_v14 = vshll.u32 %v9921_v63, 16  ;;  %v7291_v5 = vshll.u32 %v9922_v52, 16  ;;  %v7295_v27 = vshrl.u32 %v9922_v52, 16  ;;  %v9926_v63 = vld [vmem:[%s16303_s0 + $0x1ac] sm:$0x1] }
 0x212   :  { %v7227_v55 = vrot.slane %v7226_v60, 4  ;;  %v7241_v39 = vrot.slane %v7240_v0, 4  ;;  %v7255_v4 = vrot.slane %v7253_v8, 5  ;;  %v7260_v59 = vrot.slane %v7258_v62, 4  ;;  %v11612_v60 = vld [vmem:[%s16303_s0 + $0x9c] sm:$0xff]  }
 0x213   :  { %10631 = vmatmul.mubr.msk.bf16.gmra.mrb[12].mxu1 %vm980_vm4, %v11607_v16  ;;  %v7251_v40 = vrot.slane %v7250_v46, 4  ;;  %v7263_v44 = vrot.slane %v7261_v25, 5  ;;  %v7269_v33 = vrot.slane %v7267_v23, 5  ;;  %v7273_v20 = vrot.slane %v7271_v47, 4 }
 0x214   :  { %10634 = vmatprep.mubr.msk.bf16.mxu1 %vm980_vm4, %v11608_v31  ;;  %v9954_v48 = vcombine.low %v7198_v50, %v7208_v19  ;;  %v7284_v37 = vrot.slane %v7282_v1, 4  ;;  %v7287_v24 = vrot.slane %v7285_v14, 5  ;;  %v7293_v54 = vrot.slane %v7291_v5, 5  ;;  %v9992_v1 = vld [vmem:[%s16303_s0 + $0x18] sm:$0xe]  ;;  %v11613_v5 = vld [vmem:[%s16303_s0 + $0xa8] sm:$0xff]  }
 0x215   :  { %v7297_v42 = vrot.slane %v7295_v27, 4  ;;  %v7222_v58 = vsel %vm11923_vm3, %v7217_v26, %v14905_v10  ;;  %v7232_v28 = vsel %vm11923_vm3, %v7227_v55, %v7231_v21  ;;  %v7246_v13 = vsel %vm11923_vm3, %v7241_v39, %v14913_v6  ;;  %v11755_v26 = vld [vmem:[%s16303_s0 + $0x1c] sm:$0xf] }
 0x216   :  { %v7256_v3 = vsel %vm11923_vm3, %v7251_v40, %v7255_v4  ;;  %v7264_v36 = vor.u32 %v7263_v44, %v7260_v59  ;;  %v7274_v17 = vor.u32 %v7273_v20, %v7269_v33  ;;  %v7277_v56 = vshll.u32 %v9920_v7, 16  ;;  %v11614_v59 = vld [vmem:[%s16303_s0 + $0xb4] sm:$0xff]   ;;  %v11756_v44 = vld [vmem:[%s16303_s0 + $0x20] sm:$0x1]  ;;  %v11757_v20 = vld [vmem:[%s16303_s0 + $0x28] sm:$0xf] }
 0x217   :  { %v7306_v10 = vshrl.u32 %v9924_v61, 16  ;;  %v7309_v38 = vshll.u32 %v9924_v61, 16  ;;  %v7315_v41 = vshll.u32 %v9925_v32, 16  ;;  %v7319_v29 = vshrl.u32 %v9925_v32, 16  ;;  %v9993_v61 = vld [vmem:[%s16303_s0 + $0x24] sm:$0xe] }
 0x218   :  { %10931 = vmatmul.mubr.msk.bf16.gmra.mrb[48].mxu0 %vm980_vm4, %v9953_v57  ;;  %v7288_v11 = vor.u32 %v7287_v24, %v7284_v37  ;;  %v7298_v51 = vor.u32 %v7297_v42, %v7293_v54  ;;  %v7301_v45 = vshll.u32 %v9923_v15, 16  ;;  %v9955_v6 = vcombine.low %v7222_v58, %v7232_v28  ;;  %v9994_v32 = vld [vmem:[%s16303_s0 + $0x30] sm:$0xe]  ;;  %v11759_v15 = vld [vmem:[%s16303_s0 + $0x2c] sm:$0x1] }
 0x219   :  { %10934 = vmatprep.mubr.msk.bf16.mxu0 %vm980_vm4, %v9954_v48  ;;  %v9956_v18 = vcombine.low %v7246_v13, %v7256_v3  ;;  %v7265_v16 = vrot.slane %v7264_v36, 4  ;;  %v7275_v43 = vrot.slane %v7274_v17, 4  ;;  %v7279_v35 = vrot.slane %v7277_v56, 5  ;;  %v11615_v36 = vld [vmem:[%s16303_s0 + $0xc0] sm:$0xff]  }
 0x21a   :  { %v7308_v12 = vrot.slane %v7306_v10, 4  ;;  %v7311_v53 = vrot.slane %v7309_v38, 5  ;;  %v7317_v31 = vrot.slane %v7315_v41, 5  ;;  %v7321_v57 = vrot.slane %v7319_v29, 4  ;;  %v11616_v56 = vld [vmem:[%s16303_s0 + $0xe4] sm:$0xff]  }
 0x21b   :  { %10635 = vmatmul.mubr.msk.bf16.gmra.mrb[16].mxu1 %vm980_vm4, %v11609_v49  ;;  %v7289_v0 = vrot.slane %v7288_v11, 4  ;;  %v7299_v8 = vrot.slane %v7298_v51, 4  ;;  %v7303_v62 = vrot.slane %v7301_v45, 5  ;;  %v7270_v52 = vsel %vm11923_vm3, %v7265_v16, %v7269_v33  ;;  %v11760_v41 = vld [vmem:[%s16303_s0 + $0x38] sm:$0x1] }
 0x21c   :  { %10638 = vmatprep.mubr.msk.bf16.mxu1 %vm980_vm4, %v11610_v9  ;;  %v7280_v46 = vsel %vm11923_vm3, %v7275_v43, %v7279_v35  ;;  %v7312_v25 = vor.u32 %v7311_v53, %v7308_v12  ;;  %v7322_v23 = vor.u32 %v7321_v57, %v7317_v31  ;;  %v7325_v47 = vshll.u32 %v9926_v63, 16  ;;  %v9995_v45 = vld [vmem:[%s16303_s0 + $0x3c] sm:$0xe]  ;;  %v9996_v16 = vld [vmem:[%s16303_s0 + $0x48] sm:$0xe] }
 0x21d   :  { %v7294_v50 = vsel %vm11923_vm3, %v7289_v0, %v7293_v54  ;;  %v7304_v19 = vsel %vm11923_vm3, %v7299_v8, %v7303_v62  ;;  %v8009_v21 = vrot.slane %v11755_v26, 5  ;;  %v9957_v14 = vcombine.low %v7270_v52, %v7280_v46  ;;  %v11758_v54 = vld [vmem:[%s16303_s0 + $0x34] sm:$0xf]  ;;  %v11762_v43 = vld [vmem:[%s16303_s0 + $0x4c] sm:$0xf] }
 0x21e   :  { %v9958_v27 = vcombine.low %v7294_v50, %v7304_v19  ;;  %v7313_v55 = vrot.slane %v7312_v25, 4  ;;  %v7323_v39 = vrot.slane %v7322_v23, 4  ;;  %v7327_v4 = vrot.slane %v7325_v47, 5  ;;  %v11763_v12 = vld [vmem:[%s16303_s0 + $0x58] sm:$0xf] }
 0x21f   :  { %v10024_v49 = vrot.slane %v9992_v1, 9  ;;  %v8011_v40 = vrot.slane %v8009_v21, 4  ;;  %v8012_v33 = vrot.slane %v11756_v44, 5  ;;  %v8016_v9 = vrot.slane %v11757_v20, 5  ;;  %v11764_v0 = vld [vmem:[%s16303_s0 + $0x64] sm:$0xf] }
 0x220   :  { %10935 = vmatmul.mubr.msk.bf16.gmra.mrb[52].mxu0 %vm980_vm4, %v9955_v6  ;;  %v7318_v48 = vsel %vm11923_vm3, %v7313_v55, %v7317_v31  ;;  %v7328_v7 = vsel %vm11923_vm3, %v7323_v39, %v7327_v4  ;;  %v8023_v42 = vrot.slane %v11758_v54, 5  ;;  %v10025_v28 = vrot.slane %v9993_v61, 9  ;;  %v11761_v6 = vld [vmem:[%s16303_s0 + $0x40] sm:$0xf]  ;;  %v11765_v52 = vld [vmem:[%s16303_s0 + $0x44] sm:$0x1] }
 0x221   :  { %10938 = vmatprep.mubr.msk.bf16.mxu0 %vm980_vm4, %v9956_v18  ;;  %v8010_v37 = vsel %vm12398_vm7, %v10024_v49, %v8009_v21  ;;  %v8013_v24 = vsel %vm12398_vm7, %v8011_v40, %v8012_v33  ;;  %v9959_v58 = vcombine.low %v7318_v48, %v7328_v7  ;;  %v8018_v13 = vrot.slane %v8016_v9, 4  ;;  %v11766_v50 = vld [vmem:[%s16303_s0 + $0x50] sm:$0x1]  ;;  %v11618_v39 = vld [vmem:[%s16303_s0 + $0xfc] sm:$0xff]   ;;  %v9999_v40 = vld [vmem:[%s16303_s0 + $0x6c] sm:$0xe] }
 0x222   :  { %v8019_v3 = vrot.slane %v11759_v15, 5  ;;  %v10057_v17 = vcombine.low %v8010_v37, %v8013_v24  ;;  %v10026_v10 = vrot.slane %v9994_v32, 9  ;;  %v8025_v38 = vrot.slane %v8023_v42, 4  ;;  %v11617_v21 = vld [vmem:[%s16303_s0 + $0xf0] sm:$0xff]   ;;  %v10000_v37 = vld [vmem:[%s16303_s0 + $0x78] sm:$0xe] }
 0x223   :  { %10639 = vmatmul.mubr.msk.bf16.gmra.mrb[20].mxu1 %vm980_vm4, %v11611_v22  ;;  %v8026_v29 = vrot.slane %v11760_v41, 5  ;;  %v8017_v11 = vsel %vm12398_vm7, %v10025_v28, %v8016_v9  ;;  %v8030_v18 = vrot.slane %v11761_v6, 5  ;;  %v8037_v35 = vrot.slane %v11762_v43, 5  ;;  %v9997_v22 = vld [vmem:[%s16303_s0 + $0x54] sm:$0xe] }
 0x224   :  { %10642 = vmatprep.mubr.msk.bf16.mxu1 %vm980_vm4, %v11612_v60  ;;  %v8020_v51 = vsel %vm12398_vm7, %v8018_v13, %v8019_v3  ;;  %v8044_v53 = vrot.slane %v11763_v12, 5  ;;  %v8024_v31 = vsel %vm12398_vm7, %v10026_v10, %v8023_v42  ;;  %v9998_v60 = vld [vmem:[%s16303_s0 + $0x60] sm:$0xe]  ;;  %v8051_v8 = vrot.slane %v11764_v0, 5  ;;  %v11769_v44 = vld [vmem:[%s16303_s0 + $0x70] sm:$0xf] }
 0x225   :  { %v8027_v57 = vsel %vm12398_vm7, %v8025_v38, %v8026_v29  ;;  %v10058_v62 = vcombine.low %v8017_v11, %v8020_v51  ;;  %v10027_v63 = vrot.slane %v9995_v45, 9  ;;  %v8033_v46 = vrot.slane %v11765_v52, 5  ;;  %v10001_v24 = vld [vmem:[%s16303_s0 + $0x84] sm:$0xe]  ;;  %v11771_v3 = vld [vmem:[%s16303_s0 + $0x74] sm:$0x1] }
 0x226   :  { %v10028_v25 = vrot.slane %v9996_v16, 9  ;;  %v8032_v23 = vrot.slane %v8030_v18, 4  ;;  %v8039_v47 = vrot.slane %v8037_v35, 4  ;;  %v8040_v19 = vrot.slane %v11766_v50, 5  ;;  %v10002_v51 = vld [vmem:[%s16303_s0 + $0x90] sm:$0xe] }
 0x227   :  { %v10029_v26 = vrot.slane %v9997_v22, 9  ;;  %v10059_v1 = vcombine.low %v8024_v31, %v8027_v57  ;;  %v10030_v55 = vrot.slane %v9998_v60, 9  ;;  %v8053_v4 = vrot.slane %v8051_v8, 4  ;;  %v11619_v45 = vld [vmem:[%s16303_s0 + $0x108] sm:$0xff]   ;;  %v11773_v43 = vld [vmem:[%s16303_s0 + $0x80] sm:$0x1] }
 0x228   :  { %10939 = vmatmul.mubr.msk.bf16.gmra.mrb[56].mxu0 %vm980_vm4, %v9957_v14  ;;  %v8046_v14 = vrot.slane %v8044_v53, 4  ;;  %v8058_v33 = vrot.slane %v11769_v44, 5  ;;  %v8031_v20 = vsel %vm12398_vm7, %v10027_v63, %v8030_v18  ;;  %v8034_v9 = vsel %vm12398_vm7, %v8032_v23, %v8033_v46  ;;  %v9460_v22 = vld [vmem:[%s16303_s0 + $0xe4] sm:$0xf]  ;;  %v11620_v12 = vld [vmem:[%s16303_s0 + $0x114] sm:$0xff]  }
 0x229   :  { %10942 = vmatprep.mubr.msk.bf16.mxu0 %vm980_vm4, %v9958_v27  ;;  %v8038_v48 = vsel %vm12398_vm7, %v10028_v25, %v8037_v35  ;;  %v8041_v7 = vsel %vm12398_vm7, %v8039_v47, %v8040_v19  ;;  %v15116_v61 = vsel %vm12398_vm7, %v10029_v26, %v8044_v53  ;;  %v15132_v42 = vsel %vm12398_vm7, %v10030_v55, %v8051_v8  ;;  %v11774_v57 = vld [vmem:[%s16303_s0 + $0x8c] sm:$0x1]  ;;  %v11775_v0 = vld [vmem:[%s16303_s0 + $0x94] sm:$0xf]  ;;  %v10003_v46 = vld [vmem:[%s16303_s0 + $0x9c] sm:$0xe] }
 0x22a   :  { %v10031_v32 = vrot.slane %v9999_v40, 9  ;;  %v8060_v15 = vrot.slane %v8058_v33, 4  ;;  %v10032_v10 = vrot.slane %v10000_v37, 9  ;;  %v10033_v38 = vrot.slane %v10001_v24, 9  ;;  %v11776_v25 = vld [vmem:[%s16303_s0 + $0xa0] sm:$0xf] }
 0x22b   :  { %10643 = vmatmul.mubr.msk.bf16.gmra.mrb[24].mxu1 %vm980_vm4, %v11613_v5  ;;  %v11767_v5 = vld [vmem:[%s16303_s0 + $0x5c] sm:$0x1]  ;;  %v10060_v41 = vcombine.low %v8031_v20, %v8034_v9  ;;  %v10061_v29 = vcombine.low %v8038_v48, %v8041_v7  ;;  %v8068_v35 = vrot.slane %v11773_v43, 5  ;;  %v8075_v60 = vrot.slane %v11774_v57, 5  ;;  %v10004_v47 = vld [vmem:[%s16303_s0 + $0xa8] sm:$0xe] }
 0x22c   :  { %10646 = vmatprep.mubr.msk.bf16.mxu1 %vm980_vm4, %v11614_v59  ;;  %v8047_v27 = vrot.slane %v11767_v5, 5  ;;  %v11768_v59 = vld [vmem:[%s16303_s0 + $0x68] sm:$0x1]  ;;  %v15160_v18 = vsel %vm12398_vm7, %v10031_v32, %v8058_v33  ;;  %v8079_v8 = vrot.slane %v11775_v0, 5  ;;  %v10034_v52 = vrot.slane %v10002_v51, 9 }
 0x22d   :  { %v8054_v49 = vrot.slane %v11768_v59, 5  ;;  %v8086_v23 = vrot.slane %v11776_v25, 5  ;;  %v10005_v50 = vld [vmem:[%s16303_s0 + $0xb4] sm:$0xe]  ;;  %v3951_v19 = vshrl.u32 %v9460_v22, 16  ;;  %v3954_v26 = vshll.u32 %v9460_v22, 16 }
 0x22e   :  { %v15128_v54 = vsel %vm12398_vm7, %v8046_v14, %v8047_v27  ;;  %v11778_v55 = vld [vmem:[%s16303_s0 + $0x98] sm:$0x1]  ;;  %v8081_v40 = vrot.slane %v8079_v8, 4  ;;  %v10035_v44 = vrot.slane %v10003_v46, 9  ;;  %v11781_v48 = vld [vmem:[%s16303_s0 + $0xa4] sm:$0x1] }
 0x22f   :  { %v15140_v13 = vsel %vm12398_vm7, %v8053_v4, %v8054_v49  ;;  %v10062_v11 = vcombine.low %v15116_v61, %v15128_v54  ;;  %v11779_v4 = vld [vmem:[%s16303_s0 + $0xac] sm:$0xf]  ;;  %v11780_v33 = vld [vmem:[%s16303_s0 + $0xb8] sm:$0xf]  ;;  %v8088_v9 = vrot.slane %v8086_v23, 4  ;;  %v8089_v7 = vrot.slane %v11781_v48, 5 }
 0x230   :  { %10943 = vmatmul.mubr.msk.bf16.gmra.mrb[60].mxu0 %vm980_vm4, %v9959_v58  ;;  %v11770_v58 = vld [vmem:[%s16303_s0 + $0x7c] sm:$0xf]  ;;  %v10063_v6 = vcombine.low %v15132_v42, %v15140_v13  ;;  %v8093_v59 = vrot.slane %v11779_v4, 5  ;;  %v8100_v20 = vrot.slane %v11780_v33, 5  ;;  %v10036_v37 = vrot.slane %v10004_v47, 9 }
 0x231   :  { %10948 = vmatprep.mubr.msk.bf16.mxu0 %vm980_vm4, %v10057_v17  ;;  %v8065_v28 = vrot.slane %v11770_v58, 5  ;;  %v11772_v17 = vld [vmem:[%s16303_s0 + $0x88] sm:$0xf]  ;;  %v10037_v24 = vrot.slane %v10005_v50, 9  ;;  %v3953_v32 = vrot.slane %v3951_v19, 4  ;;  %v3956_v58 = vrot.slane %v3954_v26, 5 }
 0x232   :  { %v11785_v22 = vld [vmem:[%s16303_s0 + $0xd0] sm:$0xf]  ;;  %v15267_v57 = vsel %vm12398_vm7, %v8088_v9, %v8089_v7  ;;  %v10007_v0 = vld [vmem:[%s16303_s0 + $0xcc] sm:$0xe]  ;;  %v11787_v47 = vld [vmem:[%s16303_s0 + $0xec] sm:$0x1] }
 0x233   :  { %10647 = vmatmul.mubr.msk.bf16.gmra.mrb[28].mxu1 %vm980_vm4, %v11615_v36  ;;  %v8061_v36 = vrot.slane %v11771_v3, 5  ;;  %v8067_v16 = vrot.slane %v8065_v28, 4  ;;  %v11621_v3 = vld [vmem:[%s16303_s0 + $0x120] sm:$0xff]   ;;  %v15285_v46 = vsel %vm12398_vm7, %v10037_v24, %v8100_v20  ;;  %v3957_v25 = vor.u32 %v3956_v58, %v3953_v32  ;;  %v10008_v19 = vld [vmem:[%s16303_s0 + $0xf0] sm:$0xe] }
 0x234   :  { %10650 = vmatprep.mubr.msk.bf16.mxu1 %vm980_vm4, %v11616_v56  ;;  %v8072_v56 = vrot.slane %v11772_v17, 5  ;;  %v8095_v17 = vrot.slane %v8093_v59, 4  ;;  %v3970_v50 = vshll.u32 %v11787_v47, 16  ;;  %v11788_v26 = vld [vmem:[%s16303_s0 + $0xc8] sm:$0x1]  ;;  %v10039_v42 = vrot.slane %v10007_v0, 9 }
 0x235   :  { %v15173_v53 = vsel %vm12398_vm7, %v8060_v15, %v8061_v36  ;;  %v15211_v27 = vsel %vm12398_vm7, %v8067_v16, %v8068_v35  ;;  %v15237_v36 = vsel %vm12398_vm7, %v10034_v52, %v8079_v8  ;;  %v11784_v16 = vld [vmem:[%s16303_s0 + $0xbc] sm:$0x1]  ;;  %v10006_v35 = vld [vmem:[%s16303_s0 + $0xc0] sm:$0xe]  ;;  %v11786_v8 = vld [vmem:[%s16303_s0 + $0xf4] sm:$0xf] }
 0x236   :  { %v8074_v31 = vrot.slane %v8072_v56, 4  ;;  %v15187_v63 = vsel %vm12398_vm7, %v10033_v38, %v8072_v56  ;;  %v10064_v5 = vcombine.low %v15160_v18, %v15173_v53  ;;  %v11782_v56 = vld [vmem:[%s16303_s0 + $0xb0] sm:$0x1]  ;;  %v11783_v38 = vld [vmem:[%s16303_s0 + $0xc4] sm:$0xf]  ;;  %v8103_v43 = vrot.slane %v11784_v16, 5 }
 0x237   :  { %v8121_v52 = vrot.slane %v11786_v8, 5  ;;  %v10038_v54 = vrot.slane %v10006_v35, 9  ;;  %v3958_v33 = vrot.slane %v3957_v25, 4  ;;  %v3972_v9 = vrot.slane %v3970_v50, 5  ;;  %v9466_v48 = vld [vmem:[%s16303_s0 + $0xfc] sm:$0xf] }
 0x238   :  { %10949 = vmatmul.mubr.msk.bf16.vlgmr.msra.gmra.mrb[0].mxu0 %vm980_vm4, %v10058_v62  ;;  %v15183_v62 = vsel %vm12398_vm7, %v10032_v10, %v8065_v28  ;;  %v15222_v49 = vsel %vm12398_vm7, %v8074_v31, %v8075_v60  ;;  %v8096_v10 = vrot.slane %v11782_v56, 5  ;;  %v15263_v31 = vsel %vm12398_vm7, %v10035_v44, %v8086_v23  ;;  %v11624_v32 = vld [vmem:[%s16303_s0 + $0x144] sm:$0xff]   ;;  %v11791_v35 = vld [vmem:[%s16303_s0 + $0x100] sm:$0xf] }
 0x239   :  { %10952 = vmatprep.mubr.msk.bf16.mxu0 %vm980_vm4, %v10059_v1  ;;  %v15271_v60 = vsel %vm12398_vm7, %v10036_v37, %v8093_v59  ;;  %v8123_v4 = vrot.slane %v8121_v52, 4  ;;  %v11790_v59 = vld [vmem:[%s16303_s0 + $0xf8] sm:$0x1]  ;;  %v10066_v44 = vcombine.low %v15187_v63, %v15222_v49  ;;  %v10068_v7 = vcombine.low %v15263_v31, %v15267_v57  ;;  %v9469_v56 = vld [vmem:[%s16303_s0 + $0x108] sm:$0xf] }
 0x23a   :  { %v15301_v61 = vsel %vm12398_vm7, %v8095_v17, %v8096_v10  ;;  %v4023_v18 = vshrl.u32 %v9469_v56, 16  ;;  %v4026_v53 = vshll.u32 %v9469_v56, 16  ;;  %v11799_v63 = vld [vmem:[%s16303_s0 + $0x110] sm:$0x1] }
 0x23b   :  { %10651 = vmatmul.mubr.msk.bf16.gmra.mrb[32].mxu1 %vm980_vm4, %v11617_v21  ;;  %v11777_v21 = vld [vmem:[%s16303_s0 + $0xe8] sm:$0xf]  ;;  %v10069_v37 = vcombine.low %v15271_v60, %v15301_v61  ;;  %v8138_v49 = vrot.slane %v11799_v63, 5 }
 0x23c   :  { %10654 = vmatprep.mubr.msk.bf16.mxu1 %vm980_vm4, %v11618_v39  ;;  %v3960_v1 = vshll.u32 %v11777_v21, 16  ;;  %v3964_v14 = vshrl.u32 %v11777_v21, 16  ;;  %v8082_v39 = vrot.slane %v11778_v55, 5  ;;  %v8110_v21 = vrot.slane %v11788_v26, 5 }
 0x23d   :  { %v10065_v55 = vcombine.low %v15183_v62, %v15211_v27  ;;  %v11623_v62 = vld [vmem:[%s16303_s0 + $0x138] sm:$0xff]  }
 0x23e   :  { %v15230_v28 = vrot.slane %v3960_v1, 5  ;;  %v3966_v15 = vrot.slane %v3964_v14, 4  ;;  %v15250_v51 = vsel %vm12398_vm7, %v8081_v40, %v8082_v39  ;;  %v10040_v39 = vrot.slane %v10008_v19, 9  ;;  %v11794_v19 = vld [vmem:[%s16303_s0 + $0x104] sm:$0x1] }
 0x23f   :  { %v8124_v40 = vrot.slane %v11790_v59, 5  ;;  %v10067_v27 = vcombine.low %v15237_v36, %v15250_v51  ;;  %v4025_v59 = vrot.slane %v4023_v18, 4 }
 0x240   :  { %10953 = vmatmul.mubr.msk.bf16.gmra.mrb[4].mxu0 %vm980_vm4, %v10060_v41  ;;  %v8107_v41 = vrot.slane %v11783_v38, 5  ;;  %v3967_v23 = vor.u32 %v3966_v15, %v15230_v28  ;;  %v15359_v10 = vsel %vm12398_vm7, %v10040_v39, %v8121_v52  ;;  %v3963_v16 = vsel %vm11923_vm3, %v3958_v33, %v15230_v28 }
 0x241   :  { %10956 = vmatprep.mubr.msk.bf16.mxu0 %vm980_vm4, %v10061_v29  ;;  %v11622_v29 = vld [vmem:[%s16303_s0 + $0x12c] sm:$0xff]   ;;  %v15363_v38 = vsel %vm12398_vm7, %v8123_v4, %v8124_v40  ;;  %v4028_v40 = vrot.slane %v4026_v53, 5  ;;  %v11798_v53 = vld [vmem:[%s16303_s0 + $0x118] sm:$0xf] }
 0x242   :  { %v15340_v58 = vsel %vm12398_vm7, %v10038_v54, %v8107_v41  ;;  %v10073_v50 = vcombine.low %v15359_v10, %v15363_v38  ;;  %v8131_v54 = vrot.slane %v11794_v19, 5  ;;  %v11625_v4 = vld [vmem:[%s16303_s0 + $0x150] sm:$0xff]  }
 0x243   :  { %10655 = vmatmul.mubr.msk.bf16.gmra.mrb[36].mxu1 %vm980_vm4, %v11619_v45  ;;  %v8102_v45 = vrot.slane %v8100_v20, 4  ;;  %v3968_v20 = vrot.slane %v3967_v23, 4  ;;  %v11793_v23 = vld [vmem:[%s16303_s0 + $0x100] sm:$0xf] }
 0x244   :  { %10658 = vmatprep.mubr.msk.bf16.mxu1 %vm980_vm4, %v11620_v12  ;;  %v8114_v12 = vrot.slane %v11785_v22, 5  ;;  %v4008_v22 = vshll.u32 %v11791_v35, 16  ;;  %v8128_v47 = vrot.slane %v11793_v23, 5  ;;  %v10011_v23 = vld [vmem:[%s16303_s0 + $0x114] sm:$0xe] }
 0x245   :  { %v15309_v1 = vsel %vm12398_vm7, %v8102_v45, %v8103_v43  ;;  %v4002_v45 = vshll.u32 %v9466_v48, 16  ;;  %v3973_v43 = vsel %vm11923_vm3, %v3968_v20, %v3972_v9  ;;  %v11626_v9 = vld [vmem:[%s16303_s0 + $0x15c] sm:$0xff]  }
 0x246   :  { %v8116_v13 = vrot.slane %v8114_v12, 4  ;;  %v10070_v24 = vcombine.low %v15285_v46, %v15309_v1 }
 0x247   :  { %v4004_v26 = vrot.slane %v4002_v45, 5 }
 0x248   :  { %10957 = vmatmul.mubr.msk.bf16.gmra.mrb[8].mxu0 %vm980_vm4, %v10062_v11  ;;  %v8109_v11 = vrot.slane %v8107_v41, 4  ;;  %v10009_v41 = vld [vmem:[%s16303_s0 + $0xfc] sm:$0xe] }
 0x249   :  { %10960 = vmatprep.mubr.msk.bf16.mxu0 %vm980_vm4, %v10063_v6  ;;  %v11789_v6 = vld [vmem:[%s16303_s0 + $0xd4] sm:$0x1]  ;;  %v10041_v25 = vrot.slane %v10009_v41, 9 }
 0x24a   :  { %v8117_v14 = vrot.slane %v11789_v6, 5  ;;  %v15344_v15 = vsel %vm12398_vm7, %v8109_v11, %v8110_v21  ;;  %v9472_v21 = vld [vmem:[%s16303_s0 + $0x114] sm:$0xf] }
 0x24b   :  { %10659 = vmatmul.mubr.msk.bf16.gmra.mrb[40].mxu1 %vm980_vm4, %v11621_v3  ;;  %v15348_v3 = vsel %vm12398_vm7, %v10039_v42, %v8114_v12  ;;  %v4012_v12 = vshrl.u32 %v11791_v35, 16  ;;  %v10071_v8 = vcombine.low %v15340_v58, %v15344_v15  ;;  %v15401_v42 = vcombine.low %v3963_v16, %v3973_v43  ;;  %v11797_v16 = vld [vmem:[%s16303_s0 + $0x118] sm:$0xf]  ;;  %v9484_v15 = vld [vmem:[%s16303_s0 + $0x144] sm:$0xf] }
 0x24c   :  { %10662 = vmatprep.mubr.msk.bf16.mxu1 %vm980_vm4, %v11622_v29  ;;  %v15352_v17 = vsel %vm12398_vm7, %v8116_v13, %v8117_v14  ;;  %v3999_v29 = vshrl.u32 %v9466_v48, 16  ;;  %v15403_v13 = vrot.slane %v4008_v22, 5  ;;  %v10010_v14 = vld [vmem:[%s16303_s0 + $0x108] sm:$0xe]  ;;  %v8130_v48 = vrot.slane %v8128_v47, 4 }
 0x24d   :  { %v10072_v52 = vcombine.low %v15348_v3, %v15352_v17  ;;  %v4014_v6 = vrot.slane %v4012_v12, 4  ;;  %v4047_v56 = vshrl.u32 %v9472_v21, 16  ;;  %v4050_v41 = vshll.u32 %v9472_v21, 16 }
 0x24e   :  { %v4001_v11 = vrot.slane %v3999_v29, 4  ;;  %v10042_v45 = vrot.slane %v10010_v14, 9  ;;  %v4056_v43 = vshll.u32 %v11797_v16, 16  ;;  %v4060_v35 = vshrl.u32 %v11797_v16, 16 }
 0x24f   :  { %v15431_v22 = vsel %vm12398_vm7, %v10041_v25, %v8128_v47  ;;  %v4015_v12 = vor.u32 %v4014_v6, %v15403_v13  ;;  %v15455_v36 = vsel %vm12398_vm7, %v8130_v48, %v8131_v54  ;;  %v4052_v47 = vrot.slane %v4050_v41, 5  ;;  %v9475_v6 = vld [vmem:[%s16303_s0 + $0x120] sm:$0xf]  ;;  %v11801_v54 = vld [vmem:[%s16303_s0 + $0x11c] sm:$0x1] }
 0x250   :  { %10961 = vmatmul.mubr.msk.bf16.gmra.mrb[12].mxu0 %vm980_vm4, %v10064_v5  ;;  %v11792_v5 = vld [vmem:[%s16303_s0 + $0x10c] sm:$0xf]  ;;  %v4005_v29 = vor.u32 %v4004_v26, %v4001_v11  ;;  %v15461_v26 = vrot.slane %v4056_v43, 5  ;;  %v4062_v21 = vrot.slane %v4060_v35, 4  ;;  %v11802_v41 = vld [vmem:[%s16303_s0 + $0x124] sm:$0xf] }
 0x251   :  { %10964 = vmatprep.mubr.msk.bf16.mxu0 %vm980_vm4, %v10065_v55  ;;  %v4032_v28 = vshll.u32 %v11792_v5, 16  ;;  %v4036_v0 = vshrl.u32 %v11792_v5, 16  ;;  %v11795_v55 = vld [vmem:[%s16303_s0 + $0x10c] sm:$0xf]  ;;  %v8142_v5 = vrot.slane %v11798_v53, 5  ;;  %v4016_v14 = vrot.slane %v4015_v12, 4 }
 0x252   :  { %v8135_v39 = vrot.slane %v11795_v55, 5  ;;  %v4006_v19 = vrot.slane %v4005_v29, 4  ;;  %v10043_v55 = vrot.slane %v10011_v23, 9  ;;  %v8149_v29 = vrot.slane %v11802_v41, 5  ;;  %v11803_v35 = vld [vmem:[%s16303_s0 + $0x11c] sm:$0x1] }
 0x253   :  { %10663 = vmatmul.mubr.msk.bf16.gmra.mrb[44].mxu1 %vm980_vm4, %v11623_v62  ;;  %v15414_v33 = vrot.slane %v4032_v28, 5  ;;  %v4038_v20 = vrot.slane %v4036_v0, 4  ;;  %v11796_v62 = vld [vmem:[%s16303_s0 + $0x104] sm:$0x1]  ;;  %v11800_v0 = vld [vmem:[%s16303_s0 + $0x110] sm:$0x1]  ;;  %v4063_v43 = vor.u32 %v4062_v21, %v15461_v26 }
 0x254   :  { %10666 = vmatprep.mubr.msk.bf16.mxu1 %vm980_vm4, %v11624_v32  ;;  %v4018_v32 = vshll.u32 %v11796_v62, 16  ;;  %v8137_v18 = vrot.slane %v8135_v39, 4  ;;  %v4042_v25 = vshll.u32 %v11800_v0, 16  ;;  %v15459_v11 = vsel %vm12398_vm7, %v10042_v45, %v8135_v39  ;;  %v11627_v39 = vld [vmem:[%s16303_s0 + $0x168] sm:$0xff]   ;;  %v11628_v62 = vld [vmem:[%s16303_s0 + $0x174] sm:$0xff]  }
 0x255   :  { %v4039_v28 = vor.u32 %v4038_v20, %v15414_v33  ;;  %v4071_v45 = vshrl.u32 %v9475_v6, 16  ;;  %v4074_v16 = vshll.u32 %v9475_v6, 16  ;;  %v4066_v12 = vshll.u32 %v11803_v35, 16 }
 0x256   :  { %v4020_v51 = vrot.slane %v4018_v32, 5  ;;  %v4044_v48 = vrot.slane %v4042_v25, 5  ;;  %v8151_v23 = vrot.slane %v8149_v29, 4 }
 0x257   :  { %v4073_v60 = vrot.slane %v4071_v45, 4  ;;  %v4076_v61 = vrot.slane %v4074_v16, 5  ;;  %v11807_v16 = vld [vmem:[%s16303_s0 + $0x130] sm:$0xf] }
 0x258   :  { %10965 = vmatmul.mubr.msk.bf16.gmra.mrb[16].mxu0 %vm980_vm4, %v10066_v44  ;;  %v4029_v44 = vor.u32 %v4028_v40, %v4025_v59  ;;  %v8145_v59 = vrot.slane %v11801_v54, 5  ;;  %v15474_v40 = vsel %vm12398_vm7, %v8137_v18, %v8138_v49  ;;  %v11804_v18 = vld [vmem:[%s16303_s0 + $0x124] sm:$0xf]  ;;  %v4011_v49 = vsel %vm11923_vm3, %v4006_v19, %v15403_v13  ;;  %v11805_v13 = vld [vmem:[%s16303_s0 + $0x128] sm:$0x1] }
 0x259   :  { %10968 = vmatprep.mubr.msk.bf16.mxu0 %vm980_vm4, %v10067_v27  ;;  %v4049_v27 = vrot.slane %v4047_v56, 4  ;;  %v10012_v56 = vld [vmem:[%s16303_s0 + $0x120] sm:$0xe]  ;;  %v4080_v53 = vshll.u32 %v11804_v18, 16  ;;  %v4084_v63 = vshrl.u32 %v11804_v18, 16  ;;  %v10074_v19 = vcombine.low %v15431_v22, %v15455_v36 }
 0x25a   :  { %v4030_v20 = vrot.slane %v4029_v44, 4  ;;  %v4021_v44 = vsel %vm11923_vm3, %v4016_v14, %v4020_v51  ;;  %v4068_v51 = vrot.slane %v4066_v12, 5  ;;  %v10075_v6 = vcombine.low %v15459_v11, %v15474_v40  ;;  %v9490_v11 = vld [vmem:[%s16303_s0 + $0x15c] sm:$0xf] }
 0x25b   :  { %10667 = vmatmul.mubr.msk.bf16.gmra.mrb[48].mxu1 %vm980_vm4, %v11625_v4  ;;  %v8144_v4 = vrot.slane %v8142_v5, 4  ;;  %v4053_v32 = vor.u32 %v4052_v47, %v4049_v27  ;;  %v15526_v27 = vrot.slane %v4080_v53, 5  ;;  %v4086_v47 = vrot.slane %v4084_v63, 4  ;;  %v11808_v53 = vld [vmem:[%s16303_s0 + $0x13c] sm:$0xf] }
 0x25c   :  { %10670 = vmatprep.mubr.msk.bf16.mxu1 %vm980_vm4, %v11626_v9  ;;  %v4040_v9 = vrot.slane %v4039_v28, 4  ;;  %v15503_v28 = vsel %vm12398_vm7, %v10043_v55, %v8142_v5  ;;  %v4035_v31 = vsel %vm11923_vm3, %v4030_v20, %v15414_v33  ;;  %v8152_v5 = vrot.slane %v11805_v13, 5  ;;  %v11629_v55 = vld [vmem:[%s16303_s0 + $0x180] sm:$0xff]   ;;  %v9481_v20 = vld [vmem:[%s16303_s0 + $0x138] sm:$0xf] }
 0x25d   :  { %v15507_v0 = vsel %vm12398_vm7, %v8144_v4, %v8145_v59  ;;  %v4054_v25 = vrot.slane %v4053_v32, 4  ;;  %v4064_v33 = vrot.slane %v4063_v43, 4  ;;  %v15530_v21 = vcombine.low %v4011_v49, %v4021_v44  ;;  %v11809_v13 = vld [vmem:[%s16303_s0 + $0x130] sm:$0xf] }
 0x25e   :  { %v4045_v57 = vsel %vm11923_vm3, %v4040_v9, %v4044_v48  ;;  %v10076_v14 = vcombine.low %v15503_v28, %v15507_v0  ;;  %v11630_v9 = vld [vmem:[%s16303_s0 + $0x18c] sm:$0xff]   ;;  %v4077_v32 = vor.u32 %v4076_v61, %v4073_v60  ;;  %v4104_v43 = vshll.u32 %v11807_v16, 16  ;;  %v10014_v61 = vld [vmem:[%s16303_s0 + $0x138] sm:$0xe] }
 0x25f   :  { %v15539_v4 = vcombine.low %v4035_v31, %v4045_v57  ;;  %v4059_v48 = vsel %vm11923_vm3, %v4054_v25, %v15461_v26  ;;  %v4069_v45 = vsel %vm11923_vm3, %v4064_v33, %v4068_v51  ;;  %v4087_v26 = vor.u32 %v4086_v47, %v15526_v27 }
 0x260   :  { %10969 = vmatmul.mubr.msk.bf16.gmra.mrb[20].mxu0 %vm980_vm4, %v10068_v7  ;;  %v10044_v7 = vrot.slane %v10012_v56, 9  ;;  %v11806_v56 = vld [vmem:[%s16303_s0 + $0x128] sm:$0x1]  ;;  %v4108_v35 = vshrl.u32 %v11807_v16, 16  ;;  %v4119_v12 = vshrl.u32 %v9481_v20, 16  ;;  %v4122_v18 = vshll.u32 %v9481_v20, 16 }
 0x261   :  { %10972 = vmatprep.mubr.msk.bf16.mxu0 %vm980_vm4, %v10069_v37  ;;  %v9478_v37 = vld [vmem:[%s16303_s0 + $0x12c] sm:$0xf]  ;;  %v4090_v41 = vshll.u32 %v11806_v56, 16  ;;  %v4128_v63 = vshll.u32 %v11808_v53, 16  ;;  %v4132_v49 = vshrl.u32 %v11808_v53, 16  ;;  %v15588_v31 = vcombine.low %v4059_v48, %v4069_v45 }
 0x262   :  { %v15543_v54 = vsel %vm12398_vm7, %v10044_v7, %v8149_v29  ;;  %v4095_v59 = vshrl.u32 %v9478_v37, 16  ;;  %v15564_v29 = vld [vmem:[%s16303_s0 + $0x12c] sm:$0xe]  ;;  %v4078_v57 = vrot.slane %v4077_v32, 4  ;;  %v8156_v58 = vrot.slane %v11809_v13, 5 }
 0x263   :  { %10671 = vmatmul.mubr.msk.bf16.gmra.mrb[52].mxu1 %vm980_vm4, %v11627_v39  ;;  %v4098_v39 = vshll.u32 %v9478_v37, 16  ;;  %v10045_v1 = vrot.slane %v15564_v29, 9  ;;  %v4092_v7 = vrot.slane %v4090_v41, 5  ;;  %v4110_v60 = vrot.slane %v4108_v35, 4  ;;  %v11812_v41 = vld [vmem:[%s16303_s0 + $0x148] sm:$0xf] }
 0x264   :  { %10674 = vmatprep.mubr.msk.bf16.mxu1 %vm980_vm4, %v11628_v62  ;;  %v15556_v62 = vsel %vm12398_vm7, %v8151_v23, %v8152_v5  ;;  %v11810_v5 = vld [vmem:[%s16303_s0 + $0x134] sm:$0x1]  ;;  %v15599_v23 = vrot.slane %v4104_v43, 5  ;;  %v4121_v37 = vrot.slane %v4119_v12, 4  ;;  %v4124_v33 = vrot.slane %v4122_v18, 5 }
 0x265   :  { %v10077_v46 = vcombine.low %v15543_v54, %v15556_v62  ;;  %v4100_v44 = vrot.slane %v4098_v39, 5  ;;  %v8159_v25 = vrot.slane %v11810_v5, 5  ;;  %v15604_v51 = vrot.slane %v4128_v63, 5  ;;  %v11811_v39 = vld [vmem:[%s16303_s0 + $0x13c] sm:$0xf] }
 0x266   :  { %v4134_v47 = vrot.slane %v4132_v49, 4  ;;  %v8163_v20 = vrot.slane %v11811_v39, 5  ;;  %v4146_v48 = vshll.u32 %v9484_v15, 16  ;;  %v4083_v32 = vsel %vm11923_vm3, %v4078_v57, %v15526_v27  ;;  %v11813_v43 = vld [vmem:[%s16303_s0 + $0x134] sm:$0x1] }
 0x267   :  { %v8158_v56 = vrot.slane %v8156_v58, 4  ;;  %v4152_v29 = vshll.u32 %v11812_v41, 16  ;;  %v4156_v45 = vshrl.u32 %v11812_v41, 16  ;;  %v4111_v16 = vor.u32 %v4110_v60, %v15599_v23  ;;  %v11814_v27 = vld [vmem:[%s16303_s0 + $0x140] sm:$0x1] }
 0x268   :  { %10973 = vmatmul.mubr.msk.bf16.gmra.mrb[24].mxu0 %vm980_vm4, %v10070_v24  ;;  %v4097_v24 = vrot.slane %v4095_v59, 4  ;;  %v4114_v35 = vshll.u32 %v11813_v43, 16  ;;  %v10046_v12 = vrot.slane %v10014_v61, 9  ;;  %v8166_v18 = vrot.slane %v11814_v27, 5  ;;  %v11815_v49 = vld [vmem:[%s16303_s0 + $0x140] sm:$0x1] }
 0x269   :  { %10976 = vmatprep.mubr.msk.bf16.mxu0 %vm980_vm4, %v10071_v8  ;;  %v4088_v8 = vrot.slane %v4087_v26, 4  ;;  %v4125_v53 = vor.u32 %v4124_v33, %v4121_v37  ;;  %v4135_v63 = vor.u32 %v4134_v47, %v15604_v51  ;;  %v8165_v17 = vrot.slane %v8163_v20, 4  ;;  %v10015_v61 = vld [vmem:[%s16303_s0 + $0x144] sm:$0xe] }
 0x26a   :  { %v4101_v59 = vor.u32 %v4100_v44, %v4097_v24  ;;  %v4138_v24 = vshll.u32 %v11815_v49, 16  ;;  %v4148_v44 = vrot.slane %v4146_v48, 5  ;;  %v15644_v57 = vsel %vm12398_vm7, %v10045_v1, %v8156_v58  ;;  %v9487_v1 = vld [vmem:[%s16303_s0 + $0x150] sm:$0xf] }
 0x26b   :  { %10675 = vmatmul.mubr.msk.bf16.gmra.mrb[56].mxu1 %vm980_vm4, %v11629_v55  ;;  %v11631_v55 = vld [vmem:[%s16303_s0 + $0x198] sm:$0xff]   ;;  %v4093_v26 = vsel %vm11923_vm3, %v4088_v8, %v4092_v7  ;;  %v15648_v7 = vsel %vm12398_vm7, %v8158_v56, %v8159_v25  ;;  %v15650_v13 = vrot.slane %v4152_v29, 5  ;;  %v4158_v10 = vrot.slane %v4156_v45, 4  ;;  %v11816_v8 = vld [vmem:[%s16303_s0 + $0x148] sm:$0xf] }
 0x26c   :  { %10678 = vmatprep.mubr.msk.bf16.mxu1 %vm980_vm4, %v11630_v9  ;;  %v4143_v9 = vshrl.u32 %v9484_v15, 16  ;;  %v4102_v3 = vrot.slane %v4101_v59, 4  ;;  %v15652_v38 = vcombine.low %v4083_v32, %v4093_v26  ;;  %v4116_v15 = vrot.slane %v4114_v35, 5  ;;  %v11819_v45 = vld [vmem:[%s16303_s0 + $0x14c] sm:$0x1] }
 0x26d   :  { %v15662_v58 = vsel %vm12398_vm7, %v10046_v12, %v8163_v20  ;;  %v4126_v5 = vrot.slane %v4125_v53, 4  ;;  %v4136_v25 = vrot.slane %v4135_v63, 4  ;;  %v4140_v60 = vrot.slane %v4138_v24, 5  ;;  %v10016_v20 = vld [vmem:[%s16303_s0 + $0x150] sm:$0xe] }
 0x26e   :  { %v4107_v37 = vsel %vm11923_vm3, %v4102_v3, %v15599_v23  ;;  %v15672_v33 = vsel %vm12398_vm7, %v8165_v17, %v8166_v18  ;;  %v4159_v39 = vor.u32 %v4158_v10, %v15650_v13  ;;  %v11818_v23 = vld [vmem:[%s16303_s0 + $0x154] sm:$0xf]  ;;  %v4167_v48 = vshrl.u32 %v9487_v1, 16  ;;  %v9493_v10 = vld [vmem:[%s16303_s0 + $0x168] sm:$0xf] }
 0x26f   :  { %v4170_v32 = vshll.u32 %v9487_v1, 16  ;;  %v10047_v41 = vrot.slane %v10015_v61, 9  ;;  %v8173_v26 = vrot.slane %v11819_v45, 5  ;;  %v4141_v43 = vsel %vm11923_vm3, %v4136_v25, %v4140_v60  ;;  %v11820_v35 = vld [vmem:[%s16303_s0 + $0x154] sm:$0xf] }
 0x270   :  { %10977 = vmatmul.mubr.msk.bf16.gmra.mrb[28].mxu0 %vm980_vm4, %v10072_v52  ;;  %v4145_v52 = vrot.slane %v4143_v9, 4  ;;  %v8177_v9 = vrot.slane %v11818_v23, 5  ;;  %v4176_v12 = vshll.u32 %v11820_v35, 16  ;;  %v4180_v27 = vshrl.u32 %v11820_v35, 16 }
 0x271   :  { %10980 = vmatprep.mubr.msk.bf16.mxu0 %vm980_vm4, %v10073_v50  ;;  %v4112_v50 = vrot.slane %v4111_v16, 4  ;;  %v4131_v16 = vsel %vm11923_vm3, %v4126_v5, %v15604_v51  ;;  %v11821_v51 = vld [vmem:[%s16303_s0 + $0x158] sm:$0x1]  ;;  %v4160_v53 = vrot.slane %v4159_v39, 4  ;;  %v4169_v49 = vrot.slane %v4167_v48, 4 }
 0x272   :  { %v4149_v47 = vor.u32 %v4148_v44, %v4145_v52  ;;  %v8180_v18 = vrot.slane %v11821_v51, 5  ;;  %v8179_v63 = vrot.slane %v8177_v9, 4  ;;  %v10078_v40 = vcombine.low %v15644_v57, %v15648_v7  ;;  %v11824_v48 = vld [vmem:[%s16303_s0 + $0x160] sm:$0xf]  ;;  %v11831_v7 = vld [vmem:[%s16303_s0 + $0x170] sm:$0x1] }
 0x273   :  { %10679 = vmatmul.mubr.msk.bf16.gmra.mrb[60].mxu1 %vm980_vm4, %v11631_v55  ;;  %v11817_v55 = vld [vmem:[%s16303_s0 + $0x14c] sm:$0x1]  ;;  %v4117_v56 = vsel %vm11923_vm3, %v4112_v50, %v4116_v15  ;;  %v10079_v24 = vcombine.low %v15662_v58, %v15672_v33  ;;  %v15731_v52 = vrot.slane %v4176_v12, 5  ;;  %v4182_v44 = vrot.slane %v4180_v27, 4  ;;  %v11826_v12 = vld [vmem:[%s16303_s0 + $0x164] sm:$0x1] }
 0x274   :  { %10716 = vmatprep.mubr.msk.bf16.mxu1 %vm980_vm4, %v15401_v42  ;;  %v8170_v42 = vrot.slane %v11816_v8, 5  ;;  %v4162_v59 = vshll.u32 %v11817_v55, 16  ;;  %v4150_v22 = vrot.slane %v4149_v47, 4  ;;  %v10017_v8 = vld [vmem:[%s16303_s0 + $0x15c] sm:$0xe]  ;;  %v4194_v1 = vshll.u32 %v9490_v11, 16 }
 0x275   :  { %v15750_v25 = vsel %vm12398_vm7, %v8179_v63, %v8180_v18  ;;  %v4218_v39 = vshll.u32 %v9493_v10, 16  ;;  %v4183_v23 = vor.u32 %v4182_v44, %v15731_v52  ;;  %v8187_v27 = vrot.slane %v11826_v12, 5  ;;  %v10018_v18 = vld [vmem:[%s16303_s0 + $0x168] sm:$0xe] }
 0x276   :  { %v8172_v29 = vrot.slane %v8170_v42, 4  ;;  %v4164_v36 = vrot.slane %v4162_v59, 5  ;;  %v15723_v3 = vsel %vm12398_vm7, %v10047_v41, %v8170_v42  ;;  %v4155_v50 = vsel %vm11923_vm3, %v4150_v22, %v15650_v13  ;;  %v11822_v13 = vld [vmem:[%s16303_s0 + $0x158] sm:$0x1]  ;;  %v11827_v22 = vld [vmem:[%s16303_s0 + $0x164] sm:$0x1] }
 0x277   :  { %v4191_v42 = vshrl.u32 %v9490_v11, 16  ;;  %v4186_v61 = vshll.u32 %v11822_v13, 16  ;;  %v4215_v59 = vshrl.u32 %v9493_v10, 16  ;;  %v4196_v0 = vrot.slane %v4194_v1, 5  ;;  %v11828_v11 = vld [vmem:[%s16303_s0 + $0x178] sm:$0xf] }
 0x278   :  { %10981 = vmatmul.mubr.msk.bf16.gmra.mrb[32].mxu0 %vm980_vm4, %v10074_v19  ;;  %v10048_v19 = vrot.slane %v10016_v20, 9  ;;  %v15729_v17 = vsel %vm12398_vm7, %v8172_v29, %v8173_v26  ;;  %v4165_v5 = vsel %vm11923_vm3, %v4160_v53, %v4164_v36  ;;  %v15792_v35 = vrot.slane %v4183_v23, 4 }
 0x279   :  { %10984 = vmatprep.mubr.msk.bf16.mxu0 %vm980_vm4, %v10075_v6  ;;  %v15717_v6 = vcombine.low %v4107_v37, %v4117_v56  ;;  %v11823_v37 = vld [vmem:[%s16303_s0 + $0x160] sm:$0xf]  ;;  %v10080_v20 = vcombine.low %v15723_v3, %v15729_v17  ;;  %v4193_v28 = vrot.slane %v4191_v42, 4  ;;  %v15779_v29 = vcombine.low %v4155_v50, %v4165_v5  ;;  %v11829_v42 = vld [vmem:[%s16303_s0 + $0x16c] sm:$0xf] }
 0x27a   :  { %v15741_v15 = vsel %vm12398_vm7, %v10048_v19, %v8177_v9  ;;  %v4200_v47 = vshll.u32 %v11823_v37, 16  ;;  %v4204_v55 = vshrl.u32 %v11823_v37, 16  ;;  %v10049_v9 = vrot.slane %v10017_v8, 9  ;;  %v11830_v37 = vld [vmem:[%s16303_s0 + $0x170] sm:$0x1] }
 0x27b   :  { %10717 = vmatmul.mubr.msk.bf16.vlgmr.msra.gmra.mrb[32].mxu1 %vm980_vm4, %v14813_v2  ;;  %v4172_v2 = vrot.slane %v4170_v32, 5  ;;  %v8184_v32 = vrot.slane %v11824_v48, 5  ;;  %v15785_v54 = vrot.slane %v4186_v61, 5  ;;  %v4217_v26 = vrot.slane %v4215_v59, 4 }
 0x27c   :  { %10720 = vmatprep.mubr.msk.bf16.mxu1 %vm980_vm4, %v15530_v21  ;;  %v15725_v21 = vcombine.low %v4131_v16, %v4141_v43  ;;  %v15787_v62 = vrot.slane %v4200_v47, 5  ;;  %v4220_v16 = vrot.slane %v4218_v39, 5  ;;  %v9496_v43 = vld [vmem:[%s16303_s0 + $0x174] sm:$0xf]  ;;  %v4210_v36 = vshll.u32 %v11827_v22, 16 }
 0x27d   :  { %v4173_v60 = vor.u32 %v4172_v2, %v4169_v49  ;;  %v15802_v19 = vsel %vm12398_vm7, %v10049_v9, %v8184_v32  ;;  %v4197_v51 = vor.u32 %v4196_v0, %v4193_v28  ;;  %v4239_v49 = vshrl.u32 %v9496_v43, 16  ;;  %v11832_v39 = vld [vmem:[%s16303_s0 + $0x178] sm:$0xf]  ;;  %v10020_v22 = vld [vmem:[%s16303_s0 + $0x180] sm:$0xe] }
 0x27e   :  { %v4242_v2 = vshll.u32 %v9496_v43, 16  ;;  %v4248_v44 = vshll.u32 %v11828_v11, 16  ;;  %v4252_v10 = vshrl.u32 %v11828_v11, 16  ;;  %v8191_v1 = vrot.slane %v11829_v42, 5  ;;  %v11834_v43 = vld [vmem:[%s16303_s0 + $0x17c] sm:$0x1] }
 0x27f   :  { %v15783_v45 = vrot.slane %v4173_v60, 4  ;;  %v4221_v5 = vor.u32 %v4220_v16, %v4217_v26  ;;  %v15828_v13 = vrot.slane %v4210_v36, 5  ;;  %v10050_v61 = vrot.slane %v10018_v18, 9  ;;  %v11833_v26 = vld [vmem:[%s16303_s0 + $0x17c] sm:$0x1] }
 0x280   :  { %10985 = vmatmul.mubr.msk.bf16.gmra.mrb[36].mxu0 %vm980_vm4, %v10076_v14  ;;  %v11825_v14 = vld [vmem:[%s16303_s0 + $0x16c] sm:$0xf]  ;;  %v4234_v47 = vshll.u32 %v11830_v37, 16  ;;  %v15842_v57 = vrot.slane %v4197_v51, 4  ;;  %v8198_v23 = vrot.slane %v11832_v39, 5  ;;  %v4244_v58 = vrot.slane %v4242_v2, 5 }
 0x281   :  { %10988 = vmatprep.mubr.msk.bf16.mxu0 %vm980_vm4, %v10077_v46  ;;  %v4224_v56 = vshll.u32 %v11825_v14, 16  ;;  %v4228_v41 = vshrl.u32 %v11825_v14, 16  ;;  %v4206_v46 = vrot.slane %v4204_v55, 4  ;;  %v4179_v50 = vsel %vm11923_vm3, %v15783_v45, %v15731_v52  ;;  %v10019_v55 = vld [vmem:[%s16303_s0 + $0x174] sm:$0xe] }
 0x282   :  { %v15853_v33 = vrot.slane %v4248_v44, 5  ;;  %v8193_v48 = vrot.slane %v8191_v1, 4  ;;  %v10051_v28 = vrot.slane %v10019_v55, 9  ;;  %v4189_v0 = vsel %vm11923_vm3, %v15792_v35, %v15785_v54  ;;  %v9499_v35 = vld [vmem:[%s16303_s0 + $0x180] sm:$0xf] }
 0x283   :  { %10721 = vmatmul.mubr.msk.bf16.gmra.mrb[36].mxu1 %vm980_vm4, %v15539_v4  ;;  %v10081_v4 = vcombine.low %v15741_v15, %v15750_v25  ;;  %v15807_v53 = vrot.slane %v4224_v56, 5  ;;  %v4230_v63 = vrot.slane %v4228_v41, 4  ;;  %v4207_v8 = vor.u32 %v4206_v46, %v15787_v62  ;;  %v11835_v36 = vld [vmem:[%s16303_s0 + $0x184] sm:$0xf]  ;;  %v11837_v15 = vld [vmem:[%s16303_s0 + $0x188] sm:$0x1] }
 0x284   :  { %10724 = vmatprep.mubr.msk.bf16.mxu1 %vm980_vm4, %v15588_v31  ;;  %v8186_v31 = vrot.slane %v8184_v32, 4  ;;  %v4222_v32 = vrot.slane %v4221_v5, 4  ;;  %v4236_v56 = vrot.slane %v4234_v47, 5  ;;  %v8200_v46 = vrot.slane %v8198_v23, 4  ;;  %v11836_v11 = vld [vmem:[%s16303_s0 + $0x184] sm:$0xf] }
 0x285   :  { %v4231_v59 = vor.u32 %v4230_v63, %v15807_v53  ;;  %v4208_v9 = vrot.slane %v4207_v8, 4  ;;  %v8201_v16 = vrot.slane %v11833_v26, 5  ;;  %v4258_v54 = vshll.u32 %v11834_v43, 16  ;;  %v10021_v52 = vld [vmem:[%s16303_s0 + $0x18c] sm:$0xe] }
 0x286   :  { %v15826_v60 = vsel %vm12398_vm7, %v8186_v31, %v8187_v27  ;;  %v4203_v31 = vsel %vm11923_vm3, %v15842_v57, %v15787_v62  ;;  %v4227_v62 = vsel %vm11923_vm3, %v4222_v32, %v15807_v53  ;;  %v15895_v63 = vsel %vm12398_vm7, %v10051_v28, %v8198_v23  ;;  %v9502_v53 = vld [vmem:[%s16303_s0 + $0x18c] sm:$0xf]  ;;  %v11841_v26 = vld [vmem:[%s16303_s0 + $0x19c] sm:$0xf]  ;;  %v10022_v43 = vld [vmem:[%s16303_s0 + $0x198] sm:$0xe] }
 0x287   :  { %v10082_v14 = vcombine.low %v15802_v19, %v15826_v60  ;;  %v4232_v41 = vrot.slane %v4231_v59, 4  ;;  %v8205_v19 = vrot.slane %v11835_v36, 5  ;;  %v4213_v51 = vsel %vm11923_vm3, %v4208_v9, %v15828_v13  ;;  %v11838_v60 = vld [vmem:[%s16303_s0 + $0x190] sm:$0xf] }
 0x288   :  { %10989 = vmatmul.mubr.msk.bf16.gmra.mrb[40].mxu0 %vm980_vm4, %v10078_v40  ;;  %v8194_v40 = vrot.slane %v11831_v7, 5  ;;  %v4266_v2 = vshll.u32 %v9499_v35, 16  ;;  %v4272_v44 = vshll.u32 %v11836_v11, 16  ;;  %v15917_v17 = vsel %vm12398_vm7, %v8200_v46, %v8201_v16 }
 0x289   :  { %10992 = vmatprep.mubr.msk.bf16.mxu0 %vm980_vm4, %v10079_v24  ;;  %v4254_v24 = vrot.slane %v4252_v10, 4  ;;  %v4276_v10 = vshrl.u32 %v11836_v11, 16  ;;  %v4237_v3 = vsel %vm11923_vm3, %v4232_v41, %v4236_v56  ;;  %v10052_v8 = vrot.slane %v10020_v22, 9 }
 0x28a   :  { %v8195_v18 = vsel %vm12398_vm7, %v8193_v48, %v8194_v40  ;;  %v8208_v25 = vrot.slane %v11837_v15, 5  ;;  %v4290_v5 = vshll.u32 %v9502_v53, 16  ;;  %v4296_v13 = vshll.u32 %v11838_v60, 16  ;;  %v9505_v48 = vld [vmem:[%s16303_s0 + $0x198] sm:$0xf] }
 0x28b   :  { %10725 = vmatmul.mubr.msk.bf16.gmra.mrb[40].mxu1 %vm980_vm4, %v15652_v38  ;;  %v4241_v38 = vrot.slane %v4239_v49, 4  ;;  %v4255_v27 = vor.u32 %v4254_v24, %v15853_v33  ;;  %v4263_v49 = vshrl.u32 %v9499_v35, 16  ;;  %v4268_v47 = vrot.slane %v4266_v2, 5  ;;  %v11844_v2 = vld [vmem:[%s16303_s0 + $0x194] sm:$0x1] }
 0x28c   :  { %10728 = vmatprep.mubr.msk.bf16.mxu1 %vm980_vm4, %v15717_v6  ;;  %v15863_v6 = vsel %vm12398_vm7, %v10050_v61, %v8191_v1  ;;  %v4300_v61 = vshrl.u32 %v11838_v60, 16  ;;  %v15927_v55 = vrot.slane %v4272_v44, 5  ;;  %v9534_v57 = vcombine.low %v4179_v50, %v4189_v0  ;;  %v11839_v0 = vld [vmem:[%s16303_s0 + $0x188] sm:$0x1] }
 0x28d   :  { %v4245_v12 = vor.u32 %v4244_v58, %v4241_v38  ;;  %v4256_v1 = vrot.slane %v4255_v27, 4  ;;  %v4265_v37 = vrot.slane %v4263_v49, 4  ;;  %v9535_v7 = vcombine.low %v4203_v31, %v4213_v51  ;;  %v11842_v31 = vld [vmem:[%s16303_s0 + $0x19c] sm:$0xf]  ;;  %v11843_v51 = vld [vmem:[%s16303_s0 + $0x194] sm:$0x1] }
 0x28e   :  { %v10083_v40 = vcombine.low %v15863_v6, %v8195_v18  ;;  %v9536_v59 = vcombine.low %v4227_v62, %v4237_v3  ;;  %v10084_v39 = vcombine.low %v15895_v63, %v15917_v17  ;;  %v8206_v38 = vsel %vm12398_vm7, %v10052_v8, %v8205_v19  ;;  %v11845_v3 = vld [vmem:[%s16303_s0 + $0x1a0] sm:$0x1] }
 0x28f   :  { %v4246_v42 = vrot.slane %v4245_v12, 4  ;;  %v4292_v50 = vrot.slane %v4290_v5, 5  ;;  %v15947_v24 = vrot.slane %v4296_v13, 5  ;;  %v4302_v9 = vrot.slane %v4300_v61, 4 }
 0x290   :  { %10993 = vmatmul.mubr.msk.bf16.gmra.mrb[44].mxu0 %vm980_vm4, %v10080_v20  ;;  %v4260_v20 = vrot.slane %v4258_v54, 5  ;;  %v4269_v32 = vor.u32 %v4268_v47, %v4265_v37  ;;  %v4282_v6 = vshll.u32 %v11839_v0, 16  ;;  %v10053_v41 = vrot.slane %v10021_v52, 9  ;;  %v11846_v37 = vld [vmem:[%s16303_s0 + $0x1a8] sm:$0xf] }
 0x291   :  { %10996 = vmatprep.mubr.msk.bf16.mxu0 %vm980_vm4, %v10081_v4  ;;  %v4287_v4 = vshrl.u32 %v9502_v53, 16  ;;  %v4251_v23 = vsel %vm11923_vm3, %v4246_v42, %v15853_v33  ;;  %v8219_v16 = vrot.slane %v11841_v26, 5  ;;  %v4311_v54 = vshrl.u32 %v9505_v48, 16 }
 0x292   :  { %v4261_v33 = vsel %vm11923_vm3, %v4256_v1, %v4260_v20  ;;  %v4314_v35 = vshll.u32 %v9505_v48, 16  ;;  %v4320_v12 = vshll.u32 %v11842_v31, 16  ;;  %v4324_v27 = vshrl.u32 %v11842_v31, 16 }
 0x293   :  { %10729 = vmatmul.mubr.msk.bf16.gmra.mrb[44].mxu1 %vm980_vm4, %v15725_v21  ;;  %v8207_v21 = vrot.slane %v8205_v19, 4  ;;  %v4289_v45 = vrot.slane %v4287_v4, 4  ;;  %v9537_v22 = vcombine.low %v4251_v23, %v4261_v33  ;;  %v4303_v19 = vor.u32 %v4302_v9, %v15947_v24  ;;  %v11848_v9 = vld [vmem:[%s16303_s0 + $0x1ac] sm:$0x1] }
 0x294   :  { %10732 = vmatprep.mubr.msk.bf16.mxu1 %vm980_vm4, %v15779_v29  ;;  %v4278_v29 = vrot.slane %v4276_v10, 4  ;;  %v4306_v18 = vshll.u32 %v11843_v51, 16  ;;  %v4270_v62 = vrot.slane %v4269_v32, 4  ;;  %v4284_v49 = vrot.slane %v4282_v6, 5 }
 0x295   :  { %v8209_v58 = vsel %vm12398_vm7, %v8207_v21, %v8208_v25  ;;  %v4293_v36 = vor.u32 %v4292_v50, %v4289_v45  ;;  %v8215_v11 = vrot.slane %v11844_v2, 5  ;;  %v10054_v10 = vrot.slane %v10022_v43, 9 }
 0x296   :  { %v4279_v28 = vor.u32 %v4278_v29, %v15927_v55  ;;  %v10085_v56 = vcombine.low %v8206_v38, %v8209_v58  ;;  %v8221_v53 = vrot.slane %v8219_v16, 4  ;;  %v8222_v17 = vrot.slane %v11845_v3, 5 }
 0x297   :  { %v4313_v20 = vrot.slane %v4311_v54, 4  ;;  %v4316_v8 = vrot.slane %v4314_v35, 5  ;;  %v4322_v42 = vrot.slane %v4320_v12, 5  ;;  %v4326_v1 = vrot.slane %v4324_v27, 4 }
 0x298   :  { %10997 = vmatmul.mubr.msk.bf16.gmra.mrb[48].mxu0 %vm980_vm4, %v10082_v14  ;;  %v11840_v14 = vld [vmem:[%s16303_s0 + $0x190] sm:$0xf]  ;;  %v4280_v63 = vrot.slane %v4279_v28, 4  ;;  %v4294_v21 = vrot.slane %v4293_v36, 4  ;;  %v4304_v15 = vrot.slane %v4303_v19, 4  ;;  %v4308_v25 = vrot.slane %v4306_v18, 5 }
 0x299   :  { %11000 = vmatprep.mubr.msk.bf16.mxu0 %vm980_vm4, %v10083_v40  ;;  %v8212_v46 = vrot.slane %v11840_v14, 5  ;;  %v4275_v4 = vsel %vm11923_vm3, %v4270_v62, %v15927_v55  ;;  %v8220_v61 = vsel %vm12398_vm7, %v10054_v10, %v8219_v16  ;;  %v8226_v47 = vrot.slane %v11846_v37, 5 }
 0x29a   :  { %v4285_v60 = vsel %vm11923_vm3, %v4280_v63, %v4284_v49  ;;  %v8223_v55 = vsel %vm12398_vm7, %v8221_v53, %v8222_v17  ;;  %v4317_v29 = vor.u32 %v4316_v8, %v4313_v20  ;;  %v4309_v23 = vsel %vm11923_vm3, %v4304_v15, %v4308_v25 }
 0x29b   :  { %10733 = vmatmul.mubr.msk.bf16.gmra.mrb[48].mxu1 %vm980_vm4, %v9534_v57  ;;  %v8214_v44 = vrot.slane %v8212_v46, 4  ;;  %v8213_v5 = vsel %vm12398_vm7, %v10053_v41, %v8212_v46  ;;  %v4327_v57 = vor.u32 %v4326_v1, %v4322_v42  ;;  %v9538_v38 = vcombine.low %v4275_v4, %v4285_v60 }
 0x29c   :  { %10736 = vmatprep.mubr.msk.bf16.mxu1 %vm980_vm4, %v9535_v7  ;;  %v11847_v7 = vld [vmem:[%s16303_s0 + $0x1a0] sm:$0x1]  ;;  %v10087_v52 = vcombine.low %v8220_v61, %v8223_v55  ;;  %v8228_v50 = vrot.slane %v8226_v47, 4  ;;  %v8229_v48 = vrot.slane %v11848_v9, 5  ;;  %v4318_v32 = vrot.slane %v4317_v29, 4 }
 0x29d   :  { %v8216_v13 = vsel %vm12398_vm7, %v8214_v44, %v8215_v11  ;;  %v4330_v40 = vshll.u32 %v11847_v7, 16  ;;  %v4328_v28 = vrot.slane %v4327_v57, 4 }
 0x29e   :  { %v10086_v58 = vcombine.low %v8213_v5, %v8216_v13  ;;  %v8230_v6 = vsel %vm12398_vm7, %v8228_v50, %v8229_v48 }
 0x29f   :  { %v4332_v0 = vrot.slane %v4330_v40, 5 }
 0x2a0   :  { %11001 = vmatmul.mubr.msk.bf16.gmra.mrb[52].mxu0 %vm980_vm4, %v10084_v39  ;;  %v4299_v39 = vsel %vm11923_vm3, %v4294_v21, %v15947_v24 }
 0x2a1   :  { %11004 = vmatprep.mubr.msk.bf16.mxu0 %vm980_vm4, %v10085_v56  ;;  %v9539_v33 = vcombine.low %v4299_v39, %v4309_v23  ;;  %v4323_v56 = vsel %vm11923_vm3, %v4318_v32, %v4322_v42  ;;  %v4333_v41 = vsel %vm11923_vm3, %v4328_v28, %v4332_v0 }
 0x2a2   :  { %v9540_v46 = vcombine.low %v4323_v56, %v4333_v41 }
 0x2a3   :  { %10737 = vmatmul.mubr.msk.bf16.gmra.mrb[52].mxu1 %vm980_vm4, %v9536_v59  ;;  %v10023_v59 = vld [vmem:[%s16303_s0 + $0x1a4] sm:$0xe] }
 0x2a4   :  { %10740 = vmatprep.mubr.msk.bf16.mxu1 %vm980_vm4, %v9537_v22  ;;  %v10055_v45 = vrot.slane %v10023_v59, 9 }
 0x2a6   :  { %v8227_v24 = vsel %vm12398_vm7, %v10055_v45, %v8226_v47 }
 0x2a7   :  { %v10088_v14 = vcombine.low %v8227_v24, %v8230_v6 }
 0x2a8   :  { %11005 = vmatmul.mubr.msk.bf16.gmra.mrb[56].mxu0 %vm980_vm4, %v10086_v58 }
 0x2a9   :  { %11008 = vmatprep.mubr.msk.bf16.mxu0 %vm980_vm4, %v10087_v52 }
 0x2ab   :  { %10741 = vmatmul.mubr.msk.bf16.gmra.mrb[56].mxu1 %vm980_vm4, %v9538_v38 }
 0x2ac   :  { %10744 = vmatprep.mubr.msk.bf16.mxu1 %vm980_vm4, %v9539_v33 }
 0x2b0   :  { %11009 = vmatmul.mubr.msk.bf16.gmra.mrb[60].mxu0 %vm980_vm4, %v10088_v14 }
 0x2b3   :  { %10745 = vmatmul.mubr.msk.bf16.gmra.mrb[60].mxu1 %vm980_vm4, %v9540_v46 }
 0x2ce   :  { %v10620_v26 = vpop.f32.mrb[0].mxu1 }
 0x2cf   :  { %v3151_v16 = vpop.f32.mrb[1].mxu1 }
 0x2d0   :  { %v10621_v43 = vpop.f32.mrb[2].mxu1 }
 0x2d1   :  { %v3154_v54 = vpop.f32.mrb[3].mxu1 }
 0x2d6   :  { %v10624_v34 = vpop.f32.mrb[4].mxu1 }
 0x2d7   :  { %v3167_v35 = vpop.f32.mrb[5].mxu1 }
 0x2d8   :  { %v10625_v31 = vpop.f32.mrb[6].mxu1 }
 0x2d9   :  { %v3170_v12 = vpop.f32.mrb[7].mxu1 }
 0x2de   :  { %v16032_v27 = vpop.f32.mrb[8].mxu1 }
 0x2df   :  { %v16034_v22 = vpop.f32.mrb[9].mxu1 }
 0x2e0   :  { %v16036_v30 = vpop.f32.mrb[10].mxu1 }
 0x2e1   :  { %v16038_v36 = vpop.f32.mrb[11].mxu1 }
 0x2e6   :  { %v16040_v19 = vpop.f32.mrb[12].mxu1 }
 0x2e7   :  { %v16042_v51 = vpop.f32.mrb[13].mxu1 }
 0x2e8   :  { %v16044_v18 = vpop.f32.mrb[14].mxu1 }
 0x2e9   :  { %v16046_v62 = vpop.f32.mrb[15].mxu1 }
 0x2ee   :  { %v16048_v63 = vpop.f32.mrb[16].mxu1 }
 0x2ef   :  { %v16050_v49 = vpop.f32.mrb[17].mxu1 }
 0x2f0   :  { %v16052_v2 = vpop.f32.mrb[18].mxu1 }
 0x2f1   :  { %v16054_v11 = vpop.f32.mrb[19].mxu1 }
 0x2f6   :  { %v16056_v44 = vpop.f32.mrb[20].mxu1 }
 0x2f7   :  { %v16058_v10 = vpop.f32.mrb[21].mxu1 }
 0x2f8   :  { %v16060_v53 = vpop.f32.mrb[22].mxu1 }
 0x2f9   :  { %v16062_v3 = vpop.f32.mrb[23].mxu1 }
 0x2fe   :  { %v16064_v17 = vpop.f32.mrb[24].mxu1 }
 0x2ff   :  { %v16066_v20 = vpop.f32.mrb[25].mxu1 }
 0x300   :  { %v16068_v8 = vpop.f32.mrb[26].mxu1 }
 0x301   :  { %v16070_v42 = vpop.f32.mrb[27].mxu1 }
 0x306   :  { %v16072_v1 = vpop.f32.mrb[28].mxu1 }
 0x307   :  { %v16074_v21 = vpop.f32.mrb[29].mxu1 }
 0x308   :  { %v16076_v15 = vpop.f32.mrb[30].mxu1 }
 0x309   :  { %v16078_v25 = vpop.f32.mrb[31].mxu1 }
 0x30b   :  { %v10950_v4 = vpop.f32.mrb[0].mxu0 }
 0x30c   :  { %v11014_v5 = vadd.f32 %v10950_v4, %v10620_v26  ;;  %v8462_v60 = vpop.f32.mrb[1].mxu0 }
 0x30d   :  { %v11015_v13 = vadd.f32 %v8462_v60, %v3151_v16  ;;  %v10951_v61 = vpop.f32.mrb[2].mxu0 }
 0x30e   :  { %8783 = vst [vmem:[%s16304_s2 + $0x10] sm:$0xff] %v11014_v5  ;;  %v11016_v37 = vadd.f32 %v10951_v61, %v10621_v43  ;;  %v8465_v47 = vpop.f32.mrb[3].mxu0  ;;  %v8917_v40 = vmul.f32 %v11014_v5, %v11014_v5 }
 0x30f   :  { %8781 = vst [vmem:[%s16304_s2] sm:$0xff] %v11015_v13  ;;  %v11017_v55 = vadd.f32 %v8465_v47, %v3154_v54  ;;  %v8915_v29 = vmul.f32 %v11015_v13, %v11015_v13 }
 0x310   :  { %8784 = vst [vmem:[%s16304_s2 + $0x18] sm:$0xff] %v11016_v37  ;;  %v8918_v52 = vmul.f32 %v11016_v37, %v11016_v37 }
 0x311   :  { %8782 = vst [vmem:[%s16304_s2 + $0x8] sm:$0xff] %v11017_v55  ;;  %v8845_v57 = vadd.f32 %v11017_v55, %v11015_v13  ;;  %v8916_v7 = vmul.f32 %v11017_v55, %v11017_v55 }
 0x313   :  { %v8846_v59 = vadd.f32 %v11014_v5, %v8845_v57  ;;  %v8979_v39 = vadd.f32 %v8916_v7, %v8915_v29  ;;  %v10954_v23 = vpop.f32.mrb[4].mxu0 }
 0x314   :  { %v11018_v38 = vadd.f32 %v10954_v23, %v10624_v34  ;;  %v8478_v58 = vpop.f32.mrb[5].mxu0 }
 0x315   :  { %v8980_v45 = vadd.f32 %v8979_v39, %v8917_v40  ;;  %v11019_v50 = vadd.f32 %v8478_v58, %v3167_v35  ;;  %v8847_v9 = vadd.f32 %v11016_v37, %v8846_v59  ;;  %v10955_v48 = vpop.f32.mrb[6].mxu0 }
 0x316   :  { %8787 = vst [vmem:[%s16304_s2 + $0x30] sm:$0xff] %v11018_v38  ;;  %v11020_v33 = vadd.f32 %v10955_v48, %v10625_v31  ;;  %v8481_v32 = vpop.f32.mrb[7].mxu0  ;;  %v8921_v46 = vmul.f32 %v11018_v38, %v11018_v38 }
 0x317   :  { %8785 = vst [vmem:[%s16304_s2 + $0x20] sm:$0xff] %v11019_v50  ;;  %v8848_v28 = vadd.f32 %v11019_v50, %v8847_v9  ;;  %v8919_v0 = vmul.f32 %v11019_v50, %v11019_v50  ;;  %v8981_v24 = vadd.f32 %v8980_v45, %v8918_v52  ;;  %v11021_v6 = vadd.f32 %v8481_v32, %v3170_v12 }
 0x318   :  { %8788 = vst [vmem:[%s16304_s2 + $0x38] sm:$0xff] %v11020_v33  ;;  %v8922_v35 = vmul.f32 %v11020_v33, %v11020_v33 }
 0x319   :  { %v8982_v56 = vadd.f32 %v8981_v24, %v8919_v0  ;;  %8786 = vst [vmem:[%s16304_s2 + $0x28] sm:$0xff] %v11021_v6  ;;  %v8849_v41 = vadd.f32 %v11021_v6, %v8848_v28  ;;  %v8920_v14 = vmul.f32 %v11021_v6, %v11021_v6 }
 0x31b   :  { %v8850_v26 = vadd.f32 %v11018_v38, %v8849_v41  ;;  %v8983_v16 = vadd.f32 %v8982_v56, %v8920_v14  ;;  %v10958_v43 = vpop.f32.mrb[8].mxu0 }
 0x31c   :  { %v11022_v54 = vadd.f32 %v10958_v43, %v16032_v27  ;;  %v8494_v34 = vpop.f32.mrb[9].mxu0 }
 0x31d   :  { %v8984_v31 = vadd.f32 %v8983_v16, %v8921_v46  ;;  %v11023_v12 = vadd.f32 %v8494_v34, %v16034_v22  ;;  %v8851_v4 = vadd.f32 %v11020_v33, %v8850_v26  ;;  %v10959_v5 = vpop.f32.mrb[10].mxu0 }
 0x31e   :  { %8791 = vst [vmem:[%s16304_s2 + $0x50] sm:$0xff] %v11022_v54  ;;  %v11024_v60 = vadd.f32 %v10959_v5, %v16036_v30  ;;  %v8497_v13 = vpop.f32.mrb[11].mxu0  ;;  %v8925_v29 = vmul.f32 %v11022_v54, %v11022_v54 }
 0x31f   :  { %8789 = vst [vmem:[%s16304_s2 + $0x40] sm:$0xff] %v11023_v12  ;;  %v8852_v61 = vadd.f32 %v11023_v12, %v8851_v4  ;;  %v8923_v27 = vmul.f32 %v11023_v12, %v11023_v12  ;;  %v8985_v37 = vadd.f32 %v8984_v31, %v8922_v35  ;;  %v11025_v47 = vadd.f32 %v8497_v13, %v16038_v36 }
 0x320   :  { %8792 = vst [vmem:[%s16304_s2 + $0x58] sm:$0xff] %v11024_v60  ;;  %v8926_v23 = vmul.f32 %v11024_v60, %v11024_v60 }
 0x321   :  { %v8986_v22 = vadd.f32 %v8985_v37, %v8923_v27  ;;  %8790 = vst [vmem:[%s16304_s2 + $0x48] sm:$0xff] %v11025_v47  ;;  %v8853_v30 = vadd.f32 %v11025_v47, %v8852_v61  ;;  %v8924_v55 = vmul.f32 %v11025_v47, %v11025_v47 }
 0x323   :  { %v8854_v57 = vadd.f32 %v11022_v54, %v8853_v30  ;;  %v8987_v7 = vadd.f32 %v8986_v22, %v8924_v55  ;;  %v10962_v40 = vpop.f32.mrb[12].mxu0 }
 0x324   :  { %v11026_v59 = vadd.f32 %v10962_v40, %v16040_v19  ;;  %v8510_v39 = vpop.f32.mrb[13].mxu0 }
 0x325   :  { %v8988_v36 = vadd.f32 %v8987_v7, %v8925_v29  ;;  %v11027_v38 = vadd.f32 %v8510_v39, %v16042_v51  ;;  %v8855_v58 = vadd.f32 %v11024_v60, %v8854_v57  ;;  %v10963_v52 = vpop.f32.mrb[14].mxu0 }
 0x326   :  { %8795 = vst [vmem:[%s16304_s2 + $0x70] sm:$0xff] %v11026_v59  ;;  %v11028_v45 = vadd.f32 %v10963_v52, %v16044_v18  ;;  %v8513_v50 = vpop.f32.mrb[15].mxu0  ;;  %v8929_v28 = vmul.f32 %v11026_v59, %v11026_v59 }
 0x327   :  { %8793 = vst [vmem:[%s16304_s2 + $0x60] sm:$0xff] %v11027_v38  ;;  %v8856_v9 = vadd.f32 %v11027_v38, %v8855_v58  ;;  %v8927_v19 = vmul.f32 %v11027_v38, %v11027_v38  ;;  %v8989_v48 = vadd.f32 %v8988_v36, %v8926_v23  ;;  %v11029_v33 = vadd.f32 %v8513_v50, %v16046_v62 }
 0x328   :  { %8796 = vst [vmem:[%s16304_s2 + $0x78] sm:$0xff] %v11028_v45  ;;  %v8930_v14 = vmul.f32 %v11028_v45, %v11028_v45 }
 0x329   :  { %v8990_v51 = vadd.f32 %v8989_v48, %v8927_v19  ;;  %8794 = vst [vmem:[%s16304_s2 + $0x68] sm:$0xff] %v11029_v33  ;;  %v8857_v18 = vadd.f32 %v11029_v33, %v8856_v9  ;;  %v8928_v32 = vmul.f32 %v11029_v33, %v11029_v33 }
 0x32b   :  { %v8858_v0 = vadd.f32 %v11026_v59, %v8857_v18  ;;  %v8991_v24 = vadd.f32 %v8990_v51, %v8928_v32  ;;  %v10966_v6 = vpop.f32.mrb[16].mxu0 }
 0x32c   :  { %v11030_v56 = vadd.f32 %v10966_v6, %v16048_v63  ;;  %v8526_v41 = vpop.f32.mrb[17].mxu0 }
 0x32d   :  { %v8992_v62 = vadd.f32 %v8991_v24, %v8929_v28  ;;  %v11031_v46 = vadd.f32 %v8526_v41, %v16050_v49  ;;  %v8859_v26 = vadd.f32 %v11028_v45, %v8858_v0  ;;  %v10967_v16 = vpop.f32.mrb[18].mxu0 }
 0x32e   :  { %8799 = vst [vmem:[%s16304_s2 + $0x90] sm:$0xff] %v11030_v56  ;;  %v11032_v43 = vadd.f32 %v10967_v16, %v16052_v2  ;;  %v8529_v54 = vpop.f32.mrb[19].mxu0  ;;  %v8933_v4 = vmul.f32 %v11030_v56, %v11030_v56 }
 0x32f   :  { %8797 = vst [vmem:[%s16304_s2 + $0x80] sm:$0xff] %v11031_v46  ;;  %v8860_v34 = vadd.f32 %v11031_v46, %v8859_v26  ;;  %v8931_v63 = vmul.f32 %v11031_v46, %v11031_v46  ;;  %v8993_v35 = vadd.f32 %v8992_v62, %v8930_v14  ;;  %v11033_v31 = vadd.f32 %v8529_v54, %v16054_v11 }
 0x330   :  { %8800 = vst [vmem:[%s16304_s2 + $0x98] sm:$0xff] %v11032_v43  ;;  %v8934_v37 = vmul.f32 %v11032_v43, %v11032_v43 }
 0x331   :  { %v8994_v49 = vadd.f32 %v8993_v35, %v8931_v63  ;;  %8798 = vst [vmem:[%s16304_s2 + $0x88] sm:$0xff] %v11033_v31  ;;  %v8861_v2 = vadd.f32 %v11033_v31, %v8860_v34  ;;  %v8932_v12 = vmul.f32 %v11033_v31, %v11033_v31 }
 0x333   :  { %v8862_v5 = vadd.f32 %v11030_v56, %v8861_v2  ;;  %v8995_v60 = vadd.f32 %v8994_v49, %v8932_v12  ;;  %v10970_v13 = vpop.f32.mrb[20].mxu0 }
 0x334   :  { %v11034_v61 = vadd.f32 %v10970_v13, %v16056_v44  ;;  %v8542_v27 = vpop.f32.mrb[21].mxu0 }
 0x335   :  { %v8996_v11 = vadd.f32 %v8995_v60, %v8933_v4  ;;  %v11035_v47 = vadd.f32 %v8542_v27, %v16058_v10  ;;  %v8863_v22 = vadd.f32 %v11032_v43, %v8862_v5  ;;  %v10971_v30 = vpop.f32.mrb[22].mxu0 }
 0x336   :  { %8803 = vst [vmem:[%s16304_s2 + $0xb0] sm:$0xff] %v11034_v61  ;;  %v11036_v55 = vadd.f32 %v10971_v30, %v16060_v53  ;;  %v8545_v29 = vpop.f32.mrb[23].mxu0  ;;  %v8937_v39 = vmul.f32 %v11034_v61, %v11034_v61 }
 0x337   :  { %8801 = vst [vmem:[%s16304_s2 + $0xa0] sm:$0xff] %v11035_v47  ;;  %v8864_v57 = vadd.f32 %v11035_v47, %v8863_v22  ;;  %v8935_v44 = vmul.f32 %v11035_v47, %v11035_v47  ;;  %v8997_v7 = vadd.f32 %v8996_v11, %v8934_v37  ;;  %v11037_v40 = vadd.f32 %v8545_v29, %v16062_v3 }
 0x338   :  { %8804 = vst [vmem:[%s16304_s2 + $0xb8] sm:$0xff] %v11036_v55  ;;  %v8938_v45 = vmul.f32 %v11036_v55, %v11036_v55 }
 0x339   :  { %v8998_v10 = vadd.f32 %v8997_v7, %v8935_v44  ;;  %8802 = vst [vmem:[%s16304_s2 + $0xa8] sm:$0xff] %v11037_v40  ;;  %v8865_v53 = vadd.f32 %v11037_v40, %v8864_v57  ;;  %v8936_v59 = vmul.f32 %v11037_v40, %v11037_v40 }
 0x33b   :  { %v8866_v23 = vadd.f32 %v11034_v61, %v8865_v53  ;;  %v8999_v36 = vadd.f32 %v8998_v10, %v8936_v59  ;;  %v10974_v38 = vpop.f32.mrb[24].mxu0 }
 0x33c   :  { %v11038_v58 = vadd.f32 %v10974_v38, %v16064_v17  ;;  %v8558_v52 = vpop.f32.mrb[25].mxu0 }
 0x33d   :  { %v9000_v3 = vadd.f32 %v8999_v36, %v8937_v39  ;;  %v11039_v50 = vadd.f32 %v8558_v52, %v16066_v20  ;;  %v8867_v9 = vadd.f32 %v11036_v55, %v8866_v23  ;;  %v10975_v19 = vpop.f32.mrb[26].mxu0 }
 0x33e   :  { %8807 = vst [vmem:[%s16304_s2 + $0xd0] sm:$0xff] %v11038_v58  ;;  %v11040_v48 = vadd.f32 %v10975_v19, %v16068_v8  ;;  %v8561_v33 = vpop.f32.mrb[27].mxu0  ;;  %v8941_v0 = vmul.f32 %v11038_v58, %v11038_v58 }
 0x33f   :  { %8805 = vst [vmem:[%s16304_s2 + $0xc0] sm:$0xff] %v11039_v50  ;;  %v8868_v51 = vadd.f32 %v11039_v50, %v8867_v9  ;;  %v8939_v17 = vmul.f32 %v11039_v50, %v11039_v50  ;;  %v9001_v18 = vadd.f32 %v9000_v3, %v8938_v45  ;;  %v11041_v32 = vadd.f32 %v8561_v33, %v16070_v42 }
 0x340   :  { %8808 = vst [vmem:[%s16304_s2 + $0xd8] sm:$0xff] %v11040_v48  ;;  %v8942_v62 = vmul.f32 %v11040_v48, %v11040_v48 }
 0x341   :  { %v9002_v20 = vadd.f32 %v9001_v18, %v8939_v17  ;;  %8806 = vst [vmem:[%s16304_s2 + $0xc8] sm:$0xff] %v11041_v32  ;;  %v8869_v8 = vadd.f32 %v11041_v32, %v8868_v51  ;;  %v8940_v28 = vmul.f32 %v11041_v32, %v11041_v32 }
 0x343   :  { %v8870_v24 = vadd.f32 %v11038_v58, %v8869_v8  ;;  %v9003_v6 = vadd.f32 %v9002_v20, %v8940_v28  ;;  %v10978_v56 = vpop.f32.mrb[28].mxu0 }
 0x344   :  { %v11042_v41 = vadd.f32 %v10978_v56, %v16072_v1  ;;  %v8574_v14 = vpop.f32.mrb[29].mxu0 }
 0x345   :  { %v9004_v42 = vadd.f32 %v9003_v6, %v8941_v0  ;;  %v11043_v46 = vadd.f32 %v8574_v14, %v16074_v21  ;;  %v8871_v26 = vadd.f32 %v11040_v48, %v8870_v24  ;;  %v10979_v16 = vpop.f32.mrb[30].mxu0 }
 0x346   :  { %8811 = vst [vmem:[%s16304_s2 + $0xf0] sm:$0xff] %v11042_v41  ;;  %v11044_v43 = vadd.f32 %v10979_v16, %v16076_v15  ;;  %v8577_v54 = vpop.f32.mrb[31].mxu0  ;;  %v8945_v49 = vmul.f32 %v11042_v41, %v11042_v41 }
 0x347   :  { %8809 = vst [vmem:[%s16304_s2 + $0xe0] sm:$0xff] %v11043_v46  ;;  %v8872_v34 = vadd.f32 %v11043_v46, %v8871_v26  ;;  %v8943_v1 = vmul.f32 %v11043_v46, %v11043_v46  ;;  %v9005_v63 = vadd.f32 %v9004_v42, %v8942_v62  ;;  %v11045_v35 = vadd.f32 %v8577_v54, %v16078_v25 }
 0x348   :  { %8812 = vst [vmem:[%s16304_s2 + $0xf8] sm:$0xff] %v11044_v43  ;;  %v8946_v13 = vmul.f32 %v11044_v43, %v11044_v43 }
 0x349   :  { %v9006_v21 = vadd.f32 %v9005_v63, %v8943_v1  ;;  %8810 = vst [vmem:[%s16304_s2 + $0xe8] sm:$0xff] %v11045_v35  ;;  %v8873_v15 = vadd.f32 %v11045_v35, %v8872_v34  ;;  %v8944_v31 = vmul.f32 %v11045_v35, %v11045_v35 }
 0x34b   :  { %v8874_v2 = vadd.f32 %v11042_v41, %v8873_v15  ;;  %v9007_v12 = vadd.f32 %v9006_v21, %v8944_v31  ;;  %v10982_v4 = vpop.f32.mrb[32].mxu0 }
 0x34c   :  { %v8590_v60 = vpop.f32.mrb[33].mxu0 }
 0x34d   :  { %v9008_v61 = vadd.f32 %v9007_v12, %v8945_v49  ;;  %v8875_v37 = vadd.f32 %v11044_v43, %v8874_v2  ;;  %v10983_v11 = vpop.f32.mrb[34].mxu0 }
 0x34e   :  { %v10718_v5 = vpop.f32.mrb[32].mxu1  ;;  %v8593_v30 = vpop.f32.mrb[35].mxu0 }
 0x34f   :  { %v11046_v25 = vadd.f32 %v10982_v4, %v10718_v5  ;;  %v4693_v27 = vpop.f32.mrb[33].mxu1  ;;  %v9009_v55 = vadd.f32 %v9008_v61, %v8946_v13 }
 0x350   :  { %v11047_v47 = vadd.f32 %v8590_v60, %v4693_v27  ;;  %v10719_v22 = vpop.f32.mrb[34].mxu1 }
 0x351   :  { %8815 = vst [vmem:[%s16304_s2 + $0x110] sm:$0xff] %v11046_v25  ;;  %v11048_v29 = vadd.f32 %v10983_v11, %v10719_v22  ;;  %v4696_v57 = vpop.f32.mrb[35].mxu1  ;;  %v8949_v23 = vmul.f32 %v11046_v25, %v11046_v25 }
 0x352   :  { %8813 = vst [vmem:[%s16304_s2 + $0x100] sm:$0xff] %v11047_v47  ;;  %v8876_v44 = vadd.f32 %v11047_v47, %v8875_v37  ;;  %v8947_v7 = vmul.f32 %v11047_v47, %v11047_v47  ;;  %v11049_v40 = vadd.f32 %v8593_v30, %v4696_v57 }
 0x353   :  { %8816 = vst [vmem:[%s16304_s2 + $0x118] sm:$0xff] %v11048_v29  ;;  %v10986_v39 = vpop.f32.mrb[36].mxu0  ;;  %v8950_v9 = vmul.f32 %v11048_v29, %v11048_v29 }
 0x354   :  { %v9010_v10 = vadd.f32 %v9009_v55, %v8947_v7  ;;  %8814 = vst [vmem:[%s16304_s2 + $0x108] sm:$0xff] %v11049_v40  ;;  %v8877_v53 = vadd.f32 %v11049_v40, %v8876_v44  ;;  %v8948_v59 = vmul.f32 %v11049_v40, %v11049_v40  ;;  %v8606_v52 = vpop.f32.mrb[37].mxu0 }
 0x355   :  { %v10987_v50 = vpop.f32.mrb[38].mxu0 }
 0x356   :  { %v8878_v36 = vadd.f32 %v11046_v25, %v8877_v53  ;;  %v9011_v38 = vadd.f32 %v9010_v10, %v8948_v59  ;;  %v10722_v58 = vpop.f32.mrb[36].mxu1  ;;  %v8609_v17 = vpop.f32.mrb[39].mxu0 }
 0x357   :  { %v11050_v45 = vadd.f32 %v10986_v39, %v10722_v58  ;;  %v4709_v3 = vpop.f32.mrb[37].mxu1 }
 0x358   :  { %v9012_v19 = vadd.f32 %v9011_v38, %v8949_v23  ;;  %v11051_v48 = vadd.f32 %v8606_v52, %v4709_v3  ;;  %v8879_v33 = vadd.f32 %v11048_v29, %v8878_v36  ;;  %v10723_v51 = vpop.f32.mrb[38].mxu1 }
 0x359   :  { %8819 = vst [vmem:[%s16304_s2 + $0x130] sm:$0xff] %v11050_v45  ;;  %v11052_v18 = vadd.f32 %v10987_v50, %v10723_v51  ;;  %v4712_v32 = vpop.f32.mrb[39].mxu1  ;;  %v8953_v14 = vmul.f32 %v11050_v45, %v11050_v45 }
 0x35a   :  { %8817 = vst [vmem:[%s16304_s2 + $0x120] sm:$0xff] %v11051_v48  ;;  %v8880_v20 = vadd.f32 %v11051_v48, %v8879_v33  ;;  %v8951_v8 = vmul.f32 %v11051_v48, %v11051_v48  ;;  %v9013_v28 = vadd.f32 %v9012_v19, %v8950_v9  ;;  %v11053_v0 = vadd.f32 %v8609_v17, %v4712_v32 }
 0x35b   :  { %8820 = vst [vmem:[%s16304_s2 + $0x138] sm:$0xff] %v11052_v18  ;;  %v10990_v41 = vpop.f32.mrb[40].mxu0  ;;  %v8954_v34 = vmul.f32 %v11052_v18, %v11052_v18 }
 0x35c   :  { %v9014_v24 = vadd.f32 %v9013_v28, %v8951_v8  ;;  %8818 = vst [vmem:[%s16304_s2 + $0x128] sm:$0xff] %v11053_v0  ;;  %v8881_v6 = vadd.f32 %v11053_v0, %v8880_v20  ;;  %v8952_v56 = vmul.f32 %v11053_v0, %v11053_v0  ;;  %v8622_v26 = vpop.f32.mrb[41].mxu0 }
 0x35d   :  { %v10991_v54 = vpop.f32.mrb[42].mxu0 }
 0x35e   :  { %v8882_v62 = vadd.f32 %v11050_v45, %v8881_v6  ;;  %v9015_v42 = vadd.f32 %v9014_v24, %v8952_v56  ;;  %v10726_v46 = vpop.f32.mrb[40].mxu1  ;;  %v8625_v15 = vpop.f32.mrb[43].mxu0 }
 0x35f   :  { %v11054_v16 = vadd.f32 %v10990_v41, %v10726_v46  ;;  %v4725_v43 = vpop.f32.mrb[41].mxu1 }
 0x360   :  { %v9016_v1 = vadd.f32 %v9015_v42, %v8953_v14  ;;  %v11055_v63 = vadd.f32 %v8622_v26, %v4725_v43  ;;  %v8883_v35 = vadd.f32 %v11052_v18, %v8882_v62  ;;  %v10727_v21 = vpop.f32.mrb[42].mxu1 }
 0x361   :  { %8823 = vst [vmem:[%s16304_s2 + $0x150] sm:$0xff] %v11054_v16  ;;  %v11056_v31 = vadd.f32 %v10991_v54, %v10727_v21  ;;  %v4728_v49 = vpop.f32.mrb[43].mxu1  ;;  %v8957_v27 = vmul.f32 %v11054_v16, %v11054_v16 }
 0x362   :  { %8821 = vst [vmem:[%s16304_s2 + $0x140] sm:$0xff] %v11055_v63  ;;  %v8884_v2 = vadd.f32 %v11055_v63, %v8883_v35  ;;  %v8955_v12 = vmul.f32 %v11055_v63, %v11055_v63  ;;  %v9017_v4 = vadd.f32 %v9016_v1, %v8954_v34  ;;  %v11057_v5 = vadd.f32 %v8625_v15, %v4728_v49 }
 0x363   :  { %8824 = vst [vmem:[%s16304_s2 + $0x158] sm:$0xff] %v11056_v31  ;;  %v10994_v25 = vpop.f32.mrb[44].mxu0  ;;  %v8958_v57 = vmul.f32 %v11056_v31, %v11056_v31 }
 0x364   :  { %v9018_v60 = vadd.f32 %v9017_v4, %v8955_v12  ;;  %8822 = vst [vmem:[%s16304_s2 + $0x148] sm:$0xff] %v11057_v5  ;;  %v8885_v13 = vadd.f32 %v11057_v5, %v8884_v2  ;;  %v8956_v61 = vmul.f32 %v11057_v5, %v11057_v5  ;;  %v8638_v22 = vpop.f32.mrb[45].mxu0 }
 0x365   :  { %v10995_v29 = vpop.f32.mrb[46].mxu0 }
 0x366   :  { %v8886_v37 = vadd.f32 %v11054_v16, %v8885_v13  ;;  %v9019_v11 = vadd.f32 %v9018_v60, %v8956_v61  ;;  %v10730_v47 = vpop.f32.mrb[44].mxu1  ;;  %v8641_v53 = vpop.f32.mrb[47].mxu0 }
 0x367   :  { %v11058_v30 = vadd.f32 %v10994_v25, %v10730_v47  ;;  %v4741_v55 = vpop.f32.mrb[45].mxu1 }
 0x368   :  { %v9020_v44 = vadd.f32 %v9019_v11, %v8957_v27  ;;  %v11059_v7 = vadd.f32 %v8638_v22, %v4741_v55  ;;  %v8887_v40 = vadd.f32 %v11056_v31, %v8886_v37  ;;  %v10731_v10 = vpop.f32.mrb[46].mxu1 }
 0x369   :  { %8827 = vst [vmem:[%s16304_s2 + $0x170] sm:$0xff] %v11058_v30  ;;  %v11060_v59 = vadd.f32 %v10995_v29, %v10731_v10  ;;  %v4744_v39 = vpop.f32.mrb[47].mxu1  ;;  %v8961_v9 = vmul.f32 %v11058_v30, %v11058_v30 }
 0x36a   :  { %8825 = vst [vmem:[%s16304_s2 + $0x160] sm:$0xff] %v11059_v7  ;;  %v8888_v23 = vadd.f32 %v11059_v7, %v8887_v40  ;;  %v8959_v36 = vmul.f32 %v11059_v7, %v11059_v7  ;;  %v9021_v38 = vadd.f32 %v9020_v44, %v8958_v57  ;;  %v11061_v58 = vadd.f32 %v8641_v53, %v4744_v39 }
 0x36b   :  { %8828 = vst [vmem:[%s16304_s2 + $0x178] sm:$0xff] %v11060_v59  ;;  %v10998_v50 = vpop.f32.mrb[48].mxu0  ;;  %v8962_v20 = vmul.f32 %v11060_v59, %v11060_v59 }
 0x36c   :  { %v9022_v52 = vadd.f32 %v9021_v38, %v8959_v36  ;;  %8826 = vst [vmem:[%s16304_s2 + $0x168] sm:$0xff] %v11061_v58  ;;  %v8889_v45 = vadd.f32 %v11061_v58, %v8888_v23  ;;  %v8960_v3 = vmul.f32 %v11061_v58, %v11061_v58  ;;  %v8654_v51 = vpop.f32.mrb[49].mxu0 }
 0x36d   :  { %v10999_v32 = vpop.f32.mrb[50].mxu0 }
 0x36e   :  { %v8890_v19 = vadd.f32 %v11058_v30, %v8889_v45  ;;  %v9023_v48 = vadd.f32 %v9022_v52, %v8960_v3  ;;  %v10734_v33 = vpop.f32.mrb[48].mxu1  ;;  %v8657_v6 = vpop.f32.mrb[51].mxu0 }
 0x36f   :  { %v11062_v17 = vadd.f32 %v10998_v50, %v10734_v33  ;;  %v4757_v18 = vpop.f32.mrb[49].mxu1 }
 0x370   :  { %v9024_v8 = vadd.f32 %v9023_v48, %v8961_v9  ;;  %v11063_v28 = vadd.f32 %v8654_v51, %v4757_v18  ;;  %v8891_v0 = vadd.f32 %v11060_v59, %v8890_v19  ;;  %v10735_v24 = vpop.f32.mrb[50].mxu1 }
 0x371   :  { %8831 = vst [vmem:[%s16304_s2 + $0x190] sm:$0xff] %v11062_v17  ;;  %v11064_v56 = vadd.f32 %v10999_v32, %v10735_v24  ;;  %v4760_v41 = vpop.f32.mrb[51].mxu1  ;;  %v8965_v34 = vmul.f32 %v11062_v17, %v11062_v17 }
 0x372   :  { %8829 = vst [vmem:[%s16304_s2 + $0x180] sm:$0xff] %v11063_v28  ;;  %v8892_v14 = vadd.f32 %v11063_v28, %v8891_v0  ;;  %v8963_v62 = vmul.f32 %v11063_v28, %v11063_v28  ;;  %v9025_v42 = vadd.f32 %v9024_v8, %v8962_v20  ;;  %v11065_v46 = vadd.f32 %v8657_v6, %v4760_v41 }
 0x373   :  { %8832 = vst [vmem:[%s16304_s2 + $0x198] sm:$0xff] %v11064_v56  ;;  %v11002_v54 = vpop.f32.mrb[52].mxu0  ;;  %v8966_v2 = vmul.f32 %v11064_v56, %v11064_v56 }
 0x374   :  { %v9026_v26 = vadd.f32 %v9025_v42, %v8963_v62  ;;  %8830 = vst [vmem:[%s16304_s2 + $0x188] sm:$0xff] %v11065_v46  ;;  %v8893_v16 = vadd.f32 %v11065_v46, %v8892_v14  ;;  %v8964_v43 = vmul.f32 %v11065_v46, %v11065_v46  ;;  %v8670_v21 = vpop.f32.mrb[53].mxu0 }
 0x375   :  { %v11003_v49 = vpop.f32.mrb[54].mxu0 }
 0x376   :  { %v8894_v1 = vadd.f32 %v11062_v17, %v8893_v16  ;;  %v9027_v63 = vadd.f32 %v9026_v26, %v8964_v43  ;;  %v10738_v35 = vpop.f32.mrb[52].mxu1  ;;  %v8673_v13 = vpop.f32.mrb[55].mxu0 }
 0x377   :  { %v11066_v15 = vadd.f32 %v11002_v54, %v10738_v35  ;;  %v4773_v31 = vpop.f32.mrb[53].mxu1 }
 0x378   :  { %v9028_v12 = vadd.f32 %v9027_v63, %v8965_v34  ;;  %v11067_v4 = vadd.f32 %v8670_v21, %v4773_v31  ;;  %v8895_v5 = vadd.f32 %v11064_v56, %v8894_v1  ;;  %v10739_v60 = vpop.f32.mrb[54].mxu1 }
 0x379   :  { %8835 = vst [vmem:[%s16304_s2 + $0x1b0] sm:$0xff] %v11066_v15  ;;  %v11068_v61 = vadd.f32 %v11003_v49, %v10739_v60  ;;  %v4776_v25 = vpop.f32.mrb[55].mxu1  ;;  %v8969_v57 = vmul.f32 %v11066_v15, %v11066_v15 }
 0x37a   :  { %8833 = vst [vmem:[%s16304_s2 + $0x1a0] sm:$0xff] %v11067_v4  ;;  %v8896_v27 = vadd.f32 %v11067_v4, %v8895_v5  ;;  %v8967_v37 = vmul.f32 %v11067_v4, %v11067_v4  ;;  %v9029_v11 = vadd.f32 %v9028_v12, %v8966_v2  ;;  %v11069_v47 = vadd.f32 %v8673_v13, %v4776_v25 }
 0x37b   :  { %8836 = vst [vmem:[%s16304_s2 + $0x1b8] sm:$0xff] %v11068_v61  ;;  %v11006_v29 = vpop.f32.mrb[56].mxu0  ;;  %v8970_v23 = vmul.f32 %v11068_v61, %v11068_v61 }
 0x37c   :  { %v9030_v22 = vadd.f32 %v9029_v11, %v8967_v37  ;;  %8834 = vst [vmem:[%s16304_s2 + $0x1a8] sm:$0xff] %v11069_v47  ;;  %v8897_v30 = vadd.f32 %v11069_v47, %v8896_v27  ;;  %v8968_v55 = vmul.f32 %v11069_v47, %v11069_v47  ;;  %v8686_v10 = vpop.f32.mrb[57].mxu0 }
 0x37d   :  { %v11007_v39 = vpop.f32.mrb[58].mxu0 }
 0x37e   :  { %v8898_v44 = vadd.f32 %v11066_v15, %v8897_v30  ;;  %v9031_v7 = vadd.f32 %v9030_v22, %v8968_v55  ;;  %v10742_v40 = vpop.f32.mrb[56].mxu1  ;;  %v8689_v45 = vpop.f32.mrb[59].mxu0 }
 0x37f   :  { %v11070_v53 = vadd.f32 %v11006_v29, %v10742_v40  ;;  %v4789_v59 = vpop.f32.mrb[57].mxu1 }
 0x380   :  { %v9032_v36 = vadd.f32 %v9031_v7, %v8969_v57  ;;  %v11071_v38 = vadd.f32 %v8686_v10, %v4789_v59  ;;  %v8899_v58 = vadd.f32 %v11068_v61, %v8898_v44  ;;  %v10743_v52 = vpop.f32.mrb[58].mxu1 }
 0x381   :  { %8839 = vst [vmem:[%s16304_s2 + $0x1d0] sm:$0xff] %v11070_v53  ;;  %v11072_v3 = vadd.f32 %v11007_v39, %v10743_v52  ;;  %v4792_v50 = vpop.f32.mrb[59].mxu1  ;;  %v8973_v20 = vmul.f32 %v11070_v53, %v11070_v53 }
 0x382   :  { %8837 = vst [vmem:[%s16304_s2 + $0x1c0] sm:$0xff] %v11071_v38  ;;  %v8900_v9 = vadd.f32 %v11071_v38, %v8899_v58  ;;  %v8971_v19 = vmul.f32 %v11071_v38, %v11071_v38  ;;  %v9033_v48 = vadd.f32 %v9032_v36, %v8970_v23  ;;  %v11073_v33 = vadd.f32 %v8689_v45, %v4792_v50 }
 0x383   :  { %8840 = vst [vmem:[%s16304_s2 + $0x1d8] sm:$0xff] %v11072_v3  ;;  %v11010_v32 = vpop.f32.mrb[60].mxu0  ;;  %v8974_v14 = vmul.f32 %v11072_v3, %v11072_v3 }
 0x384   :  { %v9034_v51 = vadd.f32 %v9033_v48, %v8971_v19  ;;  %8838 = vst [vmem:[%s16304_s2 + $0x1c8] sm:$0xff] %v11073_v33  ;;  %v8901_v17 = vadd.f32 %v11073_v33, %v8900_v9  ;;  %v8972_v18 = vmul.f32 %v11073_v33, %v11073_v33  ;;  %v8702_v24 = vpop.f32.mrb[61].mxu0 }
 0x385   :  { %v11011_v41 = vpop.f32.mrb[62].mxu0 }
 0x386   :  { %v8902_v8 = vadd.f32 %v11070_v53, %v8901_v17  ;;  %v9035_v28 = vadd.f32 %v9034_v51, %v8972_v18  ;;  %v10746_v0 = vpop.f32.mrb[60].mxu1  ;;  %v8705_v16 = vpop.f32.mrb[63].mxu0 }
 0x387   :  { %v11074_v6 = vadd.f32 %v11010_v32, %v10746_v0  ;;  %v4805_v56 = vpop.f32.mrb[61].mxu1 }
 0x388   :  { %v9036_v62 = vadd.f32 %v9035_v28, %v8973_v20  ;;  %v11075_v42 = vadd.f32 %v8702_v24, %v4805_v56  ;;  %v8903_v46 = vadd.f32 %v11072_v3, %v8902_v8  ;;  %v10747_v26 = vpop.f32.mrb[62].mxu1 }
 0x389   :  { %8843 = vst [vmem:[%s16304_s2 + $0x1f0] sm:$0xff] %v11074_v6  ;;  %v11076_v43 = vadd.f32 %v11011_v41, %v10747_v26  ;;  %v4808_v54 = vpop.f32.mrb[63].mxu1  ;;  %v8977_v49 = vmul.f32 %v11074_v6, %v11074_v6 }
 0x38a   :  { %8841 = vst [vmem:[%s16304_s2 + $0x1e0] sm:$0xff] %v11075_v42  ;;  %v8904_v34 = vadd.f32 %v11075_v42, %v8903_v46  ;;  %v8975_v1 = vmul.f32 %v11075_v42, %v11075_v42  ;;  %v9037_v63 = vadd.f32 %v9036_v62, %v8974_v14  ;;  %v11077_v35 = vadd.f32 %v8705_v16, %v4808_v54 }
 0x38b   :  { %8844 = vst [vmem:[%s16304_s2 + $0x1f8] sm:$0xff] %v11076_v43  ;;  %v8978_v4 = vmul.f32 %v11076_v43, %v11076_v43 }
 0x38c   :  { %v9038_v21 = vadd.f32 %v9037_v63, %v8975_v1  ;;  %8842 = vst [vmem:[%s16304_s2 + $0x1e8] sm:$0xff] %v11077_v35  ;;  %v8905_v15 = vadd.f32 %v11077_v35, %v8904_v34  ;;  %v8976_v31 = vmul.f32 %v11077_v35, %v11077_v35 }
 0x38e   :  { %v8906_v2 = vadd.f32 %v11074_v6, %v8905_v15  ;;  %v9039_v12 = vadd.f32 %v9038_v21, %v8976_v31 }
 0x390   :  { %v8907_v5 = vadd.f32 %v11076_v43, %v8906_v2  ;;  %v9040_v60 = vadd.f32 %v9039_v12, %v8977_v49 }
 0x392   :  { %v8908_v13 = vrot.slane %v8907_v5, 4  ;;  %v9041_v61 = vadd.f32 %v9040_v60, %v8978_v4 }
 0x394   :  { %v8909_v25 = vadd.f32 %v8908_v13, %v8907_v5  ;;  %v9042_v27 = vrot.slane %v9041_v61, 4 }
 0x396   :  { %v8910_v37 = vrot.slane %v8909_v25, 2  ;;  %v9043_v11 = vadd.f32 %v9042_v27, %v9041_v61 }
 0x398   :  { %v8911_v47 = vadd.f32 %v8910_v37, %v8909_v25  ;;  %v9044_v22 = vrot.slane %v9043_v11, 2 }
 0x39a   :  { %v8912_v30 = vrot.slane %v8911_v47, 1  ;;  %v9045_v55 = vadd.f32 %v9044_v22, %v9043_v11 }
 0x39c   :  { %v8913_v29 = vadd.f32 %v8912_v30, %v8911_v47  ;;  %v9046_v57 = vrot.slane %v9045_v55, 1 }
 0x39e   :  { %8914 = vst [vmem:[%s16305_s3] sm:$0x1] %v8913_v29  ;;  %v9047_v44 = vadd.f32 %v9046_v57, %v9045_v55 }
 0x3a0   :  { %9048 = vst [vmem:[%s16305_s3 + $0x1] sm:$0x1] %v9047_v44 }

</bundles_post_ra>
